<compile_context>
chip_gen: v5e
topology: v5e:2x2
jax: 0.10.0
libtpu: 0.0.40
codegen_flags: <defaults>
</compile_context>

<pallas_src>
import functools

import jax
import jax.numpy as jnp
from jax.experimental import pallas as pl
from jax.experimental.pallas import tpu as pltpu

NEG_SLOPE = 0.2
EPS = 1e-5
_VMEM_LIMIT = 40 * 1024 * 1024   # within v7x's 64 MiB physical VMEM; fine on v5e/v6e


def _round_up(x, m):
    return (x + m - 1) // m * m


# ------------------------- matmul + bias (+LeakyReLU) kernels -------------------------

def _matmul_bias_single_kernel(a_ref, w_ref, b_ref, o_ref, *, leaky):
    # Whole K in one step: no accumulator scratch needed.
    out = jnp.dot(a_ref[...], w_ref[...], preferred_element_type=jnp.float32)
    out = out + b_ref[...]
    if leaky:
        out = jnp.where(out >= 0, out, NEG_SLOPE * out)
    o_ref[...] = out.astype(o_ref.dtype)


def _matmul_bias_acc_kernel(a_ref, w_ref, b_ref, o_ref, acc_ref, *, leaky):
    k = pl.program_id(2)

    @pl.when(k == 0)
    def _():
        acc_ref[...] = jnp.zeros_like(acc_ref)

    acc_ref[...] += jnp.dot(a_ref[...], w_ref[...],
                            preferred_element_type=jnp.float32)

    @pl.when(k == pl.num_programs(2) - 1)
    def _():
        out = acc_ref[...] + b_ref[...]
        if leaky:
            out = jnp.where(out >= 0, out, NEG_SLOPE * out)
        o_ref[...] = out.astype(o_ref.dtype)


def matmul_bias(a, w, b, leaky, keep_oc_pad=False, out_dtype=jnp.bfloat16):
    """a: (M, K) bf16, w: (K, OC) f32, b: (OC,) f32 -> (M, OC or OC_padded) out_dtype."""
    M, K = a.shape
    OC = w.shape[1]

    # Full-K single step where possible; bf16-safe (16) sublane alignment on M.
    tm = min(512, _round_up(M, 16))
    tn = min(256, _round_up(OC, 128))
    tk = min(4096, _round_up(K, 128))
    Mp, Kp, Np = _round_up(M, tm), _round_up(K, tk), _round_up(OC, tn)

    # v7x megacore: make sure there are >= 2 "parallel" output blocks when possible.
    if (Mp // tm) * (Np // tn) < 2:
        if tn > 128:
            tn = 128
        elif tm >= 32 and tm % 32 == 0:
            tm //= 2

    a_p = a.astype(jnp.bfloat16)
    if (Mp, Kp) != (M, K):
        a_p = jnp.pad(a_p, ((0, Mp - M), (0, Kp - K)))
    w_p = w.astype(jnp.bfloat16)
    if (Kp, Np) != (K, OC):
        w_p = jnp.pad(w_p, ((0, Kp - K), (0, Np - OC)))
    b_p = b.astype(jnp.float32).reshape(1, OC)
    if Np != OC:
        b_p = jnp.pad(b_p, ((0, 0), (0, Np - OC)))

    nk = Kp // tk
    flops = 2 * Mp * Kp * Np
    bytes_accessed = (Mp * Kp + Kp * Np) * 2 + Np * 4 \
        + Mp * Np * jnp.dtype(out_dtype).itemsize
    cost = pl.CostEstimate(flops=flops, transcendentals=0,
                           bytes_accessed=bytes_accessed)

    if nk == 1:
        out = pl.pallas_call(
            functools.partial(_matmul_bias_single_kernel, leaky=leaky),
            out_shape=jax.ShapeDtypeStruct((Mp, Np), out_dtype),
            grid=(Mp // tm, Np // tn),
            in_specs=[
                pl.BlockSpec((tm, Kp), lambda i, j: (i, 0)),
                pl.BlockSpec((Kp, tn), lambda i, j: (0, j)),
                pl.BlockSpec((1, tn), lambda i, j: (0, j)),
            ],
            out_specs=pl.BlockSpec((tm, tn), lambda i, j: (i, j)),
            compiler_params=pltpu.CompilerParams(
                dimension_semantics=("parallel", "parallel"),
                vmem_limit_bytes=_VMEM_LIMIT),
            cost_estimate=cost,
        )(a_p, w_p, b_p)
    else:
        out = pl.pallas_call(
            functools.partial(_matmul_bias_acc_kernel, leaky=leaky),
            out_shape=jax.ShapeDtypeStruct((Mp, Np), out_dtype),
            grid_spec=pltpu.PrefetchScalarGridSpec(
                num_scalar_prefetch=0,
                grid=(Mp // tm, Np // tn, nk),
                in_specs=[
                    pl.BlockSpec((tm, tk), lambda i, j, k: (i, k)),
                    pl.BlockSpec((tk, tn), lambda i, j, k: (k, j)),
                    pl.BlockSpec((1, tn), lambda i, j, k: (0, j)),
                ],
                out_specs=pl.BlockSpec((tm, tn), lambda i, j, k: (i, j)),
                scratch_shapes=[pltpu.VMEM((tm, tn), jnp.float32)],
            ),
            compiler_params=pltpu.CompilerParams(
                dimension_semantics=("parallel", "parallel", "arbitrary"),
                vmem_limit_bytes=_VMEM_LIMIT),
            cost_estimate=cost,
        )(a_p, w_p, b_p)

    if keep_oc_pad:
        return out[:M] if Mp != M else out
    return out[:M, :OC] if (Mp, Np) != (M, OC) else out


# ------------------------- InstanceNorm + LeakyReLU (bf16 in/out, f32 stats) -------------------------

def _inorm_lrelu_kernel(x_ref, o_ref):
    x = x_ref[...].astype(jnp.float32)                            # (1, HW, C)
    mean = jnp.mean(x, axis=1, keepdims=True)
    var = jnp.mean(jnp.square(x - mean), axis=1, keepdims=True)   # biased var
    xn = (x - mean) * jax.lax.rsqrt(var + EPS)
    y = jnp.where(xn >= 0, xn, NEG_SLOPE * xn)
    o_ref[...] = y.astype(o_ref.dtype)


def inorm_lrelu(x):
    """x: (N, HW, C) bf16 -> (N, HW, C) bf16, normalized over HW per (n, c)."""
    N, HW, C = x.shape
    return pl.pallas_call(
        _inorm_lrelu_kernel,
        out_shape=jax.ShapeDtypeStruct(x.shape, x.dtype),
        grid=(N,),
        in_specs=[pl.BlockSpec((1, HW, C), lambda n: (n, 0, 0))],
        out_specs=pl.BlockSpec((1, HW, C), lambda n: (n, 0, 0)),
        compiler_params=pltpu.CompilerParams(
            dimension_semantics=("parallel",)),
    )(x)


# ------------------------- fused InstanceNorm + LeakyReLU + conv5 + global avg-pool -------------------------
# mean_{oh,ow} conv5(y)[oh,ow] == sum_{h,w,c} y[h,w,c] * Weff[h,w,c] + b5,
# with Weff a window-count weighting of w5 (computed once outside).

def _inorm_lrelu_wsum_kernel(x_ref, w_ref, o_ref):
    x = x_ref[...].astype(jnp.float32)                            # (1, HW, C)
    mean = jnp.mean(x, axis=1, keepdims=True)
    var = jnp.mean(jnp.square(x - mean), axis=1, keepdims=True)
    xn = (x - mean) * jax.lax.rsqrt(var + EPS)
    y = jnp.where(xn >= 0, xn, NEG_SLOPE * xn)
    s = jnp.sum(y * w_ref[...])                                   # f32 scalar
    o_ref[...] = jnp.broadcast_to(s, (1, 1, 128))


def inorm_lrelu_wsum(x, weff):
    """x: (N, HW, C) bf16, weff: (HW, C) f32 -> (N,) f32."""
    N, HW, C = x.shape
    out = pl.pallas_call(
        _inorm_lrelu_wsum_kernel,
        out_shape=jax.ShapeDtypeStruct((N, 1, 128), jnp.float32),
        grid=(N,),
        in_specs=[
            pl.BlockSpec((1, HW, C), lambda n: (n, 0, 0)),
            pl.BlockSpec((HW, C), lambda n: (0, 0)),
        ],
        out_specs=pl.BlockSpec((1, 1, 128), lambda n: (n, 0, 0)),
        compiler_params=pltpu.CompilerParams(
            dimension_semantics=("parallel",)),
    )(x, weff)
    return out[:, 0, 0]


def _conv_avgpool_weights(w5, H, W, pad):
    """w5: (1, C, KH, KW), stride-1 conv -> Weff: (H*W, C) f32, scaled by 1/(OH*OW)."""
    _, C, KH, KW = w5.shape
    OH = H + 2 * pad - KH + 1
    OW = W + 2 * pad - KW + 1
    h = jnp.arange(H)[:, None]
    kh = jnp.arange(KH)[None, :]
    mh = ((h + pad - kh >= 0) & (h + pad - kh <= OH - 1)).astype(jnp.float32)
    wv = jnp.arange(W)[:, None]
    kw = jnp.arange(KW)[None, :]
    mw = ((wv + pad - kw >= 0) & (wv + pad - kw <= OW - 1)).astype(jnp.float32)
    weff = jnp.einsum('hk,wl,ckl->hwc', mh, mw, w5[0].astype(jnp.float32))
    return (weff / (OH * OW)).reshape(H * W, C)


# ------------------------- JAX glue: NHWC im2col, layer plumbing -------------------------

def im2col_nhwc(x, kh, kw, stride, pad, c_take=None):
    """x: (N, H, W, C) -> (N*OH*OW, KH*KW*c_take), K ordered (kh, kw, c).

    c_take < C drops trailing (zero-padded) channels lazily inside the gather,
    so no standalone channel-slice copy is ever materialized.
    """
    N, H, W, C = x.shape
    if c_take is None:
        c_take = C
    xp = jnp.pad(x, ((0, 0), (pad, pad), (pad, pad), (0, 0)))
    OH = (H + 2 * pad - kh) // stride + 1
    OW = (W + 2 * pad - kw) // stride + 1
    cols = []
    for i in range(kh):
        for j in range(kw):
            cols.append(
                xp[:, i:i + stride * OH:stride, j:j + stride * OW:stride, :c_take])
    cols = jnp.stack(cols, axis=3)                  # (N, OH, OW, KH*KW, c_take)
    return cols.reshape(N * OH * OW, kh * kw * c_take), OH, OW


def _weight_to_matrix(w):
    """PyTorch OIHW (OC, C, KH, KW) -> (KH*KW*C, OC) matching im2col K order."""
    OC, C, KH, KW = w.shape
    return jnp.transpose(w, (2, 3, 1, 0)).reshape(KH * KW * C, OC)


def conv_layer_nhwc(x, w, b, stride, pad, leaky, c_take=None, keep_oc_pad=False):
    N = x.shape[0]
    a, OH, OW = im2col_nhwc(x, w.shape[2], w.shape[3], stride, pad, c_take=c_take)
    y = matmul_bias(a, _weight_to_matrix(w), b, leaky, keep_oc_pad=keep_oc_pad)
    return y.reshape(N, OH, OW, y.shape[1]), OH, OW


def discriminator_forward(x_nchw, p):
    N = x_nchw.shape[0]
    # single NCHW -> NHWC transpose, cast to bf16 once (before any im2col)
    x = jnp.transpose(x_nchw, (0, 2, 3, 1)).astype(jnp.bfloat16)

    # Conv(input_nc -> 64, s=2, p=1) + LeakyReLU (fused epilogue).
    # Output kept padded to 128 lanes (extra channels are exactly zero).
    c1 = p["w1"].shape[0]
    x, OH, OW = conv_layer_nhwc(x, p["w1"], p["b1"], 2, 1,
                                leaky=True, keep_oc_pad=True)

    # Conv(64 -> 128, s=2, p=1) + InstanceNorm + LeakyReLU
    # (layer-1's zero pad channels are dropped lazily inside the im2col gather)
    x, OH, OW = conv_layer_nhwc(x, p["w2"], p["b2"], 2, 1, leaky=False, c_take=c1)
    x = inorm_lrelu(x.reshape(N, OH * OW, x.shape[-1])).reshape(N, OH, OW, -1)

    # Conv(128 -> 256, s=2, p=1) + InstanceNorm + LeakyReLU
    x, OH, OW = conv_layer_nhwc(x, p["w3"], p["b3"], 2, 1, leaky=False)
    x = inorm_lrelu(x.reshape(N, OH * OW, x.shape[-1])).reshape(N, OH, OW, -1)

    # Conv(256 -> 512, s=1, p=1); its InstanceNorm+LeakyReLU is fused with the
    # conv5(512->1, s=1, p=1) + global avg-pool reduction below, so this widest
    # activation is written to HBM only once (by the conv4 matmul).
    x, OH, OW = conv_layer_nhwc(x, p["w4"], p["b4"], 1, 1, leaky=False)
    weff = _conv_avgpool_weights(p["w5"], OH, OW, pad=1)       # (OH*OW, 512) f32
    out = inorm_lrelu_wsum(x.reshape(N, OH * OW, x.shape[-1]), weff)
    return out + p["b5"][0].astype(jnp.float32)


# ------------------------- pure-JAX reference for validation -------------------------

def _ref_forward(x, p, conv_dtype=jnp.float32):
    def conv(x, w, b, stride, pad, dt):
        y = jax.lax.conv_general_dilated(
            x.astype(dt), w.astype(dt), (stride, stride),
            [(pad, pad), (pad, pad)],
            dimension_numbers=("NCHW", "OIHW", "NCHW"),
            preferred_element_type=jnp.float32)
        return y + b[None, :, None, None].astype(jnp.float32)

    def lrelu(x):
        return jnp.where(x >= 0, x, NEG_SLOPE * x)

    def inorm(x):
        m = jnp.mean(x, axis=(2, 3), keepdims=True)
        v = jnp.mean(jnp.square(x - m), axis=(2, 3), keepdims=True)
        return (x - m) * jax.lax.rsqrt(v + EPS)

    x = lrelu(conv(x, p["w1"], p["b1"], 2, 1, conv_dtype))
    x = lrelu(inorm(conv(x, p["w2"], p["b2"], 2, 1, conv_dtype)))
    x = lrelu(inorm(conv(x, p["w3"], p["b3"], 2, 1, conv_dtype)))
    x = lrelu(inorm(conv(x, p["w4"], p["b4"], 1, 1, conv_dtype)))
    x = conv(x, p["w5"], p["b5"], 1, 1, jnp.float32)   # kernel path does layer 5 in f32
    return jnp.mean(x, axis=(1, 2, 3))


# ------------------------- driver -------------------------

def make_params(key, input_nc):
    shapes = [
        ("w1", (64, input_nc, 4, 4)), ("b1", (64,)),
        ("w2", (128, 64, 4, 4)), ("b2", (128,)),
        ("w3", (256, 128, 4, 4)), ("b3", (256,)),
        ("w4", (512, 256, 4, 4)), ("b4", (512,)),
        ("w5", (1, 512, 4, 4)), ("b5", (1,)),
    ]
    keys = jax.random.split(key, len(shapes))
    return {name: 0.05 * jax.random.normal(k, shp, jnp.float32)
            for (name, shp), k in zip(shapes, keys)}


if __name__ == "__main__":
    input_nc = 3
    key = jax.random.PRNGKey(0)
    kx, kp = jax.random.split(key)
    # spatial 32 is the smallest clean size that survives all 5 convs
    x = jax.random.normal(kx, (2, input_nc, 32, 32), jnp.float32)
    params = make_params(kp, input_nc)

    fwd = jax.jit(discriminator_forward)
    out = jax.block_until_ready(fwd(x, params))
    assert out.shape == (2,)

    # precision-matched reference (bf16 conv operands, f32 accumulation)
    ref_bf16 = jax.block_until_ready(_ref_forward(x, params, jnp.bfloat16))
    assert jnp.allclose(out, ref_bf16, rtol=5e-2, atol=5e-2), (out, ref_bf16)

    # full-f32 reference (PyTorch semantics); looser tolerance due to bf16
    # operands + bf16 activation storage (intentional precision trade-off)
    ref_f32 = jax.block_until_ready(_ref_forward(x, params, jnp.float32))
    assert jnp.allclose(out, ref_f32, rtol=1e-1, atol=1e-1), (out, ref_f32)

    print("KERNEL_OK")
</pallas_src>

<mosaic_0001>
module attributes {stable_mosaic.version = 11 : i64} {
  func.func @_matmul_bias_single_kernel(%arg0: i32, %arg1: i32, %arg2: memref<256x128xbf16, #tpu.memory_space<vmem>>, %arg3: memref<128x128xbf16, #tpu.memory_space<vmem>>, %arg4: memref<1x128xf32, #tpu.memory_space<vmem>>, %arg5: memref<256x128xbf16, #tpu.memory_space<vmem>>) attributes {dimension_semantics = [#tpu.dimension_semantics<parallel>, #tpu.dimension_semantics<parallel>], iteration_bounds = array<i64: 2, 1>, scalar_prefetch = 0 : i64, scratch_operands = 0 : i64, tpu.core_type = #tpu.core_type<tc>, window_params = [{transform_indices = @transform_0, window_bounds = array<i64: 256, 128>}, {transform_indices = @transform_1, window_bounds = array<i64: 128, 128>}, {transform_indices = @transform_2, window_bounds = array<i64: 1, 128>}, {transform_indices = @transform_3, window_bounds = array<i64: 256, 128>}]} {
    %c0 = arith.constant 0 : index
    %c0_0 = arith.constant 0 : index
    %0 = vector.load %arg2[%c0, %c0_0] : memref<256x128xbf16, #tpu.memory_space<vmem>>, vector<256x128xbf16>
    %c0_1 = arith.constant 0 : index
    %c0_2 = arith.constant 0 : index
    %1 = vector.load %arg3[%c0_1, %c0_2] : memref<128x128xbf16, #tpu.memory_space<vmem>>, vector<128x128xbf16>
    %cst = arith.constant dense<0.000000e+00> : vector<256x128xf32>
    %2 = tpu.matmul %0, %1, %cst {dimension_numbers = #tpu.dot_dimension_numbers<[1], [0], [0], [1], [0, 0, 1, 1], [], []>} : vector<256x128xbf16>, vector<128x128xbf16>, vector<256x128xf32> -> vector<256x128xf32>
    %c0_3 = arith.constant 0 : index
    %c0_4 = arith.constant 0 : index
    %3 = vector.load %arg4[%c0_3, %c0_4] : memref<1x128xf32, #tpu.memory_space<vmem>>, vector<1x128xf32>
    %4 = vector.broadcast %3 : vector<1x128xf32> to vector<256x128xf32>
    %5 = arith.addf %2, %4 : vector<256x128xf32>
    %cst_5 = arith.constant 0.000000e+00 : f32
    %6 = vector.broadcast %cst_5 : f32 to vector<256x128xf32>
    %7 = arith.cmpf oge, %5, %6 : vector<256x128xf32>
    %cst_6 = arith.constant 2.000000e-01 : f32
    %8 = vector.broadcast %cst_6 : f32 to vector<256x128xf32>
    %9 = arith.mulf %8, %5 : vector<256x128xf32>
    %10 = arith.select %7, %5, %9 : vector<256x128xi1>, vector<256x128xf32>
    %11 = arith.truncf %10 : vector<256x128xf32> to vector<256x128xbf16>
    %c0_7 = arith.constant 0 : index
    %c0_8 = arith.constant 0 : index
    %12 = vector.load %arg5[%c0_7, %c0_8] : memref<256x128xbf16, #tpu.memory_space<vmem>>, vector<256x128xbf16>
    tpu.vector_store %arg5[%c0_7, %c0_8], %11 {strides = array<i32>} : memref<256x128xbf16, #tpu.memory_space<vmem>>, vector<256x128xbf16>,
    return
  }
  func.func @transform_0(%arg0: i32, %arg1: i32) -> (i32, i32) {
    %c0_i32 = arith.constant 0 : i32
    %c0_i32_0 = arith.constant 0 : i32
    return %arg0, %c0_i32 : i32, i32
  }
  func.func @transform_1(%arg0: i32, %arg1: i32) -> (i32, i32) {
    %c0_i32 = arith.constant 0 : i32
    %c0_i32_0 = arith.constant 0 : i32
    return %c0_i32, %arg1 : i32, i32
  }
  func.func @transform_2(%arg0: i32, %arg1: i32) -> (i32, i32) {
    %c0_i32 = arith.constant 0 : i32
    %c0_i32_0 = arith.constant 0 : i32
    return %c0_i32, %arg1 : i32, i32
  }
  func.func @transform_3(%arg0: i32, %arg1: i32) -> (i32, i32) {
    %c0_i32 = arith.constant 0 : i32
    return %arg0, %arg1 : i32, i32
  }
}

module attributes {stable_mosaic.version = 11 : i64} {
  func.func @_matmul_bias_single_kernel(%arg0: i32, %arg1: i32, %arg2: memref<64x1024xbf16, #tpu.memory_space<vmem>>, %arg3: memref<1024x128xbf16, #tpu.memory_space<vmem>>, %arg4: memref<1x128xf32, #tpu.memory_space<vmem>>, %arg5: memref<64x128xbf16, #tpu.memory_space<vmem>>) attributes {dimension_semantics = [#tpu.dimension_semantics<parallel>, #tpu.dimension_semantics<parallel>], iteration_bounds = array<i64: 2, 1>, scalar_prefetch = 0 : i64, scratch_operands = 0 : i64, tpu.core_type = #tpu.core_type<tc>, window_params = [{transform_indices = @transform_0, window_bounds = array<i64: 64, 1024>}, {transform_indices = @transform_1, window_bounds = array<i64: 1024, 128>}, {transform_indices = @transform_2, window_bounds = array<i64: 1, 128>}, {transform_indices = @transform_3, window_bounds = array<i64: 64, 128>}]} {
    %c0 = arith.constant 0 : index
    %c0_0 = arith.constant 0 : index
    %0 = vector.load %arg2[%c0, %c0_0] : memref<64x1024xbf16, #tpu.memory_space<vmem>>, vector<64x1024xbf16>
    %c0_1 = arith.constant 0 : index
    %c0_2 = arith.constant 0 : index
    %1 = vector.load %arg3[%c0_1, %c0_2] : memref<1024x128xbf16, #tpu.memory_space<vmem>>, vector<1024x128xbf16>
    %cst = arith.constant dense<0.000000e+00> : vector<64x128xf32>
    %2 = tpu.matmul %0, %1, %cst {dimension_numbers = #tpu.dot_dimension_numbers<[1], [0], [0], [1], [0, 0, 1, 1], [], []>} : vector<64x1024xbf16>, vector<1024x128xbf16>, vector<64x128xf32> -> vector<64x128xf32>
    %c0_3 = arith.constant 0 : index
    %c0_4 = arith.constant 0 : index
    %3 = vector.load %arg4[%c0_3, %c0_4] : memref<1x128xf32, #tpu.memory_space<vmem>>, vector<1x128xf32>
    %4 = vector.broadcast %3 : vector<1x128xf32> to vector<64x128xf32>
    %5 = arith.addf %2, %4 : vector<64x128xf32>
    %6 = arith.truncf %5 : vector<64x128xf32> to vector<64x128xbf16>
    %c0_5 = arith.constant 0 : index
    %c0_6 = arith.constant 0 : index
    %7 = vector.load %arg5[%c0_5, %c0_6] : memref<64x128xbf16, #tpu.memory_space<vmem>>, vector<64x128xbf16>
    tpu.vector_store %arg5[%c0_5, %c0_6], %6 {strides = array<i32>} : memref<64x128xbf16, #tpu.memory_space<vmem>>, vector<64x128xbf16>,
    return
  }
  func.func @transform_0(%arg0: i32, %arg1: i32) -> (i32, i32) {
    %c0_i32 = arith.constant 0 : i32
    %c0_i32_0 = arith.constant 0 : i32
    return %arg0, %c0_i32 : i32, i32
  }
  func.func @transform_1(%arg0: i32, %arg1: i32) -> (i32, i32) {
    %c0_i32 = arith.constant 0 : i32
    %c0_i32_0 = arith.constant 0 : i32
    return %c0_i32, %arg1 : i32, i32
  }
  func.func @transform_2(%arg0: i32, %arg1: i32) -> (i32, i32) {
    %c0_i32 = arith.constant 0 : i32
    %c0_i32_0 = arith.constant 0 : i32
    return %c0_i32, %arg1 : i32, i32
  }
  func.func @transform_3(%arg0: i32, %arg1: i32) -> (i32, i32) {
    %c0_i32 = arith.constant 0 : i32
    return %arg0, %arg1 : i32, i32
  }
}

module attributes {stable_mosaic.version = 11 : i64} {
  func.func @_inorm_lrelu_kernel(%arg0: i32, %arg1: memref<1x64x128xbf16, #tpu.memory_space<vmem>>, %arg2: memref<1x64x128xbf16, #tpu.memory_space<vmem>>) attributes {dimension_semantics = [#tpu.dimension_semantics<parallel>], iteration_bounds = array<i64: 2>, scalar_prefetch = 0 : i64, scratch_operands = 0 : i64, tpu.core_type = #tpu.core_type<tc>, window_params = [{transform_indices = @transform_0, window_bounds = array<i64: 1, 64, 128>}, {transform_indices = @transform_1, window_bounds = array<i64: 1, 64, 128>}]} {
    %c0 = arith.constant 0 : index
    %c0_0 = arith.constant 0 : index
    %c0_1 = arith.constant 0 : index
    %0 = vector.load %arg1[%c0, %c0_0, %c0_1] : memref<1x64x128xbf16, #tpu.memory_space<vmem>>, vector<1x64x128xbf16>
    %1 = arith.extf %0 : vector<1x64x128xbf16> to vector<1x64x128xf32>
    %cst = arith.constant dense<0.000000e+00> : vector<1x128xf32>
    %2 = vector.multi_reduction <add>, %1, %cst [1] : vector<1x64x128xf32> to vector<1x128xf32>
    %3 = vector.shape_cast %2 : vector<1x128xf32> to vector<1x1x128xf32>
    %cst_2 = arith.constant 6.400000e+01 : f32
    %4 = vector.broadcast %cst_2 : f32 to vector<1x1x128xf32>
    %5 = arith.divf %3, %4 : vector<1x1x128xf32>
    %6 = vector.broadcast %5 : vector<1x1x128xf32> to vector<1x64x128xf32>
    %7 = arith.subf %1, %6 : vector<1x64x128xf32>
    %8 = arith.mulf %7, %7 : vector<1x64x128xf32>
    %cst_3 = arith.constant dense<0.000000e+00> : vector<1x128xf32>
    %9 = vector.multi_reduction <add>, %8, %cst_3 [1] : vector<1x64x128xf32> to vector<1x128xf32>
    %10 = vector.shape_cast %9 : vector<1x128xf32> to vector<1x1x128xf32>
    %cst_4 = arith.constant 6.400000e+01 : f32
    %11 = vector.broadcast %cst_4 : f32 to vector<1x1x128xf32>
    %12 = arith.divf %10, %11 : vector<1x1x128xf32>
    %13 = vector.broadcast %5 : vector<1x1x128xf32> to vector<1x64x128xf32>
    %14 = arith.subf %1, %13 : vector<1x64x128xf32>
    %cst_5 = arith.constant 9.99999974E-6 : f32
    %15 = vector.broadcast %cst_5 : f32 to vector<1x1x128xf32>
    %16 = arith.addf %12, %15 : vector<1x1x128xf32>
    %17 = math.rsqrt %16 : vector<1x1x128xf32>
    %18 = vector.broadcast %17 : vector<1x1x128xf32> to vector<1x64x128xf32>
    %19 = arith.mulf %14, %18 : vector<1x64x128xf32>
    %cst_6 = arith.constant 0.000000e+00 : f32
    %20 = vector.broadcast %cst_6 : f32 to vector<1x64x128xf32>
    %21 = arith.cmpf oge, %19, %20 : vector<1x64x128xf32>
    %cst_7 = arith.constant 2.000000e-01 : f32
    %22 = vector.broadcast %cst_7 : f32 to vector<1x64x128xf32>
    %23 = arith.mulf %22, %19 : vector<1x64x128xf32>
    %24 = arith.select %21, %19, %23 : vector<1x64x128xi1>, vector<1x64x128xf32>
    %25 = arith.truncf %24 : vector<1x64x128xf32> to vector<1x64x128xbf16>
    %c0_8 = arith.constant 0 : index
    %c0_9 = arith.constant 0 : index
    %c0_10 = arith.constant 0 : index
    %26 = vector.load %arg2[%c0_8, %c0_9, %c0_10] : memref<1x64x128xbf16, #tpu.memory_space<vmem>>, vector<1x64x128xbf16>
    tpu.vector_store %arg2[%c0_8, %c0_9, %c0_10], %25 {strides = array<i32>} : memref<1x64x128xbf16, #tpu.memory_space<vmem>>, vector<1x64x128xbf16>,
    return
  }
  func.func @transform_0(%arg0: i32) -> (i32, i32, i32) {
    %c0_i32 = arith.constant 0 : i32
    %c0_i32_0 = arith.constant 0 : i32
    %c0_i32_1 = arith.constant 0 : i32
    return %arg0, %c0_i32, %c0_i32_0 : i32, i32, i32
  }
  func.func @transform_1(%arg0: i32) -> (i32, i32, i32) {
    %c0_i32 = arith.constant 0 : i32
    %c0_i32_0 = arith.constant 0 : i32
    %c0_i32_1 = arith.constant 0 : i32
    return %arg0, %c0_i32, %c0_i32_0 : i32, i32, i32
  }
}

module attributes {stable_mosaic.version = 11 : i64} {
  func.func @_inorm_lrelu_kernel(%arg0: i32, %arg1: memref<1x16x256xbf16, #tpu.memory_space<vmem>>, %arg2: memref<1x16x256xbf16, #tpu.memory_space<vmem>>) attributes {dimension_semantics = [#tpu.dimension_semantics<parallel>], iteration_bounds = array<i64: 2>, scalar_prefetch = 0 : i64, scratch_operands = 0 : i64, tpu.core_type = #tpu.core_type<tc>, window_params = [{transform_indices = @transform_0, window_bounds = array<i64: 1, 16, 256>}, {transform_indices = @transform_1, window_bounds = array<i64: 1, 16, 256>}]} {
    %c0 = arith.constant 0 : index
    %c0_0 = arith.constant 0 : index
    %c0_1 = arith.constant 0 : index
    %0 = vector.load %arg1[%c0, %c0_0, %c0_1] : memref<1x16x256xbf16, #tpu.memory_space<vmem>>, vector<1x16x256xbf16>
    %1 = arith.extf %0 : vector<1x16x256xbf16> to vector<1x16x256xf32>
    %cst = arith.constant dense<0.000000e+00> : vector<1x256xf32>
    %2 = vector.multi_reduction <add>, %1, %cst [1] : vector<1x16x256xf32> to vector<1x256xf32>
    %3 = vector.shape_cast %2 : vector<1x256xf32> to vector<1x1x256xf32>
    %cst_2 = arith.constant 1.600000e+01 : f32
    %4 = vector.broadcast %cst_2 : f32 to vector<1x1x256xf32>
    %5 = arith.divf %3, %4 : vector<1x1x256xf32>
    %6 = vector.broadcast %5 : vector<1x1x256xf32> to vector<1x16x256xf32>
    %7 = arith.subf %1, %6 : vector<1x16x256xf32>
    %8 = arith.mulf %7, %7 : vector<1x16x256xf32>
    %cst_3 = arith.constant dense<0.000000e+00> : vector<1x256xf32>
    %9 = vector.multi_reduction <add>, %8, %cst_3 [1] : vector<1x16x256xf32> to vector<1x256xf32>
    %10 = vector.shape_cast %9 : vector<1x256xf32> to vector<1x1x256xf32>
    %cst_4 = arith.constant 1.600000e+01 : f32
    %11 = vector.broadcast %cst_4 : f32 to vector<1x1x256xf32>
    %12 = arith.divf %10, %11 : vector<1x1x256xf32>
    %13 = vector.broadcast %5 : vector<1x1x256xf32> to vector<1x16x256xf32>
    %14 = arith.subf %1, %13 : vector<1x16x256xf32>
    %cst_5 = arith.constant 9.99999974E-6 : f32
    %15 = vector.broadcast %cst_5 : f32 to vector<1x1x256xf32>
    %16 = arith.addf %12, %15 : vector<1x1x256xf32>
    %17 = math.rsqrt %16 : vector<1x1x256xf32>
    %18 = vector.broadcast %17 : vector<1x1x256xf32> to vector<1x16x256xf32>
    %19 = arith.mulf %14, %18 : vector<1x16x256xf32>
    %cst_6 = arith.constant 0.000000e+00 : f32
    %20 = vector.broadcast %cst_6 : f32 to vector<1x16x256xf32>
    %21 = arith.cmpf oge, %19, %20 : vector<1x16x256xf32>
    %cst_7 = arith.constant 2.000000e-01 : f32
    %22 = vector.broadcast %cst_7 : f32 to vector<1x16x256xf32>
    %23 = arith.mulf %22, %19 : vector<1x16x256xf32>
    %24 = arith.select %21, %19, %23 : vector<1x16x256xi1>, vector<1x16x256xf32>
    %25 = arith.truncf %24 : vector<1x16x256xf32> to vector<1x16x256xbf16>
    %c0_8 = arith.constant 0 : index
    %c0_9 = arith.constant 0 : index
    %c0_10 = arith.constant 0 : index
    %26 = vector.load %arg2[%c0_8, %c0_9, %c0_10] : memref<1x16x256xbf16, #tpu.memory_space<vmem>>, vector<1x16x256xbf16>
    tpu.vector_store %arg2[%c0_8, %c0_9, %c0_10], %25 {strides = array<i32>} : memref<1x16x256xbf16, #tpu.memory_space<vmem>>, vector<1x16x256xbf16>,
    return
  }
  func.func @transform_0(%arg0: i32) -> (i32, i32, i32) {
    %c0_i32 = arith.constant 0 : i32
    %c0_i32_0 = arith.constant 0 : i32
    %c0_i32_1 = arith.constant 0 : i32
    return %arg0, %c0_i32, %c0_i32_0 : i32, i32, i32
  }
  func.func @transform_1(%arg0: i32) -> (i32, i32, i32) {
    %c0_i32 = arith.constant 0 : i32
    %c0_i32_0 = arith.constant 0 : i32
    %c0_i32_1 = arith.constant 0 : i32
    return %arg0, %c0_i32, %c0_i32_0 : i32, i32, i32
  }
}

module attributes {stable_mosaic.version = 11 : i64} {
  func.func @_matmul_bias_single_kernel(%arg0: i32, %arg1: i32, %arg2: memref<32x2048xbf16, #tpu.memory_space<vmem>>, %arg3: memref<2048x128xbf16, #tpu.memory_space<vmem>>, %arg4: memref<1x128xf32, #tpu.memory_space<vmem>>, %arg5: memref<32x128xbf16, #tpu.memory_space<vmem>>) attributes {dimension_semantics = [#tpu.dimension_semantics<parallel>, #tpu.dimension_semantics<parallel>], iteration_bounds = array<i64: 1, 2>, scalar_prefetch = 0 : i64, scratch_operands = 0 : i64, tpu.core_type = #tpu.core_type<tc>, window_params = [{transform_indices = @transform_0, window_bounds = array<i64: 32, 2048>}, {transform_indices = @transform_1, window_bounds = array<i64: 2048, 128>}, {transform_indices = @transform_2, window_bounds = array<i64: 1, 128>}, {transform_indices = @transform_3, window_bounds = array<i64: 32, 128>}]} {
    %c0 = arith.constant 0 : index
    %c0_0 = arith.constant 0 : index
    %0 = vector.load %arg2[%c0, %c0_0] : memref<32x2048xbf16, #tpu.memory_space<vmem>>, vector<32x2048xbf16>
    %c0_1 = arith.constant 0 : index
    %c0_2 = arith.constant 0 : index
    %1 = vector.load %arg3[%c0_1, %c0_2] : memref<2048x128xbf16, #tpu.memory_space<vmem>>, vector<2048x128xbf16>
    %cst = arith.constant dense<0.000000e+00> : vector<32x128xf32>
    %2 = tpu.matmul %0, %1, %cst {dimension_numbers = #tpu.dot_dimension_numbers<[1], [0], [0], [1], [0, 0, 1, 1], [], []>} : vector<32x2048xbf16>, vector<2048x128xbf16>, vector<32x128xf32> -> vector<32x128xf32>
    %c0_3 = arith.constant 0 : index
    %c0_4 = arith.constant 0 : index
    %3 = vector.load %arg4[%c0_3, %c0_4] : memref<1x128xf32, #tpu.memory_space<vmem>>, vector<1x128xf32>
    %4 = vector.broadcast %3 : vector<1x128xf32> to vector<32x128xf32>
    %5 = arith.addf %2, %4 : vector<32x128xf32>
    %6 = arith.truncf %5 : vector<32x128xf32> to vector<32x128xbf16>
    %c0_5 = arith.constant 0 : index
    %c0_6 = arith.constant 0 : index
    %7 = vector.load %arg5[%c0_5, %c0_6] : memref<32x128xbf16, #tpu.memory_space<vmem>>, vector<32x128xbf16>
    tpu.vector_store %arg5[%c0_5, %c0_6], %6 {strides = array<i32>} : memref<32x128xbf16, #tpu.memory_space<vmem>>, vector<32x128xbf16>,
    return
  }
  func.func @transform_0(%arg0: i32, %arg1: i32) -> (i32, i32) {
    %c0_i32 = arith.constant 0 : i32
    %c0_i32_0 = arith.constant 0 : i32
    return %arg0, %c0_i32 : i32, i32
  }
  func.func @transform_1(%arg0: i32, %arg1: i32) -> (i32, i32) {
    %c0_i32 = arith.constant 0 : i32
    %c0_i32_0 = arith.constant 0 : i32
    return %c0_i32, %arg1 : i32, i32
  }
  func.func @transform_2(%arg0: i32, %arg1: i32) -> (i32, i32) {
    %c0_i32 = arith.constant 0 : i32
    %c0_i32_0 = arith.constant 0 : i32
    return %c0_i32, %arg1 : i32, i32
  }
  func.func @transform_3(%arg0: i32, %arg1: i32) -> (i32, i32) {
    %c0_i32 = arith.constant 0 : i32
    return %arg0, %arg1 : i32, i32
  }
}

module attributes {stable_mosaic.version = 11 : i64} {
  func.func @_matmul_bias_single_kernel(%arg0: i32, %arg1: i32, %arg2: memref<32x4096xbf16, #tpu.memory_space<vmem>>, %arg3: memref<4096x256xbf16, #tpu.memory_space<vmem>>, %arg4: memref<1x256xf32, #tpu.memory_space<vmem>>, %arg5: memref<32x256xbf16, #tpu.memory_space<vmem>>) attributes {dimension_semantics = [#tpu.dimension_semantics<parallel>, #tpu.dimension_semantics<parallel>], iteration_bounds = array<i64: 1, 2>, scalar_prefetch = 0 : i64, scratch_operands = 0 : i64, tpu.core_type = #tpu.core_type<tc>, window_params = [{transform_indices = @transform_0, window_bounds = array<i64: 32, 4096>}, {transform_indices = @transform_1, window_bounds = array<i64: 4096, 256>}, {transform_indices = @transform_2, window_bounds = array<i64: 1, 256>}, {transform_indices = @transform_3, window_bounds = array<i64: 32, 256>}]} {
    %c0 = arith.constant 0 : index
    %c0_0 = arith.constant 0 : index
    %0 = vector.load %arg2[%c0, %c0_0] : memref<32x4096xbf16, #tpu.memory_space<vmem>>, vector<32x4096xbf16>
    %c0_1 = arith.constant 0 : index
    %c0_2 = arith.constant 0 : index
    %1 = vector.load %arg3[%c0_1, %c0_2] : memref<4096x256xbf16, #tpu.memory_space<vmem>>, vector<4096x256xbf16>
    %cst = arith.constant dense<0.000000e+00> : vector<32x256xf32>
    %2 = tpu.matmul %0, %1, %cst {dimension_numbers = #tpu.dot_dimension_numbers<[1], [0], [0], [1], [0, 0, 1, 1], [], []>} : vector<32x4096xbf16>, vector<4096x256xbf16>, vector<32x256xf32> -> vector<32x256xf32>
    %c0_3 = arith.constant 0 : index
    %c0_4 = arith.constant 0 : index
    %3 = vector.load %arg4[%c0_3, %c0_4] : memref<1x256xf32, #tpu.memory_space<vmem>>, vector<1x256xf32>
    %4 = vector.broadcast %3 : vector<1x256xf32> to vector<32x256xf32>
    %5 = arith.addf %2, %4 : vector<32x256xf32>
    %6 = arith.truncf %5 : vector<32x256xf32> to vector<32x256xbf16>
    %c0_5 = arith.constant 0 : index
    %c0_6 = arith.constant 0 : index
    %7 = vector.load %arg5[%c0_5, %c0_6] : memref<32x256xbf16, #tpu.memory_space<vmem>>, vector<32x256xbf16>
    tpu.vector_store %arg5[%c0_5, %c0_6], %6 {strides = array<i32>} : memref<32x256xbf16, #tpu.memory_space<vmem>>, vector<32x256xbf16>,
    return
  }
  func.func @transform_0(%arg0: i32, %arg1: i32) -> (i32, i32) {
    %c0_i32 = arith.constant 0 : i32
    %c0_i32_0 = arith.constant 0 : i32
    return %arg0, %c0_i32 : i32, i32
  }
  func.func @transform_1(%arg0: i32, %arg1: i32) -> (i32, i32) {
    %c0_i32 = arith.constant 0 : i32
    %c0_i32_0 = arith.constant 0 : i32
    return %c0_i32, %arg1 : i32, i32
  }
  func.func @transform_2(%arg0: i32, %arg1: i32) -> (i32, i32) {
    %c0_i32 = arith.constant 0 : i32
    %c0_i32_0 = arith.constant 0 : i32
    return %c0_i32, %arg1 : i32, i32
  }
  func.func @transform_3(%arg0: i32, %arg1: i32) -> (i32, i32) {
    %c0_i32 = arith.constant 0 : i32
    return %arg0, %arg1 : i32, i32
  }
}

module attributes {stable_mosaic.version = 11 : i64} {
  func.func @_inorm_lrelu_wsum_kernel(%arg0: i32, %arg1: memref<1x9x512xbf16, #tpu.memory_space<vmem>>, %arg2: memref<9x512xf32, #tpu.memory_space<vmem>>, %arg3: memref<1x1x128xf32, #tpu.memory_space<vmem>>) attributes {dimension_semantics = [#tpu.dimension_semantics<parallel>], iteration_bounds = array<i64: 2>, scalar_prefetch = 0 : i64, scratch_operands = 0 : i64, tpu.core_type = #tpu.core_type<tc>, window_params = [{transform_indices = @transform_0, window_bounds = array<i64: 1, 9, 512>}, {pipeline_mode = #tpu.pipeline_mode<synchronous>, transform_indices = @transform_1, window_bounds = array<i64: 9, 512>}, {transform_indices = @transform_2, window_bounds = array<i64: 1, 1, 128>}]} {
    %c0 = arith.constant 0 : index
    %c0_0 = arith.constant 0 : index
    %c0_1 = arith.constant 0 : index
    %0 = vector.load %arg1[%c0, %c0_0, %c0_1] : memref<1x9x512xbf16, #tpu.memory_space<vmem>>, vector<1x9x512xbf16>
    %1 = arith.extf %0 : vector<1x9x512xbf16> to vector<1x9x512xf32>
    %cst = arith.constant dense<0.000000e+00> : vector<1x512xf32>
    %2 = vector.multi_reduction <add>, %1, %cst [1] : vector<1x9x512xf32> to vector<1x512xf32>
    %3 = vector.shape_cast %2 : vector<1x512xf32> to vector<1x1x512xf32>
    %cst_2 = arith.constant 9.000000e+00 : f32
    %4 = vector.broadcast %cst_2 : f32 to vector<1x1x512xf32>
    %5 = arith.divf %3, %4 : vector<1x1x512xf32>
    %6 = vector.broadcast %5 : vector<1x1x512xf32> to vector<1x9x512xf32>
    %7 = arith.subf %1, %6 : vector<1x9x512xf32>
    %8 = arith.mulf %7, %7 : vector<1x9x512xf32>
    %cst_3 = arith.constant dense<0.000000e+00> : vector<1x512xf32>
    %9 = vector.multi_reduction <add>, %8, %cst_3 [1] : vector<1x9x512xf32> to vector<1x512xf32>
    %10 = vector.shape_cast %9 : vector<1x512xf32> to vector<1x1x512xf32>
    %cst_4 = arith.constant 9.000000e+00 : f32
    %11 = vector.broadcast %cst_4 : f32 to vector<1x1x512xf32>
    %12 = arith.divf %10, %11 : vector<1x1x512xf32>
    %13 = vector.broadcast %5 : vector<1x1x512xf32> to vector<1x9x512xf32>
    %14 = arith.subf %1, %13 : vector<1x9x512xf32>
    %cst_5 = arith.constant 9.99999974E-6 : f32
    %15 = vector.broadcast %cst_5 : f32 to vector<1x1x512xf32>
    %16 = arith.addf %12, %15 : vector<1x1x512xf32>
    %17 = math.rsqrt %16 : vector<1x1x512xf32>
    %18 = vector.broadcast %17 : vector<1x1x512xf32> to vector<1x9x512xf32>
    %19 = arith.mulf %14, %18 : vector<1x9x512xf32>
    %cst_6 = arith.constant 0.000000e+00 : f32
    %20 = vector.broadcast %cst_6 : f32 to vector<1x9x512xf32>
    %21 = arith.cmpf oge, %19, %20 : vector<1x9x512xf32>
    %cst_7 = arith.constant 2.000000e-01 : f32
    %22 = vector.broadcast %cst_7 : f32 to vector<1x9x512xf32>
    %23 = arith.mulf %22, %19 : vector<1x9x512xf32>
    %24 = arith.select %21, %19, %23 : vector<1x9x512xi1>, vector<1x9x512xf32>
    %c0_8 = arith.constant 0 : index
    %c0_9 = arith.constant 0 : index
    %25 = vector.load %arg2[%c0_8, %c0_9] : memref<9x512xf32, #tpu.memory_space<vmem>>, vector<9x512xf32>
    %26 = vector.shape_cast %25 : vector<9x512xf32> to vector<1x9x512xf32>
    %27 = arith.mulf %24, %26 : vector<1x9x512xf32>
    %28 = vector.shape_cast %27 : vector<1x9x512xf32> to vector<1x1x9x512xf32>
    %cst_10 = arith.constant dense<0.000000e+00> : vector<1xf32>
    %29 = vector.multi_reduction <add>, %28, %cst_10 [1, 2, 3] : vector<1x1x9x512xf32> to vector<1xf32>
    %30 = vector.shape_cast %29 : vector<1xf32> to vector<1x1x1x1xf32>
    %31 = vector.extract %30[0, 0, 0, 0] : f32 from vector<1x1x1x1xf32>
    %32 = vector.broadcast %31 : f32 to vector<1x1x128xf32>
    %c0_11 = arith.constant 0 : index
    %c0_12 = arith.constant 0 : index
    %c0_13 = arith.constant 0 : index
    %33 = vector.load %arg3[%c0_11, %c0_12, %c0_13] : memref<1x1x128xf32, #tpu.memory_space<vmem>>, vector<1x1x128xf32>
    tpu.vector_store %arg3[%c0_11, %c0_12, %c0_13], %32 {strides = array<i32>} : memref<1x1x128xf32, #tpu.memory_space<vmem>>, vector<1x1x128xf32>,
    return
  }
  func.func @transform_0(%arg0: i32) -> (i32, i32, i32) {
    %c0_i32 = arith.constant 0 : i32
    %c0_i32_0 = arith.constant 0 : i32
    %c0_i32_1 = arith.constant 0 : i32
    return %arg0, %c0_i32, %c0_i32_0 : i32, i32, i32
  }
  func.func @transform_1(%arg0: i32) -> (i32, i32) {
    %c0_i32 = arith.constant 0 : i32
    %c0_i32_0 = arith.constant 0 : i32
    %c0_i32_1 = arith.constant 0 : i32
    return %c0_i32, %c0_i32_0 : i32, i32
  }
  func.func @transform_2(%arg0: i32) -> (i32, i32, i32) {
    %c0_i32 = arith.constant 0 : i32
    %c0_i32_0 = arith.constant 0 : i32
    %c0_i32_1 = arith.constant 0 : i32
    return %arg0, %c0_i32, %c0_i32_0 : i32, i32, i32
  }
}

</mosaic_0001>

<bundles_post_ra>
// kernel: discriminator_forward.7
= control target key start
LH: loop header
LB: loop body
LE: loop exit
PB: predicated region body
PF: predicated region fallthrough
CT: control target
= control target key end

     0   :  { %s1093_s12 = smov 0   ;;  %s1095_s13 = smov 0   ;;  %s1233_s0 = inlined_call_operand.vmem [shape: bf16[512,128], index: 0, kind: input, shape index: {}]   ;;  %s1234_s1 = inlined_call_operand.vmem [shape: bf16[128,128], index: 1, kind: input, shape index: {}]   ;;  %s1235_s2 = inlined_call_operand.vmem [shape: f32[1,128], index: 2, kind: input, shape index: {}]   ;;  %s1236_s3 = inlined_call_operand.vmem [shape: bf16[512,128], index: 3, kind: output, shape index: {}]  }
   0x1   :  { %s1097_s14 = smov 0  }
   0x2 LB: > { %s25_s15 = sadd.s32 1, %s1067_s13  ;;  %p778_p0 = scmp.ge.s32.totalorder %s1071_s14, 1  ;;  %s1071_s14 = sphi %s1097_s14, %s13_s14   ;;  %s1067_s13 = sphi %s1095_s13, %s1238_s13   ;;  %s1063_s12 = sphi %s1093_s12, %s1237_s12  }
   0x3   : > { %p27_p1 = scmp.ge.s32.totalorder %s25_s15, 2  ;;  %p169_p2 = scmp.lt.s32.totalorder %s1071_s14, 3 }
   0x5   : > { %s1240_s15 = smov (%p27_p1, %s25_s15), 0  ;;  %p170_p3 = pnand %p778_p0, %p169_p2 }
   0x6   : > { %s779_s24 = sshll.u32 (!%p170_p3), %s1063_s12, 5 }
   0x7   : > { %173 = sbr.rel (%p170_p3) target bundleno = 242 (0xf2), region = 32  ;;  %p204_p4 = scmp.lt.s32.totalorder (!%p170_p3), %s779_s24, 63 }
   0xc   : > { %v904_v0 = vld [vmem:[%s1234_s1 + $0x38] sm:$0xff]  ;;  %v903_v1 = vld [vmem:[%s1234_s1 + $0x30] sm:$0xff]  ;;  %v902_v2 = vld [vmem:[%s1234_s1 + $0x28] sm:$0xff]  ;;  %s1242_s24 = smov (!%p204_p4, %s779_s24), 63 }
   0xd   : > { %421 = vmatpush.bf16.msra.mxu0 %v904_v0  ;;  %1000 = vmatpush.bf16.msra.mxu1 %v904_v0  ;;  %v901_v3 = vld [vmem:[%s1234_s1 + $0x20] sm:$0xff]  ;;  %v900_v4 = vld [vmem:[%s1234_s1 + $0x18] sm:$0xff]  ;;  %v899_v5 = vld [vmem:[%s1234_s1 + $0x10] sm:$0xff]  ;;  %s780_s4 = sshll.u32 %s1242_s24, 2 }
   0xe   : > { %1001 = vmatpush.bf16.msra.mxu2 %v904_v0  ;;  %1002 = vmatpush.bf16.msra.mxu3 %v904_v0  ;;  %v898_v6 = vld [vmem:[%s1234_s1 + $0x8] sm:$0xff]  ;;  %v897_v7 = vld [vmem:[%s1234_s1] sm:$0xff]  ;;  %s1146_s9 = scalar_lea.vmem %s1233_s0, %s780_s4  ;;  %s1180_s17 = scalar_lea.vmem %s1236_s3, %s780_s4 }
   0xf   : > { %v881_v8 = vld [vmem:[%s1146_s9] sm:$0xff]  ;;  %v882_v12 = vld [vmem:[%s1146_s9 + $0x8] sm:$0xff]  ;;  %v883_v16 = vld [vmem:[%s1146_s9 + $0x10] sm:$0xff] }
  0x10   : > { %v885_v9 = vld [vmem:[%s1146_s9 + $0x20] sm:$0xff]  ;;  %v886_v13 = vld [vmem:[%s1146_s9 + $0x28] sm:$0xff]  ;;  %v887_v17 = vld [vmem:[%s1146_s9 + $0x30] sm:$0xff] }
  0x11   : > { %422 = vmatpush.bf16.msra.mxu0 %v903_v1  ;;  %1003 = vmatpush.bf16.msra.mxu1 %v903_v1  ;;  %v889_v10 = vld [vmem:[%s1146_s9 + $0x40] sm:$0xff]  ;;  %v890_v14 = vld [vmem:[%s1146_s9 + $0x48] sm:$0xff]  ;;  %v891_v18 = vld [vmem:[%s1146_s9 + $0x50] sm:$0xff] }
  0x12   : > { %1004 = vmatpush.bf16.msra.mxu2 %v903_v1  ;;  %1005 = vmatpush.bf16.msra.mxu3 %v903_v1  ;;  %v893_v11 = vld [vmem:[%s1146_s9 + $0x60] sm:$0xff]  ;;  %v894_v15 = vld [vmem:[%s1146_s9 + $0x68] sm:$0xff]  ;;  %v895_v19 = vld [vmem:[%s1146_s9 + $0x70] sm:$0xff] }
  0x13   : > { %v884_v20 = vld [vmem:[%s1146_s9 + $0x18] sm:$0xff]  ;;  %v1167_v26 = vld [vmem:[%s1235_s2] ss:$0 sm:$0xff] }
  0x14   : > { %v888_v21 = vld [vmem:[%s1146_s9 + $0x38] sm:$0xff] }
  0x15   : > { %423 = vmatpush.bf16.msra.mxu0 %v902_v2  ;;  %1006 = vmatpush.bf16.msra.mxu1 %v902_v2  ;;  %v892_v22 = vld [vmem:[%s1146_s9 + $0x58] sm:$0xff] }
  0x16   : > { %1007 = vmatpush.bf16.msra.mxu2 %v902_v2  ;;  %1008 = vmatpush.bf16.msra.mxu3 %v902_v2  ;;  %v896_v23 = vld [vmem:[%s1146_s9 + $0x78] sm:$0xff] }
  0x19   : > { %424 = vmatpush.bf16.msra.mxu0 %v901_v3  ;;  %1009 = vmatpush.bf16.msra.mxu1 %v901_v3 }
  0x1a   : > { %1010 = vmatpush.bf16.msra.mxu2 %v901_v3  ;;  %1011 = vmatpush.bf16.msra.mxu3 %v901_v3 }
  0x1d   : > { %425 = vmatpush.bf16.msra.mxu0 %v900_v4  ;;  %1012 = vmatpush.bf16.msra.mxu1 %v900_v4 }
  0x1e   : > { %1013 = vmatpush.bf16.msra.mxu2 %v900_v4  ;;  %1014 = vmatpush.bf16.msra.mxu3 %v900_v4 }
  0x21   : > { %426 = vmatpush.bf16.msra.mxu0 %v899_v5  ;;  %1015 = vmatpush.bf16.msra.mxu1 %v899_v5 }
  0x22   : > { %1016 = vmatpush.bf16.msra.mxu2 %v899_v5  ;;  %1017 = vmatpush.bf16.msra.mxu3 %v899_v5 }
  0x25   : > { %427 = vmatpush.bf16.msra.mxu0 %v898_v6  ;;  %1018 = vmatpush.bf16.msra.mxu1 %v898_v6 }
  0x26   : > { %1019 = vmatpush.bf16.msra.mxu2 %v898_v6  ;;  %1020 = vmatpush.bf16.msra.mxu3 %v898_v6 }
  0x29   : > { %428 = vmatpush.bf16.msra.mxu0 %v897_v7  ;;  %1021 = vmatpush.bf16.msra.mxu1 %v897_v7 }
  0x2a   : > { %1022 = vmatpush.bf16.msra.mxu2 %v897_v7  ;;  %1023 = vmatpush.bf16.msra.mxu3 %v897_v7 }
  0x2c   : > { %429 = vmatmul.bf16.vlgmr.msra.gmra.mxu0 %v881_v8  ;;  %449 = vmatmul.bf16.vlgmr.msra.gmra.mxu1 %v885_v9 }
  0x2d   : > { %469 = vmatmul.bf16.vlgmr.msra.gmra.mxu2 %v889_v10  ;;  %489 = vmatmul.bf16.vlgmr.msra.gmra.mxu3 %v893_v11 }
  0x3c   : > { %434 = vmatmul.bf16.gmra.mxu0 %v882_v12  ;;  %454 = vmatmul.bf16.gmra.mxu1 %v886_v13 }
  0x3d   : > { %474 = vmatmul.bf16.gmra.mxu2 %v890_v14  ;;  %494 = vmatmul.bf16.gmra.mxu3 %v894_v15 }
  0x4c   : > { %439 = vmatmul.bf16.gmra.mxu0 %v883_v16  ;;  %459 = vmatmul.bf16.gmra.mxu1 %v887_v17 }
  0x4d   : > { %479 = vmatmul.bf16.gmra.mxu2 %v891_v18  ;;  %499 = vmatmul.bf16.gmra.mxu3 %v895_v19 }
  0x5c   : > { %444 = vmatmul.bf16.gmra.mxu0 %v884_v20  ;;  %464 = vmatmul.bf16.gmra.mxu1 %v888_v21 }
  0x5d   : > { %484 = vmatmul.bf16.gmra.mxu2 %v892_v22  ;;  %504 = vmatmul.bf16.gmra.mxu3 %v896_v23 }
  0xa9   : > { %v430_v24 = vpop.f32.mrf.mxu0  ;;  %v450_v25 = vpop.f32.mrf.mxu1 }
  0xaa   : > { %v431_v27 = vadd.f32 %v1167_v26, %v430_v24  ;;  %v451_v28 = vadd.f32 %v1167_v26, %v450_v25 }
  0xac   : > { %v542_v33 = vmul.f32 0.2, %v431_v27  ;;  %v550_v34 = vmul.f32 0.2, %v451_v28  ;;  %vm510_vm0 = vcmp.ge.f32.partialorder %v431_v27, 0.0  ;;  %vm518_vm1 = vcmp.ge.f32.partialorder %v451_v28, 0.0 }
  0xae   : > { %v574_v41 = vsel %vm510_vm0, %v431_v27, %v542_v33  ;;  %v582_v42 = vsel %vm518_vm1, %v451_v28, %v550_v34 }
  0xb0   : > { %v470_v29 = vpop.f32.mrf.mxu2  ;;  %v490_v30 = vpop.f32.mrf.mxu3 }
  0xb1   : > { %v432_v31 = vpop.f32.mrf.mxu0  ;;  %v452_v32 = vpop.f32.mrf.mxu1  ;;  %v471_v39 = vadd.f32 %v1167_v26, %v470_v29  ;;  %v491_v40 = vadd.f32 %v1167_v26, %v490_v30 }
  0xb2   : > { %v433_v35 = vadd.f32 %v1167_v26, %v432_v31  ;;  %v453_v36 = vadd.f32 %v1167_v26, %v452_v32 }
  0xb3   : > { %v558_v49 = vmul.f32 0.2, %v471_v39  ;;  %v566_v50 = vmul.f32 0.2, %v491_v40  ;;  %vm526_vm4 = vcmp.ge.f32.partialorder %v471_v39, 0.0  ;;  %vm534_vm5 = vcmp.ge.f32.partialorder %v491_v40, 0.0 }
  0xb4   : > { %vm511_vm2 = vcmp.ge.f32.partialorder %v433_v35, 0.0  ;;  %v543_v37 = vmul.f32 0.2, %v433_v35  ;;  %vm519_vm3 = vcmp.ge.f32.partialorder %v453_v36, 0.0  ;;  %v551_v38 = vmul.f32 0.2, %v453_v36 }
  0xb5   : > { %v590_v57 = vsel %vm526_vm4, %v471_v39, %v558_v49  ;;  %v598_v58 = vsel %vm534_vm5, %v491_v40, %v566_v50 }
  0xb6   : > { %v575_v43 = vsel %vm511_vm2, %v433_v35, %v543_v37  ;;  %v583_v44 = vsel %vm519_vm3, %v453_v36, %v551_v38 }
  0xb7   : > { %v908_v45 = vpack.c.bf16 %v575_v43, %v574_v41  ;;  %v928_v46 = vpack.c.bf16 %v583_v44, %v582_v42 }
  0xb8   : > { %v472_v47 = vpop.f32.mrf.mxu2  ;;  %v492_v48 = vpop.f32.mrf.mxu3 }
  0xb9   : > { %909 = vst [vmem:[%s1180_s17] sm:$0xff] %v908_v45   ;;  %v473_v51 = vadd.f32 %v1167_v26, %v472_v47  ;;  %v493_v52 = vadd.f32 %v1167_v26, %v492_v48  ;;  %v435_v53 = vpop.f32.mrf.mxu0  ;;  %v455_v54 = vpop.f32.mrf.mxu1 }
  0xba   : > { %988 = vst [vmem:[%s1180_s17 + $0x20] sm:$0xff] %v928_v46   ;;  %v436_v63 = vadd.f32 %v1167_v26, %v435_v53  ;;  %v456_v0 = vadd.f32 %v1167_v26, %v455_v54 }
  0xbb   : > { %vm527_vm6 = vcmp.ge.f32.partialorder %v473_v51, 0.0  ;;  %v559_v55 = vmul.f32 0.2, %v473_v51  ;;  %vm535_vm7 = vcmp.ge.f32.partialorder %v493_v52, 0.0  ;;  %v567_v56 = vmul.f32 0.2, %v493_v52 }
  0xbc   : > { %v544_v5 = vmul.f32 0.2, %v436_v63  ;;  %v552_v6 = vmul.f32 0.2, %v456_v0  ;;  %vm512_vm8 = vcmp.ge.f32.partialorder %v436_v63, 0.0  ;;  %vm520_vm9 = vcmp.ge.f32.partialorder %v456_v0, 0.0 }
  0xbd   : > { %v591_v59 = vsel %vm527_vm6, %v473_v51, %v559_v55  ;;  %v599_v60 = vsel %vm535_vm7, %v493_v52, %v567_v56 }
  0xbe   : > { %v948_v61 = vpack.c.bf16 %v591_v59, %v590_v57  ;;  %v968_v62 = vpack.c.bf16 %v599_v60, %v598_v58  ;;  %v576_v13 = vsel %vm512_vm8, %v436_v63, %v544_v5  ;;  %v584_v14 = vsel %vm520_vm9, %v456_v0, %v552_v6 }
  0xc0   : > { %992 = vst [vmem:[%s1180_s17 + $0x40] sm:$0xff] %v948_v61   ;;  %v475_v1 = vpop.f32.mrf.mxu2  ;;  %v495_v2 = vpop.f32.mrf.mxu3 }
  0xc1   : > { %996 = vst [vmem:[%s1180_s17 + $0x60] sm:$0xff] %v968_v62   ;;  %v437_v3 = vpop.f32.mrf.mxu0  ;;  %v457_v4 = vpop.f32.mrf.mxu1  ;;  %v476_v11 = vadd.f32 %v1167_v26, %v475_v1  ;;  %v496_v12 = vadd.f32 %v1167_v26, %v495_v2 }
  0xc2   : > { %v438_v7 = vadd.f32 %v1167_v26, %v437_v3  ;;  %v458_v8 = vadd.f32 %v1167_v26, %v457_v4 }
  0xc3   : > { %v560_v21 = vmul.f32 0.2, %v476_v11  ;;  %v568_v22 = vmul.f32 0.2, %v496_v12  ;;  %vm528_vm12 = vcmp.ge.f32.partialorder %v476_v11, 0.0  ;;  %vm536_vm13 = vcmp.ge.f32.partialorder %v496_v12, 0.0 }
  0xc4   : > { %vm513_vm10 = vcmp.ge.f32.partialorder %v438_v7, 0.0  ;;  %v545_v9 = vmul.f32 0.2, %v438_v7  ;;  %vm521_vm11 = vcmp.ge.f32.partialorder %v458_v8, 0.0  ;;  %v553_v10 = vmul.f32 0.2, %v458_v8 }
  0xc5   : > { %v592_v30 = vsel %vm528_vm12, %v476_v11, %v560_v21  ;;  %v600_v31 = vsel %vm536_vm13, %v496_v12, %v568_v22 }
  0xc6   : > { %v577_v15 = vsel %vm513_vm10, %v438_v7, %v545_v9  ;;  %v585_v16 = vsel %vm521_vm11, %v458_v8, %v553_v10 }
  0xc7   : > { %v913_v17 = vpack.c.bf16 %v577_v15, %v576_v13  ;;  %v933_v18 = vpack.c.bf16 %v585_v16, %v584_v14 }
  0xc8   : > { %v477_v19 = vpop.f32.mrf.mxu2  ;;  %v497_v20 = vpop.f32.mrf.mxu3 }
  0xc9   : > { %985 = vst [vmem:[%s1180_s17 + $0x8] sm:$0xff] %v913_v17   ;;  %v478_v23 = vadd.f32 %v1167_v26, %v477_v19  ;;  %v498_v24 = vadd.f32 %v1167_v26, %v497_v20  ;;  %v440_v25 = vpop.f32.mrf.mxu0  ;;  %v460_v27 = vpop.f32.mrf.mxu1 }
  0xca   : > { %989 = vst [vmem:[%s1180_s17 + $0x28] sm:$0xff] %v933_v18   ;;  %v441_v36 = vadd.f32 %v1167_v26, %v440_v25  ;;  %v461_v37 = vadd.f32 %v1167_v26, %v460_v27 }
  0xcb   : > { %vm529_vm14 = vcmp.ge.f32.partialorder %v478_v23, 0.0  ;;  %v561_v28 = vmul.f32 0.2, %v478_v23  ;;  %vm537_vm15 = vcmp.ge.f32.partialorder %v498_v24, 0.0  ;;  %v569_v29 = vmul.f32 0.2, %v498_v24 }
  0xcc   : > { %v546_v42 = vmul.f32 0.2, %v441_v36  ;;  %v554_v43 = vmul.f32 0.2, %v461_v37  ;;  %vm514_vm0 = vcmp.ge.f32.partialorder %v441_v36, 0.0  ;;  %vm522_vm1 = vcmp.ge.f32.partialorder %v461_v37, 0.0 }
  0xcd   : > { %v593_v32 = vsel %vm529_vm14, %v478_v23, %v561_v28  ;;  %v601_v33 = vsel %vm537_vm15, %v498_v24, %v569_v29 }
  0xce   : > { %v953_v34 = vpack.c.bf16 %v593_v32, %v592_v30  ;;  %v973_v35 = vpack.c.bf16 %v601_v33, %v600_v31  ;;  %v578_v50 = vsel %vm514_vm0, %v441_v36, %v546_v42  ;;  %v586_v51 = vsel %vm522_vm1, %v461_v37, %v554_v43 }
  0xd0   : > { %993 = vst [vmem:[%s1180_s17 + $0x48] sm:$0xff] %v953_v34   ;;  %v480_v38 = vpop.f32.mrf.mxu2  ;;  %v500_v39 = vpop.f32.mrf.mxu3 }
  0xd1   : > { %997 = vst [vmem:[%s1180_s17 + $0x68] sm:$0xff] %v973_v35   ;;  %v442_v40 = vpop.f32.mrf.mxu0  ;;  %v462_v41 = vpop.f32.mrf.mxu1  ;;  %v481_v48 = vadd.f32 %v1167_v26, %v480_v38  ;;  %v501_v49 = vadd.f32 %v1167_v26, %v500_v39 }
  0xd2   : > { %v443_v44 = vadd.f32 %v1167_v26, %v442_v40  ;;  %v463_v45 = vadd.f32 %v1167_v26, %v462_v41 }
  0xd3   : > { %v562_v58 = vmul.f32 0.2, %v481_v48  ;;  %v570_v59 = vmul.f32 0.2, %v501_v49  ;;  %vm530_vm4 = vcmp.ge.f32.partialorder %v481_v48, 0.0  ;;  %vm538_vm5 = vcmp.ge.f32.partialorder %v501_v49, 0.0 }
  0xd4   : > { %vm515_vm2 = vcmp.ge.f32.partialorder %v443_v44, 0.0  ;;  %v547_v46 = vmul.f32 0.2, %v443_v44  ;;  %vm523_vm3 = vcmp.ge.f32.partialorder %v463_v45, 0.0  ;;  %v555_v47 = vmul.f32 0.2, %v463_v45 }
  0xd5   : > { %v594_v2 = vsel %vm530_vm4, %v481_v48, %v562_v58  ;;  %v602_v3 = vsel %vm538_vm5, %v501_v49, %v570_v59 }
  0xd6   : > { %v579_v52 = vsel %vm515_vm2, %v443_v44, %v547_v46  ;;  %v587_v53 = vsel %vm523_vm3, %v463_v45, %v555_v47 }
  0xd7   : > { %v918_v54 = vpack.c.bf16 %v579_v52, %v578_v50  ;;  %v938_v55 = vpack.c.bf16 %v587_v53, %v586_v51 }
  0xd8   : > { %v482_v56 = vpop.f32.mrf.mxu2  ;;  %v502_v57 = vpop.f32.mrf.mxu3 }
  0xd9   : > { %986 = vst [vmem:[%s1180_s17 + $0x10] sm:$0xff] %v918_v54   ;;  %v483_v60 = vadd.f32 %v1167_v26, %v482_v56  ;;  %v503_v61 = vadd.f32 %v1167_v26, %v502_v57  ;;  %v445_v62 = vpop.f32.mrf.mxu0  ;;  %v465_v63 = vpop.f32.mrf.mxu1 }
  0xda   : > { %990 = vst [vmem:[%s1180_s17 + $0x30] sm:$0xff] %v938_v55   ;;  %v446_v8 = vadd.f32 %v1167_v26, %v445_v62  ;;  %v466_v9 = vadd.f32 %v1167_v26, %v465_v63 }
  0xdb   : > { %vm531_vm6 = vcmp.ge.f32.partialorder %v483_v60, 0.0  ;;  %v563_v0 = vmul.f32 0.2, %v483_v60  ;;  %vm539_vm7 = vcmp.ge.f32.partialorder %v503_v61, 0.0  ;;  %v571_v1 = vmul.f32 0.2, %v503_v61 }
  0xdc   : > { %v548_v14 = vmul.f32 0.2, %v446_v8  ;;  %v556_v15 = vmul.f32 0.2, %v466_v9  ;;  %vm516_vm8 = vcmp.ge.f32.partialorder %v446_v8, 0.0  ;;  %vm524_vm9 = vcmp.ge.f32.partialorder %v466_v9, 0.0 }
  0xdd   : > { %v595_v4 = vsel %vm531_vm6, %v483_v60, %v563_v0  ;;  %v603_v5 = vsel %vm539_vm7, %v503_v61, %v571_v1 }
  0xde   : > { %v958_v6 = vpack.c.bf16 %v595_v4, %v594_v2  ;;  %v978_v7 = vpack.c.bf16 %v603_v5, %v602_v3  ;;  %v580_v22 = vsel %vm516_vm8, %v446_v8, %v548_v14  ;;  %v588_v23 = vsel %vm524_vm9, %v466_v9, %v556_v15 }
  0xe0   : > { %994 = vst [vmem:[%s1180_s17 + $0x50] sm:$0xff] %v958_v6   ;;  %v485_v10 = vpop.f32.mrf.mxu2  ;;  %v505_v11 = vpop.f32.mrf.mxu3 }
  0xe1   : > { %998 = vst [vmem:[%s1180_s17 + $0x70] sm:$0xff] %v978_v7   ;;  %v447_v12 = vpop.f32.mrf.mxu0  ;;  %v467_v13 = vpop.f32.mrf.mxu1  ;;  %v486_v20 = vadd.f32 %v1167_v26, %v485_v10  ;;  %v506_v21 = vadd.f32 %v1167_v26, %v505_v11 }
  0xe2   : > { %v448_v16 = vadd.f32 %v1167_v26, %v447_v12  ;;  %v468_v17 = vadd.f32 %v1167_v26, %v467_v13 }
  0xe3   : > { %v564_v31 = vmul.f32 0.2, %v486_v20  ;;  %v572_v32 = vmul.f32 0.2, %v506_v21  ;;  %vm532_vm12 = vcmp.ge.f32.partialorder %v486_v20, 0.0  ;;  %vm540_vm13 = vcmp.ge.f32.partialorder %v506_v21, 0.0 }
  0xe4   : > { %vm517_vm10 = vcmp.ge.f32.partialorder %v448_v16, 0.0  ;;  %v549_v18 = vmul.f32 0.2, %v448_v16  ;;  %vm525_vm11 = vcmp.ge.f32.partialorder %v468_v17, 0.0  ;;  %v557_v19 = vmul.f32 0.2, %v468_v17 }
  0xe5   : > { %v596_v37 = vsel %vm532_vm12, %v486_v20, %v564_v31  ;;  %v604_v38 = vsel %vm540_vm13, %v506_v21, %v572_v32 }
  0xe6   : > { %v581_v24 = vsel %vm517_vm10, %v448_v16, %v549_v18  ;;  %v589_v25 = vsel %vm525_vm11, %v468_v17, %v557_v19 }
  0xe7   : > { %v923_v27 = vpack.c.bf16 %v581_v24, %v580_v22  ;;  %v943_v28 = vpack.c.bf16 %v589_v25, %v588_v23 }
  0xe8   : > { %v487_v29 = vpop.f32.mrf.mxu2  ;;  %v507_v30 = vpop.f32.mrf.mxu3 }
  0xe9   : > { %987 = vst [vmem:[%s1180_s17 + $0x18] sm:$0xff] %v923_v27   ;;  %v488_v33 = vadd.f32 %v1167_v26, %v487_v29  ;;  %v508_v34 = vadd.f32 %v1167_v26, %v507_v30 }
  0xea   : > { %991 = vst [vmem:[%s1180_s17 + $0x38] sm:$0xff] %v943_v28  }
  0xeb   : > { %vm533_vm14 = vcmp.ge.f32.partialorder %v488_v33, 0.0  ;;  %v565_v35 = vmul.f32 0.2, %v488_v33  ;;  %vm541_vm15 = vcmp.ge.f32.partialorder %v508_v34, 0.0  ;;  %v573_v36 = vmul.f32 0.2, %v508_v34 }
  0xed   : > { %v597_v39 = vsel %vm533_vm14, %v488_v33, %v565_v35  ;;  %v605_v40 = vsel %vm541_vm15, %v508_v34, %v573_v36 }
  0xee   : > { %v963_v41 = vpack.c.bf16 %v597_v39, %v596_v37  ;;  %v983_v42 = vpack.c.bf16 %v605_v40, %v604_v38 }
  0xf0   : > { %995 = vst [vmem:[%s1180_s17 + $0x58] sm:$0xff] %v963_v41  }
  0xf1   : > { %999 = vst [vmem:[%s1180_s17 + $0x78] sm:$0xff] %v983_v42  }
  0xf2 PF: > { %s13_s14 = sadd.s32 1, %s1071_s14   ;;  %s1237_s12 = smov %s1067_s13 }
  0xf3   : > { %p10_p5 = scmp.ge.s32.totalorder %s13_s14, 4   ;;  %s1238_s13 = smov %s1240_s15 }
  0xf5   :  { %12 = sbr.rel (!%p10_p5) target bundleno = 2 (0x2), region = 68 }

// kernel: discriminator_forward.9
= control target key start
LH: loop header
LB: loop body
LE: loop exit
PB: predicated region body
PF: predicated region fallthrough
CT: control target
= control target key end

     0   :  { %s385_s6 = smov 0   ;;  %s409_s0 = inlined_call_operand.vmem [shape: bf16[2,64,128], index: 0, kind: input, shape index: {}]   ;;  %s410_s1 = inlined_call_operand.vmem [shape: bf16[2,64,128], index: 1, kind: output, shape index: {}]  }
   0x1 LB: > { %s298_s7 = sadd.s32 4294967295, %s372_s6   ;;  %p302_p0 = scmp.ge.s32.totalorder %s372_s6, 1  ;;  %s372_s6 = sphi %s385_s6, %s11_s6  }
   0x2   : > { %p87_p1 = scmp.lt.s32.totalorder %s372_s6, 3 }
   0x4   : > { %p88_p2 = pnand %p302_p0, %p87_p1 }
   0x5   : > { %p107_p3 = scmp.lt.s32.totalorder (!%p88_p2), %s298_s7, 1 }
   0x6   : > { %91 = sbr.rel (%p88_p2) target bundleno = 110 (0x6e), region = 24 }
   0xb   : > { %s412_s7 = smov (!%p107_p3, %s298_s7), 1  ;;  %v374_v5 = vmov 64.0  }
   0xc   : > { %s309_s8 = sshll.u32 %s412_s7, 5  ;;  %362 = vrcp.f32 %v374_v5 }
   0xd   : > { %s111_s11 = scalar_lea.vmem %s409_s0, %s309_s8  ;;  %s116_s14 = scalar_lea.vmem %s410_s1, %s309_s8 }
   0xe   : > { %v312_v0 = vld [vmem:[%s111_s11] sm:$0xff]   ;;  %v347_v1 = vld [vmem:[%s111_s11 + $0x8] sm:$0xff]   ;;  %v348_v6 = vld [vmem:[%s111_s11 + $0x10] sm:$0xff]  }
   0xf   : > { %v313_v2 = vunpack.c.l.bf16 %v312_v0  ;;  %v314_v3 = vunpack.c.h.bf16 %v312_v0  ;;  %v317_v4 = vunpack.c.l.bf16 %v347_v1  ;;  %v318_v7 = vunpack.c.h.bf16 %v347_v1  ;;  %v349_v11 = vld [vmem:[%s111_s11 + $0x18] sm:$0xff]  }
  0x10   : > { %v321_v9 = vunpack.c.l.bf16 %v348_v6  ;;  %v322_v13 = vunpack.c.h.bf16 %v348_v6  ;;  %v325_v15 = vunpack.c.l.bf16 %v349_v11  ;;  %v326_v18 = vunpack.c.h.bf16 %v349_v11 }
  0x11   : > { %v133_v8 = vadd.f32 %v314_v3, %v313_v2 }
  0x12   : > { %v363_v12 = vpop.eup %362 }
  0x13   : > { %v134_v10 = vadd.f32 %v317_v4, %v133_v8  ;;  %v147_v17 = vmul.f32 64.0, %v363_v12  ;;  %vm151_vm0 = vweird.f32 %v363_v12 }
  0x15   : > { %v135_v14 = vadd.f32 %v318_v7, %v134_v10  ;;  %v148_v21 = vsub.f32 1.0, %v147_v17 }
  0x17   : > { %v136_v16 = vadd.f32 %v321_v9, %v135_v14  ;;  %v149_v24 = vmul.f32 %v363_v12, %v148_v21 }
  0x19   : > { %v137_v19 = vadd.f32 %v322_v13, %v136_v16  ;;  %v150_v27 = vadd.f32 %v363_v12, %v149_v24 }
  0x1b   : > { %v138_v20 = vadd.f32 %v325_v15, %v137_v19  ;;  %v152_v30 = vsel %vm151_vm0, %v363_v12, %v150_v27 }
  0x1d   : > { %v139_v22 = vadd.f32 %v326_v18, %v138_v20 }
  0x1f   : > { %v140_v23 = vrot.slane %v139_v22, 4 }
  0x21   : > { %v141_v25 = vadd.f32 %v140_v23, %v139_v22 }
  0x23   : > { %v142_v26 = vrot.slane %v141_v25, 2 }
  0x25   : > { %v143_v28 = vadd.f32 %v142_v26, %v141_v25 }
  0x27   : > { %v144_v29 = vrot.slane %v143_v28, 1 }
  0x29   : > { %v145_v31 = vadd.f32 %v144_v29, %v143_v28 }
  0x2b   : > { %v153_v32 = vmul.f32 %v152_v30, %v145_v31 }
  0x2d   : > { %v154_v33 = vsub.f32 %v313_v2, %v153_v32  ;;  %v155_v34 = vsub.f32 %v314_v3, %v153_v32  ;;  %v156_v35 = vsub.f32 %v317_v4, %v153_v32  ;;  %v157_v36 = vsub.f32 %v318_v7, %v153_v32 }
  0x2e   : > { %v158_v37 = vsub.f32 %v321_v9, %v153_v32  ;;  %v159_v41 = vsub.f32 %v322_v13, %v153_v32  ;;  %v160_v44 = vsub.f32 %v325_v15, %v153_v32  ;;  %v161_v47 = vsub.f32 %v326_v18, %v153_v32 }
  0x2f   : > { %v162_v38 = vmul.f32 %v154_v33, %v154_v33  ;;  %v163_v39 = vmul.f32 %v155_v34, %v155_v34  ;;  %v164_v40 = vmul.f32 %v156_v35, %v156_v35  ;;  %v165_v42 = vmul.f32 %v157_v36, %v157_v36 }
  0x30   : > { %v166_v45 = vmul.f32 %v158_v37, %v158_v37  ;;  %v167_v48 = vmul.f32 %v159_v41, %v159_v41  ;;  %v168_v50 = vmul.f32 %v160_v44, %v160_v44  ;;  %v169_v52 = vmul.f32 %v161_v47, %v161_v47 }
  0x31   : > { %v170_v43 = vadd.f32 %v163_v39, %v162_v38 }
  0x33   : > { %v171_v46 = vadd.f32 %v170_v43, %v164_v40 }
  0x35   : > { %v172_v49 = vadd.f32 %v171_v46, %v165_v42 }
  0x37   : > { %v173_v51 = vadd.f32 %v172_v49, %v166_v45 }
  0x39   : > { %v174_v53 = vadd.f32 %v173_v51, %v167_v48 }
  0x3b   : > { %v175_v54 = vadd.f32 %v174_v53, %v168_v50 }
  0x3d   : > { %v176_v55 = vadd.f32 %v175_v54, %v169_v52 }
  0x3f   : > { %v177_v56 = vrot.slane %v176_v55, 4 }
  0x41   : > { %v178_v57 = vadd.f32 %v177_v56, %v176_v55 }
  0x43   : > { %v179_v58 = vrot.slane %v178_v57, 2 }
  0x45   : > { %v180_v59 = vadd.f32 %v179_v58, %v178_v57 }
  0x47   : > { %v181_v60 = vrot.slane %v180_v59, 1 }
  0x49   : > { %v182_v61 = vadd.f32 %v181_v60, %v180_v59 }
  0x4b   : > { %v183_v62 = vmul.f32 %v182_v61, %v152_v30 }
  0x4d   : > { %v184_v63 = vadd.f32 1e-05, %v183_v62 }
  0x4f   : > { %364 = vrsqrt.f32 %v184_v63  ;;  %vm191_vm1 = vweird.f32 %v184_v63 }
  0x55   : > { %v365_v0 = vpop.eup %364 }
  0x56   : > { %v186_v1 = vmul.f32 %v365_v0, %v184_v63  ;;  %vm192_vm2 = vweird.f32 %v365_v0 }
  0x57   : > { %vm193_vm3 = vmor %vm191_vm1, %vm192_vm2 }
  0x58   : > { %v187_v2 = vmul.f32 %v365_v0, %v186_v1 }
  0x5a   : > { %v188_v3 = vmul.f32 0.5, %v187_v2 }
  0x5c   : > { %v189_v4 = vsub.f32 1.5, %v188_v3 }
  0x5e   : > { %v190_v5 = vmul.f32 %v365_v0, %v189_v4 }
  0x60   : > { %v194_v6 = vsel %vm193_vm3, %v365_v0, %v190_v5 }
  0x61   : > { %v195_v7 = vmul.f32 %v194_v6, %v154_v33  ;;  %v196_v8 = vmul.f32 %v194_v6, %v155_v34  ;;  %v197_v9 = vmul.f32 %v194_v6, %v156_v35  ;;  %v198_v10 = vmul.f32 %v194_v6, %v157_v36 }
  0x62   : > { %v199_v11 = vmul.f32 %v194_v6, %v158_v37  ;;  %v200_v12 = vmul.f32 %v194_v6, %v159_v41  ;;  %v201_v13 = vmul.f32 %v194_v6, %v160_v44  ;;  %v202_v14 = vmul.f32 %v194_v6, %v161_v47 }
  0x63   : > { %vm203_vm4 = vcmp.ge.f32.partialorder %v195_v7, 0.0  ;;  %vm204_vm5 = vcmp.ge.f32.partialorder %v196_v8, 0.0  ;;  %v211_v15 = vmul.f32 0.2, %v195_v7  ;;  %v212_v16 = vmul.f32 0.2, %v196_v8 }
  0x64   : > { %vm205_vm6 = vcmp.ge.f32.partialorder %v197_v9, 0.0  ;;  %vm206_vm7 = vcmp.ge.f32.partialorder %v198_v10, 0.0  ;;  %v213_v17 = vmul.f32 0.2, %v197_v9  ;;  %v214_v18 = vmul.f32 0.2, %v198_v10 }
  0x65   : > { %v219_v19 = vsel %vm203_vm4, %v195_v7, %v211_v15  ;;  %v220_v20 = vsel %vm204_vm5, %v196_v8, %v212_v16  ;;  %vm207_vm8 = vcmp.ge.f32.partialorder %v199_v11, 0.0  ;;  %vm208_vm9 = vcmp.ge.f32.partialorder %v200_v12, 0.0 }
  0x66   : > { %v330_v21 = vpack.c.bf16 %v220_v20, %v219_v19  ;;  %v221_v22 = vsel %vm205_vm6, %v197_v9, %v213_v17  ;;  %v222_v23 = vsel %vm206_vm7, %v198_v10, %v214_v18  ;;  %v215_v24 = vmul.f32 0.2, %v199_v11 }
  0x67   : > { %v335_v25 = vpack.c.bf16 %v222_v23, %v221_v22  ;;  %v216_v26 = vmul.f32 0.2, %v200_v12  ;;  %vm209_vm10 = vcmp.ge.f32.partialorder %v201_v13, 0.0  ;;  %vm210_vm11 = vcmp.ge.f32.partialorder %v202_v14, 0.0 }
  0x68   : > { %331 = vst [vmem:[%s116_s14] sm:$0xff] %v330_v21   ;;  %v223_v27 = vsel %vm207_vm8, %v199_v11, %v215_v24  ;;  %v217_v28 = vmul.f32 0.2, %v201_v13  ;;  %v218_v29 = vmul.f32 0.2, %v202_v14 }
  0x69   : > { %350 = vst [vmem:[%s116_s14 + $0x8] sm:$0xff] %v335_v25   ;;  %v224_v30 = vsel %vm208_vm9, %v200_v12, %v216_v26 }
  0x6a   : > { %v340_v31 = vpack.c.bf16 %v224_v30, %v223_v27  ;;  %v225_v32 = vsel %vm209_vm10, %v201_v13, %v217_v28  ;;  %v226_v33 = vsel %vm210_vm11, %v202_v14, %v218_v29 }
  0x6b   : > { %v345_v34 = vpack.c.bf16 %v226_v33, %v225_v32 }
  0x6c   : > { %351 = vst [vmem:[%s116_s14 + $0x10] sm:$0xff] %v340_v31  }
  0x6d   : > { %352 = vst [vmem:[%s116_s14 + $0x18] sm:$0xff] %v345_v34  }
  0x6e PF: > { %s11_s6 = sadd.s32 1, %s372_s6  }
  0x6f   : > { %p8_p4 = scmp.ge.s32.totalorder %s11_s6, 4  }
  0x71   :  { %10 = sbr.rel (!%p8_p4) target bundleno = 1 (0x1), region = 54 }

// kernel: discriminator_forward.8
= control target key start
LH: loop header
LB: loop body
LE: loop exit
PB: predicated region body
PF: predicated region fallthrough
CT: control target
= control target key end

     0   :  { %s1873_s12 = smov 0   ;;  %s1875_s13 = smov 0   ;;  %s2211_s0 = inlined_call_operand.vmem [shape: bf16[128,1024], index: 0, kind: input, shape index: {}]   ;;  %s2212_s1 = inlined_call_operand.vmem [shape: bf16[1024,128], index: 1, kind: input, shape index: {}]   ;;  %s2213_s2 = inlined_call_operand.vmem [shape: f32[1,128], index: 2, kind: input, shape index: {}]   ;;  %s2214_s3 = inlined_call_operand.vmem [shape: bf16[128,128], index: 3, kind: output, shape index: {}]  }
   0x1   :  { %s1877_s14 = smov 0  }
   0x2 LB: > { %s25_s15 = sadd.s32 1, %s1847_s13  ;;  %p1292_p0 = scmp.ge.s32.totalorder %s1851_s14, 1  ;;  %s1851_s14 = sphi %s1877_s14, %s13_s14   ;;  %s1847_s13 = sphi %s1875_s13, %s2216_s13   ;;  %s1843_s12 = sphi %s1873_s12, %s2215_s12  }
   0x3   : > { %p27_p1 = scmp.ge.s32.totalorder %s25_s15, 2  ;;  %p170_p2 = scmp.lt.s32.totalorder %s1851_s14, 3 }
   0x5   : > { %s2218_s15 = smov (%p27_p1, %s25_s15), 0  ;;  %p171_p3 = pnand %p1292_p0, %p170_p2 }
   0x6   : > { %s1293_s17 = sshll.u32 (!%p171_p3), %s1843_s12, 3 }
   0x7   : > { %174 = sbr.rel (%p171_p3) target bundleno = 305 (0x131), region = 32  ;;  %p206_p4 = scmp.lt.s32.totalorder (!%p171_p3), %s1293_s17, 15 }
   0xc   : > { %v1724_v0 = vld [vmem:[%s2212_s1 + $0x38] sm:$0xff]  ;;  %v1723_v4 = vld [vmem:[%s2212_s1 + $0x30] sm:$0xff]  ;;  %v1722_v8 = vld [vmem:[%s2212_s1 + $0x28] sm:$0xff]  ;;  %s2220_s17 = smov (!%p206_p4, %s1293_s17), 15 }
   0xd   : > { %v1732_v1 = vld [vmem:[%s2212_s1 + $0x78] sm:$0xff]  ;;  %936 = vmatpush.bf16.msra.mxu0 %v1724_v0  ;;  %v1731_v5 = vld [vmem:[%s2212_s1 + $0x70] sm:$0xff]  ;;  %v1730_v9 = vld [vmem:[%s2212_s1 + $0x68] sm:$0xff]  ;;  %s1684_s19 = sshll.u32 %s2220_s17, 5 }
   0xe   : > { %v1740_v2 = vld [vmem:[%s2212_s1 + $0xb8] sm:$0xff]  ;;  %965 = vmatpush.bf16.msra.mxu1 %v1732_v1  ;;  %v1739_v6 = vld [vmem:[%s2212_s1 + $0xb0] sm:$0xff]  ;;  %v1738_v10 = vld [vmem:[%s2212_s1 + $0xa8] sm:$0xff]  ;;  %s1978_s12 = scalar_lea.vmem %s2211_s0, %s1684_s19 }
   0xf   : > { %v1748_v3 = vld [vmem:[%s2212_s1 + $0xf8] sm:$0xff]  ;;  %994 = vmatpush.bf16.msra.mxu2 %v1740_v2  ;;  %v1747_v7 = vld [vmem:[%s2212_s1 + $0xf0] sm:$0xff]  ;;  %v1746_v11 = vld [vmem:[%s2212_s1 + $0xe8] sm:$0xff] }
  0x10   : > { %1023 = vmatpush.bf16.msra.mxu3 %v1748_v3  ;;  %v1721_v12 = vld [vmem:[%s2212_s1 + $0x20] sm:$0xff]  ;;  %v1720_v16 = vld [vmem:[%s2212_s1 + $0x18] sm:$0xff]  ;;  %v1719_v20 = vld [vmem:[%s2212_s1 + $0x10] sm:$0xff] }
  0x11   : > { %937 = vmatpush.bf16.msra.mxu0 %v1723_v4  ;;  %v1729_v13 = vld [vmem:[%s2212_s1 + $0x60] sm:$0xff]  ;;  %v1728_v17 = vld [vmem:[%s2212_s1 + $0x58] sm:$0xff]  ;;  %v1727_v21 = vld [vmem:[%s2212_s1 + $0x50] sm:$0xff] }
  0x12   : > { %966 = vmatpush.bf16.msra.mxu1 %v1731_v5  ;;  %v1737_v14 = vld [vmem:[%s2212_s1 + $0xa0] sm:$0xff]  ;;  %v1736_v18 = vld [vmem:[%s2212_s1 + $0x98] sm:$0xff]  ;;  %v1735_v22 = vld [vmem:[%s2212_s1 + $0x90] sm:$0xff] }
  0x13   : > { %995 = vmatpush.bf16.msra.mxu2 %v1739_v6  ;;  %v1745_v15 = vld [vmem:[%s2212_s1 + $0xe0] sm:$0xff]  ;;  %v1744_v19 = vld [vmem:[%s2212_s1 + $0xd8] sm:$0xff]  ;;  %v1743_v23 = vld [vmem:[%s2212_s1 + $0xd0] sm:$0xff] }
  0x14   : > { %1024 = vmatpush.bf16.msra.mxu3 %v1747_v7  ;;  %v1718_v24 = vld [vmem:[%s2212_s1 + $0x8] sm:$0xff]  ;;  %v1717_v28 = vld [vmem:[%s2212_s1] sm:$0xff]  ;;  %v1772_v40 = vld [vmem:[%s2212_s1 + $0x1b8] sm:$0xff] }
  0x15   : > { %938 = vmatpush.bf16.msra.mxu0 %v1722_v8  ;;  %v1726_v25 = vld [vmem:[%s2212_s1 + $0x48] sm:$0xff]  ;;  %v1725_v29 = vld [vmem:[%s2212_s1 + $0x40] sm:$0xff]  ;;  %v1756_v41 = vld [vmem:[%s2212_s1 + $0x138] sm:$0xff] }
  0x16   : > { %967 = vmatpush.bf16.msra.mxu1 %v1730_v9  ;;  %v1734_v26 = vld [vmem:[%s2212_s1 + $0x88] sm:$0xff]  ;;  %v1733_v30 = vld [vmem:[%s2212_s1 + $0x80] sm:$0xff]  ;;  %v1780_v46 = vld [vmem:[%s2212_s1 + $0x1f8] sm:$0xff] }
  0x17   : > { %996 = vmatpush.bf16.msra.mxu2 %v1738_v10  ;;  %v1742_v27 = vld [vmem:[%s2212_s1 + $0xc8] sm:$0xff]  ;;  %v1741_v31 = vld [vmem:[%s2212_s1 + $0xc0] sm:$0xff]  ;;  %v1764_v47 = vld [vmem:[%s2212_s1 + $0x178] sm:$0xff] }
  0x18   : > { %1025 = vmatpush.bf16.msra.mxu3 %v1746_v11  ;;  %v1300_v32 = vld [vmem:[%s1978_s12] sm:$0xf]  ;;  %v1685_v34 = vld [vmem:[%s1978_s12 + $0x4] sm:$0xf]  ;;  %v1308_v36 = vld [vmem:[%s1978_s12 + $0x8] sm:$0xf] }
  0x19   : > { %939 = vmatpush.bf16.msra.mxu0 %v1721_v12  ;;  %v1689_v33 = vld [vmem:[%s1978_s12 + $0x1c] sm:$0xf0]  ;;  %v1302_v35 = vld [vmem:[%s1978_s12 + $0x20] sm:$0xf0]  ;;  %v1690_v37 = vld [vmem:[%s1978_s12 + $0x24] sm:$0xf0] }
  0x1a   : > { %968 = vmatpush.bf16.msra.mxu1 %v1729_v13  ;;  %v1686_v38 = vld [vmem:[%s1978_s12 + $0xc] sm:$0xf]  ;;  %v1301_v42 = vor.u32 %v1689_v33, %v1300_v32  ;;  %v1305_v43 = vor.u32 %v1685_v34, %v1302_v35  ;;  %v1309_v44 = vor.u32 %v1690_v37, %v1308_v36  ;;  %v1771_v48 = vld [vmem:[%s2212_s1 + $0x1b0] sm:$0xff]  ;;  %v1332_v56 = vld [vmem:[%s1978_s12 + $0x40] sm:$0xf] }
  0x1b   : > { %997 = vmatpush.bf16.msra.mxu2 %v1737_v14  ;;  %v1310_v39 = vld [vmem:[%s1978_s12 + $0x28] sm:$0xf0]  ;;  %v1755_v49 = vld [vmem:[%s2212_s1 + $0x130] sm:$0xff]  ;;  %v1769_v57 = vld [vmem:[%s2212_s1 + $0x1a0] sm:$0xff] }
  0x1c   : > { %1026 = vmatpush.bf16.msra.mxu3 %v1745_v15  ;;  %v1313_v45 = vor.u32 %v1686_v38, %v1310_v39  ;;  %v1779_v50 = vld [vmem:[%s2212_s1 + $0x1f0] sm:$0xff]  ;;  %v1770_v52 = vld [vmem:[%s2212_s1 + $0x1a8] sm:$0xff]  ;;  %v1753_v58 = vld [vmem:[%s2212_s1 + $0x120] sm:$0xff] }
  0x1d   : > { %940 = vmatpush.bf16.msra.mxu0 %v1720_v16  ;;  %v1763_v51 = vld [vmem:[%s2212_s1 + $0x170] sm:$0xff]  ;;  %v1754_v53 = vld [vmem:[%s2212_s1 + $0x128] sm:$0xff]  ;;  %v1697_v59 = vld [vmem:[%s1978_s12 + $0x5c] sm:$0xf0] }
  0x1e   : > { %969 = vmatpush.bf16.msra.mxu1 %v1728_v17  ;;  %v1778_v54 = vld [vmem:[%s2212_s1 + $0x1e8] sm:$0xff]  ;;  %v1693_v60 = vld [vmem:[%s1978_s12 + $0x44] sm:$0xf]  ;;  %v1768_v4 = vld [vmem:[%s2212_s1 + $0x198] sm:$0xff]  ;;  %v1333_v6 = vor.u32 %v1697_v59, %v1332_v56 }
  0x1f   : > { %998 = vmatpush.bf16.msra.mxu2 %v1736_v18  ;;  %v1762_v55 = vld [vmem:[%s2212_s1 + $0x168] sm:$0xff]  ;;  %v1334_v61 = vld [vmem:[%s1978_s12 + $0x60] sm:$0xf0]  ;;  %v1752_v5 = vld [vmem:[%s2212_s1 + $0x118] sm:$0xff] }
  0x20   : > { %1027 = vmatpush.bf16.msra.mxu3 %v1744_v19  ;;  %v1340_v62 = vld [vmem:[%s1978_s12 + $0x48] sm:$0xf]  ;;  %v1694_v0 = vld [vmem:[%s1978_s12 + $0x4c] sm:$0xf]  ;;  %v1777_v2 = vld [vmem:[%s2212_s1 + $0x1e0] sm:$0xff]  ;;  %v1337_v7 = vor.u32 %v1693_v60, %v1334_v61 }
  0x21   : > { %941 = vmatpush.bf16.msra.mxu0 %v1719_v20  ;;  %v1698_v63 = vld [vmem:[%s1978_s12 + $0x64] sm:$0xf0]  ;;  %v1342_v1 = vld [vmem:[%s1978_s12 + $0x68] sm:$0xf0]  ;;  %v1761_v3 = vld [vmem:[%s2212_s1 + $0x160] sm:$0xff] }
  0x22   : > { %970 = vmatpush.bf16.msra.mxu1 %v1727_v21  ;;  %v1341_v8 = vor.u32 %v1698_v63, %v1340_v62  ;;  %v1345_v9 = vor.u32 %v1694_v0, %v1342_v1  ;;  %v1776_v10 = vld [vmem:[%s2212_s1 + $0x1d8] sm:$0xff]  ;;  %v1767_v12 = vld [vmem:[%s2212_s1 + $0x190] sm:$0xff]  ;;  %v1766_v16 = vld [vmem:[%s2212_s1 + $0x188] sm:$0xff] }
  0x23   : > { %999 = vmatpush.bf16.msra.mxu2 %v1735_v22  ;;  %v1760_v11 = vld [vmem:[%s2212_s1 + $0x158] sm:$0xff]  ;;  %v1751_v13 = vld [vmem:[%s2212_s1 + $0x110] sm:$0xff]  ;;  %v1750_v17 = vld [vmem:[%s2212_s1 + $0x108] sm:$0xff] }
  0x24   : > { %1028 = vmatpush.bf16.msra.mxu3 %v1743_v23  ;;  %v1775_v14 = vld [vmem:[%s2212_s1 + $0x1d0] sm:$0xff]  ;;  %v1774_v18 = vld [vmem:[%s2212_s1 + $0x1c8] sm:$0xff]  ;;  %v1364_v20 = vld [vmem:[%s1978_s12 + $0x80] sm:$0xf] }
  0x25   : > { %942 = vmatpush.bf16.msra.mxu0 %v1718_v24  ;;  %v1759_v15 = vld [vmem:[%s2212_s1 + $0x150] sm:$0xff]  ;;  %v1758_v19 = vld [vmem:[%s2212_s1 + $0x148] sm:$0xff]  ;;  %v1765_v21 = vld [vmem:[%s2212_s1 + $0x180] sm:$0xff] }
  0x26   : > { %971 = vmatpush.bf16.msra.mxu1 %v1726_v25  ;;  %v1749_v22 = vld [vmem:[%s2212_s1 + $0x100] sm:$0xff]  ;;  %v1348_v60 = vld [vmem:[%s1978_s12 + $0x50] sm:$0xf]  ;;  %v1695_v62 = vld [vmem:[%s1978_s12 + $0x54] sm:$0xf] }
  0x27   : > { %1000 = vmatpush.bf16.msra.mxu2 %v1734_v26  ;;  %v1705_v23 = vld [vmem:[%s1978_s12 + $0x9c] sm:$0xf0]  ;;  %v1701_v24 = vld [vmem:[%s1978_s12 + $0x84] sm:$0xf]  ;;  %v1372_v26 = vld [vmem:[%s1978_s12 + $0x88] sm:$0xf] }
  0x28   : > { %1029 = vmatpush.bf16.msra.mxu3 %v1742_v27  ;;  %v1366_v25 = vld [vmem:[%s1978_s12 + $0xa0] sm:$0xf0]  ;;  %v1706_v27 = vld [vmem:[%s1978_s12 + $0xa4] sm:$0xf0]  ;;  %v1365_v32 = vor.u32 %v1705_v23, %v1364_v20  ;;  %v1396_v36 = vld [vmem:[%s1978_s12 + $0xc0] sm:$0xf] }
  0x29   : > { %943 = vmatpush.bf16.msra.mxu0 %v1717_v28  ;;  %v1702_v28 = vld [vmem:[%s1978_s12 + $0x8c] sm:$0xf]  ;;  %v1369_v33 = vor.u32 %v1701_v24, %v1366_v25  ;;  %v1373_v34 = vor.u32 %v1706_v27, %v1372_v26  ;;  %v1713_v37 = vld [vmem:[%s1978_s12 + $0xdc] sm:$0xf0]  ;;  %v1709_v38 = vld [vmem:[%s1978_s12 + $0xc4] sm:$0xf] }
  0x2a   : > { %972 = vmatpush.bf16.msra.mxu1 %v1725_v29  ;;  %v1374_v29 = vld [vmem:[%s1978_s12 + $0xa8] sm:$0xf0]  ;;  %v1398_v39 = vld [vmem:[%s1978_s12 + $0xe0] sm:$0xf0]  ;;  %v1699_v61 = vld [vmem:[%s1978_s12 + $0x6c] sm:$0xf0] }
  0x2b   : > { %1001 = vmatpush.bf16.msra.mxu2 %v1733_v30  ;;  %v1773_v30 = vld [vmem:[%s2212_s1 + $0x1c0] sm:$0xff]  ;;  %v1377_v35 = vor.u32 %v1702_v28, %v1374_v29  ;;  %v1350_v63 = vld [vmem:[%s1978_s12 + $0x70] sm:$0xf0]  ;;  %v1356_v0 = vld [vmem:[%s1978_s12 + $0x58] sm:$0xf] }
  0x2c   : > { %1030 = vmatpush.bf16.msra.mxu3 %v1741_v31  ;;  %944 = vmatmul.bf16.vlgmr.msra.gmra.mxu0 %v1301_v42  ;;  %v1757_v31 = vld [vmem:[%s2212_s1 + $0x140] sm:$0xff]  ;;  %v1710_v42 = vld [vmem:[%s1978_s12 + $0xcc] sm:$0xf]  ;;  %v1700_v1 = vld [vmem:[%s1978_s12 + $0x74] sm:$0xf0] }
  0x2d   : > { %1052 = vmatpush.bf16.msrb.mxu0 %v1756_v41  ;;  %973 = vmatmul.bf16.vlgmr.msra.gmra.mxu1 %v1305_v43  ;;  %v1714_v41 = vld [vmem:[%s1978_s12 + $0xe4] sm:$0xf0]  ;;  %v1406_v43 = vld [vmem:[%s1978_s12 + $0xe8] sm:$0xf0]  ;;  %v1412_v20 = vld [vmem:[%s1978_s12 + $0xd0] sm:$0xf] }
  0x2e   : > { %1002 = vmatmul.bf16.vlgmr.msra.gmra.mxu2 %v1309_v44  ;;  %1081 = vmatpush.bf16.msrb.mxu1 %v1764_v47  ;;  %v1397_v44 = vor.u32 %v1713_v37, %v1396_v36  ;;  %v1409_v47 = vor.u32 %v1710_v42, %v1406_v43  ;;  %v1414_v23 = vld [vmem:[%s1978_s12 + $0xf0] sm:$0xf0]  ;;  %v1420_v24 = vld [vmem:[%s1978_s12 + $0xd8] sm:$0xf]  ;;  %v1712_v26 = vld [vmem:[%s1978_s12 + $0xdc] sm:$0xf] }
  0x2f   : > { %1110 = vmatpush.bf16.msrb.mxu2 %v1772_v40  ;;  %1031 = vmatmul.bf16.vlgmr.msra.gmra.mxu3 %v1313_v45  ;;  %v1404_v40 = vld [vmem:[%s1978_s12 + $0xc8] sm:$0xf]  ;;  %v1401_v45 = vor.u32 %v1709_v38, %v1398_v39  ;;  %v1716_v25 = vld [vmem:[%s1978_s12 + $0xf4] sm:$0xf0]  ;;  %v1422_v27 = vld [vmem:[%s1978_s12 + $0xf8] sm:$0xf0] }
  0x30   : > { %1139 = vmatpush.bf16.msrb.mxu3 %v1780_v46  ;;  %v1405_v46 = vor.u32 %v1714_v41, %v1404_v40 }
  0x31   : > { %1053 = vmatpush.bf16.msrb.mxu0 %v1755_v49  ;;  %v1691_v49 = vld [vmem:[%s1978_s12 + $0x2c] sm:$0xf0] }
  0x32   : > { %1082 = vmatpush.bf16.msrb.mxu1 %v1763_v51  ;;  %v1318_v51 = vld [vmem:[%s1978_s12 + $0x30] sm:$0xf0] }
  0x33   : > { %1111 = vmatpush.bf16.msrb.mxu2 %v1771_v48  ;;  %v1316_v48 = vld [vmem:[%s1978_s12 + $0x10] sm:$0xf] }
  0x34   : > { %1140 = vmatpush.bf16.msrb.mxu3 %v1779_v50  ;;  %v1687_v50 = vld [vmem:[%s1978_s12 + $0x14] sm:$0xf]  ;;  %v1317_v56 = vor.u32 %v1691_v49, %v1316_v48 }
  0x35   : > { %1054 = vmatpush.bf16.msrb.mxu0 %v1754_v53  ;;  %v1692_v53 = vld [vmem:[%s1978_s12 + $0x34] sm:$0xf0] }
  0x36   : > { %1083 = vmatpush.bf16.msrb.mxu1 %v1762_v55  ;;  %v1326_v55 = vld [vmem:[%s1978_s12 + $0x38] sm:$0xf0] }
  0x37   : > { %1112 = vmatpush.bf16.msrb.mxu2 %v1770_v52  ;;  %v1324_v52 = vld [vmem:[%s1978_s12 + $0x18] sm:$0xf] }
  0x38   : > { %1141 = vmatpush.bf16.msrb.mxu3 %v1778_v54  ;;  %v1688_v54 = vld [vmem:[%s1978_s12 + $0x1c] sm:$0xf] }
  0x39   : > { %1055 = vmatpush.bf16.msrb.mxu0 %v1753_v58  ;;  %v1325_v58 = vor.u32 %v1692_v53, %v1324_v52  ;;  %v1329_v59 = vor.u32 %v1688_v54, %v1326_v55 }
  0x3a   : > { %1084 = vmatpush.bf16.msrb.mxu1 %v1761_v3  ;;  %v1358_v3 = vld [vmem:[%s1978_s12 + $0x78] sm:$0xf0] }
  0x3b   : > { %1113 = vmatpush.bf16.msrb.mxu2 %v1769_v57  ;;  %v1321_v57 = vor.u32 %v1687_v50, %v1318_v51 }
  0x3c   : > { %1142 = vmatpush.bf16.msrb.mxu3 %v1777_v2  ;;  %949 = vmatmul.bf16.gmra.mxu0 %v1333_v6  ;;  %v1696_v2 = vld [vmem:[%s1978_s12 + $0x5c] sm:$0xf]  ;;  %v1357_v6 = vor.u32 %v1700_v1, %v1356_v0 }
  0x3d   : > { %1056 = vmatpush.bf16.msrb.mxu0 %v1752_v5  ;;  %978 = vmatmul.bf16.gmra.mxu1 %v1337_v7  ;;  %v1353_v5 = vor.u32 %v1695_v62, %v1350_v63  ;;  %v1361_v7 = vor.u32 %v1696_v2, %v1358_v3 }
  0x3e   : > { %1007 = vmatmul.bf16.gmra.mxu2 %v1341_v8  ;;  %1085 = vmatpush.bf16.msrb.mxu1 %v1760_v11  ;;  %v1380_v8 = vld [vmem:[%s1978_s12 + $0x90] sm:$0xf]  ;;  %v1382_v11 = vld [vmem:[%s1978_s12 + $0xb0] sm:$0xf0] }
  0x3f   : > { %1114 = vmatpush.bf16.msrb.mxu2 %v1768_v4  ;;  %1036 = vmatmul.bf16.gmra.mxu3 %v1345_v9  ;;  %v1349_v4 = vor.u32 %v1699_v61, %v1348_v60  ;;  %v1707_v9 = vld [vmem:[%s1978_s12 + $0xac] sm:$0xf0] }
  0x40   : > { %1143 = vmatpush.bf16.msrb.mxu3 %v1776_v10  ;;  %v1703_v10 = vld [vmem:[%s1978_s12 + $0x94] sm:$0xf] }
  0x41   : > { %1057 = vmatpush.bf16.msrb.mxu0 %v1751_v13  ;;  %v1708_v13 = vld [vmem:[%s1978_s12 + $0xb4] sm:$0xf0] }
  0x42   : > { %1086 = vmatpush.bf16.msrb.mxu1 %v1759_v15  ;;  %v1390_v15 = vld [vmem:[%s1978_s12 + $0xb8] sm:$0xf0] }
  0x43   : > { %1115 = vmatpush.bf16.msrb.mxu2 %v1767_v12  ;;  %v1388_v12 = vld [vmem:[%s1978_s12 + $0x98] sm:$0xf] }
  0x44   : > { %1144 = vmatpush.bf16.msrb.mxu3 %v1775_v14  ;;  %v1704_v14 = vld [vmem:[%s1978_s12 + $0x9c] sm:$0xf] }
  0x45   : > { %1058 = vmatpush.bf16.msrb.mxu0 %v1750_v17  ;;  %v1385_v17 = vor.u32 %v1703_v10, %v1382_v11 }
  0x46   : > { %1087 = vmatpush.bf16.msrb.mxu1 %v1758_v19  ;;  %v1393_v19 = vor.u32 %v1704_v14, %v1390_v15 }
  0x47   : > { %1116 = vmatpush.bf16.msrb.mxu2 %v1766_v16  ;;  %v1381_v16 = vor.u32 %v1707_v9, %v1380_v8 }
  0x48   : > { %1145 = vmatpush.bf16.msrb.mxu3 %v1774_v18  ;;  %v1389_v18 = vor.u32 %v1708_v13, %v1388_v12 }
  0x49   : > { %1059 = vmatpush.bf16.msrb.mxu0 %v1749_v22  ;;  %v1711_v22 = vld [vmem:[%s1978_s12 + $0xd4] sm:$0xf] }
  0x4a   : > { %1088 = vmatpush.bf16.msrb.mxu1 %v1757_v31  ;;  %v1417_v29 = vor.u32 %v1711_v22, %v1414_v23  ;;  %v1425_v31 = vor.u32 %v1712_v26, %v1422_v27 }
  0x4b   : > { %1117 = vmatpush.bf16.msrb.mxu2 %v1765_v21  ;;  %v1715_v21 = vld [vmem:[%s1978_s12 + $0xec] sm:$0xf0]  ;;  %s1297_s12 = sshll.u32 %s2220_s17, 2 }
  0x4c   : > { %1146 = vmatpush.bf16.msrb.mxu3 %v1773_v30  ;;  %954 = vmatmul.bf16.gmra.mxu0 %v1365_v32  ;;  %v1413_v28 = vor.u32 %v1715_v21, %v1412_v20  ;;  %v1421_v30 = vor.u32 %v1716_v25, %v1420_v24  ;;  %v2161_v32 = vld [vmem:[%s2213_s2] ss:$0 sm:$0xff]  ;;  %s2187_s18 = scalar_lea.vmem %s2214_s3, %s1297_s12 }
  0x4d   : > { %983 = vmatmul.bf16.gmra.mxu1 %v1369_v33 }
  0x4e   : > { %1012 = vmatmul.bf16.gmra.mxu2 %v1373_v34 }
  0x4f   : > { %1041 = vmatmul.bf16.gmra.mxu3 %v1377_v35 }
  0x5c   : > { %959 = vmatmul.bf16.gmra.mxu0 %v1397_v44 }
  0x5d   : > { %988 = vmatmul.bf16.gmra.mxu1 %v1401_v45 }
  0x5e   : > { %1017 = vmatmul.bf16.gmra.mxu2 %v1405_v46 }
  0x5f   : > { %1046 = vmatmul.bf16.gmra.mxu3 %v1409_v47 }
  0x6c   : > { %1060 = vmatmul.bf16.vlgmr.msrb.gmra.mxu0 %v1317_v56 }
  0x6d   : > { %1089 = vmatmul.bf16.vlgmr.msrb.gmra.mxu1 %v1321_v57 }
  0x6e   : > { %1118 = vmatmul.bf16.vlgmr.msrb.gmra.mxu2 %v1325_v58 }
  0x6f   : > { %1147 = vmatmul.bf16.vlgmr.msrb.gmra.mxu3 %v1329_v59 }
  0x7c   : > { %1065 = vmatmul.bf16.gmra.mxu0 %v1349_v4 }
  0x7d   : > { %1094 = vmatmul.bf16.gmra.mxu1 %v1353_v5 }
  0x7e   : > { %1123 = vmatmul.bf16.gmra.mxu2 %v1357_v6 }
  0x7f   : > { %1152 = vmatmul.bf16.gmra.mxu3 %v1361_v7 }
  0x8c   : > { %1070 = vmatmul.bf16.gmra.mxu0 %v1381_v16 }
  0x8d   : > { %1099 = vmatmul.bf16.gmra.mxu1 %v1385_v17 }
  0x8e   : > { %1128 = vmatmul.bf16.gmra.mxu2 %v1389_v18 }
  0x8f   : > { %1157 = vmatmul.bf16.gmra.mxu3 %v1393_v19 }
  0x9c   : > { %1075 = vmatmul.bf16.gmra.mxu0 %v1413_v28 }
  0x9d   : > { %1104 = vmatmul.bf16.gmra.mxu1 %v1417_v29 }
  0x9e   : > { %1133 = vmatmul.bf16.gmra.mxu2 %v1421_v30 }
  0x9f   : > { %1162 = vmatmul.bf16.gmra.mxu3 %v1425_v31 }
  0xa9   : > { %v945_v33 = vpop.f32.mrf.mxu0 }
  0xaa   : > { %v974_v34 = vpop.f32.mrf.mxu1  ;;  %v946_v35 = vadd.f32 %v2161_v32, %v945_v33 }
  0xac   : > { %v975_v36 = vadd.f32 %v974_v34, %v946_v35 }
  0xb1   : > { %v1003_v37 = vpop.f32.mrf.mxu2  ;;  %v947_v40 = vpop.f32.mrf.mxu0 }
  0xb2   : > { %v1032_v38 = vpop.f32.mrf.mxu3  ;;  %v1004_v39 = vadd.f32 %v1003_v37, %v975_v36  ;;  %v976_v41 = vpop.f32.mrf.mxu1  ;;  %v948_v15 = vadd.f32 %v2161_v32, %v947_v40 }
  0xb4   : > { %v1033_v42 = vadd.f32 %v1032_v38, %v1004_v39  ;;  %v977_v20 = vadd.f32 %v976_v41, %v948_v15 }
  0xb9   : > { %v1005_v43 = vpop.f32.mrf.mxu2  ;;  %v950_v45 = vpop.f32.mrf.mxu0 }
  0xba   : > { %v1034_v44 = vpop.f32.mrf.mxu3  ;;  %v979_v46 = vpop.f32.mrf.mxu1  ;;  %v951_v47 = vadd.f32 %v2161_v32, %v950_v45  ;;  %v1006_v21 = vadd.f32 %v1005_v43, %v977_v20 }
  0xbc   : > { %v980_v48 = vadd.f32 %v979_v46, %v951_v47  ;;  %v1035_v24 = vadd.f32 %v1034_v44, %v1006_v21 }
  0xc1   : > { %v1008_v49 = vpop.f32.mrf.mxu2  ;;  %v952_v52 = vpop.f32.mrf.mxu0 }
  0xc2   : > { %v1037_v50 = vpop.f32.mrf.mxu3  ;;  %v1009_v51 = vadd.f32 %v1008_v49, %v980_v48  ;;  %v981_v53 = vpop.f32.mrf.mxu1  ;;  %v953_v30 = vadd.f32 %v2161_v32, %v952_v52 }
  0xc4   : > { %v1038_v54 = vadd.f32 %v1037_v50, %v1009_v51  ;;  %v982_v39 = vadd.f32 %v981_v53, %v953_v30 }
  0xc9   : > { %v1010_v55 = vpop.f32.mrf.mxu2  ;;  %v955_v57 = vpop.f32.mrf.mxu0 }
  0xca   : > { %v1039_v56 = vpop.f32.mrf.mxu3  ;;  %v984_v58 = vpop.f32.mrf.mxu1  ;;  %v956_v59 = vadd.f32 %v2161_v32, %v955_v57 }
  0xcc   : > { %v985_v60 = vadd.f32 %v984_v58, %v956_v59 }
  0xd1   : > { %v1013_v61 = vpop.f32.mrf.mxu2  ;;  %v957_v0 = vpop.f32.mrf.mxu0 }
  0xd2   : > { %v1042_v62 = vpop.f32.mrf.mxu3  ;;  %v1014_v63 = vadd.f32 %v1013_v61, %v985_v60  ;;  %v986_v1 = vpop.f32.mrf.mxu1  ;;  %v958_v52 = vadd.f32 %v2161_v32, %v957_v0 }
  0xd4   : > { %v2166_v2 = vadd.f32 %v1042_v62, %v1014_v63  ;;  %v987_v62 = vadd.f32 %v986_v1, %v958_v52 }
  0xd9   : > { %v1015_v3 = vpop.f32.mrf.mxu2  ;;  %v960_v5 = vpop.f32.mrf.mxu0 }
  0xda   : > { %v2168_v4 = vpop.f32.mrf.mxu3  ;;  %v989_v6 = vpop.f32.mrf.mxu1  ;;  %v961_v7 = vadd.f32 %v2161_v32, %v960_v5 }
  0xdc   : > { %v990_v8 = vadd.f32 %v989_v6, %v961_v7  ;;  %v1016_v6 = vadd.f32 %v1015_v3, %v987_v62 }
  0xe1   : > { %v1018_v9 = vpop.f32.mrf.mxu2  ;;  %v2171_v12 = vpop.f32.mrf.mxu0 }
  0xe2   : > { %v1047_v10 = vpop.f32.mrf.mxu3  ;;  %v1019_v11 = vadd.f32 %v1018_v9, %v990_v8  ;;  %v2173_v13 = vpop.f32.mrf.mxu1  ;;  %v1045_v8 = vadd.f32 %v2168_v4, %v1016_v6 }
  0xe4   : > { %v2175_v14 = vadd.f32 %v1047_v10, %v1019_v11 }
  0xe9   : > { %v2178_v16 = vpop.f32.mrf.mxu2  ;;  %v1061_v18 = vpop.f32.mrf.mxu0 }
  0xea   : > { %v2180_v17 = vpop.f32.mrf.mxu3  ;;  %v1090_v19 = vpop.f32.mrf.mxu1  ;;  %v1062_v25 = vadd.f32 %v1061_v18, %v1033_v42  ;;  %v1011_v42 = vadd.f32 %v1010_v55, %v982_v39  ;;  %v963_v18 = vadd.f32 %v2161_v32, %v2171_v12 }
  0xec   : > { %v1091_v29 = vadd.f32 %v1090_v19, %v1062_v25  ;;  %v1040_v46 = vadd.f32 %v1039_v56, %v1011_v42 }
  0xf1   : > { %v1119_v22 = vpop.f32.mrf.mxu2  ;;  %v1063_v26 = vpop.f32.mrf.mxu0 }
  0xf2   : > { %v1148_v23 = vpop.f32.mrf.mxu3  ;;  %v1092_v27 = vpop.f32.mrf.mxu1  ;;  %v1064_v28 = vadd.f32 %v1063_v26, %v1035_v24  ;;  %v1120_v31 = vadd.f32 %v1119_v22, %v1091_v29 }
  0xf4   : > { %v1093_v33 = vadd.f32 %v1092_v27, %v1064_v28  ;;  %v1149_v40 = vadd.f32 %v1148_v23, %v1120_v31  ;;  %v992_v23 = vadd.f32 %v2173_v13, %v963_v18 }
  0xf9   : > { %v1121_v34 = vpop.f32.mrf.mxu2  ;;  %v1066_v37 = vpop.f32.mrf.mxu0 }
  0xfa   : > { %v1150_v35 = vpop.f32.mrf.mxu3  ;;  %v1122_v36 = vadd.f32 %v1121_v34, %v1093_v33  ;;  %v1095_v38 = vpop.f32.mrf.mxu1  ;;  %v1067_v47 = vadd.f32 %v1066_v37, %v1038_v54 }
  0xfc   : > { %v1151_v41 = vadd.f32 %v1150_v35, %v1122_v36  ;;  %v1096_v51 = vadd.f32 %v1095_v38, %v1067_v47 }
  0xfe   : > { %v1784_v43 = vpack.c.bf16 %v1151_v41, %v1149_v40 }
 0x100   : > { %1785 = vst [vmem:[%s2187_s18] sm:$0xff] %v1784_v43  }
 0x101   : > { %v1124_v44 = vpop.f32.mrf.mxu2  ;;  %v1068_v48 = vpop.f32.mrf.mxu0 }
 0x102   : > { %v1153_v45 = vpop.f32.mrf.mxu3  ;;  %v1097_v49 = vpop.f32.mrf.mxu1  ;;  %v1069_v50 = vadd.f32 %v1068_v48, %v1040_v46  ;;  %v1125_v53 = vadd.f32 %v1124_v44, %v1096_v51 }
 0x104   : > { %v1098_v57 = vadd.f32 %v1097_v49, %v1069_v50  ;;  %v1154_v63 = vadd.f32 %v1153_v45, %v1125_v53 }
 0x109   : > { %v1126_v58 = vpop.f32.mrf.mxu2  ;;  %v1071_v61 = vpop.f32.mrf.mxu0 }
 0x10a   : > { %v1155_v59 = vpop.f32.mrf.mxu3  ;;  %v1127_v60 = vadd.f32 %v1126_v58, %v1098_v57  ;;  %v1100_v55 = vpop.f32.mrf.mxu1  ;;  %v1072_v9 = vadd.f32 %v1071_v61, %v2166_v2  ;;  %v1021_v2 = vadd.f32 %v2178_v16, %v992_v23 }
 0x10c   : > { %v1156_v5 = vadd.f32 %v1155_v59, %v1127_v60  ;;  %v1101_v15 = vadd.f32 %v1100_v55, %v1072_v9  ;;  %v1050_v32 = vadd.f32 %v2180_v17, %v1021_v2 }
 0x10e   : > { %v1789_v56 = vpack.c.bf16 %v1156_v5, %v1154_v63 }
 0x110   : > { %1801 = vst [vmem:[%s2187_s18 + $0x8] sm:$0xff] %v1789_v56  }
 0x111   : > { %v1129_v54 = vpop.f32.mrf.mxu2  ;;  %v1073_v0 = vpop.f32.mrf.mxu0 }
 0x112   : > { %v1158_v7 = vpop.f32.mrf.mxu3  ;;  %v1102_v10 = vpop.f32.mrf.mxu1  ;;  %v1074_v11 = vadd.f32 %v1073_v0, %v1045_v8  ;;  %v1130_v1 = vadd.f32 %v1129_v54, %v1101_v15 }
 0x114   : > { %v1103_v19 = vadd.f32 %v1102_v10, %v1074_v11  ;;  %v1159_v24 = vadd.f32 %v1158_v7, %v1130_v1 }
 0x119   : > { %v1131_v20 = vpop.f32.mrf.mxu2  ;;  %v1076_v22 = vpop.f32.mrf.mxu0 }
 0x11a   : > { %v1160_v3 = vpop.f32.mrf.mxu3  ;;  %v1132_v21 = vadd.f32 %v1131_v20, %v1103_v19  ;;  %v1105_v25 = vpop.f32.mrf.mxu1  ;;  %v1077_v12 = vadd.f32 %v1076_v22, %v2175_v14 }
 0x11c   : > { %v1161_v4 = vadd.f32 %v1160_v3, %v1132_v21  ;;  %v1106_v31 = vadd.f32 %v1105_v25, %v1077_v12 }
 0x11e   : > { %v1794_v26 = vpack.c.bf16 %v1161_v4, %v1159_v24 }
 0x120   : > { %1802 = vst [vmem:[%s2187_s18 + $0x10] sm:$0xff] %v1794_v26  }
 0x121   : > { %v1134_v27 = vpop.f32.mrf.mxu2  ;;  %v1078_v29 = vpop.f32.mrf.mxu0 }
 0x122   : > { %v1163_v28 = vpop.f32.mrf.mxu3  ;;  %v1079_v30 = vadd.f32 %v1078_v29, %v1050_v32  ;;  %v1107_v33 = vpop.f32.mrf.mxu1  ;;  %v1135_v34 = vadd.f32 %v1134_v27, %v1106_v31 }
 0x124   : > { %v1108_v13 = vadd.f32 %v1107_v33, %v1079_v30  ;;  %v1164_v38 = vadd.f32 %v1163_v28, %v1135_v34 }
 0x129   : > { %v1136_v35 = vpop.f32.mrf.mxu2 }
 0x12a   : > { %v1137_v36 = vadd.f32 %v1136_v35, %v1108_v13  ;;  %v1165_v37 = vpop.f32.mrf.mxu3 }
 0x12c   : > { %v1166_v16 = vadd.f32 %v1165_v37, %v1137_v36 }
 0x12e   : > { %v1799_v39 = vpack.c.bf16 %v1166_v16, %v1164_v38 }
 0x130   : > { %1803 = vst [vmem:[%s2187_s18 + $0x18] sm:$0xff] %v1799_v39  }
 0x131 PF: > { %s13_s14 = sadd.s32 1, %s1851_s14   ;;  %s2215_s12 = smov %s1847_s13 }
 0x132   : > { %p10_p5 = scmp.ge.s32.totalorder %s13_s14, 4   ;;  %s2216_s13 = smov %s2218_s15 }
 0x134   :  { %12 = sbr.rel (!%p10_p5) target bundleno = 2 (0x2), region = 68 }

// kernel: discriminator_forward.11
= control target key start
LH: loop header
LB: loop body
LE: loop exit
PB: predicated region body
PF: predicated region fallthrough
CT: control target
= control target key end

     0   :  { %s314_s6 = smov 0   ;;  %s338_s0 = inlined_call_operand.vmem [shape: bf16[2,16,256], index: 0, kind: input, shape index: {}]   ;;  %s339_s1 = inlined_call_operand.vmem [shape: bf16[2,16,256], index: 1, kind: output, shape index: {}]  }
   0x1 LB: > { %s267_s7 = sadd.s32 4294967295, %s301_s6   ;;  %p271_p0 = scmp.ge.s32.totalorder %s301_s6, 1  ;;  %s301_s6 = sphi %s314_s6, %s11_s6  }
   0x2   : > { %p87_p1 = scmp.lt.s32.totalorder %s301_s6, 3 }
   0x4   : > { %p88_p2 = pnand %p271_p0, %p87_p1 }
   0x5   : > { %p107_p3 = scmp.lt.s32.totalorder (!%p88_p2), %s267_s7, 1 }
   0x6   : > { %91 = sbr.rel (%p88_p2) target bundleno = 83 (0x53), region = 24 }
   0xb   : > { %v303_v0 = vmov 16.0   ;;  %s341_s7 = smov (!%p107_p3, %s267_s7), 1 }
   0xc   : > { %289 = vrcp.f32 %v303_v0  ;;  %s278_s8 = sshll.u32 %s341_s7, 4 }
   0xd   : > { %s111_s11 = scalar_lea.vmem %s338_s0, %s278_s8  ;;  %s116_s14 = scalar_lea.vmem %s339_s1, %s278_s8 }
   0xe   : > { %v117_v1 = vld [vmem:[%s111_s11] sm:$0xff]  ;;  %v118_v2 = vld [vmem:[%s111_s11 + $0x8] sm:$0xff] }
   0xf   : > { %v119_v4 = vunpack.c.l.bf16 %v117_v1  ;;  %v120_v5 = vunpack.c.h.bf16 %v117_v1  ;;  %v121_v6 = vunpack.c.l.bf16 %v118_v2  ;;  %v122_v7 = vunpack.c.h.bf16 %v118_v2 }
  0x11   : > { %v123_v9 = vadd.f32 %v121_v6, %v119_v4  ;;  %v130_v10 = vadd.f32 %v122_v7, %v120_v5 }
  0x12   : > { %v290_v3 = vpop.eup %289 }
  0x13   : > { %v138_v8 = vmul.f32 16.0, %v290_v3  ;;  %v124_v12 = vrot.slane %v123_v9, 4  ;;  %v131_v13 = vrot.slane %v130_v10, 4  ;;  %vm142_vm0 = vweird.f32 %v290_v3 }
  0x15   : > { %v139_v11 = vsub.f32 1.0, %v138_v8  ;;  %v125_v15 = vadd.f32 %v124_v12, %v123_v9  ;;  %v132_v16 = vadd.f32 %v131_v13, %v130_v10 }
  0x17   : > { %v140_v14 = vmul.f32 %v290_v3, %v139_v11  ;;  %v126_v17 = vrot.slane %v125_v15, 2  ;;  %v133_v18 = vrot.slane %v132_v16, 2 }
  0x19   : > { %v141_v19 = vadd.f32 %v290_v3, %v140_v14  ;;  %v127_v20 = vadd.f32 %v126_v17, %v125_v15  ;;  %v134_v21 = vadd.f32 %v133_v18, %v132_v16 }
  0x1b   : > { %v128_v22 = vrot.slane %v127_v20, 1  ;;  %v135_v23 = vrot.slane %v134_v21, 1  ;;  %v143_v24 = vsel %vm142_vm0, %v290_v3, %v141_v19 }
  0x1d   : > { %v129_v25 = vadd.f32 %v128_v22, %v127_v20  ;;  %v136_v26 = vadd.f32 %v135_v23, %v134_v21 }
  0x1f   : > { %v144_v27 = vmul.f32 %v143_v24, %v129_v25  ;;  %v145_v28 = vmul.f32 %v143_v24, %v136_v26 }
  0x21   : > { %v146_v29 = vsub.f32 %v119_v4, %v144_v27  ;;  %v147_v30 = vsub.f32 %v120_v5, %v145_v28  ;;  %v148_v31 = vsub.f32 %v121_v6, %v144_v27  ;;  %v149_v32 = vsub.f32 %v122_v7, %v145_v28 }
  0x23   : > { %v150_v33 = vmul.f32 %v146_v29, %v146_v29  ;;  %v151_v34 = vmul.f32 %v147_v30, %v147_v30  ;;  %v152_v35 = vmul.f32 %v148_v31, %v148_v31  ;;  %v153_v36 = vmul.f32 %v149_v32, %v149_v32 }
  0x25   : > { %v154_v37 = vadd.f32 %v152_v35, %v150_v33  ;;  %v161_v38 = vadd.f32 %v153_v36, %v151_v34 }
  0x27   : > { %v155_v39 = vrot.slane %v154_v37, 4  ;;  %v162_v40 = vrot.slane %v161_v38, 4 }
  0x29   : > { %v156_v41 = vadd.f32 %v155_v39, %v154_v37  ;;  %v163_v42 = vadd.f32 %v162_v40, %v161_v38 }
  0x2b   : > { %v157_v43 = vrot.slane %v156_v41, 2  ;;  %v164_v44 = vrot.slane %v163_v42, 2 }
  0x2d   : > { %v158_v45 = vadd.f32 %v157_v43, %v156_v41  ;;  %v165_v46 = vadd.f32 %v164_v44, %v163_v42 }
  0x2f   : > { %v159_v47 = vrot.slane %v158_v45, 1  ;;  %v166_v48 = vrot.slane %v165_v46, 1 }
  0x31   : > { %v160_v49 = vadd.f32 %v159_v47, %v158_v45  ;;  %v167_v50 = vadd.f32 %v166_v48, %v165_v46 }
  0x33   : > { %v168_v51 = vmul.f32 %v160_v49, %v143_v24  ;;  %v169_v52 = vmul.f32 %v167_v50, %v143_v24 }
  0x35   : > { %v170_v53 = vadd.f32 1e-05, %v168_v51  ;;  %v171_v54 = vadd.f32 1e-05, %v169_v52 }
  0x37   : > { %291 = vrsqrt.f32 %v170_v53  ;;  %vm178_vm1 = vweird.f32 %v170_v53  ;;  %vm188_vm3 = vweird.f32 %v171_v54 }
  0x38   : > { %293 = vrsqrt.f32 %v171_v54 }
  0x3d   : > { %v292_v55 = vpop.eup %291 }
  0x3e   : > { %v294_v56 = vpop.eup %293  ;;  %v173_v57 = vmul.f32 %v292_v55, %v170_v53  ;;  %vm179_vm2 = vweird.f32 %v292_v55 }
  0x3f   : > { %v183_v58 = vmul.f32 %v294_v56, %v171_v54  ;;  %vm189_vm4 = vweird.f32 %v294_v56  ;;  %vm180_vm5 = vmor %vm178_vm1, %vm179_vm2 }
  0x40   : > { %v174_v59 = vmul.f32 %v292_v55, %v173_v57  ;;  %vm190_vm6 = vmor %vm188_vm3, %vm189_vm4 }
  0x41   : > { %v184_v60 = vmul.f32 %v294_v56, %v183_v58 }
  0x42   : > { %v175_v61 = vmul.f32 0.5, %v174_v59 }
  0x43   : > { %v185_v62 = vmul.f32 0.5, %v184_v60 }
  0x44   : > { %v176_v63 = vsub.f32 1.5, %v175_v61 }
  0x45   : > { %v186_v0 = vsub.f32 1.5, %v185_v62 }
  0x46   : > { %v177_v1 = vmul.f32 %v292_v55, %v176_v63 }
  0x47   : > { %v187_v2 = vmul.f32 %v294_v56, %v186_v0 }
  0x48   : > { %v181_v3 = vsel %vm180_vm5, %v292_v55, %v177_v1 }
  0x49   : > { %v191_v4 = vsel %vm190_vm6, %v294_v56, %v187_v2  ;;  %v192_v5 = vmul.f32 %v181_v3, %v146_v29  ;;  %v194_v6 = vmul.f32 %v181_v3, %v148_v31 }
  0x4a   : > { %v193_v7 = vmul.f32 %v191_v4, %v147_v30  ;;  %v195_v8 = vmul.f32 %v191_v4, %v149_v32 }
  0x4b   : > { %vm196_vm7 = vcmp.ge.f32.partialorder %v192_v5, 0.0  ;;  %v200_v9 = vmul.f32 0.2, %v192_v5  ;;  %vm198_vm8 = vcmp.ge.f32.partialorder %v194_v6, 0.0  ;;  %v202_v10 = vmul.f32 0.2, %v194_v6 }
  0x4c   : > { %vm197_vm9 = vcmp.ge.f32.partialorder %v193_v7, 0.0  ;;  %v201_v11 = vmul.f32 0.2, %v193_v7  ;;  %vm199_vm10 = vcmp.ge.f32.partialorder %v195_v8, 0.0  ;;  %v203_v12 = vmul.f32 0.2, %v195_v8 }
  0x4d   : > { %v204_v13 = vsel %vm196_vm7, %v192_v5, %v200_v9  ;;  %v206_v14 = vsel %vm198_vm8, %v194_v6, %v202_v10 }
  0x4e   : > { %v205_v15 = vsel %vm197_vm9, %v193_v7, %v201_v11  ;;  %v207_v16 = vsel %vm199_vm10, %v195_v8, %v203_v12 }
  0x4f   : > { %v208_v17 = vpack.c.bf16 %v205_v15, %v204_v13  ;;  %v209_v18 = vpack.c.bf16 %v207_v16, %v206_v14 }
  0x51   : > { %210 = vst [vmem:[%s116_s14] sm:$0xff] %v208_v17 }
  0x52   : > { %211 = vst [vmem:[%s116_s14 + $0x8] sm:$0xff] %v209_v18 }
  0x53 PF: > { %s11_s6 = sadd.s32 1, %s301_s6  }
  0x54   : > { %p8_p4 = scmp.ge.s32.totalorder %s11_s6, 4  }
  0x56   :  { %10 = sbr.rel (!%p8_p4) target bundleno = 1 (0x1), region = 54 }

// kernel: discriminator_forward.10
= control target key start
LH: loop header
LB: loop body
LE: loop exit
PB: predicated region body
PF: predicated region fallthrough
CT: control target
= control target key end

     0   :  { %s4954_s12 = smov 0   ;;  %s4956_s13 = smov 0   ;;  %s5881_s0 = inlined_call_operand.vmem [shape: bf16[32,2048], index: 0, kind: input, shape index: {}]   ;;  %s5882_s1 = inlined_call_operand.vmem [shape: bf16[2048,256], index: 1, kind: input, shape index: {}]   ;;  %s5883_s2 = inlined_call_operand.vmem [shape: f32[1,256], index: 2, kind: input, shape index: {}]   ;;  %s5884_s3 = inlined_call_operand.vmem [shape: bf16[32,256], index: 3, kind: output, shape index: {}]  }
   0x1   :  { %s4958_s14 = smov 0   ;;  %s4960_s15 = smov 0  }
   0x2   :  { %s4962_s16 = smov 0  }
   0x3 LB: > { %s22_s17 = sadd.s32 1, %s4928_s15  ;;  %s4028_s18 = sadd.s32 4294967295, %s4932_s16   ;;  %s4932_s16 = sphi %s4962_s16, %s13_s16   ;;  %s4928_s15 = sphi %s4960_s15, %s5889_s15   ;;  %s4924_s14 = sphi %s4958_s14, %s5888_s14   ;;  %s4920_s13 = sphi %s4956_s13, %s5887_s13   ;;  %s4916_s12 = sphi %s4954_s12, %s5886_s12  }
   0x4   : > { %p23_p0 = scmp.ge.s32.totalorder %s22_s17, 2  ;;  %p65_p1 = scmp.ne.s32.totalorder %s4920_s13, %s4916_s12 }
   0x5   : > { %p66_p2 = scmp.eq.s32.totalorder %s4932_s16, 0  ;;  %p123_p4 = scmp.eq.s32.totalorder %s4028_s18, 1 }
   0x6   : > { %s5891_s17 = smov (%p23_p0, %s22_s17), 0  ;;  %s58_s20 = sadd.s32 1, %s4920_s13 }
   0x7   : > { %p67_p3 = por %p66_p2, %p65_p1  ;;  %s55_s19 = ssub.s32 %s4928_s15, %s5891_s17 }
   0x8   : > { %p56_p5 = scmp.eq.s32.totalorder %s55_s19, 0  ;;  %p4989_p6 = por %p123_p4, %p65_p1 }
   0x9   : > { %p4032_p7 = scmp.ge.s32.totalorder %s4932_s16, 2 }
   0xa   : > { %s4994_s22 = scalar_select %p56_p5, %s4920_s13, %s58_s20  }
   0xb   : > { %155 = sbr.rel (%p4032_p7) target bundleno = 276 (0x114), region = 20 }
  0x10   : > { %158 = sbr.rel (!%p67_p3) target bundleno = 276 (0x114), region = 24  ;;  %s160_s23 = sand.u32 (%p67_p3), 1, %s4920_s13  }
  0x11   : > { %s4034_s24 = sshll.u32 (%p67_p3), %s4928_s15, 2  ;;  %s4033_s25 = sshll.u32 (%p67_p3), %s160_s23, 10 }
  0x12   : > { %s5002_s28 = scalar_lea.vmem (%p67_p3), %s5882_s1, %s4034_s24  ;;  %s5006_s29 = scalar_lea.vmem (%p67_p3), [#allocation2], %s4033_s25 }
  0x13   : > { %v181_v0 = vld [vmem:[%s5002_s28] sm:$0xf] (%p67_p3)  ;;  %v183_v1 = vld [vmem:[%s5002_s28 + $0x8] sm:$0xf] (%p67_p3)  ;;  %v185_v2 = vld [vmem:[%s5002_s28 + $0x10] sm:$0xf] (%p67_p3) }
  0x14   : > { %182 = vst [vmem:[%s5006_s29] sm:$0xf] (%p67_p3), %v181_v0  ;;  %v187_v3 = vld [vmem:[%s5002_s28 + $0x18] sm:$0xf] (%p67_p3)  ;;  %v189_v4 = vld [vmem:[%s5002_s28 + $0x20] sm:$0xf] (%p67_p3) }
  0x15   : > { %184 = vst [vmem:[%s5006_s29 + $0x4] sm:$0xf] %v183_v1  ;;  %v191_v5 = vld [vmem:[%s5002_s28 + $0x28] sm:$0xf]  ;;  %v193_v6 = vld [vmem:[%s5002_s28 + $0x30] sm:$0xf] }
  0x16   : > { %186 = vst [vmem:[%s5006_s29 + $0x8] sm:$0xf] %v185_v2  ;;  %v195_v7 = vld [vmem:[%s5002_s28 + $0x38] sm:$0xf]  ;;  %v197_v8 = vld [vmem:[%s5002_s28 + $0x40] sm:$0xf] }
  0x17   : > { %188 = vst [vmem:[%s5006_s29 + $0xc] sm:$0xf] %v187_v3  ;;  %v199_v9 = vld [vmem:[%s5002_s28 + $0x48] sm:$0xf]  ;;  %v201_v10 = vld [vmem:[%s5002_s28 + $0x50] sm:$0xf] }
  0x18   : > { %190 = vst [vmem:[%s5006_s29 + $0x10] sm:$0xf] %v189_v4  ;;  %v203_v11 = vld [vmem:[%s5002_s28 + $0x58] sm:$0xf]  ;;  %v205_v12 = vld [vmem:[%s5002_s28 + $0x60] sm:$0xf] }
  0x19   : > { %192 = vst [vmem:[%s5006_s29 + $0x14] sm:$0xf] %v191_v5  ;;  %v207_v13 = vld [vmem:[%s5002_s28 + $0x68] sm:$0xf]  ;;  %v209_v14 = vld [vmem:[%s5002_s28 + $0x70] sm:$0xf] }
  0x1a   : > { %194 = vst [vmem:[%s5006_s29 + $0x18] sm:$0xf] %v193_v6  ;;  %v211_v15 = vld [vmem:[%s5002_s28 + $0x78] sm:$0xf]  ;;  %v213_v16 = vld [vmem:[%s5002_s28 + $0x80] sm:$0xf] }
  0x1b   : > { %196 = vst [vmem:[%s5006_s29 + $0x1c] sm:$0xf] %v195_v7  ;;  %v215_v17 = vld [vmem:[%s5002_s28 + $0x88] sm:$0xf]  ;;  %v217_v18 = vld [vmem:[%s5002_s28 + $0x90] sm:$0xf] }
  0x1c   : > { %198 = vst [vmem:[%s5006_s29 + $0x20] sm:$0xf] %v197_v8  ;;  %v219_v19 = vld [vmem:[%s5002_s28 + $0x98] sm:$0xf]  ;;  %v221_v20 = vld [vmem:[%s5002_s28 + $0xa0] sm:$0xf] }
  0x1d   : > { %200 = vst [vmem:[%s5006_s29 + $0x24] sm:$0xf] %v199_v9  ;;  %v223_v21 = vld [vmem:[%s5002_s28 + $0xa8] sm:$0xf]  ;;  %v225_v22 = vld [vmem:[%s5002_s28 + $0xb0] sm:$0xf] }
  0x1e   : > { %202 = vst [vmem:[%s5006_s29 + $0x28] sm:$0xf] %v201_v10  ;;  %v227_v23 = vld [vmem:[%s5002_s28 + $0xb8] sm:$0xf]  ;;  %v229_v24 = vld [vmem:[%s5002_s28 + $0xc0] sm:$0xf] }
  0x1f   : > { %204 = vst [vmem:[%s5006_s29 + $0x2c] sm:$0xf] %v203_v11  ;;  %v231_v25 = vld [vmem:[%s5002_s28 + $0xc8] sm:$0xf]  ;;  %v233_v26 = vld [vmem:[%s5002_s28 + $0xd0] sm:$0xf] }
  0x20   : > { %206 = vst [vmem:[%s5006_s29 + $0x30] sm:$0xf] %v205_v12  ;;  %v235_v27 = vld [vmem:[%s5002_s28 + $0xd8] sm:$0xf]  ;;  %v237_v28 = vld [vmem:[%s5002_s28 + $0xe0] sm:$0xf] }
  0x21   : > { %208 = vst [vmem:[%s5006_s29 + $0x34] sm:$0xf] %v207_v13  ;;  %v239_v29 = vld [vmem:[%s5002_s28 + $0xe8] sm:$0xf]  ;;  %v241_v30 = vld [vmem:[%s5002_s28 + $0xf0] sm:$0xf] }
  0x22   : > { %210 = vst [vmem:[%s5006_s29 + $0x38] sm:$0xf] %v209_v14  ;;  %v243_v31 = vld [vmem:[%s5002_s28 + $0xf8] sm:$0xf]  ;;  %v245_v32 = vld [vmem:[%s5002_s28 + $0x100] sm:$0xf] }
  0x23   : > { %212 = vst [vmem:[%s5006_s29 + $0x3c] sm:$0xf] %v211_v15  ;;  %v247_v33 = vld [vmem:[%s5002_s28 + $0x108] sm:$0xf]  ;;  %v249_v34 = vld [vmem:[%s5002_s28 + $0x110] sm:$0xf] }
  0x24   : > { %214 = vst [vmem:[%s5006_s29 + $0x40] sm:$0xf] %v213_v16  ;;  %v251_v35 = vld [vmem:[%s5002_s28 + $0x118] sm:$0xf]  ;;  %v253_v36 = vld [vmem:[%s5002_s28 + $0x120] sm:$0xf] }
  0x25   : > { %216 = vst [vmem:[%s5006_s29 + $0x44] sm:$0xf] %v215_v17  ;;  %v255_v37 = vld [vmem:[%s5002_s28 + $0x128] sm:$0xf]  ;;  %v257_v38 = vld [vmem:[%s5002_s28 + $0x130] sm:$0xf] }
  0x26   : > { %218 = vst [vmem:[%s5006_s29 + $0x48] sm:$0xf] %v217_v18  ;;  %v259_v39 = vld [vmem:[%s5002_s28 + $0x138] sm:$0xf]  ;;  %v261_v40 = vld [vmem:[%s5002_s28 + $0x140] sm:$0xf] }
  0x27   : > { %220 = vst [vmem:[%s5006_s29 + $0x4c] sm:$0xf] %v219_v19  ;;  %v263_v41 = vld [vmem:[%s5002_s28 + $0x148] sm:$0xf]  ;;  %v265_v42 = vld [vmem:[%s5002_s28 + $0x150] sm:$0xf] }
  0x28   : > { %222 = vst [vmem:[%s5006_s29 + $0x50] sm:$0xf] %v221_v20  ;;  %v267_v43 = vld [vmem:[%s5002_s28 + $0x158] sm:$0xf]  ;;  %v269_v44 = vld [vmem:[%s5002_s28 + $0x160] sm:$0xf] }
  0x29   : > { %224 = vst [vmem:[%s5006_s29 + $0x54] sm:$0xf] %v223_v21  ;;  %v271_v45 = vld [vmem:[%s5002_s28 + $0x168] sm:$0xf]  ;;  %v273_v46 = vld [vmem:[%s5002_s28 + $0x170] sm:$0xf] }
  0x2a   : > { %226 = vst [vmem:[%s5006_s29 + $0x58] sm:$0xf] %v225_v22  ;;  %v275_v47 = vld [vmem:[%s5002_s28 + $0x178] sm:$0xf]  ;;  %v277_v48 = vld [vmem:[%s5002_s28 + $0x180] sm:$0xf] }
  0x2b   : > { %228 = vst [vmem:[%s5006_s29 + $0x5c] sm:$0xf] %v227_v23  ;;  %v279_v49 = vld [vmem:[%s5002_s28 + $0x188] sm:$0xf]  ;;  %v281_v50 = vld [vmem:[%s5002_s28 + $0x190] sm:$0xf] }
  0x2c   : > { %230 = vst [vmem:[%s5006_s29 + $0x60] sm:$0xf] %v229_v24  ;;  %v283_v51 = vld [vmem:[%s5002_s28 + $0x198] sm:$0xf]  ;;  %v285_v52 = vld [vmem:[%s5002_s28 + $0x1a0] sm:$0xf] }
  0x2d   : > { %232 = vst [vmem:[%s5006_s29 + $0x64] sm:$0xf] %v231_v25  ;;  %v287_v53 = vld [vmem:[%s5002_s28 + $0x1a8] sm:$0xf]  ;;  %v289_v54 = vld [vmem:[%s5002_s28 + $0x1b0] sm:$0xf] }
  0x2e   : > { %234 = vst [vmem:[%s5006_s29 + $0x68] sm:$0xf] %v233_v26  ;;  %v291_v55 = vld [vmem:[%s5002_s28 + $0x1b8] sm:$0xf]  ;;  %v293_v56 = vld [vmem:[%s5002_s28 + $0x1c0] sm:$0xf] }
  0x2f   : > { %236 = vst [vmem:[%s5006_s29 + $0x6c] sm:$0xf] %v235_v27  ;;  %v295_v57 = vld [vmem:[%s5002_s28 + $0x1c8] sm:$0xf]  ;;  %v297_v58 = vld [vmem:[%s5002_s28 + $0x1d0] sm:$0xf] }
  0x30   : > { %238 = vst [vmem:[%s5006_s29 + $0x70] sm:$0xf] %v237_v28  ;;  %v299_v59 = vld [vmem:[%s5002_s28 + $0x1d8] sm:$0xf]  ;;  %v301_v60 = vld [vmem:[%s5002_s28 + $0x1e0] sm:$0xf] }
  0x31   : > { %240 = vst [vmem:[%s5006_s29 + $0x74] sm:$0xf] %v239_v29  ;;  %v303_v61 = vld [vmem:[%s5002_s28 + $0x1e8] sm:$0xf]  ;;  %v305_v62 = vld [vmem:[%s5002_s28 + $0x1f0] sm:$0xf] }
  0x32   : > { %242 = vst [vmem:[%s5006_s29 + $0x78] sm:$0xf] %v241_v30  ;;  %v307_v63 = vld [vmem:[%s5002_s28 + $0x1f8] sm:$0xf]  ;;  %v309_v0 = vld [vmem:[%s5002_s28 + $0x200] sm:$0xf] }
  0x33   : > { %244 = vst [vmem:[%s5006_s29 + $0x7c] sm:$0xf] %v243_v31  ;;  %v311_v1 = vld [vmem:[%s5002_s28 + $0x208] sm:$0xf]  ;;  %v313_v2 = vld [vmem:[%s5002_s28 + $0x210] sm:$0xf] }
  0x34   : > { %246 = vst [vmem:[%s5006_s29 + $0x80] sm:$0xf] %v245_v32  ;;  %v315_v3 = vld [vmem:[%s5002_s28 + $0x218] sm:$0xf]  ;;  %v317_v4 = vld [vmem:[%s5002_s28 + $0x220] sm:$0xf] }
  0x35   : > { %248 = vst [vmem:[%s5006_s29 + $0x84] sm:$0xf] %v247_v33  ;;  %v319_v5 = vld [vmem:[%s5002_s28 + $0x228] sm:$0xf]  ;;  %v321_v6 = vld [vmem:[%s5002_s28 + $0x230] sm:$0xf] }
  0x36   : > { %250 = vst [vmem:[%s5006_s29 + $0x88] sm:$0xf] %v249_v34  ;;  %v323_v7 = vld [vmem:[%s5002_s28 + $0x238] sm:$0xf]  ;;  %v325_v8 = vld [vmem:[%s5002_s28 + $0x240] sm:$0xf] }
  0x37   : > { %252 = vst [vmem:[%s5006_s29 + $0x8c] sm:$0xf] %v251_v35  ;;  %v327_v9 = vld [vmem:[%s5002_s28 + $0x248] sm:$0xf]  ;;  %v329_v10 = vld [vmem:[%s5002_s28 + $0x250] sm:$0xf] }
  0x38   : > { %254 = vst [vmem:[%s5006_s29 + $0x90] sm:$0xf] %v253_v36  ;;  %v331_v11 = vld [vmem:[%s5002_s28 + $0x258] sm:$0xf]  ;;  %v333_v12 = vld [vmem:[%s5002_s28 + $0x260] sm:$0xf] }
  0x39   : > { %256 = vst [vmem:[%s5006_s29 + $0x94] sm:$0xf] %v255_v37  ;;  %v335_v13 = vld [vmem:[%s5002_s28 + $0x268] sm:$0xf]  ;;  %v337_v14 = vld [vmem:[%s5002_s28 + $0x270] sm:$0xf] }
  0x3a   : > { %258 = vst [vmem:[%s5006_s29 + $0x98] sm:$0xf] %v257_v38  ;;  %v339_v15 = vld [vmem:[%s5002_s28 + $0x278] sm:$0xf]  ;;  %v341_v16 = vld [vmem:[%s5002_s28 + $0x280] sm:$0xf] }
  0x3b   : > { %260 = vst [vmem:[%s5006_s29 + $0x9c] sm:$0xf] %v259_v39  ;;  %v343_v17 = vld [vmem:[%s5002_s28 + $0x288] sm:$0xf]  ;;  %v345_v18 = vld [vmem:[%s5002_s28 + $0x290] sm:$0xf] }
  0x3c   : > { %262 = vst [vmem:[%s5006_s29 + $0xa0] sm:$0xf] %v261_v40  ;;  %v347_v19 = vld [vmem:[%s5002_s28 + $0x298] sm:$0xf]  ;;  %v349_v20 = vld [vmem:[%s5002_s28 + $0x2a0] sm:$0xf] }
  0x3d   : > { %264 = vst [vmem:[%s5006_s29 + $0xa4] sm:$0xf] %v263_v41  ;;  %v351_v21 = vld [vmem:[%s5002_s28 + $0x2a8] sm:$0xf]  ;;  %v353_v22 = vld [vmem:[%s5002_s28 + $0x2b0] sm:$0xf] }
  0x3e   : > { %266 = vst [vmem:[%s5006_s29 + $0xa8] sm:$0xf] %v265_v42  ;;  %v355_v23 = vld [vmem:[%s5002_s28 + $0x2b8] sm:$0xf]  ;;  %v357_v24 = vld [vmem:[%s5002_s28 + $0x2c0] sm:$0xf] }
  0x3f   : > { %268 = vst [vmem:[%s5006_s29 + $0xac] sm:$0xf] %v267_v43  ;;  %v359_v25 = vld [vmem:[%s5002_s28 + $0x2c8] sm:$0xf]  ;;  %v361_v26 = vld [vmem:[%s5002_s28 + $0x2d0] sm:$0xf] }
  0x40   : > { %270 = vst [vmem:[%s5006_s29 + $0xb0] sm:$0xf] %v269_v44  ;;  %v363_v27 = vld [vmem:[%s5002_s28 + $0x2d8] sm:$0xf]  ;;  %v365_v28 = vld [vmem:[%s5002_s28 + $0x2e0] sm:$0xf] }
  0x41   : > { %272 = vst [vmem:[%s5006_s29 + $0xb4] sm:$0xf] %v271_v45  ;;  %v367_v29 = vld [vmem:[%s5002_s28 + $0x2e8] sm:$0xf]  ;;  %v369_v30 = vld [vmem:[%s5002_s28 + $0x2f0] sm:$0xf] }
  0x42   : > { %274 = vst [vmem:[%s5006_s29 + $0xb8] sm:$0xf] %v273_v46  ;;  %v371_v31 = vld [vmem:[%s5002_s28 + $0x2f8] sm:$0xf]  ;;  %v373_v32 = vld [vmem:[%s5002_s28 + $0x300] sm:$0xf] }
  0x43   : > { %276 = vst [vmem:[%s5006_s29 + $0xbc] sm:$0xf] %v275_v47  ;;  %v375_v33 = vld [vmem:[%s5002_s28 + $0x308] sm:$0xf]  ;;  %v377_v34 = vld [vmem:[%s5002_s28 + $0x310] sm:$0xf] }
  0x44   : > { %278 = vst [vmem:[%s5006_s29 + $0xc0] sm:$0xf] %v277_v48  ;;  %v379_v35 = vld [vmem:[%s5002_s28 + $0x318] sm:$0xf]  ;;  %v381_v36 = vld [vmem:[%s5002_s28 + $0x320] sm:$0xf] }
  0x45   : > { %280 = vst [vmem:[%s5006_s29 + $0xc4] sm:$0xf] %v279_v49  ;;  %v383_v37 = vld [vmem:[%s5002_s28 + $0x328] sm:$0xf]  ;;  %v385_v38 = vld [vmem:[%s5002_s28 + $0x330] sm:$0xf] }
  0x46   : > { %282 = vst [vmem:[%s5006_s29 + $0xc8] sm:$0xf] %v281_v50  ;;  %v387_v39 = vld [vmem:[%s5002_s28 + $0x338] sm:$0xf]  ;;  %v389_v40 = vld [vmem:[%s5002_s28 + $0x340] sm:$0xf] }
  0x47   : > { %284 = vst [vmem:[%s5006_s29 + $0xcc] sm:$0xf] %v283_v51  ;;  %v391_v41 = vld [vmem:[%s5002_s28 + $0x348] sm:$0xf]  ;;  %v393_v42 = vld [vmem:[%s5002_s28 + $0x350] sm:$0xf] }
  0x48   : > { %286 = vst [vmem:[%s5006_s29 + $0xd0] sm:$0xf] %v285_v52  ;;  %v395_v43 = vld [vmem:[%s5002_s28 + $0x358] sm:$0xf]  ;;  %v397_v44 = vld [vmem:[%s5002_s28 + $0x360] sm:$0xf] }
  0x49   : > { %288 = vst [vmem:[%s5006_s29 + $0xd4] sm:$0xf] %v287_v53  ;;  %v399_v45 = vld [vmem:[%s5002_s28 + $0x368] sm:$0xf]  ;;  %v401_v46 = vld [vmem:[%s5002_s28 + $0x370] sm:$0xf] }
  0x4a   : > { %290 = vst [vmem:[%s5006_s29 + $0xd8] sm:$0xf] %v289_v54  ;;  %v403_v47 = vld [vmem:[%s5002_s28 + $0x378] sm:$0xf]  ;;  %v405_v48 = vld [vmem:[%s5002_s28 + $0x380] sm:$0xf] }
  0x4b   : > { %292 = vst [vmem:[%s5006_s29 + $0xdc] sm:$0xf] %v291_v55  ;;  %v407_v49 = vld [vmem:[%s5002_s28 + $0x388] sm:$0xf]  ;;  %v409_v50 = vld [vmem:[%s5002_s28 + $0x390] sm:$0xf] }
  0x4c   : > { %294 = vst [vmem:[%s5006_s29 + $0xe0] sm:$0xf] %v293_v56  ;;  %v411_v51 = vld [vmem:[%s5002_s28 + $0x398] sm:$0xf]  ;;  %v413_v52 = vld [vmem:[%s5002_s28 + $0x3a0] sm:$0xf] }
  0x4d   : > { %296 = vst [vmem:[%s5006_s29 + $0xe4] sm:$0xf] %v295_v57  ;;  %v415_v53 = vld [vmem:[%s5002_s28 + $0x3a8] sm:$0xf]  ;;  %v417_v54 = vld [vmem:[%s5002_s28 + $0x3b0] sm:$0xf] }
  0x4e   : > { %298 = vst [vmem:[%s5006_s29 + $0xe8] sm:$0xf] %v297_v58  ;;  %v419_v55 = vld [vmem:[%s5002_s28 + $0x3b8] sm:$0xf]  ;;  %v421_v56 = vld [vmem:[%s5002_s28 + $0x3c0] sm:$0xf] }
  0x4f   : > { %300 = vst [vmem:[%s5006_s29 + $0xec] sm:$0xf] %v299_v59  ;;  %v423_v57 = vld [vmem:[%s5002_s28 + $0x3c8] sm:$0xf]  ;;  %v425_v58 = vld [vmem:[%s5002_s28 + $0x3d0] sm:$0xf] }
  0x50   : > { %302 = vst [vmem:[%s5006_s29 + $0xf0] sm:$0xf] %v301_v60  ;;  %v427_v59 = vld [vmem:[%s5002_s28 + $0x3d8] sm:$0xf]  ;;  %v429_v60 = vld [vmem:[%s5002_s28 + $0x3e0] sm:$0xf] }
  0x51   : > { %304 = vst [vmem:[%s5006_s29 + $0xf4] sm:$0xf] %v303_v61  ;;  %v431_v61 = vld [vmem:[%s5002_s28 + $0x3e8] sm:$0xf] }
  0x52   : > { %306 = vst [vmem:[%s5006_s29 + $0xf8] sm:$0xf] %v305_v62  ;;  %v433_v62 = vld [vmem:[%s5002_s28 + $0x3f0] sm:$0xf] }
  0x53   : > { %308 = vst [vmem:[%s5006_s29 + $0xfc] sm:$0xf] %v307_v63  ;;  %v435_v63 = vld [vmem:[%s5002_s28 + $0x3f8] sm:$0xf] }
  0x54   : > { %310 = vst [vmem:[%s5006_s29 + $0x100] sm:$0xf] %v309_v0  ;;  %v437_v0 = vld [vmem:[%s5002_s28 + $0x400] sm:$0xf] }
  0x55   : > { %312 = vst [vmem:[%s5006_s29 + $0x104] sm:$0xf] %v311_v1  ;;  %v439_v1 = vld [vmem:[%s5002_s28 + $0x408] sm:$0xf] }
  0x56   : > { %314 = vst [vmem:[%s5006_s29 + $0x108] sm:$0xf] %v313_v2  ;;  %v441_v2 = vld [vmem:[%s5002_s28 + $0x410] sm:$0xf] }
  0x57   : > { %316 = vst [vmem:[%s5006_s29 + $0x10c] sm:$0xf] %v315_v3  ;;  %v443_v3 = vld [vmem:[%s5002_s28 + $0x418] sm:$0xf] }
  0x58   : > { %318 = vst [vmem:[%s5006_s29 + $0x110] sm:$0xf] %v317_v4  ;;  %v445_v4 = vld [vmem:[%s5002_s28 + $0x420] sm:$0xf] }
  0x59   : > { %320 = vst [vmem:[%s5006_s29 + $0x114] sm:$0xf] %v319_v5  ;;  %v447_v5 = vld [vmem:[%s5002_s28 + $0x428] sm:$0xf] }
  0x5a   : > { %322 = vst [vmem:[%s5006_s29 + $0x118] sm:$0xf] %v321_v6  ;;  %v449_v6 = vld [vmem:[%s5002_s28 + $0x430] sm:$0xf] }
  0x5b   : > { %324 = vst [vmem:[%s5006_s29 + $0x11c] sm:$0xf] %v323_v7  ;;  %v451_v7 = vld [vmem:[%s5002_s28 + $0x438] sm:$0xf] }
  0x5c   : > { %326 = vst [vmem:[%s5006_s29 + $0x120] sm:$0xf] %v325_v8  ;;  %v453_v8 = vld [vmem:[%s5002_s28 + $0x440] sm:$0xf] }
  0x5d   : > { %328 = vst [vmem:[%s5006_s29 + $0x124] sm:$0xf] %v327_v9  ;;  %v455_v9 = vld [vmem:[%s5002_s28 + $0x448] sm:$0xf] }
  0x5e   : > { %330 = vst [vmem:[%s5006_s29 + $0x128] sm:$0xf] %v329_v10  ;;  %v457_v10 = vld [vmem:[%s5002_s28 + $0x450] sm:$0xf] }
  0x5f   : > { %332 = vst [vmem:[%s5006_s29 + $0x12c] sm:$0xf] %v331_v11  ;;  %v459_v11 = vld [vmem:[%s5002_s28 + $0x458] sm:$0xf] }
  0x60   : > { %334 = vst [vmem:[%s5006_s29 + $0x130] sm:$0xf] %v333_v12  ;;  %v461_v12 = vld [vmem:[%s5002_s28 + $0x460] sm:$0xf] }
  0x61   : > { %336 = vst [vmem:[%s5006_s29 + $0x134] sm:$0xf] %v335_v13  ;;  %v463_v13 = vld [vmem:[%s5002_s28 + $0x468] sm:$0xf] }
  0x62   : > { %338 = vst [vmem:[%s5006_s29 + $0x138] sm:$0xf] %v337_v14  ;;  %v465_v14 = vld [vmem:[%s5002_s28 + $0x470] sm:$0xf] }
  0x63   : > { %340 = vst [vmem:[%s5006_s29 + $0x13c] sm:$0xf] %v339_v15  ;;  %v467_v15 = vld [vmem:[%s5002_s28 + $0x478] sm:$0xf] }
  0x64   : > { %342 = vst [vmem:[%s5006_s29 + $0x140] sm:$0xf] %v341_v16  ;;  %v469_v16 = vld [vmem:[%s5002_s28 + $0x480] sm:$0xf] }
  0x65   : > { %344 = vst [vmem:[%s5006_s29 + $0x144] sm:$0xf] %v343_v17  ;;  %v471_v17 = vld [vmem:[%s5002_s28 + $0x488] sm:$0xf] }
  0x66   : > { %346 = vst [vmem:[%s5006_s29 + $0x148] sm:$0xf] %v345_v18  ;;  %v473_v18 = vld [vmem:[%s5002_s28 + $0x490] sm:$0xf] }
  0x67   : > { %348 = vst [vmem:[%s5006_s29 + $0x14c] sm:$0xf] %v347_v19  ;;  %v475_v19 = vld [vmem:[%s5002_s28 + $0x498] sm:$0xf] }
  0x68   : > { %350 = vst [vmem:[%s5006_s29 + $0x150] sm:$0xf] %v349_v20  ;;  %v477_v20 = vld [vmem:[%s5002_s28 + $0x4a0] sm:$0xf] }
  0x69   : > { %352 = vst [vmem:[%s5006_s29 + $0x154] sm:$0xf] %v351_v21  ;;  %v479_v21 = vld [vmem:[%s5002_s28 + $0x4a8] sm:$0xf] }
  0x6a   : > { %354 = vst [vmem:[%s5006_s29 + $0x158] sm:$0xf] %v353_v22  ;;  %v481_v22 = vld [vmem:[%s5002_s28 + $0x4b0] sm:$0xf] }
  0x6b   : > { %356 = vst [vmem:[%s5006_s29 + $0x15c] sm:$0xf] %v355_v23  ;;  %v483_v23 = vld [vmem:[%s5002_s28 + $0x4b8] sm:$0xf] }
  0x6c   : > { %358 = vst [vmem:[%s5006_s29 + $0x160] sm:$0xf] %v357_v24  ;;  %v485_v24 = vld [vmem:[%s5002_s28 + $0x4c0] sm:$0xf] }
  0x6d   : > { %360 = vst [vmem:[%s5006_s29 + $0x164] sm:$0xf] %v359_v25  ;;  %v487_v25 = vld [vmem:[%s5002_s28 + $0x4c8] sm:$0xf] }
  0x6e   : > { %362 = vst [vmem:[%s5006_s29 + $0x168] sm:$0xf] %v361_v26  ;;  %v489_v26 = vld [vmem:[%s5002_s28 + $0x4d0] sm:$0xf] }
  0x6f   : > { %364 = vst [vmem:[%s5006_s29 + $0x16c] sm:$0xf] %v363_v27  ;;  %v491_v27 = vld [vmem:[%s5002_s28 + $0x4d8] sm:$0xf] }
  0x70   : > { %366 = vst [vmem:[%s5006_s29 + $0x170] sm:$0xf] %v365_v28  ;;  %v493_v28 = vld [vmem:[%s5002_s28 + $0x4e0] sm:$0xf] }
  0x71   : > { %368 = vst [vmem:[%s5006_s29 + $0x174] sm:$0xf] %v367_v29  ;;  %v495_v29 = vld [vmem:[%s5002_s28 + $0x4e8] sm:$0xf] }
  0x72   : > { %370 = vst [vmem:[%s5006_s29 + $0x178] sm:$0xf] %v369_v30  ;;  %v497_v30 = vld [vmem:[%s5002_s28 + $0x4f0] sm:$0xf] }
  0x73   : > { %372 = vst [vmem:[%s5006_s29 + $0x17c] sm:$0xf] %v371_v31  ;;  %v499_v31 = vld [vmem:[%s5002_s28 + $0x4f8] sm:$0xf] }
  0x74   : > { %374 = vst [vmem:[%s5006_s29 + $0x180] sm:$0xf] %v373_v32  ;;  %v501_v32 = vld [vmem:[%s5002_s28 + $0x500] sm:$0xf] }
  0x75   : > { %376 = vst [vmem:[%s5006_s29 + $0x184] sm:$0xf] %v375_v33  ;;  %v503_v33 = vld [vmem:[%s5002_s28 + $0x508] sm:$0xf] }
  0x76   : > { %378 = vst [vmem:[%s5006_s29 + $0x188] sm:$0xf] %v377_v34  ;;  %v505_v34 = vld [vmem:[%s5002_s28 + $0x510] sm:$0xf] }
  0x77   : > { %380 = vst [vmem:[%s5006_s29 + $0x18c] sm:$0xf] %v379_v35  ;;  %v507_v35 = vld [vmem:[%s5002_s28 + $0x518] sm:$0xf] }
  0x78   : > { %382 = vst [vmem:[%s5006_s29 + $0x190] sm:$0xf] %v381_v36  ;;  %v509_v36 = vld [vmem:[%s5002_s28 + $0x520] sm:$0xf] }
  0x79   : > { %384 = vst [vmem:[%s5006_s29 + $0x194] sm:$0xf] %v383_v37  ;;  %v511_v37 = vld [vmem:[%s5002_s28 + $0x528] sm:$0xf] }
  0x7a   : > { %386 = vst [vmem:[%s5006_s29 + $0x198] sm:$0xf] %v385_v38  ;;  %v513_v38 = vld [vmem:[%s5002_s28 + $0x530] sm:$0xf] }
  0x7b   : > { %388 = vst [vmem:[%s5006_s29 + $0x19c] sm:$0xf] %v387_v39  ;;  %v515_v39 = vld [vmem:[%s5002_s28 + $0x538] sm:$0xf] }
  0x7c   : > { %390 = vst [vmem:[%s5006_s29 + $0x1a0] sm:$0xf] %v389_v40  ;;  %v517_v40 = vld [vmem:[%s5002_s28 + $0x540] sm:$0xf] }
  0x7d   : > { %392 = vst [vmem:[%s5006_s29 + $0x1a4] sm:$0xf] %v391_v41  ;;  %v519_v41 = vld [vmem:[%s5002_s28 + $0x548] sm:$0xf] }
  0x7e   : > { %394 = vst [vmem:[%s5006_s29 + $0x1a8] sm:$0xf] %v393_v42  ;;  %v521_v42 = vld [vmem:[%s5002_s28 + $0x550] sm:$0xf] }
  0x7f   : > { %396 = vst [vmem:[%s5006_s29 + $0x1ac] sm:$0xf] %v395_v43  ;;  %v523_v43 = vld [vmem:[%s5002_s28 + $0x558] sm:$0xf] }
  0x80   : > { %398 = vst [vmem:[%s5006_s29 + $0x1b0] sm:$0xf] %v397_v44  ;;  %v525_v44 = vld [vmem:[%s5002_s28 + $0x560] sm:$0xf] }
  0x81   : > { %400 = vst [vmem:[%s5006_s29 + $0x1b4] sm:$0xf] %v399_v45  ;;  %v527_v45 = vld [vmem:[%s5002_s28 + $0x568] sm:$0xf] }
  0x82   : > { %402 = vst [vmem:[%s5006_s29 + $0x1b8] sm:$0xf] %v401_v46  ;;  %v529_v46 = vld [vmem:[%s5002_s28 + $0x570] sm:$0xf] }
  0x83   : > { %404 = vst [vmem:[%s5006_s29 + $0x1bc] sm:$0xf] %v403_v47  ;;  %v531_v47 = vld [vmem:[%s5002_s28 + $0x578] sm:$0xf] }
  0x84   : > { %406 = vst [vmem:[%s5006_s29 + $0x1c0] sm:$0xf] %v405_v48  ;;  %v533_v48 = vld [vmem:[%s5002_s28 + $0x580] sm:$0xf] }
  0x85   : > { %408 = vst [vmem:[%s5006_s29 + $0x1c4] sm:$0xf] %v407_v49  ;;  %v535_v49 = vld [vmem:[%s5002_s28 + $0x588] sm:$0xf] }
  0x86   : > { %410 = vst [vmem:[%s5006_s29 + $0x1c8] sm:$0xf] %v409_v50  ;;  %v537_v50 = vld [vmem:[%s5002_s28 + $0x590] sm:$0xf] }
  0x87   : > { %412 = vst [vmem:[%s5006_s29 + $0x1cc] sm:$0xf] %v411_v51  ;;  %v539_v51 = vld [vmem:[%s5002_s28 + $0x598] sm:$0xf] }
  0x88   : > { %414 = vst [vmem:[%s5006_s29 + $0x1d0] sm:$0xf] %v413_v52  ;;  %v541_v52 = vld [vmem:[%s5002_s28 + $0x5a0] sm:$0xf] }
  0x89   : > { %416 = vst [vmem:[%s5006_s29 + $0x1d4] sm:$0xf] %v415_v53  ;;  %v543_v53 = vld [vmem:[%s5002_s28 + $0x5a8] sm:$0xf] }
  0x8a   : > { %418 = vst [vmem:[%s5006_s29 + $0x1d8] sm:$0xf] %v417_v54  ;;  %v545_v54 = vld [vmem:[%s5002_s28 + $0x5b0] sm:$0xf] }
  0x8b   : > { %420 = vst [vmem:[%s5006_s29 + $0x1dc] sm:$0xf] %v419_v55  ;;  %v547_v55 = vld [vmem:[%s5002_s28 + $0x5b8] sm:$0xf] }
  0x8c   : > { %422 = vst [vmem:[%s5006_s29 + $0x1e0] sm:$0xf] %v421_v56  ;;  %v549_v56 = vld [vmem:[%s5002_s28 + $0x5c0] sm:$0xf] }
  0x8d   : > { %424 = vst [vmem:[%s5006_s29 + $0x1e4] sm:$0xf] %v423_v57  ;;  %v551_v57 = vld [vmem:[%s5002_s28 + $0x5c8] sm:$0xf] }
  0x8e   : > { %426 = vst [vmem:[%s5006_s29 + $0x1e8] sm:$0xf] %v425_v58  ;;  %v553_v58 = vld [vmem:[%s5002_s28 + $0x5d0] sm:$0xf] }
  0x8f   : > { %428 = vst [vmem:[%s5006_s29 + $0x1ec] sm:$0xf] %v427_v59  ;;  %v555_v59 = vld [vmem:[%s5002_s28 + $0x5d8] sm:$0xf] }
  0x90   : > { %430 = vst [vmem:[%s5006_s29 + $0x1f0] sm:$0xf] %v429_v60  ;;  %v557_v60 = vld [vmem:[%s5002_s28 + $0x5e0] sm:$0xf] }
  0x91   : > { %432 = vst [vmem:[%s5006_s29 + $0x1f4] sm:$0xf] %v431_v61  ;;  %v559_v61 = vld [vmem:[%s5002_s28 + $0x5e8] sm:$0xf] }
  0x92   : > { %434 = vst [vmem:[%s5006_s29 + $0x1f8] sm:$0xf] %v433_v62  ;;  %v561_v62 = vld [vmem:[%s5002_s28 + $0x5f0] sm:$0xf] }
  0x93   : > { %436 = vst [vmem:[%s5006_s29 + $0x1fc] sm:$0xf] %v435_v63  ;;  %v563_v63 = vld [vmem:[%s5002_s28 + $0x5f8] sm:$0xf] }
  0x94   : > { %438 = vst [vmem:[%s5006_s29 + $0x200] sm:$0xf] %v437_v0  ;;  %v565_v0 = vld [vmem:[%s5002_s28 + $0x600] sm:$0xf] }
  0x95   : > { %440 = vst [vmem:[%s5006_s29 + $0x204] sm:$0xf] %v439_v1  ;;  %v567_v1 = vld [vmem:[%s5002_s28 + $0x608] sm:$0xf] }
  0x96   : > { %442 = vst [vmem:[%s5006_s29 + $0x208] sm:$0xf] %v441_v2  ;;  %v569_v2 = vld [vmem:[%s5002_s28 + $0x610] sm:$0xf] }
  0x97   : > { %444 = vst [vmem:[%s5006_s29 + $0x20c] sm:$0xf] %v443_v3  ;;  %v571_v3 = vld [vmem:[%s5002_s28 + $0x618] sm:$0xf] }
  0x98   : > { %446 = vst [vmem:[%s5006_s29 + $0x210] sm:$0xf] %v445_v4  ;;  %v573_v4 = vld [vmem:[%s5002_s28 + $0x620] sm:$0xf] }
  0x99   : > { %448 = vst [vmem:[%s5006_s29 + $0x214] sm:$0xf] %v447_v5  ;;  %v575_v5 = vld [vmem:[%s5002_s28 + $0x628] sm:$0xf] }
  0x9a   : > { %450 = vst [vmem:[%s5006_s29 + $0x218] sm:$0xf] %v449_v6  ;;  %v577_v6 = vld [vmem:[%s5002_s28 + $0x630] sm:$0xf] }
  0x9b   : > { %452 = vst [vmem:[%s5006_s29 + $0x21c] sm:$0xf] %v451_v7  ;;  %v579_v7 = vld [vmem:[%s5002_s28 + $0x638] sm:$0xf] }
  0x9c   : > { %454 = vst [vmem:[%s5006_s29 + $0x220] sm:$0xf] %v453_v8  ;;  %v581_v8 = vld [vmem:[%s5002_s28 + $0x640] sm:$0xf] }
  0x9d   : > { %456 = vst [vmem:[%s5006_s29 + $0x224] sm:$0xf] %v455_v9  ;;  %v583_v9 = vld [vmem:[%s5002_s28 + $0x648] sm:$0xf] }
  0x9e   : > { %458 = vst [vmem:[%s5006_s29 + $0x228] sm:$0xf] %v457_v10  ;;  %v585_v10 = vld [vmem:[%s5002_s28 + $0x650] sm:$0xf] }
  0x9f   : > { %460 = vst [vmem:[%s5006_s29 + $0x22c] sm:$0xf] %v459_v11  ;;  %v587_v11 = vld [vmem:[%s5002_s28 + $0x658] sm:$0xf] }
  0xa0   : > { %462 = vst [vmem:[%s5006_s29 + $0x230] sm:$0xf] %v461_v12  ;;  %v589_v12 = vld [vmem:[%s5002_s28 + $0x660] sm:$0xf] }
  0xa1   : > { %464 = vst [vmem:[%s5006_s29 + $0x234] sm:$0xf] %v463_v13  ;;  %v591_v13 = vld [vmem:[%s5002_s28 + $0x668] sm:$0xf] }
  0xa2   : > { %466 = vst [vmem:[%s5006_s29 + $0x238] sm:$0xf] %v465_v14  ;;  %v593_v14 = vld [vmem:[%s5002_s28 + $0x670] sm:$0xf] }
  0xa3   : > { %468 = vst [vmem:[%s5006_s29 + $0x23c] sm:$0xf] %v467_v15  ;;  %v595_v15 = vld [vmem:[%s5002_s28 + $0x678] sm:$0xf] }
  0xa4   : > { %470 = vst [vmem:[%s5006_s29 + $0x240] sm:$0xf] %v469_v16  ;;  %v597_v16 = vld [vmem:[%s5002_s28 + $0x680] sm:$0xf] }
  0xa5   : > { %472 = vst [vmem:[%s5006_s29 + $0x244] sm:$0xf] %v471_v17  ;;  %v599_v17 = vld [vmem:[%s5002_s28 + $0x688] sm:$0xf] }
  0xa6   : > { %474 = vst [vmem:[%s5006_s29 + $0x248] sm:$0xf] %v473_v18  ;;  %v601_v18 = vld [vmem:[%s5002_s28 + $0x690] sm:$0xf] }
  0xa7   : > { %476 = vst [vmem:[%s5006_s29 + $0x24c] sm:$0xf] %v475_v19  ;;  %v603_v19 = vld [vmem:[%s5002_s28 + $0x698] sm:$0xf] }
  0xa8   : > { %478 = vst [vmem:[%s5006_s29 + $0x250] sm:$0xf] %v477_v20  ;;  %v605_v20 = vld [vmem:[%s5002_s28 + $0x6a0] sm:$0xf] }
  0xa9   : > { %480 = vst [vmem:[%s5006_s29 + $0x254] sm:$0xf] %v479_v21  ;;  %v607_v21 = vld [vmem:[%s5002_s28 + $0x6a8] sm:$0xf] }
  0xaa   : > { %482 = vst [vmem:[%s5006_s29 + $0x258] sm:$0xf] %v481_v22  ;;  %v609_v22 = vld [vmem:[%s5002_s28 + $0x6b0] sm:$0xf] }
  0xab   : > { %484 = vst [vmem:[%s5006_s29 + $0x25c] sm:$0xf] %v483_v23  ;;  %v611_v23 = vld [vmem:[%s5002_s28 + $0x6b8] sm:$0xf] }
  0xac   : > { %486 = vst [vmem:[%s5006_s29 + $0x260] sm:$0xf] %v485_v24  ;;  %v613_v24 = vld [vmem:[%s5002_s28 + $0x6c0] sm:$0xf] }
  0xad   : > { %488 = vst [vmem:[%s5006_s29 + $0x264] sm:$0xf] %v487_v25  ;;  %v615_v25 = vld [vmem:[%s5002_s28 + $0x6c8] sm:$0xf] }
  0xae   : > { %490 = vst [vmem:[%s5006_s29 + $0x268] sm:$0xf] %v489_v26  ;;  %v617_v26 = vld [vmem:[%s5002_s28 + $0x6d0] sm:$0xf] }
  0xaf   : > { %492 = vst [vmem:[%s5006_s29 + $0x26c] sm:$0xf] %v491_v27  ;;  %v619_v27 = vld [vmem:[%s5002_s28 + $0x6d8] sm:$0xf] }
  0xb0   : > { %494 = vst [vmem:[%s5006_s29 + $0x270] sm:$0xf] %v493_v28  ;;  %v621_v28 = vld [vmem:[%s5002_s28 + $0x6e0] sm:$0xf] }
  0xb1   : > { %496 = vst [vmem:[%s5006_s29 + $0x274] sm:$0xf] %v495_v29  ;;  %v623_v29 = vld [vmem:[%s5002_s28 + $0x6e8] sm:$0xf] }
  0xb2   : > { %498 = vst [vmem:[%s5006_s29 + $0x278] sm:$0xf] %v497_v30  ;;  %v625_v30 = vld [vmem:[%s5002_s28 + $0x6f0] sm:$0xf] }
  0xb3   : > { %500 = vst [vmem:[%s5006_s29 + $0x27c] sm:$0xf] %v499_v31  ;;  %v627_v31 = vld [vmem:[%s5002_s28 + $0x6f8] sm:$0xf] }
  0xb4   : > { %502 = vst [vmem:[%s5006_s29 + $0x280] sm:$0xf] %v501_v32  ;;  %v629_v32 = vld [vmem:[%s5002_s28 + $0x700] sm:$0xf] }
  0xb5   : > { %504 = vst [vmem:[%s5006_s29 + $0x284] sm:$0xf] %v503_v33  ;;  %v631_v33 = vld [vmem:[%s5002_s28 + $0x708] sm:$0xf] }
  0xb6   : > { %506 = vst [vmem:[%s5006_s29 + $0x288] sm:$0xf] %v505_v34  ;;  %v633_v34 = vld [vmem:[%s5002_s28 + $0x710] sm:$0xf] }
  0xb7   : > { %508 = vst [vmem:[%s5006_s29 + $0x28c] sm:$0xf] %v507_v35  ;;  %v635_v35 = vld [vmem:[%s5002_s28 + $0x718] sm:$0xf] }
  0xb8   : > { %510 = vst [vmem:[%s5006_s29 + $0x290] sm:$0xf] %v509_v36  ;;  %v637_v36 = vld [vmem:[%s5002_s28 + $0x720] sm:$0xf] }
  0xb9   : > { %512 = vst [vmem:[%s5006_s29 + $0x294] sm:$0xf] %v511_v37  ;;  %v639_v37 = vld [vmem:[%s5002_s28 + $0x728] sm:$0xf] }
  0xba   : > { %514 = vst [vmem:[%s5006_s29 + $0x298] sm:$0xf] %v513_v38  ;;  %v641_v38 = vld [vmem:[%s5002_s28 + $0x730] sm:$0xf] }
  0xbb   : > { %516 = vst [vmem:[%s5006_s29 + $0x29c] sm:$0xf] %v515_v39  ;;  %v643_v39 = vld [vmem:[%s5002_s28 + $0x738] sm:$0xf] }
  0xbc   : > { %518 = vst [vmem:[%s5006_s29 + $0x2a0] sm:$0xf] %v517_v40  ;;  %v645_v40 = vld [vmem:[%s5002_s28 + $0x740] sm:$0xf] }
  0xbd   : > { %520 = vst [vmem:[%s5006_s29 + $0x2a4] sm:$0xf] %v519_v41  ;;  %v647_v41 = vld [vmem:[%s5002_s28 + $0x748] sm:$0xf] }
  0xbe   : > { %522 = vst [vmem:[%s5006_s29 + $0x2a8] sm:$0xf] %v521_v42  ;;  %v649_v42 = vld [vmem:[%s5002_s28 + $0x750] sm:$0xf] }
  0xbf   : > { %524 = vst [vmem:[%s5006_s29 + $0x2ac] sm:$0xf] %v523_v43  ;;  %v651_v43 = vld [vmem:[%s5002_s28 + $0x758] sm:$0xf] }
  0xc0   : > { %526 = vst [vmem:[%s5006_s29 + $0x2b0] sm:$0xf] %v525_v44  ;;  %v653_v44 = vld [vmem:[%s5002_s28 + $0x760] sm:$0xf] }
  0xc1   : > { %528 = vst [vmem:[%s5006_s29 + $0x2b4] sm:$0xf] %v527_v45  ;;  %v655_v45 = vld [vmem:[%s5002_s28 + $0x768] sm:$0xf] }
  0xc2   : > { %530 = vst [vmem:[%s5006_s29 + $0x2b8] sm:$0xf] %v529_v46  ;;  %v657_v46 = vld [vmem:[%s5002_s28 + $0x770] sm:$0xf] }
  0xc3   : > { %532 = vst [vmem:[%s5006_s29 + $0x2bc] sm:$0xf] %v531_v47  ;;  %v659_v47 = vld [vmem:[%s5002_s28 + $0x778] sm:$0xf] }
  0xc4   : > { %534 = vst [vmem:[%s5006_s29 + $0x2c0] sm:$0xf] %v533_v48  ;;  %v661_v48 = vld [vmem:[%s5002_s28 + $0x780] sm:$0xf] }
  0xc5   : > { %536 = vst [vmem:[%s5006_s29 + $0x2c4] sm:$0xf] %v535_v49  ;;  %v663_v49 = vld [vmem:[%s5002_s28 + $0x788] sm:$0xf] }
  0xc6   : > { %538 = vst [vmem:[%s5006_s29 + $0x2c8] sm:$0xf] %v537_v50  ;;  %v665_v50 = vld [vmem:[%s5002_s28 + $0x790] sm:$0xf] }
  0xc7   : > { %540 = vst [vmem:[%s5006_s29 + $0x2cc] sm:$0xf] %v539_v51  ;;  %v667_v51 = vld [vmem:[%s5002_s28 + $0x798] sm:$0xf] }
  0xc8   : > { %542 = vst [vmem:[%s5006_s29 + $0x2d0] sm:$0xf] %v541_v52  ;;  %v669_v52 = vld [vmem:[%s5002_s28 + $0x7a0] sm:$0xf] }
  0xc9   : > { %544 = vst [vmem:[%s5006_s29 + $0x2d4] sm:$0xf] %v543_v53  ;;  %v671_v53 = vld [vmem:[%s5002_s28 + $0x7a8] sm:$0xf] }
  0xca   : > { %546 = vst [vmem:[%s5006_s29 + $0x2d8] sm:$0xf] %v545_v54  ;;  %v673_v54 = vld [vmem:[%s5002_s28 + $0x7b0] sm:$0xf] }
  0xcb   : > { %548 = vst [vmem:[%s5006_s29 + $0x2dc] sm:$0xf] %v547_v55  ;;  %v675_v55 = vld [vmem:[%s5002_s28 + $0x7b8] sm:$0xf] }
  0xcc   : > { %550 = vst [vmem:[%s5006_s29 + $0x2e0] sm:$0xf] %v549_v56  ;;  %v677_v56 = vld [vmem:[%s5002_s28 + $0x7c0] sm:$0xf] }
  0xcd   : > { %552 = vst [vmem:[%s5006_s29 + $0x2e4] sm:$0xf] %v551_v57  ;;  %v679_v57 = vld [vmem:[%s5002_s28 + $0x7c8] sm:$0xf] }
  0xce   : > { %554 = vst [vmem:[%s5006_s29 + $0x2e8] sm:$0xf] %v553_v58  ;;  %v681_v58 = vld [vmem:[%s5002_s28 + $0x7d0] sm:$0xf] }
  0xcf   : > { %556 = vst [vmem:[%s5006_s29 + $0x2ec] sm:$0xf] %v555_v59  ;;  %v683_v59 = vld [vmem:[%s5002_s28 + $0x7d8] sm:$0xf] }
  0xd0   : > { %558 = vst [vmem:[%s5006_s29 + $0x2f0] sm:$0xf] %v557_v60  ;;  %v685_v60 = vld [vmem:[%s5002_s28 + $0x7e0] sm:$0xf] }
  0xd1   : > { %560 = vst [vmem:[%s5006_s29 + $0x2f4] sm:$0xf] %v559_v61  ;;  %v687_v61 = vld [vmem:[%s5002_s28 + $0x7e8] sm:$0xf] }
  0xd2   : > { %562 = vst [vmem:[%s5006_s29 + $0x2f8] sm:$0xf] %v561_v62  ;;  %v689_v62 = vld [vmem:[%s5002_s28 + $0x7f0] sm:$0xf] }
  0xd3   : > { %564 = vst [vmem:[%s5006_s29 + $0x2fc] sm:$0xf] %v563_v63  ;;  %v691_v63 = vld [vmem:[%s5002_s28 + $0x7f8] sm:$0xf] }
  0xd4   : > { %566 = vst [vmem:[%s5006_s29 + $0x300] sm:$0xf] %v565_v0 }
  0xd5   : > { %568 = vst [vmem:[%s5006_s29 + $0x304] sm:$0xf] %v567_v1 }
  0xd6   : > { %570 = vst [vmem:[%s5006_s29 + $0x308] sm:$0xf] %v569_v2 }
  0xd7   : > { %572 = vst [vmem:[%s5006_s29 + $0x30c] sm:$0xf] %v571_v3 }
  0xd8   : > { %574 = vst [vmem:[%s5006_s29 + $0x310] sm:$0xf] %v573_v4 }
  0xd9   : > { %576 = vst [vmem:[%s5006_s29 + $0x314] sm:$0xf] %v575_v5 }
  0xda   : > { %578 = vst [vmem:[%s5006_s29 + $0x318] sm:$0xf] %v577_v6 }
  0xdb   : > { %580 = vst [vmem:[%s5006_s29 + $0x31c] sm:$0xf] %v579_v7 }
  0xdc   : > { %582 = vst [vmem:[%s5006_s29 + $0x320] sm:$0xf] %v581_v8 }
  0xdd   : > { %584 = vst [vmem:[%s5006_s29 + $0x324] sm:$0xf] %v583_v9 }
  0xde   : > { %586 = vst [vmem:[%s5006_s29 + $0x328] sm:$0xf] %v585_v10 }
  0xdf   : > { %588 = vst [vmem:[%s5006_s29 + $0x32c] sm:$0xf] %v587_v11 }
  0xe0   : > { %590 = vst [vmem:[%s5006_s29 + $0x330] sm:$0xf] %v589_v12 }
  0xe1   : > { %592 = vst [vmem:[%s5006_s29 + $0x334] sm:$0xf] %v591_v13 }
  0xe2   : > { %594 = vst [vmem:[%s5006_s29 + $0x338] sm:$0xf] %v593_v14 }
  0xe3   : > { %596 = vst [vmem:[%s5006_s29 + $0x33c] sm:$0xf] %v595_v15 }
  0xe4   : > { %598 = vst [vmem:[%s5006_s29 + $0x340] sm:$0xf] %v597_v16 }
  0xe5   : > { %600 = vst [vmem:[%s5006_s29 + $0x344] sm:$0xf] %v599_v17 }
  0xe6   : > { %602 = vst [vmem:[%s5006_s29 + $0x348] sm:$0xf] %v601_v18 }
  0xe7   : > { %604 = vst [vmem:[%s5006_s29 + $0x34c] sm:$0xf] %v603_v19 }
  0xe8   : > { %606 = vst [vmem:[%s5006_s29 + $0x350] sm:$0xf] %v605_v20 }
  0xe9   : > { %608 = vst [vmem:[%s5006_s29 + $0x354] sm:$0xf] %v607_v21 }
  0xea   : > { %610 = vst [vmem:[%s5006_s29 + $0x358] sm:$0xf] %v609_v22 }
  0xeb   : > { %612 = vst [vmem:[%s5006_s29 + $0x35c] sm:$0xf] %v611_v23 }
  0xec   : > { %614 = vst [vmem:[%s5006_s29 + $0x360] sm:$0xf] %v613_v24 }
  0xed   : > { %616 = vst [vmem:[%s5006_s29 + $0x364] sm:$0xf] %v615_v25 }
  0xee   : > { %618 = vst [vmem:[%s5006_s29 + $0x368] sm:$0xf] %v617_v26 }
  0xef   : > { %620 = vst [vmem:[%s5006_s29 + $0x36c] sm:$0xf] %v619_v27 }
  0xf0   : > { %622 = vst [vmem:[%s5006_s29 + $0x370] sm:$0xf] %v621_v28 }
  0xf1   : > { %624 = vst [vmem:[%s5006_s29 + $0x374] sm:$0xf] %v623_v29 }
  0xf2   : > { %626 = vst [vmem:[%s5006_s29 + $0x378] sm:$0xf] %v625_v30 }
  0xf3   : > { %628 = vst [vmem:[%s5006_s29 + $0x37c] sm:$0xf] %v627_v31 }
  0xf4   : > { %630 = vst [vmem:[%s5006_s29 + $0x380] sm:$0xf] %v629_v32 }
  0xf5   : > { %632 = vst [vmem:[%s5006_s29 + $0x384] sm:$0xf] %v631_v33 }
  0xf6   : > { %634 = vst [vmem:[%s5006_s29 + $0x388] sm:$0xf] %v633_v34 }
  0xf7   : > { %636 = vst [vmem:[%s5006_s29 + $0x38c] sm:$0xf] %v635_v35 }
  0xf8   : > { %638 = vst [vmem:[%s5006_s29 + $0x390] sm:$0xf] %v637_v36 }
  0xf9   : > { %640 = vst [vmem:[%s5006_s29 + $0x394] sm:$0xf] %v639_v37 }
  0xfa   : > { %642 = vst [vmem:[%s5006_s29 + $0x398] sm:$0xf] %v641_v38 }
  0xfb   : > { %644 = vst [vmem:[%s5006_s29 + $0x39c] sm:$0xf] %v643_v39 }
  0xfc   : > { %646 = vst [vmem:[%s5006_s29 + $0x3a0] sm:$0xf] %v645_v40 }
  0xfd   : > { %648 = vst [vmem:[%s5006_s29 + $0x3a4] sm:$0xf] %v647_v41 }
  0xfe   : > { %650 = vst [vmem:[%s5006_s29 + $0x3a8] sm:$0xf] %v649_v42 }
  0xff   : > { %652 = vst [vmem:[%s5006_s29 + $0x3ac] sm:$0xf] %v651_v43 }
 0x100   : > { %654 = vst [vmem:[%s5006_s29 + $0x3b0] sm:$0xf] %v653_v44 }
 0x101   : > { %656 = vst [vmem:[%s5006_s29 + $0x3b4] sm:$0xf] %v655_v45 }
 0x102   : > { %658 = vst [vmem:[%s5006_s29 + $0x3b8] sm:$0xf] %v657_v46 }
 0x103   : > { %660 = vst [vmem:[%s5006_s29 + $0x3bc] sm:$0xf] %v659_v47 }
 0x104   : > { %662 = vst [vmem:[%s5006_s29 + $0x3c0] sm:$0xf] %v661_v48 }
 0x105   : > { %664 = vst [vmem:[%s5006_s29 + $0x3c4] sm:$0xf] %v663_v49 }
 0x106   : > { %666 = vst [vmem:[%s5006_s29 + $0x3c8] sm:$0xf] %v665_v50 }
 0x107   : > { %668 = vst [vmem:[%s5006_s29 + $0x3cc] sm:$0xf] %v667_v51 }
 0x108   : > { %670 = vst [vmem:[%s5006_s29 + $0x3d0] sm:$0xf] %v669_v52 }
 0x109   : > { %672 = vst [vmem:[%s5006_s29 + $0x3d4] sm:$0xf] %v671_v53 }
 0x10a   : > { %674 = vst [vmem:[%s5006_s29 + $0x3d8] sm:$0xf] %v673_v54 }
 0x10b   : > { %676 = vst [vmem:[%s5006_s29 + $0x3dc] sm:$0xf] %v675_v55 }
 0x10c   : > { %678 = vst [vmem:[%s5006_s29 + $0x3e0] sm:$0xf] %v677_v56 }
 0x10d   : > { %680 = vst [vmem:[%s5006_s29 + $0x3e4] sm:$0xf] %v679_v57 }
 0x10e   : > { %682 = vst [vmem:[%s5006_s29 + $0x3e8] sm:$0xf] %v681_v58 }
 0x10f   : > { %684 = vst [vmem:[%s5006_s29 + $0x3ec] sm:$0xf] %v683_v59 }
 0x110   : > { %686 = vst [vmem:[%s5006_s29 + $0x3f0] sm:$0xf] %v685_v60 }
 0x111   : > { %688 = vst [vmem:[%s5006_s29 + $0x3f4] sm:$0xf] %v687_v61 }
 0x112   : > { %690 = vst [vmem:[%s5006_s29 + $0x3f8] sm:$0xf] %v689_v62 }
 0x113   : > { %692 = vst [vmem:[%s5006_s29 + $0x3fc] sm:$0xf] %v691_v63 }
 0x114 PF: > { %p4035_p8 = scmp.ge.s32.totalorder %s4932_s16, 1  ;;  %p2283_p9 = scmp.lt.s32.totalorder %s4932_s16, 3 }
 0x116   : > { %p2284_p10 = pnand %p4035_p8, %p2283_p9 }
 0x117   : > { %s2290_s30 = sand.u32 (!%p2284_p10), 1, %s4916_s12   ;;  %p2328_p11 = scmp.lt.s32.totalorder (!%p2284_p10), %s4924_s14, 1 }
 0x118   : > { %2287 = sbr.rel (%p2284_p10) target bundleno = 587 (0x24b), region = 80  ;;  %s4036_s4 = sshll.u32 (!%p2284_p10), %s2290_s30, 10 }
 0x119   : > { %s5523_s5 = scalar_lea.vmem (!%p2284_p10), [#allocation2], %s4036_s4 }
 0x11d   : > { %v4721_v0 = vld [vmem:[%s5523_s5 + $0x38] sm:$0xff]  ;;  %v4720_v4 = vld [vmem:[%s5523_s5 + $0x30] sm:$0xff]  ;;  %v4719_v8 = vld [vmem:[%s5523_s5 + $0x28] sm:$0xff]  ;;  %s5553_s6 = scalar_select %p2328_p11, %s4924_s14, 1 }
 0x11e   : > { %v4729_v1 = vld [vmem:[%s5523_s5 + $0x78] sm:$0xff]  ;;  %3552 = vmatpush.bf16.msra.mxu0 %v4721_v0  ;;  %v4728_v5 = vld [vmem:[%s5523_s5 + $0x70] sm:$0xff]  ;;  %v4727_v9 = vld [vmem:[%s5523_s5 + $0x68] sm:$0xff]  ;;  %s4679_s12 = sshll.u32 (%p4989_p6), %s4924_s14, 2 }
 0x11f   : > { %v4737_v2 = vld [vmem:[%s5523_s5 + $0xb8] sm:$0xff]  ;;  %3571 = vmatpush.bf16.msra.mxu1 %v4729_v1  ;;  %v4736_v6 = vld [vmem:[%s5523_s5 + $0xb0] sm:$0xff]  ;;  %v4735_v10 = vld [vmem:[%s5523_s5 + $0xa8] sm:$0xff]  ;;  %s2330_s19 = scalar_lea.vmem %s5883_s2, %s5553_s6  ;;  %s4037_s6 = sshll.u32 %s2290_s30, 4 }
 0x120   : > { %v4745_v3 = vld [vmem:[%s5523_s5 + $0xf8] sm:$0xff]  ;;  %3590 = vmatpush.bf16.msra.mxu2 %v4737_v2  ;;  %v4744_v7 = vld [vmem:[%s5523_s5 + $0xf0] sm:$0xff]  ;;  %v4743_v11 = vld [vmem:[%s5523_s5 + $0xe8] sm:$0xff]  ;;  %s3875_s27 = scalar_lea.vmem (%p4989_p6), %s5884_s3, %s4679_s12 }
 0x121   : > { %3609 = vmatpush.bf16.msra.mxu3 %v4745_v3  ;;  %v4718_v12 = vld [vmem:[%s5523_s5 + $0x20] sm:$0xff]  ;;  %v4717_v16 = vld [vmem:[%s5523_s5 + $0x18] sm:$0xff]  ;;  %v4716_v20 = vld [vmem:[%s5523_s5 + $0x10] sm:$0xff] }
 0x122   : > { %3553 = vmatpush.bf16.msra.mxu0 %v4720_v4  ;;  %v4726_v13 = vld [vmem:[%s5523_s5 + $0x60] sm:$0xff]  ;;  %v4725_v17 = vld [vmem:[%s5523_s5 + $0x58] sm:$0xff]  ;;  %v4724_v21 = vld [vmem:[%s5523_s5 + $0x50] sm:$0xff] }
 0x123   : > { %3572 = vmatpush.bf16.msra.mxu1 %v4728_v5  ;;  %v4734_v14 = vld [vmem:[%s5523_s5 + $0xa0] sm:$0xff]  ;;  %v4733_v18 = vld [vmem:[%s5523_s5 + $0x98] sm:$0xff]  ;;  %v4732_v22 = vld [vmem:[%s5523_s5 + $0x90] sm:$0xff] }
 0x124   : > { %3591 = vmatpush.bf16.msra.mxu2 %v4736_v6  ;;  %v4742_v15 = vld [vmem:[%s5523_s5 + $0xe0] sm:$0xff]  ;;  %v4741_v19 = vld [vmem:[%s5523_s5 + $0xd8] sm:$0xff]  ;;  %v4740_v23 = vld [vmem:[%s5523_s5 + $0xd0] sm:$0xff] }
 0x125   : > { %3610 = vmatpush.bf16.msra.mxu3 %v4744_v7  ;;  %v4715_v24 = vld [vmem:[%s5523_s5 + $0x8] sm:$0xff]  ;;  %v4714_v28 = vld [vmem:[%s5523_s5] sm:$0xff]  ;;  %v4769_v40 = vld [vmem:[%s5523_s5 + $0x1b8] sm:$0xff] }
 0x126   : > { %3554 = vmatpush.bf16.msra.mxu0 %v4719_v8  ;;  %v4723_v25 = vld [vmem:[%s5523_s5 + $0x48] sm:$0xff]  ;;  %v4722_v29 = vld [vmem:[%s5523_s5 + $0x40] sm:$0xff]  ;;  %v4753_v41 = vld [vmem:[%s5523_s5 + $0x138] sm:$0xff] }
 0x127   : > { %3573 = vmatpush.bf16.msra.mxu1 %v4727_v9  ;;  %v4731_v26 = vld [vmem:[%s5523_s5 + $0x88] sm:$0xff]  ;;  %v4040_v30 = vld [vmem:[%s5881_s0] sm:$0xf]  ;;  %v4682_v34 = vld [vmem:[%s5881_s0 + $0x4] sm:$0xf] }
 0x128   : > { %3592 = vmatpush.bf16.msra.mxu2 %v4735_v10  ;;  %v4739_v27 = vld [vmem:[%s5523_s5 + $0xc8] sm:$0xff]  ;;  %v4690_v31 = vld [vmem:[%s5881_s0 + $0x3c] sm:$0xf0]  ;;  %v4042_v35 = vld [vmem:[%s5881_s0 + $0x40] sm:$0xf0] }
 0x129   : > { %3611 = vmatpush.bf16.msra.mxu3 %v4743_v11  ;;  %v4730_v32 = vld [vmem:[%s5523_s5 + $0x80] sm:$0xff]  ;;  %v4048_v36 = vld [vmem:[%s5881_s0 + $0x8] sm:$0xf]  ;;  %v4683_v38 = vld [vmem:[%s5881_s0 + $0xc] sm:$0xf]  ;;  %v4041_v42 = vor.u32 %v4690_v31, %v4040_v30  ;;  %v4045_v43 = vor.u32 %v4682_v34, %v4042_v35 }
 0x12a   : > { %3555 = vmatpush.bf16.msra.mxu0 %v4718_v12  ;;  %v4738_v33 = vld [vmem:[%s5523_s5 + $0xc0] sm:$0xff]  ;;  %v4691_v37 = vld [vmem:[%s5881_s0 + $0x44] sm:$0xf0]  ;;  %v4050_v39 = vld [vmem:[%s5881_s0 + $0x48] sm:$0xf0] }
 0x12b   : > { %3574 = vmatpush.bf16.msra.mxu1 %v4726_v13  ;;  %v4049_v44 = vor.u32 %v4691_v37, %v4048_v36  ;;  %v4053_v45 = vor.u32 %v4683_v38, %v4050_v39  ;;  %v4761_v46 = vld [vmem:[%s5523_s5 + $0x178] sm:$0xff]  ;;  %v4768_v48 = vld [vmem:[%s5523_s5 + $0x1b0] sm:$0xff]  ;;  %v4767_v52 = vld [vmem:[%s5523_s5 + $0x1a8] sm:$0xff] }
 0x12c   : > { %3593 = vmatpush.bf16.msra.mxu2 %v4734_v14  ;;  %v4777_v47 = vld [vmem:[%s5523_s5 + $0x1f8] sm:$0xff]  ;;  %v4752_v49 = vld [vmem:[%s5523_s5 + $0x130] sm:$0xff]  ;;  %v4751_v53 = vld [vmem:[%s5523_s5 + $0x128] sm:$0xff] }
 0x12d   : > { %3612 = vmatpush.bf16.msra.mxu3 %v4742_v15  ;;  %v4760_v50 = vld [vmem:[%s5523_s5 + $0x170] sm:$0xff]  ;;  %v4759_v54 = vld [vmem:[%s5523_s5 + $0x168] sm:$0xff]  ;;  %v4766_v56 = vld [vmem:[%s5523_s5 + $0x1a0] sm:$0xff] }
 0x12e   : > { %3556 = vmatpush.bf16.msra.mxu0 %v4717_v16  ;;  %v4776_v51 = vld [vmem:[%s5523_s5 + $0x1f0] sm:$0xff]  ;;  %v4775_v55 = vld [vmem:[%s5523_s5 + $0x1e8] sm:$0xff]  ;;  %v4750_v57 = vld [vmem:[%s5523_s5 + $0x120] sm:$0xff] }
 0x12f   : > { %3575 = vmatpush.bf16.msra.mxu1 %v4725_v17  ;;  %v4758_v58 = vld [vmem:[%s5523_s5 + $0x160] sm:$0xff]  ;;  %v4112_v0 = vld [vmem:[%s5881_s0 + $0x88] sm:$0xf]  ;;  %v4699_v2 = vld [vmem:[%s5881_s0 + $0x8c] sm:$0xf] }
 0x130   : > { %3594 = vmatpush.bf16.msra.mxu2 %v4733_v18  ;;  %v4774_v59 = vld [vmem:[%s5523_s5 + $0x1e0] sm:$0xff]  ;;  %v4707_v1 = vld [vmem:[%s5881_s0 + $0xc4] sm:$0xf0]  ;;  %v4114_v3 = vld [vmem:[%s5881_s0 + $0xc8] sm:$0xf0] }
 0x131   : > { %3613 = vmatpush.bf16.msra.mxu3 %v4741_v19  ;;  %v4104_v60 = vld [vmem:[%s5881_s0 + $0x80] sm:$0xf]  ;;  %v4698_v62 = vld [vmem:[%s5881_s0 + $0x84] sm:$0xf]  ;;  %v4765_v4 = vld [vmem:[%s5523_s5 + $0x198] sm:$0xff]  ;;  %v4113_v8 = vor.u32 %v4707_v1, %v4112_v0  ;;  %v4117_v9 = vor.u32 %v4699_v2, %v4114_v3 }
 0x132   : > { %3557 = vmatpush.bf16.msra.mxu0 %v4716_v20  ;;  %v4706_v61 = vld [vmem:[%s5881_s0 + $0xbc] sm:$0xf0]  ;;  %v4106_v63 = vld [vmem:[%s5881_s0 + $0xc0] sm:$0xf0]  ;;  %v4749_v5 = vld [vmem:[%s5523_s5 + $0x118] sm:$0xff] }
 0x133   : > { %3576 = vmatpush.bf16.msra.mxu1 %v4724_v21  ;;  %v4105_v6 = vor.u32 %v4706_v61, %v4104_v60  ;;  %v4109_v7 = vor.u32 %v4698_v62, %v4106_v63  ;;  %v4757_v10 = vld [vmem:[%s5523_s5 + $0x158] sm:$0xff]  ;;  %v4764_v12 = vld [vmem:[%s5523_s5 + $0x190] sm:$0xff]  ;;  %v4763_v16 = vld [vmem:[%s5523_s5 + $0x188] sm:$0xff] }
 0x134   : > { %3595 = vmatpush.bf16.msra.mxu2 %v4732_v22  ;;  %v4773_v11 = vld [vmem:[%s5523_s5 + $0x1d8] sm:$0xff]  ;;  %v4748_v13 = vld [vmem:[%s5523_s5 + $0x110] sm:$0xff]  ;;  %v4747_v17 = vld [vmem:[%s5523_s5 + $0x108] sm:$0xff] }
 0x135   : > { %3614 = vmatpush.bf16.msra.mxu3 %v4740_v23  ;;  %v4756_v14 = vld [vmem:[%s5523_s5 + $0x150] sm:$0xff]  ;;  %v4755_v18 = vld [vmem:[%s5523_s5 + $0x148] sm:$0xff]  ;;  %v4762_v20 = vld [vmem:[%s5523_s5 + $0x180] sm:$0xff] }
 0x136   : > { %3558 = vmatpush.bf16.msra.mxu0 %v4715_v24  ;;  %v4772_v15 = vld [vmem:[%s5523_s5 + $0x1d0] sm:$0xff]  ;;  %v4771_v19 = vld [vmem:[%s5523_s5 + $0x1c8] sm:$0xff]  ;;  %v4746_v21 = vld [vmem:[%s5523_s5 + $0x100] sm:$0xff] }
 0x137   : > { %3577 = vmatpush.bf16.msra.mxu1 %v4723_v25  ;;  %v4754_v22 = vld [vmem:[%s5523_s5 + $0x140] sm:$0xff]  ;;  %v4056_v24 = vld [vmem:[%s5881_s0 + $0x10] sm:$0xf]  ;;  %v4801_v25 = vld [vmem:[%s5523_s5 + $0x2b8] sm:$0xff] }
 0x138   : > { %3596 = vmatpush.bf16.msra.mxu2 %v4731_v26  ;;  %v4770_v23 = vld [vmem:[%s5523_s5 + $0x1c0] sm:$0xff]  ;;  %v4785_v26 = vld [vmem:[%s5523_s5 + $0x238] sm:$0xff]  ;;  %v4800_v37 = vld [vmem:[%s5523_s5 + $0x2b0] sm:$0xff] }
 0x139   : > { %3615 = vmatpush.bf16.msra.mxu3 %v4739_v27  ;;  %v4692_v27 = vld [vmem:[%s5881_s0 + $0x4c] sm:$0xf0]  ;;  %v4064_v30 = vld [vmem:[%s5881_s0 + $0x18] sm:$0xf]  ;;  %v4130_v61 = vld [vmem:[%s5881_s0 + $0xd8] sm:$0xf0] }
 0x13a   : > { %3559 = vmatpush.bf16.msra.mxu0 %v4714_v28  ;;  %v4684_v28 = vld [vmem:[%s5881_s0 + $0x14] sm:$0xf]  ;;  %v4693_v31 = vld [vmem:[%s5881_s0 + $0x54] sm:$0xf0]  ;;  %v4057_v36 = vor.u32 %v4692_v27, %v4056_v24  ;;  %v4074_v24 = vld [vmem:[%s5881_s0 + $0x60] sm:$0xf0] }
 0x13b   : > { %3578 = vmatpush.bf16.msra.mxu1 %v4722_v29  ;;  %v4058_v29 = vld [vmem:[%s5881_s0 + $0x50] sm:$0xf0]  ;;  %v4793_v34 = vld [vmem:[%s5523_s5 + $0x278] sm:$0xff]  ;;  %v4065_v39 = vor.u32 %v4693_v31, %v4064_v30  ;;  %v4687_v27 = vld [vmem:[%s5881_s0 + $0x2c] sm:$0xf] }
 0x13c   : > { %3597 = vmatpush.bf16.msra.mxu2 %v4730_v32  ;;  %v4685_v32 = vld [vmem:[%s5881_s0 + $0x1c] sm:$0xf]  ;;  %v4061_v38 = vor.u32 %v4684_v28, %v4058_v29  ;;  %v4796_v1 = vld [vmem:[%s5523_s5 + $0x290] sm:$0xff]  ;;  %v4082_v28 = vld [vmem:[%s5881_s0 + $0x68] sm:$0xf0] }
 0x13d   : > { %3616 = vmatpush.bf16.msra.mxu3 %v4738_v33  ;;  %3560 = vmatmul.bf16.vlgmr.msra.gmra.mxu0 %v4041_v42  ;;  %v4066_v33 = vld [vmem:[%s5881_s0 + $0x58] sm:$0xf0]  ;;  %v4792_v42 = vld [vmem:[%s5523_s5 + $0x270] sm:$0xff] }
 0x13e   : > { %3628 = vmatpush.bf16.msrb.mxu0 %v4753_v41  ;;  %3579 = vmatmul.bf16.vlgmr.msra.gmra.mxu1 %v4045_v43  ;;  %v4809_v35 = vld [vmem:[%s5523_s5 + $0x2f8] sm:$0xff]  ;;  %v4784_v41 = vld [vmem:[%s5523_s5 + $0x230] sm:$0xff] }
 0x13f   : > { %3598 = vmatmul.bf16.vlgmr.msra.gmra.mxu2 %v4049_v44  ;;  %3647 = vmatpush.bf16.msrb.mxu1 %v4761_v46  ;;  %v4808_v43 = vld [vmem:[%s5523_s5 + $0x2f0] sm:$0xff]  ;;  %v4799_v44 = vld [vmem:[%s5523_s5 + $0x2a8] sm:$0xff]  ;;  %v4781_v60 = vld [vmem:[%s5523_s5 + $0x218] sm:$0xff] }
 0x140   : > { %3666 = vmatpush.bf16.msrb.mxu2 %v4769_v40  ;;  %3617 = vmatmul.bf16.vlgmr.msra.gmra.mxu3 %v4053_v45  ;;  %v4069_v40 = vor.u32 %v4685_v32, %v4066_v33  ;;  %v4783_v45 = vld [vmem:[%s5523_s5 + $0x228] sm:$0xff]  ;;  %v4789_v62 = vld [vmem:[%s5523_s5 + $0x258] sm:$0xff]  ;;  %v4824_v30 = vld [vmem:[%s5523_s5 + $0x370] sm:$0xff]  ;;  %v4085_v33 = vor.u32 %v4687_v27, %v4082_v28 }
 0x141   : > { %3685 = vmatpush.bf16.msrb.mxu3 %v4777_v47  ;;  %v4791_v46 = vld [vmem:[%s5523_s5 + $0x268] sm:$0xff]  ;;  %v4805_v63 = vld [vmem:[%s5523_s5 + $0x2d8] sm:$0xff] }
 0x142   : > { %3629 = vmatpush.bf16.msrb.mxu0 %v4752_v49  ;;  %v4807_v47 = vld [vmem:[%s5523_s5 + $0x2e8] sm:$0xff]  ;;  %v4782_v49 = vld [vmem:[%s5523_s5 + $0x220] sm:$0xff]  ;;  %v4162_v27 = vld [vmem:[%s5881_s0 + $0xf8] sm:$0xf0] }
 0x143   : > { %3648 = vmatpush.bf16.msrb.mxu1 %v4760_v50  ;;  %v4790_v50 = vld [vmem:[%s5523_s5 + $0x260] sm:$0xff] }
 0x144   : > { %3667 = vmatpush.bf16.msrb.mxu2 %v4768_v48  ;;  %v4798_v48 = vld [vmem:[%s5523_s5 + $0x2a0] sm:$0xff] }
 0x145   : > { %3686 = vmatpush.bf16.msrb.mxu3 %v4776_v51  ;;  %v4806_v51 = vld [vmem:[%s5523_s5 + $0x2e0] sm:$0xff] }
 0x146   : > { %3630 = vmatpush.bf16.msrb.mxu0 %v4751_v53  ;;  %v4708_v53 = vld [vmem:[%s5881_s0 + $0xcc] sm:$0xf0] }
 0x147   : > { %3649 = vmatpush.bf16.msrb.mxu1 %v4759_v54  ;;  %v4797_v54 = vld [vmem:[%s5523_s5 + $0x298] sm:$0xff] }
 0x148   : > { %3668 = vmatpush.bf16.msrb.mxu2 %v4767_v52  ;;  %v4120_v52 = vld [vmem:[%s5881_s0 + $0x90] sm:$0xf] }
 0x149   : > { %3687 = vmatpush.bf16.msrb.mxu3 %v4775_v55  ;;  %v4700_v55 = vld [vmem:[%s5881_s0 + $0x94] sm:$0xf]  ;;  %v4121_v0 = vor.u32 %v4708_v53, %v4120_v52  ;;  %v4703_v52 = vld [vmem:[%s5881_s0 + $0xac] sm:$0xf]  ;;  %v4813_v53 = vld [vmem:[%s5523_s5 + $0x318] sm:$0xff] }
 0x14a   : > { %3631 = vmatpush.bf16.msrb.mxu0 %v4750_v57  ;;  %v4128_v57 = vld [vmem:[%s5881_s0 + $0x98] sm:$0xf] }
 0x14b   : > { %3650 = vmatpush.bf16.msrb.mxu1 %v4758_v58  ;;  %v4709_v58 = vld [vmem:[%s5881_s0 + $0xd4] sm:$0xf0] }
 0x14c   : > { %3669 = vmatpush.bf16.msrb.mxu2 %v4766_v56  ;;  %v4122_v56 = vld [vmem:[%s5881_s0 + $0xd0] sm:$0xf0]  ;;  %v4129_v3 = vor.u32 %v4709_v58, %v4128_v57 }
 0x14d   : > { %3688 = vmatpush.bf16.msrb.mxu3 %v4774_v59  ;;  %3565 = vmatmul.bf16.gmra.mxu0 %v4105_v6  ;;  %v4701_v59 = vld [vmem:[%s5881_s0 + $0x9c] sm:$0xf]  ;;  %v4125_v2 = vor.u32 %v4700_v55, %v4122_v56  ;;  %v4788_v6 = vld [vmem:[%s5523_s5 + $0x250] sm:$0xff] }
 0x14e   : > { %3632 = vmatpush.bf16.msrb.mxu0 %v4749_v5  ;;  %3584 = vmatmul.bf16.gmra.mxu1 %v4109_v7  ;;  %v4780_v5 = vld [vmem:[%s5523_s5 + $0x210] sm:$0xff]  ;;  %v4837_v55 = vld [vmem:[%s5523_s5 + $0x3d8] sm:$0xff] }
 0x14f   : > { %3603 = vmatmul.bf16.gmra.mxu2 %v4113_v8  ;;  %3651 = vmatpush.bf16.msrb.mxu1 %v4757_v10  ;;  %v4804_v7 = vld [vmem:[%s5523_s5 + $0x2d0] sm:$0xff]  ;;  %v4795_v8 = vld [vmem:[%s5523_s5 + $0x288] sm:$0xff] }
 0x150   : > { %3670 = vmatpush.bf16.msrb.mxu2 %v4765_v4  ;;  %3622 = vmatmul.bf16.gmra.mxu3 %v4117_v9  ;;  %v4133_v4 = vor.u32 %v4701_v59, %v4130_v61  ;;  %v4779_v9 = vld [vmem:[%s5523_s5 + $0x208] sm:$0xff]  ;;  %v4828_v56 = vld [vmem:[%s5523_s5 + $0x390] sm:$0xff] }
 0x151   : > { %3689 = vmatpush.bf16.msrb.mxu3 %v4773_v11  ;;  %v4787_v10 = vld [vmem:[%s5523_s5 + $0x248] sm:$0xff]  ;;  %v4820_v58 = vld [vmem:[%s5523_s5 + $0x350] sm:$0xff] }
 0x152   : > { %3633 = vmatpush.bf16.msrb.mxu0 %v4748_v13  ;;  %v4803_v11 = vld [vmem:[%s5523_s5 + $0x2c8] sm:$0xff]  ;;  %v4833_v13 = vld [vmem:[%s5523_s5 + $0x3b8] sm:$0xff] }
 0x153   : > { %3652 = vmatpush.bf16.msrb.mxu1 %v4756_v14  ;;  %v4778_v14 = vld [vmem:[%s5523_s5 + $0x200] sm:$0xff] }
 0x154   : > { %3671 = vmatpush.bf16.msrb.mxu2 %v4764_v12  ;;  %v4794_v12 = vld [vmem:[%s5523_s5 + $0x280] sm:$0xff] }
 0x155   : > { %3690 = vmatpush.bf16.msrb.mxu3 %v4772_v15  ;;  %v4786_v15 = vld [vmem:[%s5523_s5 + $0x240] sm:$0xff] }
 0x156   : > { %3634 = vmatpush.bf16.msrb.mxu0 %v4747_v17  ;;  %v4072_v17 = vld [vmem:[%s5881_s0 + $0x20] sm:$0xf] }
 0x157   : > { %3653 = vmatpush.bf16.msrb.mxu1 %v4755_v18  ;;  %v4694_v18 = vld [vmem:[%s5881_s0 + $0x5c] sm:$0xf0] }
 0x158   : > { %3672 = vmatpush.bf16.msrb.mxu2 %v4763_v16  ;;  %v4802_v16 = vld [vmem:[%s5523_s5 + $0x2c0] sm:$0xff]  ;;  %v4073_v29 = vor.u32 %v4694_v18, %v4072_v17 }
 0x159   : > { %3691 = vmatpush.bf16.msrb.mxu3 %v4771_v19  ;;  %v4817_v19 = vld [vmem:[%s5523_s5 + $0x338] sm:$0xff] }
 0x15a   : > { %3635 = vmatpush.bf16.msrb.mxu0 %v4746_v21  ;;  %v4686_v21 = vld [vmem:[%s5881_s0 + $0x24] sm:$0xf] }
 0x15b   : > { %3654 = vmatpush.bf16.msrb.mxu1 %v4754_v22  ;;  %v4841_v22 = vld [vmem:[%s5523_s5 + $0x3f8] sm:$0xff]  ;;  %v4077_v31 = vor.u32 %v4686_v21, %v4074_v24  ;;  %v4712_v21 = vld [vmem:[%s5881_s0 + $0xec] sm:$0xf0] }
 0x15c   : > { %3673 = vmatpush.bf16.msrb.mxu2 %v4762_v20  ;;  %v4825_v20 = vld [vmem:[%s5523_s5 + $0x378] sm:$0xff] }
 0x15d   : > { %3692 = vmatpush.bf16.msrb.mxu3 %v4770_v23  ;;  %3636 = vmatmul.bf16.vlgmr.msrb.gmra.mxu0 %v4057_v36  ;;  %v4832_v23 = vld [vmem:[%s5523_s5 + $0x3b0] sm:$0xff]  ;;  %v4831_v36 = vld [vmem:[%s5523_s5 + $0x3a8] sm:$0xff]  ;;  %v4160_v24 = vld [vmem:[%s5881_s0 + $0xb8] sm:$0xf] }
 0x15e   : > { %3704 = vmatpush.bf16.msra.mxu0 %v4785_v26  ;;  %3655 = vmatmul.bf16.vlgmr.msrb.gmra.mxu1 %v4061_v38  ;;  %v4695_v26 = vld [vmem:[%s5881_s0 + $0x64] sm:$0xf0] }
 0x15f   : > { %3723 = vmatpush.bf16.msra.mxu1 %v4793_v34  ;;  %3674 = vmatmul.bf16.vlgmr.msrb.gmra.mxu2 %v4065_v39  ;;  %v4816_v34 = vld [vmem:[%s5523_s5 + $0x330] sm:$0xff]  ;;  %v4815_v38 = vld [vmem:[%s5523_s5 + $0x328] sm:$0xff] }
 0x160   : > { %3742 = vmatpush.bf16.msra.mxu2 %v4801_v25  ;;  %3693 = vmatmul.bf16.vlgmr.msrb.gmra.mxu3 %v4069_v40  ;;  %v4080_v25 = vld [vmem:[%s5881_s0 + $0x28] sm:$0xf]  ;;  %v4830_v40 = vld [vmem:[%s5523_s5 + $0x3a0] sm:$0xff] }
 0x161   : > { %3761 = vmatpush.bf16.msra.mxu3 %v4809_v35  ;;  %v4081_v32 = vor.u32 %v4695_v26, %v4080_v25  ;;  %v4840_v35 = vld [vmem:[%s5523_s5 + $0x3f0] sm:$0xff]  ;;  %v4839_v39 = vld [vmem:[%s5523_s5 + $0x3e8] sm:$0xff]  ;;  %v4713_v25 = vld [vmem:[%s5881_s0 + $0xf4] sm:$0xf0] }
 0x162   : > { %3705 = vmatpush.bf16.msra.mxu0 %v4784_v41  ;;  %v4822_v41 = vld [vmem:[%s5523_s5 + $0x360] sm:$0xff]  ;;  %v4705_v26 = vld [vmem:[%s5881_s0 + $0xbc] sm:$0xf] }
 0x163   : > { %3724 = vmatpush.bf16.msra.mxu1 %v4792_v42  ;;  %v4814_v42 = vld [vmem:[%s5523_s5 + $0x320] sm:$0xff] }
 0x164   : > { %3743 = vmatpush.bf16.msra.mxu2 %v4800_v37  ;;  %v4823_v37 = vld [vmem:[%s5523_s5 + $0x368] sm:$0xff] }
 0x165   : > { %3762 = vmatpush.bf16.msra.mxu3 %v4808_v43  ;;  %v4838_v43 = vld [vmem:[%s5523_s5 + $0x3e0] sm:$0xff] }
 0x166   : > { %3706 = vmatpush.bf16.msra.mxu0 %v4783_v45  ;;  %v4136_v45 = vld [vmem:[%s5881_s0 + $0xa0] sm:$0xf] }
 0x167   : > { %3725 = vmatpush.bf16.msra.mxu1 %v4791_v46  ;;  %v4710_v46 = vld [vmem:[%s5881_s0 + $0xdc] sm:$0xf0] }
 0x168   : > { %3744 = vmatpush.bf16.msra.mxu2 %v4799_v44  ;;  %v4829_v44 = vld [vmem:[%s5523_s5 + $0x398] sm:$0xff]  ;;  %v4137_v57 = vor.u32 %v4710_v46, %v4136_v45 }
 0x169   : > { %3763 = vmatpush.bf16.msra.mxu3 %v4807_v47  ;;  %v4821_v47 = vld [vmem:[%s5523_s5 + $0x358] sm:$0xff] }
 0x16a   : > { %3707 = vmatpush.bf16.msra.mxu0 %v4782_v49  ;;  %v4138_v49 = vld [vmem:[%s5881_s0 + $0xe0] sm:$0xf0] }
 0x16b   : > { %3726 = vmatpush.bf16.msra.mxu1 %v4790_v50  ;;  %v4144_v50 = vld [vmem:[%s5881_s0 + $0xa8] sm:$0xf] }
 0x16c   : > { %3745 = vmatpush.bf16.msra.mxu2 %v4798_v48  ;;  %v4702_v48 = vld [vmem:[%s5881_s0 + $0xa4] sm:$0xf] }
 0x16d   : > { %3764 = vmatpush.bf16.msra.mxu3 %v4806_v51  ;;  %3641 = vmatmul.bf16.gmra.mxu0 %v4121_v0  ;;  %v4711_v51 = vld [vmem:[%s5881_s0 + $0xe4] sm:$0xf0]  ;;  %v4141_v59 = vor.u32 %v4702_v48, %v4138_v49 }
 0x16e   : > { %3708 = vmatpush.bf16.msra.mxu0 %v4781_v60  ;;  %3660 = vmatmul.bf16.gmra.mxu1 %v4125_v2  ;;  %v4145_v60 = vor.u32 %v4711_v51, %v4144_v50  ;;  %v4827_v0 = vld [vmem:[%s5523_s5 + $0x388] sm:$0xff] }
 0x16f   : > { %3727 = vmatpush.bf16.msra.mxu1 %v4789_v62  ;;  %3679 = vmatmul.bf16.gmra.mxu2 %v4129_v3  ;;  %v4812_v62 = vld [vmem:[%s5523_s5 + $0x310] sm:$0xff]  ;;  %v4811_v2 = vld [vmem:[%s5523_s5 + $0x308] sm:$0xff] }
 0x170   : > { %3746 = vmatpush.bf16.msra.mxu2 %v4797_v54  ;;  %3698 = vmatmul.bf16.gmra.mxu3 %v4133_v4  ;;  %v4146_v54 = vld [vmem:[%s5881_s0 + $0xe8] sm:$0xf0]  ;;  %v4826_v4 = vld [vmem:[%s5523_s5 + $0x380] sm:$0xff] }
 0x171   : > { %3765 = vmatpush.bf16.msra.mxu3 %v4805_v63  ;;  %v4149_v61 = vor.u32 %v4703_v52, %v4146_v54  ;;  %v4836_v63 = vld [vmem:[%s5523_s5 + $0x3d0] sm:$0xff]  ;;  %v4835_v3 = vld [vmem:[%s5523_s5 + $0x3c8] sm:$0xff] }
 0x172   : > { %3709 = vmatpush.bf16.msra.mxu0 %v4780_v5  ;;  %v4818_v5 = vld [vmem:[%s5523_s5 + $0x340] sm:$0xff] }
 0x173   : > { %3728 = vmatpush.bf16.msra.mxu1 %v4788_v6  ;;  %v4810_v6 = vld [vmem:[%s5523_s5 + $0x300] sm:$0xff] }
 0x174   : > { %3747 = vmatpush.bf16.msra.mxu2 %v4796_v1  ;;  %v4819_v1 = vld [vmem:[%s5523_s5 + $0x348] sm:$0xff] }
 0x175   : > { %3766 = vmatpush.bf16.msra.mxu3 %v4804_v7  ;;  %v4834_v7 = vld [vmem:[%s5523_s5 + $0x3c0] sm:$0xff] }
 0x176   : > { %3710 = vmatpush.bf16.msra.mxu0 %v4779_v9  ;;  %v4696_v9 = vld [vmem:[%s5881_s0 + $0x6c] sm:$0xf0] }
 0x177   : > { %3729 = vmatpush.bf16.msra.mxu1 %v4787_v10  ;;  %v4688_v10 = vld [vmem:[%s5881_s0 + $0x34] sm:$0xf] }
 0x178   : > { %3748 = vmatpush.bf16.msra.mxu2 %v4795_v8  ;;  %v4088_v8 = vld [vmem:[%s5881_s0 + $0x30] sm:$0xf] }
 0x179   : > { %3767 = vmatpush.bf16.msra.mxu3 %v4803_v11  ;;  %v4090_v11 = vld [vmem:[%s5881_s0 + $0x70] sm:$0xf0] }
 0x17a   : > { %3711 = vmatpush.bf16.msra.mxu0 %v4778_v14  ;;  %v4689_v14 = vld [vmem:[%s5881_s0 + $0x3c] sm:$0xf]  ;;  %v4093_v17 = vor.u32 %v4688_v10, %v4090_v11 }
 0x17b   : > { %3730 = vmatpush.bf16.msra.mxu1 %v4786_v15  ;;  %v4098_v15 = vld [vmem:[%s5881_s0 + $0x78] sm:$0xf0] }
 0x17c   : > { %3749 = vmatpush.bf16.msra.mxu2 %v4794_v12  ;;  %v4096_v12 = vld [vmem:[%s5881_s0 + $0x38] sm:$0xf] }
 0x17d   : > { %3768 = vmatpush.bf16.msra.mxu3 %v4802_v16  ;;  %3712 = vmatmul.bf16.vlgmr.msra.gmra.mxu0 %v4073_v29  ;;  %v4089_v16 = vor.u32 %v4696_v9, %v4088_v8 }
 0x17e   : > { %3780 = vmatpush.bf16.msrb.mxu0 %v4817_v19  ;;  %3731 = vmatmul.bf16.vlgmr.msra.gmra.mxu1 %v4077_v31  ;;  %v4101_v19 = vor.u32 %v4689_v14, %v4098_v15  ;;  %v4165_v31 = vor.u32 %v4705_v26, %v4162_v27 }
 0x17f   : > { %3799 = vmatpush.bf16.msrb.mxu1 %v4825_v20  ;;  %3750 = vmatmul.bf16.vlgmr.msra.gmra.mxu2 %v4081_v32  ;;  %v4152_v20 = vld [vmem:[%s5881_s0 + $0xb0] sm:$0xf]  ;;  %v4893_v32 = vld [vmem:[%s2330_s19] ss:$0 sm:$0xff]  ;;  %s2320_s19 = scalar_lea.vmem [#allocation3], %s4037_s6 }
 0x180   : > { %3818 = vmatpush.bf16.msrb.mxu2 %v4833_v13  ;;  %3769 = vmatmul.bf16.vlgmr.msra.gmra.mxu3 %v4085_v33  ;;  %v4697_v13 = vld [vmem:[%s5881_s0 + $0x74] sm:$0xf0]  ;;  %v4153_v28 = vor.u32 %v4712_v21, %v4152_v20 }
 0x181   : > { %3837 = vmatpush.bf16.msrb.mxu3 %v4841_v22  ;;  %v4097_v18 = vor.u32 %v4697_v13, %v4096_v12  ;;  %v4704_v22 = vld [vmem:[%s5881_s0 + $0xb4] sm:$0xf] }
 0x182   : > { %3781 = vmatpush.bf16.msrb.mxu0 %v4816_v34 }
 0x183   : > { %3800 = vmatpush.bf16.msrb.mxu1 %v4824_v30  ;;  %v4161_v30 = vor.u32 %v4713_v25, %v4160_v24 }
 0x184   : > { %3819 = vmatpush.bf16.msrb.mxu2 %v4832_v23  ;;  %v4154_v23 = vld [vmem:[%s5881_s0 + $0xf0] sm:$0xf0] }
 0x185   : > { %3838 = vmatpush.bf16.msrb.mxu3 %v4840_v35  ;;  %v4157_v29 = vor.u32 %v4704_v22, %v4154_v23 }
 0x186   : > { %3782 = vmatpush.bf16.msrb.mxu0 %v4815_v38 }
 0x187   : > { %3801 = vmatpush.bf16.msrb.mxu1 %v4823_v37 }
 0x188   : > { %3820 = vmatpush.bf16.msrb.mxu2 %v4831_v36 }
 0x189   : > { %3839 = vmatpush.bf16.msrb.mxu3 %v4839_v39 }
 0x18a   : > { %3783 = vmatpush.bf16.msrb.mxu0 %v4814_v42 }
 0x18b   : > { %3802 = vmatpush.bf16.msrb.mxu1 %v4822_v41 }
 0x18c   : > { %3821 = vmatpush.bf16.msrb.mxu2 %v4830_v40 }
 0x18d   : > { %3840 = vmatpush.bf16.msrb.mxu3 %v4838_v43  ;;  %3717 = vmatmul.bf16.gmra.mxu0 %v4137_v57 }
 0x18e   : > { %3784 = vmatpush.bf16.msrb.mxu0 %v4813_v53  ;;  %3736 = vmatmul.bf16.gmra.mxu1 %v4141_v59 }
 0x18f   : > { %3803 = vmatpush.bf16.msrb.mxu1 %v4821_v47  ;;  %3755 = vmatmul.bf16.gmra.mxu2 %v4145_v60 }
 0x190   : > { %3822 = vmatpush.bf16.msrb.mxu2 %v4829_v44  ;;  %3774 = vmatmul.bf16.gmra.mxu3 %v4149_v61 }
 0x191   : > { %3841 = vmatpush.bf16.msrb.mxu3 %v4837_v55 }
 0x192   : > { %3785 = vmatpush.bf16.msrb.mxu0 %v4812_v62 }
 0x193   : > { %3804 = vmatpush.bf16.msrb.mxu1 %v4820_v58 }
 0x194   : > { %3823 = vmatpush.bf16.msrb.mxu2 %v4828_v56 }
 0x195   : > { %3842 = vmatpush.bf16.msrb.mxu3 %v4836_v63 }
 0x196   : > { %3786 = vmatpush.bf16.msrb.mxu0 %v4811_v2 }
 0x197   : > { %3805 = vmatpush.bf16.msrb.mxu1 %v4819_v1 }
 0x198   : > { %3824 = vmatpush.bf16.msrb.mxu2 %v4827_v0 }
 0x199   : > { %3843 = vmatpush.bf16.msrb.mxu3 %v4835_v3 }
 0x19a   : > { %3787 = vmatpush.bf16.msrb.mxu0 %v4810_v6 }
 0x19b   : > { %3806 = vmatpush.bf16.msrb.mxu1 %v4818_v5 }
 0x19c   : > { %3825 = vmatpush.bf16.msrb.mxu2 %v4826_v4 }
 0x19d   : > { %3844 = vmatpush.bf16.msrb.mxu3 %v4834_v7  ;;  %3788 = vmatmul.bf16.vlgmr.msrb.gmra.mxu0 %v4089_v16 }
 0x19e   : > { %3807 = vmatmul.bf16.vlgmr.msrb.gmra.mxu1 %v4093_v17 }
 0x19f   : > { %3826 = vmatmul.bf16.vlgmr.msrb.gmra.mxu2 %v4097_v18 }
 0x1a0   : > { %3845 = vmatmul.bf16.vlgmr.msrb.gmra.mxu3 %v4101_v19 }
 0x1ad   : > { %3793 = vmatmul.bf16.gmra.mxu0 %v4153_v28 }
 0x1ae   : > { %3812 = vmatmul.bf16.gmra.mxu1 %v4157_v29 }
 0x1af   : > { %3831 = vmatmul.bf16.gmra.mxu2 %v4161_v30 }
 0x1b0   : > { %3850 = vmatmul.bf16.gmra.mxu3 %v4165_v31 }
 0x1ba   : > { %v3561_v33 = vpop.f32.mrf.mxu0 }
 0x1bb   : > { %v3580_v34 = vpop.f32.mrf.mxu1  ;;  %v3562_v35 = vadd.f32 %v4893_v32, %v3561_v33 }
 0x1bd   : > { %v3581_v36 = vadd.f32 %v3580_v34, %v3562_v35 }
 0x1c2   : > { %v3599_v37 = vpop.f32.mrf.mxu2  ;;  %v3563_v40 = vpop.f32.mrf.mxu0 }
 0x1c3   : > { %v3618_v38 = vpop.f32.mrf.mxu3  ;;  %v3600_v39 = vadd.f32 %v3599_v37, %v3581_v36  ;;  %v3582_v41 = vpop.f32.mrf.mxu1  ;;  %v3564_v42 = vadd.f32 %v4893_v32, %v3563_v40 }
 0x1c5   : > { %v3619_v43 = vadd.f32 %v3618_v38, %v3600_v39  ;;  %v3583_v44 = vadd.f32 %v3582_v41, %v3564_v42 }
 0x1ca   : > { %v3601_v45 = vpop.f32.mrf.mxu2  ;;  %v3566_v48 = vpop.f32.mrf.mxu0 }
 0x1cb   : > { %v3620_v46 = vpop.f32.mrf.mxu3  ;;  %v3602_v47 = vadd.f32 %v3601_v45, %v3583_v44  ;;  %v3585_v49 = vpop.f32.mrf.mxu1  ;;  %v3567_v50 = vadd.f32 %v4893_v32, %v3566_v48 }
 0x1cd   : > { %v3621_v51 = vadd.f32 %v3620_v46, %v3602_v47  ;;  %v3586_v52 = vadd.f32 %v3585_v49, %v3567_v50 }
 0x1d2   : > { %v3604_v53 = vpop.f32.mrf.mxu2  ;;  %v3568_v56 = vpop.f32.mrf.mxu0 }
 0x1d3   : > { %v3623_v54 = vpop.f32.mrf.mxu3  ;;  %v3605_v55 = vadd.f32 %v3604_v53, %v3586_v52  ;;  %v3587_v57 = vpop.f32.mrf.mxu1  ;;  %v3569_v58 = vadd.f32 %v4893_v32, %v3568_v56 }
 0x1d5   : > { %v3624_v59 = vadd.f32 %v3623_v54, %v3605_v55  ;;  %v3588_v60 = vadd.f32 %v3587_v57, %v3569_v58 }
 0x1da   : > { %v3606_v61 = vpop.f32.mrf.mxu2  ;;  %v3637_v0 = vpop.f32.mrf.mxu0 }
 0x1db   : > { %v3625_v62 = vpop.f32.mrf.mxu3  ;;  %v3607_v63 = vadd.f32 %v3606_v61, %v3588_v60  ;;  %v3656_v1 = vpop.f32.mrf.mxu1  ;;  %v3638_v24 = vadd.f32 %v3637_v0, %v3619_v43 }
 0x1dd   : > { %v3626_v2 = vadd.f32 %v3625_v62, %v3607_v63  ;;  %v3657_v29 = vadd.f32 %v3656_v1, %v3638_v24 }
 0x1e2   : > { %v3675_v3 = vpop.f32.mrf.mxu2  ;;  %v3639_v5 = vpop.f32.mrf.mxu0 }
 0x1e3   : > { %v3694_v4 = vpop.f32.mrf.mxu3  ;;  %v3658_v6 = vpop.f32.mrf.mxu1  ;;  %v3640_v28 = vadd.f32 %v3639_v5, %v3621_v51  ;;  %v3676_v30 = vadd.f32 %v3675_v3, %v3657_v29 }
 0x1e5   : > { %v3659_v31 = vadd.f32 %v3658_v6, %v3640_v28  ;;  %v3695_v37 = vadd.f32 %v3694_v4, %v3676_v30 }
 0x1ea   : > { %v3677_v7 = vpop.f32.mrf.mxu2  ;;  %v3642_v9 = vpop.f32.mrf.mxu0 }
 0x1eb   : > { %v3696_v8 = vpop.f32.mrf.mxu3  ;;  %v3661_v10 = vpop.f32.mrf.mxu1  ;;  %v3678_v33 = vadd.f32 %v3677_v7, %v3659_v31  ;;  %v3643_v42 = vadd.f32 %v3642_v9, %v3624_v59 }
 0x1ed   : > { %v3697_v38 = vadd.f32 %v3696_v8, %v3678_v33  ;;  %v3662_v50 = vadd.f32 %v3661_v10, %v3643_v42 }
 0x1f2   : > { %v3680_v11 = vpop.f32.mrf.mxu2  ;;  %v3644_v13 = vpop.f32.mrf.mxu0 }
 0x1f3   : > { %v3699_v12 = vpop.f32.mrf.mxu3  ;;  %v3663_v14 = vpop.f32.mrf.mxu1  ;;  %v3645_v47 = vadd.f32 %v3644_v13, %v3626_v2  ;;  %v3681_v52 = vadd.f32 %v3680_v11, %v3662_v50 }
 0x1f5   : > { %v3664_v53 = vadd.f32 %v3663_v14, %v3645_v47  ;;  %v3700_v62 = vadd.f32 %v3699_v12, %v3681_v52 }
 0x1fa   : > { %v3682_v15 = vpop.f32.mrf.mxu2  ;;  %v3713_v17 = vpop.f32.mrf.mxu0 }
 0x1fb   : > { %v3701_v16 = vpop.f32.mrf.mxu3  ;;  %v3732_v18 = vpop.f32.mrf.mxu1  ;;  %v3714_v39 = vadd.f32 %v3713_v17, %v3695_v37  ;;  %v3683_v56 = vadd.f32 %v3682_v15, %v3664_v53 }
 0x1fd   : > { %v3733_v44 = vadd.f32 %v3732_v18, %v3714_v39  ;;  %v3702_v0 = vadd.f32 %v3701_v16, %v3683_v56 }
 0x202   : > { %v3751_v19 = vpop.f32.mrf.mxu2  ;;  %v3715_v21 = vpop.f32.mrf.mxu0 }
 0x203   : > { %v3770_v20 = vpop.f32.mrf.mxu3  ;;  %v3734_v22 = vpop.f32.mrf.mxu1  ;;  %v3716_v40 = vadd.f32 %v3715_v21, %v3697_v38  ;;  %v3752_v48 = vadd.f32 %v3751_v19, %v3733_v44 }
 0x205   : > { %v3735_v49 = vadd.f32 %v3734_v22, %v3716_v40  ;;  %v3771_v54 = vadd.f32 %v3770_v20, %v3752_v48 }
 0x20a   : > { %v3753_v23 = vpop.f32.mrf.mxu2  ;;  %v3718_v26 = vpop.f32.mrf.mxu0 }
 0x20b   : > { %v3772_v25 = vpop.f32.mrf.mxu3  ;;  %v3737_v27 = vpop.f32.mrf.mxu1  ;;  %v3754_v51 = vadd.f32 %v3753_v23, %v3735_v49  ;;  %v3719_v1 = vadd.f32 %v3718_v26, %v3700_v62 }
 0x20d   : > { %v3773_v57 = vadd.f32 %v3772_v25, %v3754_v51  ;;  %v3738_v7 = vadd.f32 %v3737_v27, %v3719_v1 }
 0x212   : > { %v3756_v32 = vpop.f32.mrf.mxu2  ;;  %v3720_v35 = vpop.f32.mrf.mxu0 }
 0x213   : > { %v3775_v34 = vpop.f32.mrf.mxu3  ;;  %v3739_v36 = vpop.f32.mrf.mxu1  ;;  %v3721_v3 = vadd.f32 %v3720_v35, %v3702_v0  ;;  %v3757_v11 = vadd.f32 %v3756_v32, %v3738_v7 }
 0x215   : > { %v3740_v13 = vadd.f32 %v3739_v36, %v3721_v3  ;;  %v3776_v16 = vadd.f32 %v3775_v34, %v3757_v11 }
 0x21a   : > { %v3758_v41 = vpop.f32.mrf.mxu2  ;;  %v3789_v45 = vpop.f32.mrf.mxu0 }
 0x21b   : > { %v3777_v43 = vpop.f32.mrf.mxu3  ;;  %v3808_v46 = vpop.f32.mrf.mxu1  ;;  %v3790_v58 = vadd.f32 %v3789_v45, %v3771_v54  ;;  %v3759_v12 = vadd.f32 %v3758_v41, %v3740_v13 }
 0x21d   : > { %v3809_v2 = vadd.f32 %v3808_v46, %v3790_v58  ;;  %v3778_v20 = vadd.f32 %v3777_v43, %v3759_v12 }
 0x222   : > { %v3827_v55 = vpop.f32.mrf.mxu2  ;;  %v3791_v61 = vpop.f32.mrf.mxu0 }
 0x223   : > { %v3846_v60 = vpop.f32.mrf.mxu3  ;;  %v3810_v59 = vpop.f32.mrf.mxu1  ;;  %v3792_v63 = vadd.f32 %v3791_v61, %v3773_v57  ;;  %v3828_v4 = vadd.f32 %v3827_v55, %v3809_v2 }
 0x225   : > { %v3811_v5 = vadd.f32 %v3810_v59, %v3792_v63  ;;  %v3847_v14 = vadd.f32 %v3846_v60, %v3828_v4 }
 0x22a   : > { %v3829_v6 = vpop.f32.mrf.mxu2  ;;  %v3794_v10 = vpop.f32.mrf.mxu0 }
 0x22b   : > { %v3830_v8 = vadd.f32 %v3829_v6, %v3811_v5  ;;  %v3848_v9 = vpop.f32.mrf.mxu3  ;;  %v3813_v17 = vpop.f32.mrf.mxu1  ;;  %v3795_v21 = vadd.f32 %v3794_v10, %v3776_v16 }
 0x22d   : > { %v3849_v15 = vadd.f32 %v3848_v9, %v3830_v8  ;;  %v3814_v25 = vadd.f32 %v3813_v17, %v3795_v21 }
 0x22f   : > { %v4845_v18 = vpack.c.bf16 %v3849_v15, %v3847_v14 }
 0x231   : > { %4846 = vst [vmem:[%s2320_s19] sm:$0xff] %v4845_v18  }
 0x232   : > { %v3832_v19 = vpop.f32.mrf.mxu2  ;;  %v3796_v23 = vpop.f32.mrf.mxu0 }
 0x233   : > { %v3851_v22 = vpop.f32.mrf.mxu3  ;;  %v3797_v24 = vadd.f32 %v3796_v23, %v3778_v20  ;;  %v3815_v26 = vpop.f32.mrf.mxu1  ;;  %v3833_v27 = vadd.f32 %v3832_v19, %v3814_v25 }
 0x235   : > { %v3816_v28 = vadd.f32 %v3815_v26, %v3797_v24  ;;  %v3852_v32 = vadd.f32 %v3851_v22, %v3833_v27 }
 0x238   : > { %v3892_v34 = vld [vmem:[%s2320_s19] sm:$0xf] (%p4989_p6)  ;;  %v3894_v36 = vld [vmem:[%s2320_s19 + $0x4] sm:$0xf] (%p4989_p6) }
 0x239   : > { %3893 = vst [vmem:[%s3875_s27] sm:$0xf] (%p4989_p6), %v3892_v34 }
 0x23a   : > { %v3834_v29 = vpop.f32.mrf.mxu2  ;;  %3895 = vst [vmem:[%s3875_s27 + $0x8] sm:$0xf] (%p4989_p6), %v3894_v36 }
 0x23b   : > { %v3835_v30 = vadd.f32 %v3834_v29, %v3816_v28  ;;  %v3853_v31 = vpop.f32.mrf.mxu3 }
 0x23d   : > { %v3854_v33 = vadd.f32 %v3853_v31, %v3835_v30  ;;  %3870 = sbr.rel (!%p4989_p6) target bundleno = 587 (0x24b), region = 88 }
 0x23f   : > { %v4850_v35 = vpack.c.bf16 %v3854_v33, %v3852_v32 }
 0x241   : > { %4852 = vst [vmem:[%s2320_s19 + $0x8] sm:$0xff] %v4850_v35  }
 0x248   : > { %v3896_v37 = vld [vmem:[%s2320_s19 + $0x8] sm:$0xf]  ;;  %v3898_v38 = vld [vmem:[%s2320_s19 + $0xc] sm:$0xf] }
 0x249   : > { %3897 = vst [vmem:[%s3875_s27 + $0x10] sm:$0xf] %v3896_v37 }
 0x24a   : > { %3899 = vst [vmem:[%s3875_s27 + $0x18] sm:$0xf] %v3898_v38 }
 0x24b PF: > { %s13_s16 = sadd.s32 1, %s4932_s16   ;;  %s5886_s12 = smov %s4920_s13 }
 0x24c   : > { %p10_p12 = scmp.ge.s32.totalorder %s13_s16, 4   ;;  %s5887_s13 = smov %s4994_s22 }
 0x24d   : > { %s5888_s14 = smov %s4928_s15  ;;  %s5889_s15 = smov %s5891_s17 }
 0x24e   :  { %12 = sbr.rel (!%p10_p12) target bundleno = 3 (0x3), region = 170 }

// kernel: discriminator_forward.13
= control target key start
LH: loop header
LB: loop body
LE: loop exit
PB: predicated region body
PF: predicated region fallthrough
CT: control target
= control target key end

     0   :  { %s464_s9 = smov 0   ;;  %s563_s0 = inlined_call_operand.vmem [shape: bf16[2,9,512], index: 0, kind: input, shape index: {}]   ;;  %s564_s1 = inlined_call_operand.vmem [shape: f32[9,512], index: 1, kind: input, shape index: {}]   ;;  %s565_s2 = inlined_call_operand.vmem [shape: f32[2,1,128], index: 2, kind: output, shape index: {}]  }
   0x1 LB: > { %s409_s10 = sadd.s32 4294967295, %s446_s9   ;;  %p413_p0 = scmp.ge.s32.totalorder %s446_s9, 1  ;;  %s446_s9 = sphi %s464_s9, %s12_s9  }
   0x2   : > { %p112_p1 = scmp.lt.s32.totalorder %s446_s9, 3 }
   0x4   : > { %p113_p2 = pnand %p413_p0, %p112_p1 }
   0x5   : > { %p132_p3 = scmp.lt.s32.totalorder (!%p113_p2), %s409_s10, 1 }
   0x6   : > { %116 = sbr.rel (%p113_p2) target bundleno = 280 (0x118), region = 28 }
   0xb   : > { %v448_v0 = vmov 9.0   ;;  %s567_s10 = smov (!%p132_p3, %s409_s10), 1  ;;  %vm152_vm0 = vcmask 1040384  }
   0xc   : > { %430 = vrcp.f32 %v448_v0  ;;  %s418_s11 = sshll.u32 %s567_s10, 5  ;;  %s139_s5 = scalar_lea.vmem %s565_s2, %s567_s10 }
   0xd   : > { %s136_s14 = scalar_lea.vmem %s563_s0, %s418_s11 }
   0xe   : > { %v140_v1 = vld [vmem:[%s136_s14] sm:$0xff]  ;;  %v141_v2 = vld [vmem:[%s136_s14 + $0x8] sm:$0xff]  ;;  %v142_v3 = vld [vmem:[%s136_s14 + $0x10] sm:$0x11] }
   0xf   : > { %v143_v5 = vld [vmem:[%s136_s14 + $0x18] sm:$0x11]  ;;  %v144_v6 = vunpack.c.l.bf16 %v140_v1  ;;  %v145_v7 = vunpack.c.h.bf16 %v140_v1  ;;  %v146_v8 = vunpack.c.l.bf16 %v141_v2  ;;  %v147_v9 = vunpack.c.h.bf16 %v141_v2 }
  0x10   : > { %v148_v10 = vunpack.c.l.bf16 %v142_v3  ;;  %v149_v11 = vunpack.c.h.bf16 %v142_v3  ;;  %v150_v12 = vunpack.c.l.bf16 %v143_v5  ;;  %v151_v13 = vunpack.c.h.bf16 %v143_v5 }
  0x12   : > { %v431_v4 = vpop.eup %430  ;;  %v153_v15 = vsel %vm152_vm0, %v148_v10, 0.0  ;;  %v161_v16 = vsel %vm152_vm0, %v149_v11, 0.0  ;;  %v169_v17 = vsel %vm152_vm0, %v150_v12, 0.0  ;;  %v177_v18 = vsel %vm152_vm0, %v151_v13, 0.0 }
  0x13   : > { %v186_v14 = vmul.f32 9.0, %v431_v4  ;;  %v154_v19 = vadd.f32 %v153_v15, %v144_v6  ;;  %v162_v20 = vadd.f32 %v161_v16, %v145_v7  ;;  %v170_v21 = vadd.f32 %v169_v17, %v146_v8 }
  0x14   : > { %v178_v22 = vadd.f32 %v177_v18, %v147_v9  ;;  %vm190_vm1 = vweird.f32 %v431_v4 }
  0x15   : > { %v187_v23 = vsub.f32 1.0, %v186_v14  ;;  %v155_v24 = vrot.slane %v154_v19, 4  ;;  %v163_v25 = vrot.slane %v162_v20, 4  ;;  %v171_v26 = vrot.slane %v170_v21, 4 }
  0x16   : > { %v179_v27 = vrot.slane %v178_v22, 4 }
  0x17   : > { %v188_v28 = vmul.f32 %v431_v4, %v187_v23  ;;  %v156_v29 = vadd.f32 %v155_v24, %v154_v19  ;;  %v164_v30 = vadd.f32 %v163_v25, %v162_v20  ;;  %v172_v31 = vadd.f32 %v171_v26, %v170_v21 }
  0x18   : > { %v180_v32 = vadd.f32 %v179_v27, %v178_v22 }
  0x19   : > { %v157_v33 = vrot.slane %v156_v29, 2  ;;  %v165_v34 = vrot.slane %v164_v30, 2  ;;  %v173_v35 = vrot.slane %v172_v31, 2  ;;  %v189_v37 = vadd.f32 %v431_v4, %v188_v28 }
  0x1a   : > { %v181_v36 = vrot.slane %v180_v32, 2 }
  0x1b   : > { %v158_v38 = vadd.f32 %v157_v33, %v156_v29  ;;  %v166_v39 = vadd.f32 %v165_v34, %v164_v30  ;;  %v174_v40 = vadd.f32 %v173_v35, %v172_v31  ;;  %v191_v46 = vsel %vm190_vm1, %v431_v4, %v189_v37 }
  0x1c   : > { %v182_v41 = vadd.f32 %v181_v36, %v180_v32 }
  0x1d   : > { %v159_v42 = vrot.slane %v158_v38, 1  ;;  %v167_v43 = vrot.slane %v166_v39, 1  ;;  %v175_v44 = vrot.slane %v174_v40, 1 }
  0x1e   : > { %v183_v45 = vrot.slane %v182_v41, 1 }
  0x1f   : > { %v160_v47 = vadd.f32 %v159_v42, %v158_v38  ;;  %v168_v48 = vadd.f32 %v167_v43, %v166_v39  ;;  %v176_v49 = vadd.f32 %v175_v44, %v174_v40 }
  0x20   : > { %v184_v50 = vadd.f32 %v183_v45, %v182_v41 }
  0x21   : > { %v192_v51 = vmul.f32 %v191_v46, %v160_v47  ;;  %v193_v52 = vmul.f32 %v191_v46, %v168_v48  ;;  %v194_v53 = vmul.f32 %v191_v46, %v176_v49 }
  0x22   : > { %v195_v54 = vmul.f32 %v191_v46, %v184_v50 }
  0x23   : > { %v482_v55 = vsub.f32 %v144_v6, %v192_v51  ;;  %v484_v56 = vsub.f32 %v145_v7, %v193_v52  ;;  %v486_v57 = vsub.f32 %v146_v8, %v194_v53  ;;  %v490_v59 = vsub.f32 %v148_v10, %v192_v51 }
  0x24   : > { %v488_v58 = vsub.f32 %v147_v9, %v195_v54  ;;  %v492_v60 = vsub.f32 %v149_v11, %v193_v52  ;;  %v494_v61 = vsub.f32 %v150_v12, %v194_v53  ;;  %v496_v62 = vsub.f32 %v151_v13, %v195_v54 }
  0x25   : > { %v204_v63 = vmul.f32 %v482_v55, %v482_v55  ;;  %v205_v0 = vmul.f32 %v484_v56, %v484_v56  ;;  %v206_v1 = vmul.f32 %v486_v57, %v486_v57  ;;  %v208_v3 = vmul.f32 %v490_v59, %v490_v59 }
  0x26   : > { %v207_v2 = vmul.f32 %v488_v58, %v488_v58  ;;  %v209_v4 = vmul.f32 %v492_v60, %v492_v60  ;;  %v210_v5 = vmul.f32 %v494_v61, %v494_v61  ;;  %v211_v6 = vmul.f32 %v496_v62, %v496_v62 }
  0x27   : > { %v212_v7 = vsel %vm152_vm0, %v208_v3, 0.0 }
  0x28   : > { %v220_v8 = vsel %vm152_vm0, %v209_v4, 0.0  ;;  %v228_v9 = vsel %vm152_vm0, %v210_v5, 0.0  ;;  %v236_v10 = vsel %vm152_vm0, %v211_v6, 0.0  ;;  %v213_v11 = vadd.f32 %v212_v7, %v204_v63 }
  0x29   : > { %v221_v12 = vadd.f32 %v220_v8, %v205_v0  ;;  %v229_v13 = vadd.f32 %v228_v9, %v206_v1  ;;  %v237_v14 = vadd.f32 %v236_v10, %v207_v2 }
  0x2a   : > { %v214_v15 = vrot.slane %v213_v11, 4 }
  0x2b   : > { %v222_v16 = vrot.slane %v221_v12, 4  ;;  %v230_v17 = vrot.slane %v229_v13, 4  ;;  %v238_v18 = vrot.slane %v237_v14, 4 }
  0x2c   : > { %v215_v19 = vadd.f32 %v214_v15, %v213_v11 }
  0x2d   : > { %v223_v20 = vadd.f32 %v222_v16, %v221_v12  ;;  %v231_v21 = vadd.f32 %v230_v17, %v229_v13  ;;  %v239_v22 = vadd.f32 %v238_v18, %v237_v14 }
  0x2e   : > { %v216_v23 = vrot.slane %v215_v19, 2 }
  0x2f   : > { %v224_v24 = vrot.slane %v223_v20, 2  ;;  %v232_v25 = vrot.slane %v231_v21, 2  ;;  %v240_v26 = vrot.slane %v239_v22, 2 }
  0x30   : > { %v217_v27 = vadd.f32 %v216_v23, %v215_v19 }
  0x31   : > { %v225_v28 = vadd.f32 %v224_v24, %v223_v20  ;;  %v233_v29 = vadd.f32 %v232_v25, %v231_v21  ;;  %v241_v30 = vadd.f32 %v240_v26, %v239_v22 }
  0x32   : > { %v218_v31 = vrot.slane %v217_v27, 1 }
  0x33   : > { %v226_v32 = vrot.slane %v225_v28, 1  ;;  %v234_v33 = vrot.slane %v233_v29, 1  ;;  %v242_v34 = vrot.slane %v241_v30, 1 }
  0x34   : > { %v219_v35 = vadd.f32 %v218_v31, %v217_v27 }
  0x35   : > { %v227_v36 = vadd.f32 %v226_v32, %v225_v28  ;;  %v235_v37 = vadd.f32 %v234_v33, %v233_v29  ;;  %v243_v38 = vadd.f32 %v242_v34, %v241_v30  ;;  %v328_v32 = vld [vmem:[%s564_s1 + $0x20] sm:$0x1] }
  0x36   : > { %v244_v39 = vmul.f32 %v219_v35, %v191_v46  ;;  %v327_v35 = vld [vmem:[%s564_s1 + $0x18] sm:$0xff] }
  0x37   : > { %v245_v40 = vmul.f32 %v227_v36, %v191_v46  ;;  %v246_v41 = vmul.f32 %v235_v37, %v191_v46  ;;  %v247_v42 = vmul.f32 %v243_v38, %v191_v46 }
  0x38   : > { %v248_v43 = vadd.f32 1e-05, %v244_v39  ;;  %v329_v39 = vld [vmem:[%s564_s1 + $0x28] sm:$0x1] }
  0x39   : > { %v249_v44 = vadd.f32 1e-05, %v245_v40  ;;  %v250_v45 = vadd.f32 1e-05, %v246_v41  ;;  %v251_v47 = vadd.f32 1e-05, %v247_v42 }
  0x3a   : > { %432 = vrsqrt.f32 %v248_v43  ;;  %vm258_vm2 = vweird.f32 %v248_v43 }
  0x3b   : > { %434 = vrsqrt.f32 %v249_v44  ;;  %vm268_vm4 = vweird.f32 %v249_v44  ;;  %vm278_vm6 = vweird.f32 %v250_v45  ;;  %vm288_vm9 = vweird.f32 %v251_v47 }
  0x3c   : > { %436 = vrsqrt.f32 %v250_v45 }
  0x3d   : > { %438 = vrsqrt.f32 %v251_v47 }
  0x40   : > { %v433_v48 = vpop.eup %432 }
  0x41   : > { %v435_v49 = vpop.eup %434  ;;  %v253_v50 = vmul.f32 %v433_v48, %v248_v43  ;;  %vm259_vm3 = vweird.f32 %v433_v48 }
  0x42   : > { %v437_v51 = vpop.eup %436  ;;  %v263_v52 = vmul.f32 %v435_v49, %v249_v44  ;;  %vm269_vm5 = vweird.f32 %v435_v49  ;;  %vm260_vm8 = vmor %vm258_vm2, %vm259_vm3  ;;  %v330_v44 = vld [vmem:[%s564_s1 + $0x30] sm:$0x1] }
  0x43   : > { %v439_v53 = vpop.eup %438  ;;  %v254_v54 = vmul.f32 %v433_v48, %v253_v50  ;;  %v273_v63 = vmul.f32 %v437_v51, %v250_v45  ;;  %vm279_vm7 = vweird.f32 %v437_v51  ;;  %vm270_vm11 = vmor %vm268_vm4, %vm269_vm5  ;;  %v331_v50 = vld [vmem:[%s564_s1 + $0x38] sm:$0x1] }
  0x44   : > { %v264_v0 = vmul.f32 %v435_v49, %v263_v52  ;;  %v283_v1 = vmul.f32 %v439_v53, %v251_v47  ;;  %vm289_vm10 = vweird.f32 %v439_v53  ;;  %vm280_vm12 = vmor %vm278_vm6, %vm279_vm7 }
  0x45   : > { %v255_v2 = vmul.f32 0.5, %v254_v54  ;;  %v274_v46 = vmul.f32 %v437_v51, %v273_v63  ;;  %vm290_vm13 = vmor %vm288_vm9, %vm289_vm10 }
  0x46   : > { %v265_v3 = vmul.f32 0.5, %v264_v0  ;;  %v284_v4 = vmul.f32 %v439_v53, %v283_v1 }
  0x47   : > { %v256_v5 = vsub.f32 1.5, %v255_v2  ;;  %v275_v6 = vmul.f32 0.5, %v274_v46 }
  0x48   : > { %v266_v7 = vsub.f32 1.5, %v265_v3  ;;  %v285_v8 = vmul.f32 0.5, %v284_v4 }
  0x49   : > { %v257_v9 = vmul.f32 %v433_v48, %v256_v5  ;;  %v276_v10 = vsub.f32 1.5, %v275_v6 }
  0x4a   : > { %v267_v11 = vmul.f32 %v435_v49, %v266_v7  ;;  %v286_v12 = vsub.f32 1.5, %v285_v8 }
  0x4b   : > { %v261_v13 = vsel %vm260_vm8, %v433_v48, %v257_v9  ;;  %v277_v14 = vmul.f32 %v437_v51, %v276_v10 }
  0x4c   : > { %v271_v15 = vsel %vm270_vm11, %v435_v49, %v267_v11  ;;  %v287_v16 = vmul.f32 %v439_v53, %v286_v12  ;;  %v292_v17 = vmul.f32 %v261_v13, %v482_v55  ;;  %v296_v18 = vmul.f32 %v261_v13, %v490_v59  ;;  %v324_v55 = vld [vmem:[%s564_s1] sm:$0xff]  ;;  %v325_v59 = vld [vmem:[%s564_s1 + $0x8] sm:$0xff] }
  0x4d   : > { %v281_v19 = vsel %vm280_vm12, %v437_v51, %v277_v14  ;;  %v293_v20 = vmul.f32 %v271_v15, %v484_v56  ;;  %v297_v21 = vmul.f32 %v271_v15, %v492_v60 }
  0x4e   : > { %v291_v22 = vsel %vm290_vm13, %v439_v53, %v287_v16  ;;  %v294_v23 = vmul.f32 %v281_v19, %v486_v57  ;;  %v298_v25 = vmul.f32 %v281_v19, %v494_v61  ;;  %vm300_vm14 = vcmp.ge.f32.partialorder %v292_v17, 0.0  ;;  %v326_v57 = vld [vmem:[%s564_s1 + $0x10] sm:$0xff] }
  0x4f   : > { %v295_v24 = vmul.f32 %v291_v22, %v488_v58  ;;  %v299_v26 = vmul.f32 %v291_v22, %v496_v62  ;;  %vm301_vm15 = vcmp.ge.f32.partialorder %v293_v20, 0.0  ;;  %vm304_vm2 = vcmp.ge.f32.partialorder %v296_v18, 0.0 }
  0x50   : > { %vm302_vm1 = vcmp.ge.f32.partialorder %v294_v23, 0.0  ;;  %v308_v56 = vmul.f32 0.2, %v292_v17  ;;  %vm305_vm4 = vcmp.ge.f32.partialorder %v297_v21, 0.0  ;;  %v309_v58 = vmul.f32 0.2, %v293_v20 }
  0x51   : > { %vm303_vm3 = vcmp.ge.f32.partialorder %v295_v24, 0.0  ;;  %v310_v60 = vmul.f32 0.2, %v294_v23  ;;  %v311_v61 = vmul.f32 0.2, %v295_v24  ;;  %vm306_vm5 = vcmp.ge.f32.partialorder %v298_v25, 0.0 }
  0x52   : > { %v312_v62 = vmul.f32 0.2, %v296_v18  ;;  %v313_v27 = vmul.f32 0.2, %v297_v21  ;;  %v316_v28 = vsel %vm300_vm14, %v292_v17, %v308_v56  ;;  %v314_v29 = vmul.f32 0.2, %v298_v25 }
  0x53   : > { %v317_v30 = vsel %vm301_vm15, %v293_v20, %v309_v58  ;;  %v318_v31 = vsel %vm302_vm1, %v294_v23, %v310_v60  ;;  %v319_v33 = vsel %vm303_vm3, %v295_v24, %v311_v61  ;;  %v332_v36 = vmul.f32 %v324_v55, %v316_v28 }
  0x54   : > { %v320_v34 = vsel %vm304_vm2, %v296_v18, %v312_v62  ;;  %v315_v37 = vmul.f32 0.2, %v299_v26  ;;  %v321_v38 = vsel %vm305_vm4, %v297_v21, %v313_v27  ;;  %v333_v40 = vmul.f32 %v325_v59, %v317_v30 }
  0x55   : > { %v334_v41 = vmul.f32 %v326_v57, %v318_v31  ;;  %vm307_vm6 = vcmp.ge.f32.partialorder %v299_v26, 0.0  ;;  %v336_v42 = vmul.f32 %v328_v32, %v320_v34  ;;  %v322_v43 = vsel %vm306_vm5, %v298_v25, %v314_v29 }
  0x56   : > { %v335_v45 = vmul.f32 %v327_v35, %v319_v33  ;;  %v340_v47 = vadd.f32 %v333_v40, %v332_v36  ;;  %v337_v48 = vmul.f32 %v329_v39, %v321_v38  ;;  %v323_v49 = vsel %vm307_vm6, %v299_v26, %v315_v37 }
  0x57   : > { %v338_v52 = vmul.f32 %v330_v44, %v322_v43  ;;  %v343_v53 = vsel %vm152_vm0, %v336_v42, 0.0  ;;  %v339_v63 = vmul.f32 %v331_v50, %v323_v49 }
  0x58   : > { %v341_v51 = vadd.f32 %v340_v47, %v334_v41  ;;  %v345_v0 = vsel %vm152_vm0, %v337_v48, 0.0 }
  0x59   : > { %v347_v2 = vsel %vm152_vm0, %v338_v52, 0.0  ;;  %v349_v3 = vsel %vm152_vm0, %v339_v63, 0.0 }
  0x5a   : > { %v342_v54 = vadd.f32 %v341_v51, %v335_v45 }
  0x5c   : > { %v344_v1 = vadd.f32 %v343_v53, %v342_v54 }
  0x5e   : > { %v346_v46 = vadd.f32 %v345_v0, %v344_v1 }
  0x60   : > { %v348_v4 = vadd.f32 %v347_v2, %v346_v46 }
  0x62   : > { %v350_v5 = vadd.f32 %v349_v3, %v348_v4 }
  0x64   : > { %351 = vadd.xlane.f32.xlu0 %v350_v5 }
  0xd7   : > { %v352_v6 = vpop.xlane.xlu0 %351 }
  0xd8   : > { %v353_v7 = vrot.slane %v352_v6, 4 }
  0xda   : > { %v354_v8 = vadd.f32 %v353_v7, %v352_v6 }
  0xdc   : > { %v355_v9 = vrot.slane %v354_v8, 2 }
  0xde   : > { %v356_v10 = vadd.f32 %v355_v9, %v354_v8 }
  0xe0   : > { %v357_v11 = vrot.slane %v356_v10, 1 }
  0xe2   : > { %v358_v12 = vadd.f32 %v357_v11, %v356_v10 }
  0xe4   : > { %419 = vpush %v358_v12 }
 0x115   : > { %s420_s6 = spop %419 }
 0x116   : > { %v360_v13 = vstv %s420_s6 }
 0x117   : > { %361 = vst [vmem:[%s139_s5] sm:$0x1] %v360_v13 }
 0x118 PF: > { %s12_s9 = sadd.s32 1, %s446_s9  }
 0x119   : > { %p9_p4 = scmp.ge.s32.totalorder %s12_s9, 4  }
 0x11b   :  { %11 = sbr.rel (!%p9_p4) target bundleno = 1 (0x1), region = 58 }

// kernel: discriminator_forward.12
= control target key start
LH: loop header
LB: loop body
LE: loop exit
PB: predicated region body
PF: predicated region fallthrough
CT: control target
= control target key end

     0   :  { %s12235_s12 = smov 0   ;;  %s12237_s13 = smov 0   ;;  %s15168_s0 = inlined_call_operand.vmem [shape: bf16[32,4096], index: 0, kind: input, shape index: {}]   ;;  %s15169_s1 = inlined_call_operand.vmem [shape: bf16[4096,512], index: 1, kind: input, shape index: {}]   ;;  %s15170_s2 = inlined_call_operand.vmem [shape: f32[1,512], index: 2, kind: input, shape index: {}]   ;;  %s15171_s3 = inlined_call_operand.vmem [shape: bf16[32,512], index: 3, kind: output, shape index: {}]  }
   0x1   :  { %s12239_s14 = smov 0   ;;  %s12241_s15 = smov 0  }
   0x2   :  { %s12243_s16 = smov 0  }
   0x3 LB: > { %s22_s17 = sadd.s32 1, %s12209_s15  ;;  %s9235_s18 = sadd.s32 4294967295, %s12213_s16   ;;  %s12213_s16 = sphi %s12243_s16, %s13_s16   ;;  %s12209_s15 = sphi %s12241_s15, %s15279_s15   ;;  %s12205_s14 = sphi %s12239_s14, %s15278_s14   ;;  %s12201_s13 = sphi %s12237_s13, %s15277_s13   ;;  %s12197_s12 = sphi %s12235_s12, %s15276_s12  }
   0x4   : > { %p23_p0 = scmp.ge.s32.totalorder %s22_s17, 2  ;;  %p65_p1 = scmp.ne.s32.totalorder %s12201_s13, %s12197_s12 }
   0x5   : > { %p66_p2 = scmp.eq.s32.totalorder %s12213_s16, 0  ;;  %p123_p4 = scmp.eq.s32.totalorder %s9235_s18, 1 }
   0x6   : > { %s15281_s17 = smov (%p23_p0, %s22_s17), 0  ;;  %s58_s20 = sadd.s32 1, %s12201_s13 }
   0x7   : > { %p67_p3 = por %p66_p2, %p65_p1  ;;  %s55_s19 = ssub.s32 %s12209_s15, %s15281_s17 }
   0x8   : > { %p56_p5 = scmp.eq.s32.totalorder %s55_s19, 0  ;;  %p12270_p6 = por %p123_p4, %p65_p1 }
   0x9   : > { %p9239_p7 = scmp.ge.s32.totalorder %s12213_s16, 2 }
   0xa   : > { %s12275_s22 = scalar_select %p56_p5, %s12201_s13, %s58_s20  }
   0xb   : > { %155 = sbr.rel (%p9239_p7) target bundleno = 532 (0x214), region = 20 }
  0x10   : > { %158 = sbr.rel (!%p67_p3) target bundleno = 532 (0x214), region = 24  ;;  %s160_s23 = sand.u32 (%p67_p3), 1, %s12201_s13  }
  0x11   : > { %s11556_s24 = sshll.u32 (%p67_p3), %s12209_s15, 3  ;;  %s9240_s25 = sshll.u32 (%p67_p3), %s160_s23, 12 }
  0x12   : > { %s12283_s28 = scalar_lea.vmem (%p67_p3), %s15169_s1, %s11556_s24  ;;  %s12288_s29 = scalar_lea.vmem (%p67_p3), [#allocation2], %s9240_s25 }
  0x13   : > { %v1217_v0 = vld [vmem:[%s12283_s28] sm:$0xff] (%p67_p3)  ;;  %v1219_v1 = vld [vmem:[%s12283_s28 + $0x10] sm:$0xff] (%p67_p3) }
  0x14   : > { %v1221_v2 = vld [vmem:[%s12283_s28 + $0x20] sm:$0xff] (%p67_p3)  ;;  %1218 = vst [vmem:[%s12288_s29] sm:$0xff] (%p67_p3), %v1217_v0  ;;  %v1223_v3 = vld [vmem:[%s12283_s28 + $0x30] sm:$0xff] (%p67_p3) }
  0x15   : > { %1220 = vst [vmem:[%s12288_s29 + $0x8] sm:$0xff] %v1219_v1  ;;  %v1225_v4 = vld [vmem:[%s12283_s28 + $0x40] sm:$0xff]  ;;  %v1227_v5 = vld [vmem:[%s12283_s28 + $0x50] sm:$0xff] }
  0x16   : > { %1222 = vst [vmem:[%s12288_s29 + $0x10] sm:$0xff] %v1221_v2  ;;  %v1229_v6 = vld [vmem:[%s12283_s28 + $0x60] sm:$0xff]  ;;  %v1231_v7 = vld [vmem:[%s12283_s28 + $0x70] sm:$0xff] }
  0x17   : > { %1224 = vst [vmem:[%s12288_s29 + $0x18] sm:$0xff] %v1223_v3  ;;  %v1233_v8 = vld [vmem:[%s12283_s28 + $0x80] sm:$0xff]  ;;  %v1235_v9 = vld [vmem:[%s12283_s28 + $0x90] sm:$0xff] }
  0x18   : > { %1226 = vst [vmem:[%s12288_s29 + $0x20] sm:$0xff] %v1225_v4  ;;  %v1237_v10 = vld [vmem:[%s12283_s28 + $0xa0] sm:$0xff]  ;;  %v1239_v11 = vld [vmem:[%s12283_s28 + $0xb0] sm:$0xff] }
  0x19   : > { %1228 = vst [vmem:[%s12288_s29 + $0x28] sm:$0xff] %v1227_v5  ;;  %v1241_v12 = vld [vmem:[%s12283_s28 + $0xc0] sm:$0xff]  ;;  %v1243_v13 = vld [vmem:[%s12283_s28 + $0xd0] sm:$0xff] }
  0x1a   : > { %1230 = vst [vmem:[%s12288_s29 + $0x30] sm:$0xff] %v1229_v6  ;;  %v1245_v14 = vld [vmem:[%s12283_s28 + $0xe0] sm:$0xff]  ;;  %v1247_v15 = vld [vmem:[%s12283_s28 + $0xf0] sm:$0xff] }
  0x1b   : > { %1232 = vst [vmem:[%s12288_s29 + $0x38] sm:$0xff] %v1231_v7  ;;  %v1249_v16 = vld [vmem:[%s12283_s28 + $0x100] sm:$0xff]  ;;  %v1251_v17 = vld [vmem:[%s12283_s28 + $0x110] sm:$0xff] }
  0x1c   : > { %1234 = vst [vmem:[%s12288_s29 + $0x40] sm:$0xff] %v1233_v8  ;;  %v1253_v18 = vld [vmem:[%s12283_s28 + $0x120] sm:$0xff]  ;;  %v1255_v19 = vld [vmem:[%s12283_s28 + $0x130] sm:$0xff] }
  0x1d   : > { %1236 = vst [vmem:[%s12288_s29 + $0x48] sm:$0xff] %v1235_v9  ;;  %v1257_v20 = vld [vmem:[%s12283_s28 + $0x140] sm:$0xff]  ;;  %v1259_v21 = vld [vmem:[%s12283_s28 + $0x150] sm:$0xff] }
  0x1e   : > { %1238 = vst [vmem:[%s12288_s29 + $0x50] sm:$0xff] %v1237_v10  ;;  %v1261_v22 = vld [vmem:[%s12283_s28 + $0x160] sm:$0xff]  ;;  %v1263_v23 = vld [vmem:[%s12283_s28 + $0x170] sm:$0xff] }
  0x1f   : > { %1240 = vst [vmem:[%s12288_s29 + $0x58] sm:$0xff] %v1239_v11  ;;  %v1265_v24 = vld [vmem:[%s12283_s28 + $0x180] sm:$0xff]  ;;  %v1267_v25 = vld [vmem:[%s12283_s28 + $0x190] sm:$0xff] }
  0x20   : > { %1242 = vst [vmem:[%s12288_s29 + $0x60] sm:$0xff] %v1241_v12  ;;  %v1269_v26 = vld [vmem:[%s12283_s28 + $0x1a0] sm:$0xff]  ;;  %v1271_v27 = vld [vmem:[%s12283_s28 + $0x1b0] sm:$0xff] }
  0x21   : > { %1244 = vst [vmem:[%s12288_s29 + $0x68] sm:$0xff] %v1243_v13  ;;  %v1273_v28 = vld [vmem:[%s12283_s28 + $0x1c0] sm:$0xff]  ;;  %v1275_v29 = vld [vmem:[%s12283_s28 + $0x1d0] sm:$0xff] }
  0x22   : > { %1246 = vst [vmem:[%s12288_s29 + $0x70] sm:$0xff] %v1245_v14  ;;  %v1277_v30 = vld [vmem:[%s12283_s28 + $0x1e0] sm:$0xff]  ;;  %v1279_v31 = vld [vmem:[%s12283_s28 + $0x1f0] sm:$0xff] }
  0x23   : > { %1248 = vst [vmem:[%s12288_s29 + $0x78] sm:$0xff] %v1247_v15  ;;  %v1281_v32 = vld [vmem:[%s12283_s28 + $0x200] sm:$0xff]  ;;  %v1283_v33 = vld [vmem:[%s12283_s28 + $0x210] sm:$0xff] }
  0x24   : > { %1250 = vst [vmem:[%s12288_s29 + $0x80] sm:$0xff] %v1249_v16  ;;  %v1285_v34 = vld [vmem:[%s12283_s28 + $0x220] sm:$0xff]  ;;  %v1287_v35 = vld [vmem:[%s12283_s28 + $0x230] sm:$0xff] }
  0x25   : > { %1252 = vst [vmem:[%s12288_s29 + $0x88] sm:$0xff] %v1251_v17  ;;  %v1289_v36 = vld [vmem:[%s12283_s28 + $0x240] sm:$0xff]  ;;  %v1291_v37 = vld [vmem:[%s12283_s28 + $0x250] sm:$0xff] }
  0x26   : > { %1254 = vst [vmem:[%s12288_s29 + $0x90] sm:$0xff] %v1253_v18  ;;  %v1293_v38 = vld [vmem:[%s12283_s28 + $0x260] sm:$0xff]  ;;  %v1295_v39 = vld [vmem:[%s12283_s28 + $0x270] sm:$0xff] }
  0x27   : > { %1256 = vst [vmem:[%s12288_s29 + $0x98] sm:$0xff] %v1255_v19  ;;  %v1297_v40 = vld [vmem:[%s12283_s28 + $0x280] sm:$0xff]  ;;  %v1299_v41 = vld [vmem:[%s12283_s28 + $0x290] sm:$0xff] }
  0x28   : > { %1258 = vst [vmem:[%s12288_s29 + $0xa0] sm:$0xff] %v1257_v20  ;;  %v1301_v42 = vld [vmem:[%s12283_s28 + $0x2a0] sm:$0xff]  ;;  %v1303_v43 = vld [vmem:[%s12283_s28 + $0x2b0] sm:$0xff] }
  0x29   : > { %1260 = vst [vmem:[%s12288_s29 + $0xa8] sm:$0xff] %v1259_v21  ;;  %v1305_v44 = vld [vmem:[%s12283_s28 + $0x2c0] sm:$0xff]  ;;  %v1307_v45 = vld [vmem:[%s12283_s28 + $0x2d0] sm:$0xff] }
  0x2a   : > { %1262 = vst [vmem:[%s12288_s29 + $0xb0] sm:$0xff] %v1261_v22  ;;  %v1309_v46 = vld [vmem:[%s12283_s28 + $0x2e0] sm:$0xff]  ;;  %v1311_v47 = vld [vmem:[%s12283_s28 + $0x2f0] sm:$0xff] }
  0x2b   : > { %1264 = vst [vmem:[%s12288_s29 + $0xb8] sm:$0xff] %v1263_v23  ;;  %v1313_v48 = vld [vmem:[%s12283_s28 + $0x300] sm:$0xff]  ;;  %v1315_v49 = vld [vmem:[%s12283_s28 + $0x310] sm:$0xff] }
  0x2c   : > { %1266 = vst [vmem:[%s12288_s29 + $0xc0] sm:$0xff] %v1265_v24  ;;  %v1317_v50 = vld [vmem:[%s12283_s28 + $0x320] sm:$0xff]  ;;  %v1319_v51 = vld [vmem:[%s12283_s28 + $0x330] sm:$0xff] }
  0x2d   : > { %1268 = vst [vmem:[%s12288_s29 + $0xc8] sm:$0xff] %v1267_v25  ;;  %v1321_v52 = vld [vmem:[%s12283_s28 + $0x340] sm:$0xff]  ;;  %v1323_v53 = vld [vmem:[%s12283_s28 + $0x350] sm:$0xff] }
  0x2e   : > { %1270 = vst [vmem:[%s12288_s29 + $0xd0] sm:$0xff] %v1269_v26  ;;  %v1325_v54 = vld [vmem:[%s12283_s28 + $0x360] sm:$0xff]  ;;  %v1327_v55 = vld [vmem:[%s12283_s28 + $0x370] sm:$0xff] }
  0x2f   : > { %1272 = vst [vmem:[%s12288_s29 + $0xd8] sm:$0xff] %v1271_v27  ;;  %v1329_v56 = vld [vmem:[%s12283_s28 + $0x380] sm:$0xff]  ;;  %v1331_v57 = vld [vmem:[%s12283_s28 + $0x390] sm:$0xff] }
  0x30   : > { %1274 = vst [vmem:[%s12288_s29 + $0xe0] sm:$0xff] %v1273_v28  ;;  %v1333_v58 = vld [vmem:[%s12283_s28 + $0x3a0] sm:$0xff]  ;;  %v1335_v59 = vld [vmem:[%s12283_s28 + $0x3b0] sm:$0xff] }
  0x31   : > { %1276 = vst [vmem:[%s12288_s29 + $0xe8] sm:$0xff] %v1275_v29  ;;  %v1337_v60 = vld [vmem:[%s12283_s28 + $0x3c0] sm:$0xff]  ;;  %v1339_v61 = vld [vmem:[%s12283_s28 + $0x3d0] sm:$0xff] }
  0x32   : > { %1278 = vst [vmem:[%s12288_s29 + $0xf0] sm:$0xff] %v1277_v30  ;;  %v1341_v62 = vld [vmem:[%s12283_s28 + $0x3e0] sm:$0xff]  ;;  %v1343_v63 = vld [vmem:[%s12283_s28 + $0x3f0] sm:$0xff] }
  0x33   : > { %1280 = vst [vmem:[%s12288_s29 + $0xf8] sm:$0xff] %v1279_v31  ;;  %v1345_v0 = vld [vmem:[%s12283_s28 + $0x400] sm:$0xff]  ;;  %v1347_v1 = vld [vmem:[%s12283_s28 + $0x410] sm:$0xff] }
  0x34   : > { %1282 = vst [vmem:[%s12288_s29 + $0x100] sm:$0xff] %v1281_v32  ;;  %v1349_v2 = vld [vmem:[%s12283_s28 + $0x420] sm:$0xff]  ;;  %v1351_v3 = vld [vmem:[%s12283_s28 + $0x430] sm:$0xff] }
  0x35   : > { %1284 = vst [vmem:[%s12288_s29 + $0x108] sm:$0xff] %v1283_v33  ;;  %v1353_v4 = vld [vmem:[%s12283_s28 + $0x440] sm:$0xff]  ;;  %v1355_v5 = vld [vmem:[%s12283_s28 + $0x450] sm:$0xff] }
  0x36   : > { %1286 = vst [vmem:[%s12288_s29 + $0x110] sm:$0xff] %v1285_v34  ;;  %v1357_v6 = vld [vmem:[%s12283_s28 + $0x460] sm:$0xff]  ;;  %v1359_v7 = vld [vmem:[%s12283_s28 + $0x470] sm:$0xff] }
  0x37   : > { %1288 = vst [vmem:[%s12288_s29 + $0x118] sm:$0xff] %v1287_v35  ;;  %v1361_v8 = vld [vmem:[%s12283_s28 + $0x480] sm:$0xff]  ;;  %v1363_v9 = vld [vmem:[%s12283_s28 + $0x490] sm:$0xff] }
  0x38   : > { %1290 = vst [vmem:[%s12288_s29 + $0x120] sm:$0xff] %v1289_v36  ;;  %v1365_v10 = vld [vmem:[%s12283_s28 + $0x4a0] sm:$0xff]  ;;  %v1367_v11 = vld [vmem:[%s12283_s28 + $0x4b0] sm:$0xff] }
  0x39   : > { %1292 = vst [vmem:[%s12288_s29 + $0x128] sm:$0xff] %v1291_v37  ;;  %v1369_v12 = vld [vmem:[%s12283_s28 + $0x4c0] sm:$0xff]  ;;  %v1371_v13 = vld [vmem:[%s12283_s28 + $0x4d0] sm:$0xff] }
  0x3a   : > { %1294 = vst [vmem:[%s12288_s29 + $0x130] sm:$0xff] %v1293_v38  ;;  %v1373_v14 = vld [vmem:[%s12283_s28 + $0x4e0] sm:$0xff]  ;;  %v1375_v15 = vld [vmem:[%s12283_s28 + $0x4f0] sm:$0xff] }
  0x3b   : > { %1296 = vst [vmem:[%s12288_s29 + $0x138] sm:$0xff] %v1295_v39  ;;  %v1377_v16 = vld [vmem:[%s12283_s28 + $0x500] sm:$0xff]  ;;  %v1379_v17 = vld [vmem:[%s12283_s28 + $0x510] sm:$0xff] }
  0x3c   : > { %1298 = vst [vmem:[%s12288_s29 + $0x140] sm:$0xff] %v1297_v40  ;;  %v1381_v18 = vld [vmem:[%s12283_s28 + $0x520] sm:$0xff]  ;;  %v1383_v19 = vld [vmem:[%s12283_s28 + $0x530] sm:$0xff] }
  0x3d   : > { %1300 = vst [vmem:[%s12288_s29 + $0x148] sm:$0xff] %v1299_v41  ;;  %v1385_v20 = vld [vmem:[%s12283_s28 + $0x540] sm:$0xff]  ;;  %v1387_v21 = vld [vmem:[%s12283_s28 + $0x550] sm:$0xff] }
  0x3e   : > { %1302 = vst [vmem:[%s12288_s29 + $0x150] sm:$0xff] %v1301_v42  ;;  %v1389_v22 = vld [vmem:[%s12283_s28 + $0x560] sm:$0xff]  ;;  %v1391_v23 = vld [vmem:[%s12283_s28 + $0x570] sm:$0xff] }
  0x3f   : > { %1304 = vst [vmem:[%s12288_s29 + $0x158] sm:$0xff] %v1303_v43  ;;  %v1393_v24 = vld [vmem:[%s12283_s28 + $0x580] sm:$0xff]  ;;  %v1395_v25 = vld [vmem:[%s12283_s28 + $0x590] sm:$0xff] }
  0x40   : > { %1306 = vst [vmem:[%s12288_s29 + $0x160] sm:$0xff] %v1305_v44  ;;  %v1397_v26 = vld [vmem:[%s12283_s28 + $0x5a0] sm:$0xff]  ;;  %v1399_v27 = vld [vmem:[%s12283_s28 + $0x5b0] sm:$0xff] }
  0x41   : > { %1308 = vst [vmem:[%s12288_s29 + $0x168] sm:$0xff] %v1307_v45  ;;  %v1401_v28 = vld [vmem:[%s12283_s28 + $0x5c0] sm:$0xff]  ;;  %v1403_v29 = vld [vmem:[%s12283_s28 + $0x5d0] sm:$0xff] }
  0x42   : > { %1310 = vst [vmem:[%s12288_s29 + $0x170] sm:$0xff] %v1309_v46  ;;  %v1405_v30 = vld [vmem:[%s12283_s28 + $0x5e0] sm:$0xff]  ;;  %v1407_v31 = vld [vmem:[%s12283_s28 + $0x5f0] sm:$0xff] }
  0x43   : > { %1312 = vst [vmem:[%s12288_s29 + $0x178] sm:$0xff] %v1311_v47  ;;  %v1409_v32 = vld [vmem:[%s12283_s28 + $0x600] sm:$0xff]  ;;  %v1411_v33 = vld [vmem:[%s12283_s28 + $0x610] sm:$0xff] }
  0x44   : > { %1314 = vst [vmem:[%s12288_s29 + $0x180] sm:$0xff] %v1313_v48  ;;  %v1413_v34 = vld [vmem:[%s12283_s28 + $0x620] sm:$0xff]  ;;  %v1415_v35 = vld [vmem:[%s12283_s28 + $0x630] sm:$0xff] }
  0x45   : > { %1316 = vst [vmem:[%s12288_s29 + $0x188] sm:$0xff] %v1315_v49  ;;  %v1417_v36 = vld [vmem:[%s12283_s28 + $0x640] sm:$0xff]  ;;  %v1419_v37 = vld [vmem:[%s12283_s28 + $0x650] sm:$0xff] }
  0x46   : > { %1318 = vst [vmem:[%s12288_s29 + $0x190] sm:$0xff] %v1317_v50  ;;  %v1421_v38 = vld [vmem:[%s12283_s28 + $0x660] sm:$0xff]  ;;  %v1423_v39 = vld [vmem:[%s12283_s28 + $0x670] sm:$0xff] }
  0x47   : > { %1320 = vst [vmem:[%s12288_s29 + $0x198] sm:$0xff] %v1319_v51  ;;  %v1425_v40 = vld [vmem:[%s12283_s28 + $0x680] sm:$0xff]  ;;  %v1427_v41 = vld [vmem:[%s12283_s28 + $0x690] sm:$0xff] }
  0x48   : > { %1322 = vst [vmem:[%s12288_s29 + $0x1a0] sm:$0xff] %v1321_v52  ;;  %v1429_v42 = vld [vmem:[%s12283_s28 + $0x6a0] sm:$0xff]  ;;  %v1431_v43 = vld [vmem:[%s12283_s28 + $0x6b0] sm:$0xff] }
  0x49   : > { %1324 = vst [vmem:[%s12288_s29 + $0x1a8] sm:$0xff] %v1323_v53  ;;  %v1433_v44 = vld [vmem:[%s12283_s28 + $0x6c0] sm:$0xff]  ;;  %v1435_v45 = vld [vmem:[%s12283_s28 + $0x6d0] sm:$0xff] }
  0x4a   : > { %1326 = vst [vmem:[%s12288_s29 + $0x1b0] sm:$0xff] %v1325_v54  ;;  %v1437_v46 = vld [vmem:[%s12283_s28 + $0x6e0] sm:$0xff]  ;;  %v1439_v47 = vld [vmem:[%s12283_s28 + $0x6f0] sm:$0xff] }
  0x4b   : > { %1328 = vst [vmem:[%s12288_s29 + $0x1b8] sm:$0xff] %v1327_v55  ;;  %v1441_v48 = vld [vmem:[%s12283_s28 + $0x700] sm:$0xff]  ;;  %v1443_v49 = vld [vmem:[%s12283_s28 + $0x710] sm:$0xff] }
  0x4c   : > { %1330 = vst [vmem:[%s12288_s29 + $0x1c0] sm:$0xff] %v1329_v56  ;;  %v1445_v50 = vld [vmem:[%s12283_s28 + $0x720] sm:$0xff]  ;;  %v1447_v51 = vld [vmem:[%s12283_s28 + $0x730] sm:$0xff] }
  0x4d   : > { %1332 = vst [vmem:[%s12288_s29 + $0x1c8] sm:$0xff] %v1331_v57  ;;  %v1449_v52 = vld [vmem:[%s12283_s28 + $0x740] sm:$0xff]  ;;  %v1451_v53 = vld [vmem:[%s12283_s28 + $0x750] sm:$0xff] }
  0x4e   : > { %1334 = vst [vmem:[%s12288_s29 + $0x1d0] sm:$0xff] %v1333_v58  ;;  %v1453_v54 = vld [vmem:[%s12283_s28 + $0x760] sm:$0xff]  ;;  %v1455_v55 = vld [vmem:[%s12283_s28 + $0x770] sm:$0xff] }
  0x4f   : > { %1336 = vst [vmem:[%s12288_s29 + $0x1d8] sm:$0xff] %v1335_v59  ;;  %v1457_v56 = vld [vmem:[%s12283_s28 + $0x780] sm:$0xff]  ;;  %v1459_v57 = vld [vmem:[%s12283_s28 + $0x790] sm:$0xff] }
  0x50   : > { %1338 = vst [vmem:[%s12288_s29 + $0x1e0] sm:$0xff] %v1337_v60  ;;  %v1461_v58 = vld [vmem:[%s12283_s28 + $0x7a0] sm:$0xff]  ;;  %v1463_v59 = vld [vmem:[%s12283_s28 + $0x7b0] sm:$0xff] }
  0x51   : > { %1340 = vst [vmem:[%s12288_s29 + $0x1e8] sm:$0xff] %v1339_v61  ;;  %v1465_v60 = vld [vmem:[%s12283_s28 + $0x7c0] sm:$0xff]  ;;  %v1467_v61 = vld [vmem:[%s12283_s28 + $0x7d0] sm:$0xff] }
  0x52   : > { %1342 = vst [vmem:[%s12288_s29 + $0x1f0] sm:$0xff] %v1341_v62  ;;  %v1469_v62 = vld [vmem:[%s12283_s28 + $0x7e0] sm:$0xff] }
  0x53   : > { %1344 = vst [vmem:[%s12288_s29 + $0x1f8] sm:$0xff] %v1343_v63  ;;  %v1471_v63 = vld [vmem:[%s12283_s28 + $0x7f0] sm:$0xff] }
  0x54   : > { %1346 = vst [vmem:[%s12288_s29 + $0x200] sm:$0xff] %v1345_v0  ;;  %v1473_v0 = vld [vmem:[%s12283_s28 + $0x800] sm:$0xff] }
  0x55   : > { %1348 = vst [vmem:[%s12288_s29 + $0x208] sm:$0xff] %v1347_v1  ;;  %v1475_v1 = vld [vmem:[%s12283_s28 + $0x810] sm:$0xff] }
  0x56   : > { %1350 = vst [vmem:[%s12288_s29 + $0x210] sm:$0xff] %v1349_v2  ;;  %v1477_v2 = vld [vmem:[%s12283_s28 + $0x820] sm:$0xff] }
  0x57   : > { %1352 = vst [vmem:[%s12288_s29 + $0x218] sm:$0xff] %v1351_v3  ;;  %v1479_v3 = vld [vmem:[%s12283_s28 + $0x830] sm:$0xff] }
  0x58   : > { %1354 = vst [vmem:[%s12288_s29 + $0x220] sm:$0xff] %v1353_v4  ;;  %v1481_v4 = vld [vmem:[%s12283_s28 + $0x840] sm:$0xff] }
  0x59   : > { %1356 = vst [vmem:[%s12288_s29 + $0x228] sm:$0xff] %v1355_v5  ;;  %v1483_v5 = vld [vmem:[%s12283_s28 + $0x850] sm:$0xff] }
  0x5a   : > { %1358 = vst [vmem:[%s12288_s29 + $0x230] sm:$0xff] %v1357_v6  ;;  %v1485_v6 = vld [vmem:[%s12283_s28 + $0x860] sm:$0xff] }
  0x5b   : > { %1360 = vst [vmem:[%s12288_s29 + $0x238] sm:$0xff] %v1359_v7  ;;  %v1487_v7 = vld [vmem:[%s12283_s28 + $0x870] sm:$0xff] }
  0x5c   : > { %1362 = vst [vmem:[%s12288_s29 + $0x240] sm:$0xff] %v1361_v8  ;;  %v1489_v8 = vld [vmem:[%s12283_s28 + $0x880] sm:$0xff] }
  0x5d   : > { %1364 = vst [vmem:[%s12288_s29 + $0x248] sm:$0xff] %v1363_v9  ;;  %v1491_v9 = vld [vmem:[%s12283_s28 + $0x890] sm:$0xff] }
  0x5e   : > { %1366 = vst [vmem:[%s12288_s29 + $0x250] sm:$0xff] %v1365_v10  ;;  %v1493_v10 = vld [vmem:[%s12283_s28 + $0x8a0] sm:$0xff] }
  0x5f   : > { %1368 = vst [vmem:[%s12288_s29 + $0x258] sm:$0xff] %v1367_v11  ;;  %v1495_v11 = vld [vmem:[%s12283_s28 + $0x8b0] sm:$0xff] }
  0x60   : > { %1370 = vst [vmem:[%s12288_s29 + $0x260] sm:$0xff] %v1369_v12  ;;  %v1497_v12 = vld [vmem:[%s12283_s28 + $0x8c0] sm:$0xff] }
  0x61   : > { %1372 = vst [vmem:[%s12288_s29 + $0x268] sm:$0xff] %v1371_v13  ;;  %v1499_v13 = vld [vmem:[%s12283_s28 + $0x8d0] sm:$0xff] }
  0x62   : > { %1374 = vst [vmem:[%s12288_s29 + $0x270] sm:$0xff] %v1373_v14  ;;  %v1501_v14 = vld [vmem:[%s12283_s28 + $0x8e0] sm:$0xff] }
  0x63   : > { %1376 = vst [vmem:[%s12288_s29 + $0x278] sm:$0xff] %v1375_v15  ;;  %v1503_v15 = vld [vmem:[%s12283_s28 + $0x8f0] sm:$0xff] }
  0x64   : > { %1378 = vst [vmem:[%s12288_s29 + $0x280] sm:$0xff] %v1377_v16  ;;  %v1505_v16 = vld [vmem:[%s12283_s28 + $0x900] sm:$0xff] }
  0x65   : > { %1380 = vst [vmem:[%s12288_s29 + $0x288] sm:$0xff] %v1379_v17  ;;  %v1507_v17 = vld [vmem:[%s12283_s28 + $0x910] sm:$0xff] }
  0x66   : > { %1382 = vst [vmem:[%s12288_s29 + $0x290] sm:$0xff] %v1381_v18  ;;  %v1509_v18 = vld [vmem:[%s12283_s28 + $0x920] sm:$0xff] }
  0x67   : > { %1384 = vst [vmem:[%s12288_s29 + $0x298] sm:$0xff] %v1383_v19  ;;  %v1511_v19 = vld [vmem:[%s12283_s28 + $0x930] sm:$0xff] }
  0x68   : > { %1386 = vst [vmem:[%s12288_s29 + $0x2a0] sm:$0xff] %v1385_v20  ;;  %v1513_v20 = vld [vmem:[%s12283_s28 + $0x940] sm:$0xff] }
  0x69   : > { %1388 = vst [vmem:[%s12288_s29 + $0x2a8] sm:$0xff] %v1387_v21  ;;  %v1515_v21 = vld [vmem:[%s12283_s28 + $0x950] sm:$0xff] }
  0x6a   : > { %1390 = vst [vmem:[%s12288_s29 + $0x2b0] sm:$0xff] %v1389_v22  ;;  %v1517_v22 = vld [vmem:[%s12283_s28 + $0x960] sm:$0xff] }
  0x6b   : > { %1392 = vst [vmem:[%s12288_s29 + $0x2b8] sm:$0xff] %v1391_v23  ;;  %v1519_v23 = vld [vmem:[%s12283_s28 + $0x970] sm:$0xff] }
  0x6c   : > { %1394 = vst [vmem:[%s12288_s29 + $0x2c0] sm:$0xff] %v1393_v24  ;;  %v1521_v24 = vld [vmem:[%s12283_s28 + $0x980] sm:$0xff] }
  0x6d   : > { %1396 = vst [vmem:[%s12288_s29 + $0x2c8] sm:$0xff] %v1395_v25  ;;  %v1523_v25 = vld [vmem:[%s12283_s28 + $0x990] sm:$0xff] }
  0x6e   : > { %1398 = vst [vmem:[%s12288_s29 + $0x2d0] sm:$0xff] %v1397_v26  ;;  %v1525_v26 = vld [vmem:[%s12283_s28 + $0x9a0] sm:$0xff] }
  0x6f   : > { %1400 = vst [vmem:[%s12288_s29 + $0x2d8] sm:$0xff] %v1399_v27  ;;  %v1527_v27 = vld [vmem:[%s12283_s28 + $0x9b0] sm:$0xff] }
  0x70   : > { %1402 = vst [vmem:[%s12288_s29 + $0x2e0] sm:$0xff] %v1401_v28  ;;  %v1529_v28 = vld [vmem:[%s12283_s28 + $0x9c0] sm:$0xff] }
  0x71   : > { %1404 = vst [vmem:[%s12288_s29 + $0x2e8] sm:$0xff] %v1403_v29  ;;  %v1531_v29 = vld [vmem:[%s12283_s28 + $0x9d0] sm:$0xff] }
  0x72   : > { %1406 = vst [vmem:[%s12288_s29 + $0x2f0] sm:$0xff] %v1405_v30  ;;  %v1533_v30 = vld [vmem:[%s12283_s28 + $0x9e0] sm:$0xff] }
  0x73   : > { %1408 = vst [vmem:[%s12288_s29 + $0x2f8] sm:$0xff] %v1407_v31  ;;  %v1535_v31 = vld [vmem:[%s12283_s28 + $0x9f0] sm:$0xff] }
  0x74   : > { %1410 = vst [vmem:[%s12288_s29 + $0x300] sm:$0xff] %v1409_v32  ;;  %v1537_v32 = vld [vmem:[%s12283_s28 + $0xa00] sm:$0xff] }
  0x75   : > { %1412 = vst [vmem:[%s12288_s29 + $0x308] sm:$0xff] %v1411_v33  ;;  %v1539_v33 = vld [vmem:[%s12283_s28 + $0xa10] sm:$0xff] }
  0x76   : > { %1414 = vst [vmem:[%s12288_s29 + $0x310] sm:$0xff] %v1413_v34  ;;  %v1541_v34 = vld [vmem:[%s12283_s28 + $0xa20] sm:$0xff] }
  0x77   : > { %1416 = vst [vmem:[%s12288_s29 + $0x318] sm:$0xff] %v1415_v35  ;;  %v1543_v35 = vld [vmem:[%s12283_s28 + $0xa30] sm:$0xff] }
  0x78   : > { %1418 = vst [vmem:[%s12288_s29 + $0x320] sm:$0xff] %v1417_v36  ;;  %v1545_v36 = vld [vmem:[%s12283_s28 + $0xa40] sm:$0xff] }
  0x79   : > { %1420 = vst [vmem:[%s12288_s29 + $0x328] sm:$0xff] %v1419_v37  ;;  %v1547_v37 = vld [vmem:[%s12283_s28 + $0xa50] sm:$0xff] }
  0x7a   : > { %1422 = vst [vmem:[%s12288_s29 + $0x330] sm:$0xff] %v1421_v38  ;;  %v1549_v38 = vld [vmem:[%s12283_s28 + $0xa60] sm:$0xff] }
  0x7b   : > { %1424 = vst [vmem:[%s12288_s29 + $0x338] sm:$0xff] %v1423_v39  ;;  %v1551_v39 = vld [vmem:[%s12283_s28 + $0xa70] sm:$0xff] }
  0x7c   : > { %1426 = vst [vmem:[%s12288_s29 + $0x340] sm:$0xff] %v1425_v40  ;;  %v1553_v40 = vld [vmem:[%s12283_s28 + $0xa80] sm:$0xff] }
  0x7d   : > { %1428 = vst [vmem:[%s12288_s29 + $0x348] sm:$0xff] %v1427_v41  ;;  %v1555_v41 = vld [vmem:[%s12283_s28 + $0xa90] sm:$0xff] }
  0x7e   : > { %1430 = vst [vmem:[%s12288_s29 + $0x350] sm:$0xff] %v1429_v42  ;;  %v1557_v42 = vld [vmem:[%s12283_s28 + $0xaa0] sm:$0xff] }
  0x7f   : > { %1432 = vst [vmem:[%s12288_s29 + $0x358] sm:$0xff] %v1431_v43  ;;  %v1559_v43 = vld [vmem:[%s12283_s28 + $0xab0] sm:$0xff] }
  0x80   : > { %1434 = vst [vmem:[%s12288_s29 + $0x360] sm:$0xff] %v1433_v44  ;;  %v1561_v44 = vld [vmem:[%s12283_s28 + $0xac0] sm:$0xff] }
  0x81   : > { %1436 = vst [vmem:[%s12288_s29 + $0x368] sm:$0xff] %v1435_v45  ;;  %v1563_v45 = vld [vmem:[%s12283_s28 + $0xad0] sm:$0xff] }
  0x82   : > { %1438 = vst [vmem:[%s12288_s29 + $0x370] sm:$0xff] %v1437_v46  ;;  %v1565_v46 = vld [vmem:[%s12283_s28 + $0xae0] sm:$0xff] }
  0x83   : > { %1440 = vst [vmem:[%s12288_s29 + $0x378] sm:$0xff] %v1439_v47  ;;  %v1567_v47 = vld [vmem:[%s12283_s28 + $0xaf0] sm:$0xff] }
  0x84   : > { %1442 = vst [vmem:[%s12288_s29 + $0x380] sm:$0xff] %v1441_v48  ;;  %v1569_v48 = vld [vmem:[%s12283_s28 + $0xb00] sm:$0xff] }
  0x85   : > { %1444 = vst [vmem:[%s12288_s29 + $0x388] sm:$0xff] %v1443_v49  ;;  %v1571_v49 = vld [vmem:[%s12283_s28 + $0xb10] sm:$0xff] }
  0x86   : > { %1446 = vst [vmem:[%s12288_s29 + $0x390] sm:$0xff] %v1445_v50  ;;  %v1573_v50 = vld [vmem:[%s12283_s28 + $0xb20] sm:$0xff] }
  0x87   : > { %1448 = vst [vmem:[%s12288_s29 + $0x398] sm:$0xff] %v1447_v51  ;;  %v1575_v51 = vld [vmem:[%s12283_s28 + $0xb30] sm:$0xff] }
  0x88   : > { %1450 = vst [vmem:[%s12288_s29 + $0x3a0] sm:$0xff] %v1449_v52  ;;  %v1577_v52 = vld [vmem:[%s12283_s28 + $0xb40] sm:$0xff] }
  0x89   : > { %1452 = vst [vmem:[%s12288_s29 + $0x3a8] sm:$0xff] %v1451_v53  ;;  %v1579_v53 = vld [vmem:[%s12283_s28 + $0xb50] sm:$0xff] }
  0x8a   : > { %1454 = vst [vmem:[%s12288_s29 + $0x3b0] sm:$0xff] %v1453_v54  ;;  %v1581_v54 = vld [vmem:[%s12283_s28 + $0xb60] sm:$0xff] }
  0x8b   : > { %1456 = vst [vmem:[%s12288_s29 + $0x3b8] sm:$0xff] %v1455_v55  ;;  %v1583_v55 = vld [vmem:[%s12283_s28 + $0xb70] sm:$0xff] }
  0x8c   : > { %1458 = vst [vmem:[%s12288_s29 + $0x3c0] sm:$0xff] %v1457_v56  ;;  %v1585_v56 = vld [vmem:[%s12283_s28 + $0xb80] sm:$0xff] }
  0x8d   : > { %1460 = vst [vmem:[%s12288_s29 + $0x3c8] sm:$0xff] %v1459_v57  ;;  %v1587_v57 = vld [vmem:[%s12283_s28 + $0xb90] sm:$0xff] }
  0x8e   : > { %1462 = vst [vmem:[%s12288_s29 + $0x3d0] sm:$0xff] %v1461_v58  ;;  %v1589_v58 = vld [vmem:[%s12283_s28 + $0xba0] sm:$0xff] }
  0x8f   : > { %1464 = vst [vmem:[%s12288_s29 + $0x3d8] sm:$0xff] %v1463_v59  ;;  %v1591_v59 = vld [vmem:[%s12283_s28 + $0xbb0] sm:$0xff] }
  0x90   : > { %1466 = vst [vmem:[%s12288_s29 + $0x3e0] sm:$0xff] %v1465_v60  ;;  %v1593_v60 = vld [vmem:[%s12283_s28 + $0xbc0] sm:$0xff] }
  0x91   : > { %1468 = vst [vmem:[%s12288_s29 + $0x3e8] sm:$0xff] %v1467_v61  ;;  %v1595_v61 = vld [vmem:[%s12283_s28 + $0xbd0] sm:$0xff] }
  0x92   : > { %1470 = vst [vmem:[%s12288_s29 + $0x3f0] sm:$0xff] %v1469_v62  ;;  %v1597_v62 = vld [vmem:[%s12283_s28 + $0xbe0] sm:$0xff] }
  0x93   : > { %1472 = vst [vmem:[%s12288_s29 + $0x3f8] sm:$0xff] %v1471_v63  ;;  %v1599_v63 = vld [vmem:[%s12283_s28 + $0xbf0] sm:$0xff] }
  0x94   : > { %1474 = vst [vmem:[%s12288_s29 + $0x400] sm:$0xff] %v1473_v0  ;;  %v1601_v0 = vld [vmem:[%s12283_s28 + $0xc00] sm:$0xff] }
  0x95   : > { %1476 = vst [vmem:[%s12288_s29 + $0x408] sm:$0xff] %v1475_v1  ;;  %v1603_v1 = vld [vmem:[%s12283_s28 + $0xc10] sm:$0xff] }
  0x96   : > { %1478 = vst [vmem:[%s12288_s29 + $0x410] sm:$0xff] %v1477_v2  ;;  %v1605_v2 = vld [vmem:[%s12283_s28 + $0xc20] sm:$0xff] }
  0x97   : > { %1480 = vst [vmem:[%s12288_s29 + $0x418] sm:$0xff] %v1479_v3  ;;  %v1607_v3 = vld [vmem:[%s12283_s28 + $0xc30] sm:$0xff] }
  0x98   : > { %1482 = vst [vmem:[%s12288_s29 + $0x420] sm:$0xff] %v1481_v4  ;;  %v1609_v4 = vld [vmem:[%s12283_s28 + $0xc40] sm:$0xff] }
  0x99   : > { %1484 = vst [vmem:[%s12288_s29 + $0x428] sm:$0xff] %v1483_v5  ;;  %v1611_v5 = vld [vmem:[%s12283_s28 + $0xc50] sm:$0xff] }
  0x9a   : > { %1486 = vst [vmem:[%s12288_s29 + $0x430] sm:$0xff] %v1485_v6  ;;  %v1613_v6 = vld [vmem:[%s12283_s28 + $0xc60] sm:$0xff] }
  0x9b   : > { %1488 = vst [vmem:[%s12288_s29 + $0x438] sm:$0xff] %v1487_v7  ;;  %v1615_v7 = vld [vmem:[%s12283_s28 + $0xc70] sm:$0xff] }
  0x9c   : > { %1490 = vst [vmem:[%s12288_s29 + $0x440] sm:$0xff] %v1489_v8  ;;  %v1617_v8 = vld [vmem:[%s12283_s28 + $0xc80] sm:$0xff] }
  0x9d   : > { %1492 = vst [vmem:[%s12288_s29 + $0x448] sm:$0xff] %v1491_v9  ;;  %v1619_v9 = vld [vmem:[%s12283_s28 + $0xc90] sm:$0xff] }
  0x9e   : > { %1494 = vst [vmem:[%s12288_s29 + $0x450] sm:$0xff] %v1493_v10  ;;  %v1621_v10 = vld [vmem:[%s12283_s28 + $0xca0] sm:$0xff] }
  0x9f   : > { %1496 = vst [vmem:[%s12288_s29 + $0x458] sm:$0xff] %v1495_v11  ;;  %v1623_v11 = vld [vmem:[%s12283_s28 + $0xcb0] sm:$0xff] }
  0xa0   : > { %1498 = vst [vmem:[%s12288_s29 + $0x460] sm:$0xff] %v1497_v12  ;;  %v1625_v12 = vld [vmem:[%s12283_s28 + $0xcc0] sm:$0xff] }
  0xa1   : > { %1500 = vst [vmem:[%s12288_s29 + $0x468] sm:$0xff] %v1499_v13  ;;  %v1627_v13 = vld [vmem:[%s12283_s28 + $0xcd0] sm:$0xff] }
  0xa2   : > { %1502 = vst [vmem:[%s12288_s29 + $0x470] sm:$0xff] %v1501_v14  ;;  %v1629_v14 = vld [vmem:[%s12283_s28 + $0xce0] sm:$0xff] }
  0xa3   : > { %1504 = vst [vmem:[%s12288_s29 + $0x478] sm:$0xff] %v1503_v15  ;;  %v1631_v15 = vld [vmem:[%s12283_s28 + $0xcf0] sm:$0xff] }
  0xa4   : > { %1506 = vst [vmem:[%s12288_s29 + $0x480] sm:$0xff] %v1505_v16  ;;  %v1633_v16 = vld [vmem:[%s12283_s28 + $0xd00] sm:$0xff] }
  0xa5   : > { %1508 = vst [vmem:[%s12288_s29 + $0x488] sm:$0xff] %v1507_v17  ;;  %v1635_v17 = vld [vmem:[%s12283_s28 + $0xd10] sm:$0xff] }
  0xa6   : > { %1510 = vst [vmem:[%s12288_s29 + $0x490] sm:$0xff] %v1509_v18  ;;  %v1637_v18 = vld [vmem:[%s12283_s28 + $0xd20] sm:$0xff] }
  0xa7   : > { %1512 = vst [vmem:[%s12288_s29 + $0x498] sm:$0xff] %v1511_v19  ;;  %v1639_v19 = vld [vmem:[%s12283_s28 + $0xd30] sm:$0xff] }
  0xa8   : > { %1514 = vst [vmem:[%s12288_s29 + $0x4a0] sm:$0xff] %v1513_v20  ;;  %v1641_v20 = vld [vmem:[%s12283_s28 + $0xd40] sm:$0xff] }
  0xa9   : > { %1516 = vst [vmem:[%s12288_s29 + $0x4a8] sm:$0xff] %v1515_v21  ;;  %v1643_v21 = vld [vmem:[%s12283_s28 + $0xd50] sm:$0xff] }
  0xaa   : > { %1518 = vst [vmem:[%s12288_s29 + $0x4b0] sm:$0xff] %v1517_v22  ;;  %v1645_v22 = vld [vmem:[%s12283_s28 + $0xd60] sm:$0xff] }
  0xab   : > { %1520 = vst [vmem:[%s12288_s29 + $0x4b8] sm:$0xff] %v1519_v23  ;;  %v1647_v23 = vld [vmem:[%s12283_s28 + $0xd70] sm:$0xff] }
  0xac   : > { %1522 = vst [vmem:[%s12288_s29 + $0x4c0] sm:$0xff] %v1521_v24  ;;  %v1649_v24 = vld [vmem:[%s12283_s28 + $0xd80] sm:$0xff] }
  0xad   : > { %1524 = vst [vmem:[%s12288_s29 + $0x4c8] sm:$0xff] %v1523_v25  ;;  %v1651_v25 = vld [vmem:[%s12283_s28 + $0xd90] sm:$0xff] }
  0xae   : > { %1526 = vst [vmem:[%s12288_s29 + $0x4d0] sm:$0xff] %v1525_v26  ;;  %v1653_v26 = vld [vmem:[%s12283_s28 + $0xda0] sm:$0xff] }
  0xaf   : > { %1528 = vst [vmem:[%s12288_s29 + $0x4d8] sm:$0xff] %v1527_v27  ;;  %v1655_v27 = vld [vmem:[%s12283_s28 + $0xdb0] sm:$0xff] }
  0xb0   : > { %1530 = vst [vmem:[%s12288_s29 + $0x4e0] sm:$0xff] %v1529_v28  ;;  %v1657_v28 = vld [vmem:[%s12283_s28 + $0xdc0] sm:$0xff] }
  0xb1   : > { %1532 = vst [vmem:[%s12288_s29 + $0x4e8] sm:$0xff] %v1531_v29  ;;  %v1659_v29 = vld [vmem:[%s12283_s28 + $0xdd0] sm:$0xff] }
  0xb2   : > { %1534 = vst [vmem:[%s12288_s29 + $0x4f0] sm:$0xff] %v1533_v30  ;;  %v1661_v30 = vld [vmem:[%s12283_s28 + $0xde0] sm:$0xff] }
  0xb3   : > { %1536 = vst [vmem:[%s12288_s29 + $0x4f8] sm:$0xff] %v1535_v31  ;;  %v1663_v31 = vld [vmem:[%s12283_s28 + $0xdf0] sm:$0xff] }
  0xb4   : > { %1538 = vst [vmem:[%s12288_s29 + $0x500] sm:$0xff] %v1537_v32  ;;  %v1665_v32 = vld [vmem:[%s12283_s28 + $0xe00] sm:$0xff] }
  0xb5   : > { %1540 = vst [vmem:[%s12288_s29 + $0x508] sm:$0xff] %v1539_v33  ;;  %v1667_v33 = vld [vmem:[%s12283_s28 + $0xe10] sm:$0xff] }
  0xb6   : > { %1542 = vst [vmem:[%s12288_s29 + $0x510] sm:$0xff] %v1541_v34  ;;  %v1669_v34 = vld [vmem:[%s12283_s28 + $0xe20] sm:$0xff] }
  0xb7   : > { %1544 = vst [vmem:[%s12288_s29 + $0x518] sm:$0xff] %v1543_v35  ;;  %v1671_v35 = vld [vmem:[%s12283_s28 + $0xe30] sm:$0xff] }
  0xb8   : > { %1546 = vst [vmem:[%s12288_s29 + $0x520] sm:$0xff] %v1545_v36  ;;  %v1673_v36 = vld [vmem:[%s12283_s28 + $0xe40] sm:$0xff] }
  0xb9   : > { %1548 = vst [vmem:[%s12288_s29 + $0x528] sm:$0xff] %v1547_v37  ;;  %v1675_v37 = vld [vmem:[%s12283_s28 + $0xe50] sm:$0xff] }
  0xba   : > { %1550 = vst [vmem:[%s12288_s29 + $0x530] sm:$0xff] %v1549_v38  ;;  %v1677_v38 = vld [vmem:[%s12283_s28 + $0xe60] sm:$0xff] }
  0xbb   : > { %1552 = vst [vmem:[%s12288_s29 + $0x538] sm:$0xff] %v1551_v39  ;;  %v1679_v39 = vld [vmem:[%s12283_s28 + $0xe70] sm:$0xff] }
  0xbc   : > { %1554 = vst [vmem:[%s12288_s29 + $0x540] sm:$0xff] %v1553_v40  ;;  %v1681_v40 = vld [vmem:[%s12283_s28 + $0xe80] sm:$0xff] }
  0xbd   : > { %1556 = vst [vmem:[%s12288_s29 + $0x548] sm:$0xff] %v1555_v41  ;;  %v1683_v41 = vld [vmem:[%s12283_s28 + $0xe90] sm:$0xff] }
  0xbe   : > { %1558 = vst [vmem:[%s12288_s29 + $0x550] sm:$0xff] %v1557_v42  ;;  %v1685_v42 = vld [vmem:[%s12283_s28 + $0xea0] sm:$0xff] }
  0xbf   : > { %1560 = vst [vmem:[%s12288_s29 + $0x558] sm:$0xff] %v1559_v43  ;;  %v1687_v43 = vld [vmem:[%s12283_s28 + $0xeb0] sm:$0xff] }
  0xc0   : > { %1562 = vst [vmem:[%s12288_s29 + $0x560] sm:$0xff] %v1561_v44  ;;  %v1689_v44 = vld [vmem:[%s12283_s28 + $0xec0] sm:$0xff] }
  0xc1   : > { %1564 = vst [vmem:[%s12288_s29 + $0x568] sm:$0xff] %v1563_v45  ;;  %v1691_v45 = vld [vmem:[%s12283_s28 + $0xed0] sm:$0xff] }
  0xc2   : > { %1566 = vst [vmem:[%s12288_s29 + $0x570] sm:$0xff] %v1565_v46  ;;  %v1693_v46 = vld [vmem:[%s12283_s28 + $0xee0] sm:$0xff] }
  0xc3   : > { %1568 = vst [vmem:[%s12288_s29 + $0x578] sm:$0xff] %v1567_v47  ;;  %v1695_v47 = vld [vmem:[%s12283_s28 + $0xef0] sm:$0xff] }
  0xc4   : > { %1570 = vst [vmem:[%s12288_s29 + $0x580] sm:$0xff] %v1569_v48  ;;  %v1697_v48 = vld [vmem:[%s12283_s28 + $0xf00] sm:$0xff] }
  0xc5   : > { %1572 = vst [vmem:[%s12288_s29 + $0x588] sm:$0xff] %v1571_v49  ;;  %v1699_v49 = vld [vmem:[%s12283_s28 + $0xf10] sm:$0xff] }
  0xc6   : > { %1574 = vst [vmem:[%s12288_s29 + $0x590] sm:$0xff] %v1573_v50  ;;  %v1701_v50 = vld [vmem:[%s12283_s28 + $0xf20] sm:$0xff] }
  0xc7   : > { %1576 = vst [vmem:[%s12288_s29 + $0x598] sm:$0xff] %v1575_v51  ;;  %v1703_v51 = vld [vmem:[%s12283_s28 + $0xf30] sm:$0xff] }
  0xc8   : > { %1578 = vst [vmem:[%s12288_s29 + $0x5a0] sm:$0xff] %v1577_v52  ;;  %v1705_v52 = vld [vmem:[%s12283_s28 + $0xf40] sm:$0xff] }
  0xc9   : > { %1580 = vst [vmem:[%s12288_s29 + $0x5a8] sm:$0xff] %v1579_v53  ;;  %v1707_v53 = vld [vmem:[%s12283_s28 + $0xf50] sm:$0xff] }
  0xca   : > { %1582 = vst [vmem:[%s12288_s29 + $0x5b0] sm:$0xff] %v1581_v54  ;;  %v1709_v54 = vld [vmem:[%s12283_s28 + $0xf60] sm:$0xff] }
  0xcb   : > { %1584 = vst [vmem:[%s12288_s29 + $0x5b8] sm:$0xff] %v1583_v55  ;;  %v1711_v55 = vld [vmem:[%s12283_s28 + $0xf70] sm:$0xff] }
  0xcc   : > { %1586 = vst [vmem:[%s12288_s29 + $0x5c0] sm:$0xff] %v1585_v56  ;;  %v1713_v56 = vld [vmem:[%s12283_s28 + $0xf80] sm:$0xff] }
  0xcd   : > { %1588 = vst [vmem:[%s12288_s29 + $0x5c8] sm:$0xff] %v1587_v57  ;;  %v1715_v57 = vld [vmem:[%s12283_s28 + $0xf90] sm:$0xff] }
  0xce   : > { %1590 = vst [vmem:[%s12288_s29 + $0x5d0] sm:$0xff] %v1589_v58  ;;  %v1717_v58 = vld [vmem:[%s12283_s28 + $0xfa0] sm:$0xff] }
  0xcf   : > { %1592 = vst [vmem:[%s12288_s29 + $0x5d8] sm:$0xff] %v1591_v59  ;;  %v1719_v59 = vld [vmem:[%s12283_s28 + $0xfb0] sm:$0xff] }
  0xd0   : > { %1594 = vst [vmem:[%s12288_s29 + $0x5e0] sm:$0xff] %v1593_v60  ;;  %v1721_v60 = vld [vmem:[%s12283_s28 + $0xfc0] sm:$0xff] }
  0xd1   : > { %1596 = vst [vmem:[%s12288_s29 + $0x5e8] sm:$0xff] %v1595_v61  ;;  %v1723_v61 = vld [vmem:[%s12283_s28 + $0xfd0] sm:$0xff] }
  0xd2   : > { %1598 = vst [vmem:[%s12288_s29 + $0x5f0] sm:$0xff] %v1597_v62  ;;  %v1725_v62 = vld [vmem:[%s12283_s28 + $0xfe0] sm:$0xff] }
  0xd3   : > { %1600 = vst [vmem:[%s12288_s29 + $0x5f8] sm:$0xff] %v1599_v63  ;;  %v1727_v63 = vld [vmem:[%s12283_s28 + $0xff0] sm:$0xff] }
  0xd4   : > { %1602 = vst [vmem:[%s12288_s29 + $0x600] sm:$0xff] %v1601_v0  ;;  %v1729_v0 = vld [vmem:[%s12283_s28 + $0x1000] sm:$0xff] }
  0xd5   : > { %1604 = vst [vmem:[%s12288_s29 + $0x608] sm:$0xff] %v1603_v1  ;;  %v1731_v1 = vld [vmem:[%s12283_s28 + $0x1010] sm:$0xff] }
  0xd6   : > { %1606 = vst [vmem:[%s12288_s29 + $0x610] sm:$0xff] %v1605_v2  ;;  %v1733_v2 = vld [vmem:[%s12283_s28 + $0x1020] sm:$0xff] }
  0xd7   : > { %1608 = vst [vmem:[%s12288_s29 + $0x618] sm:$0xff] %v1607_v3  ;;  %v1735_v3 = vld [vmem:[%s12283_s28 + $0x1030] sm:$0xff] }
  0xd8   : > { %1610 = vst [vmem:[%s12288_s29 + $0x620] sm:$0xff] %v1609_v4  ;;  %v1737_v4 = vld [vmem:[%s12283_s28 + $0x1040] sm:$0xff] }
  0xd9   : > { %1612 = vst [vmem:[%s12288_s29 + $0x628] sm:$0xff] %v1611_v5  ;;  %v1739_v5 = vld [vmem:[%s12283_s28 + $0x1050] sm:$0xff] }
  0xda   : > { %1614 = vst [vmem:[%s12288_s29 + $0x630] sm:$0xff] %v1613_v6  ;;  %v1741_v6 = vld [vmem:[%s12283_s28 + $0x1060] sm:$0xff] }
  0xdb   : > { %1616 = vst [vmem:[%s12288_s29 + $0x638] sm:$0xff] %v1615_v7  ;;  %v1743_v7 = vld [vmem:[%s12283_s28 + $0x1070] sm:$0xff] }
  0xdc   : > { %1618 = vst [vmem:[%s12288_s29 + $0x640] sm:$0xff] %v1617_v8  ;;  %v1745_v8 = vld [vmem:[%s12283_s28 + $0x1080] sm:$0xff] }
  0xdd   : > { %1620 = vst [vmem:[%s12288_s29 + $0x648] sm:$0xff] %v1619_v9  ;;  %v1747_v9 = vld [vmem:[%s12283_s28 + $0x1090] sm:$0xff] }
  0xde   : > { %1622 = vst [vmem:[%s12288_s29 + $0x650] sm:$0xff] %v1621_v10  ;;  %v1749_v10 = vld [vmem:[%s12283_s28 + $0x10a0] sm:$0xff] }
  0xdf   : > { %1624 = vst [vmem:[%s12288_s29 + $0x658] sm:$0xff] %v1623_v11  ;;  %v1751_v11 = vld [vmem:[%s12283_s28 + $0x10b0] sm:$0xff] }
  0xe0   : > { %1626 = vst [vmem:[%s12288_s29 + $0x660] sm:$0xff] %v1625_v12  ;;  %v1753_v12 = vld [vmem:[%s12283_s28 + $0x10c0] sm:$0xff] }
  0xe1   : > { %1628 = vst [vmem:[%s12288_s29 + $0x668] sm:$0xff] %v1627_v13  ;;  %v1755_v13 = vld [vmem:[%s12283_s28 + $0x10d0] sm:$0xff] }
  0xe2   : > { %1630 = vst [vmem:[%s12288_s29 + $0x670] sm:$0xff] %v1629_v14  ;;  %v1757_v14 = vld [vmem:[%s12283_s28 + $0x10e0] sm:$0xff] }
  0xe3   : > { %1632 = vst [vmem:[%s12288_s29 + $0x678] sm:$0xff] %v1631_v15  ;;  %v1759_v15 = vld [vmem:[%s12283_s28 + $0x10f0] sm:$0xff] }
  0xe4   : > { %1634 = vst [vmem:[%s12288_s29 + $0x680] sm:$0xff] %v1633_v16  ;;  %v1761_v16 = vld [vmem:[%s12283_s28 + $0x1100] sm:$0xff] }
  0xe5   : > { %1636 = vst [vmem:[%s12288_s29 + $0x688] sm:$0xff] %v1635_v17  ;;  %v1763_v17 = vld [vmem:[%s12283_s28 + $0x1110] sm:$0xff] }
  0xe6   : > { %1638 = vst [vmem:[%s12288_s29 + $0x690] sm:$0xff] %v1637_v18  ;;  %v1765_v18 = vld [vmem:[%s12283_s28 + $0x1120] sm:$0xff] }
  0xe7   : > { %1640 = vst [vmem:[%s12288_s29 + $0x698] sm:$0xff] %v1639_v19  ;;  %v1767_v19 = vld [vmem:[%s12283_s28 + $0x1130] sm:$0xff] }
  0xe8   : > { %1642 = vst [vmem:[%s12288_s29 + $0x6a0] sm:$0xff] %v1641_v20  ;;  %v1769_v20 = vld [vmem:[%s12283_s28 + $0x1140] sm:$0xff] }
  0xe9   : > { %1644 = vst [vmem:[%s12288_s29 + $0x6a8] sm:$0xff] %v1643_v21  ;;  %v1771_v21 = vld [vmem:[%s12283_s28 + $0x1150] sm:$0xff] }
  0xea   : > { %1646 = vst [vmem:[%s12288_s29 + $0x6b0] sm:$0xff] %v1645_v22  ;;  %v1773_v22 = vld [vmem:[%s12283_s28 + $0x1160] sm:$0xff] }
  0xeb   : > { %1648 = vst [vmem:[%s12288_s29 + $0x6b8] sm:$0xff] %v1647_v23  ;;  %v1775_v23 = vld [vmem:[%s12283_s28 + $0x1170] sm:$0xff] }
  0xec   : > { %1650 = vst [vmem:[%s12288_s29 + $0x6c0] sm:$0xff] %v1649_v24  ;;  %v1777_v24 = vld [vmem:[%s12283_s28 + $0x1180] sm:$0xff] }
  0xed   : > { %1652 = vst [vmem:[%s12288_s29 + $0x6c8] sm:$0xff] %v1651_v25  ;;  %v1779_v25 = vld [vmem:[%s12283_s28 + $0x1190] sm:$0xff] }
  0xee   : > { %1654 = vst [vmem:[%s12288_s29 + $0x6d0] sm:$0xff] %v1653_v26  ;;  %v1781_v26 = vld [vmem:[%s12283_s28 + $0x11a0] sm:$0xff] }
  0xef   : > { %1656 = vst [vmem:[%s12288_s29 + $0x6d8] sm:$0xff] %v1655_v27  ;;  %v1783_v27 = vld [vmem:[%s12283_s28 + $0x11b0] sm:$0xff] }
  0xf0   : > { %1658 = vst [vmem:[%s12288_s29 + $0x6e0] sm:$0xff] %v1657_v28  ;;  %v1785_v28 = vld [vmem:[%s12283_s28 + $0x11c0] sm:$0xff] }
  0xf1   : > { %1660 = vst [vmem:[%s12288_s29 + $0x6e8] sm:$0xff] %v1659_v29  ;;  %v1787_v29 = vld [vmem:[%s12283_s28 + $0x11d0] sm:$0xff] }
  0xf2   : > { %1662 = vst [vmem:[%s12288_s29 + $0x6f0] sm:$0xff] %v1661_v30  ;;  %v1789_v30 = vld [vmem:[%s12283_s28 + $0x11e0] sm:$0xff] }
  0xf3   : > { %1664 = vst [vmem:[%s12288_s29 + $0x6f8] sm:$0xff] %v1663_v31  ;;  %v1791_v31 = vld [vmem:[%s12283_s28 + $0x11f0] sm:$0xff] }
  0xf4   : > { %1666 = vst [vmem:[%s12288_s29 + $0x700] sm:$0xff] %v1665_v32  ;;  %v1793_v32 = vld [vmem:[%s12283_s28 + $0x1200] sm:$0xff] }
  0xf5   : > { %1668 = vst [vmem:[%s12288_s29 + $0x708] sm:$0xff] %v1667_v33  ;;  %v1795_v33 = vld [vmem:[%s12283_s28 + $0x1210] sm:$0xff] }
  0xf6   : > { %1670 = vst [vmem:[%s12288_s29 + $0x710] sm:$0xff] %v1669_v34  ;;  %v1797_v34 = vld [vmem:[%s12283_s28 + $0x1220] sm:$0xff] }
  0xf7   : > { %1672 = vst [vmem:[%s12288_s29 + $0x718] sm:$0xff] %v1671_v35  ;;  %v1799_v35 = vld [vmem:[%s12283_s28 + $0x1230] sm:$0xff] }
  0xf8   : > { %1674 = vst [vmem:[%s12288_s29 + $0x720] sm:$0xff] %v1673_v36  ;;  %v1801_v36 = vld [vmem:[%s12283_s28 + $0x1240] sm:$0xff] }
  0xf9   : > { %1676 = vst [vmem:[%s12288_s29 + $0x728] sm:$0xff] %v1675_v37  ;;  %v1803_v37 = vld [vmem:[%s12283_s28 + $0x1250] sm:$0xff] }
  0xfa   : > { %1678 = vst [vmem:[%s12288_s29 + $0x730] sm:$0xff] %v1677_v38  ;;  %v1805_v38 = vld [vmem:[%s12283_s28 + $0x1260] sm:$0xff] }
  0xfb   : > { %1680 = vst [vmem:[%s12288_s29 + $0x738] sm:$0xff] %v1679_v39  ;;  %v1807_v39 = vld [vmem:[%s12283_s28 + $0x1270] sm:$0xff] }
  0xfc   : > { %1682 = vst [vmem:[%s12288_s29 + $0x740] sm:$0xff] %v1681_v40  ;;  %v1809_v40 = vld [vmem:[%s12283_s28 + $0x1280] sm:$0xff] }
  0xfd   : > { %1684 = vst [vmem:[%s12288_s29 + $0x748] sm:$0xff] %v1683_v41  ;;  %v1811_v41 = vld [vmem:[%s12283_s28 + $0x1290] sm:$0xff] }
  0xfe   : > { %1686 = vst [vmem:[%s12288_s29 + $0x750] sm:$0xff] %v1685_v42  ;;  %v1813_v42 = vld [vmem:[%s12283_s28 + $0x12a0] sm:$0xff] }
  0xff   : > { %1688 = vst [vmem:[%s12288_s29 + $0x758] sm:$0xff] %v1687_v43  ;;  %v1815_v43 = vld [vmem:[%s12283_s28 + $0x12b0] sm:$0xff] }
 0x100   : > { %1690 = vst [vmem:[%s12288_s29 + $0x760] sm:$0xff] %v1689_v44  ;;  %v1817_v44 = vld [vmem:[%s12283_s28 + $0x12c0] sm:$0xff] }
 0x101   : > { %1692 = vst [vmem:[%s12288_s29 + $0x768] sm:$0xff] %v1691_v45  ;;  %v1819_v45 = vld [vmem:[%s12283_s28 + $0x12d0] sm:$0xff] }
 0x102   : > { %1694 = vst [vmem:[%s12288_s29 + $0x770] sm:$0xff] %v1693_v46  ;;  %v1821_v46 = vld [vmem:[%s12283_s28 + $0x12e0] sm:$0xff] }
 0x103   : > { %1696 = vst [vmem:[%s12288_s29 + $0x778] sm:$0xff] %v1695_v47  ;;  %v1823_v47 = vld [vmem:[%s12283_s28 + $0x12f0] sm:$0xff] }
 0x104   : > { %1698 = vst [vmem:[%s12288_s29 + $0x780] sm:$0xff] %v1697_v48  ;;  %v1825_v48 = vld [vmem:[%s12283_s28 + $0x1300] sm:$0xff] }
 0x105   : > { %1700 = vst [vmem:[%s12288_s29 + $0x788] sm:$0xff] %v1699_v49  ;;  %v1827_v49 = vld [vmem:[%s12283_s28 + $0x1310] sm:$0xff] }
 0x106   : > { %1702 = vst [vmem:[%s12288_s29 + $0x790] sm:$0xff] %v1701_v50  ;;  %v1829_v50 = vld [vmem:[%s12283_s28 + $0x1320] sm:$0xff] }
 0x107   : > { %1704 = vst [vmem:[%s12288_s29 + $0x798] sm:$0xff] %v1703_v51  ;;  %v1831_v51 = vld [vmem:[%s12283_s28 + $0x1330] sm:$0xff] }
 0x108   : > { %1706 = vst [vmem:[%s12288_s29 + $0x7a0] sm:$0xff] %v1705_v52  ;;  %v1833_v52 = vld [vmem:[%s12283_s28 + $0x1340] sm:$0xff] }
 0x109   : > { %1708 = vst [vmem:[%s12288_s29 + $0x7a8] sm:$0xff] %v1707_v53  ;;  %v1835_v53 = vld [vmem:[%s12283_s28 + $0x1350] sm:$0xff] }
 0x10a   : > { %1710 = vst [vmem:[%s12288_s29 + $0x7b0] sm:$0xff] %v1709_v54  ;;  %v1837_v54 = vld [vmem:[%s12283_s28 + $0x1360] sm:$0xff] }
 0x10b   : > { %1712 = vst [vmem:[%s12288_s29 + $0x7b8] sm:$0xff] %v1711_v55  ;;  %v1839_v55 = vld [vmem:[%s12283_s28 + $0x1370] sm:$0xff] }
 0x10c   : > { %1714 = vst [vmem:[%s12288_s29 + $0x7c0] sm:$0xff] %v1713_v56  ;;  %v1841_v56 = vld [vmem:[%s12283_s28 + $0x1380] sm:$0xff] }
 0x10d   : > { %1716 = vst [vmem:[%s12288_s29 + $0x7c8] sm:$0xff] %v1715_v57  ;;  %v1843_v57 = vld [vmem:[%s12283_s28 + $0x1390] sm:$0xff] }
 0x10e   : > { %1718 = vst [vmem:[%s12288_s29 + $0x7d0] sm:$0xff] %v1717_v58  ;;  %v1845_v58 = vld [vmem:[%s12283_s28 + $0x13a0] sm:$0xff] }
 0x10f   : > { %1720 = vst [vmem:[%s12288_s29 + $0x7d8] sm:$0xff] %v1719_v59  ;;  %v1847_v59 = vld [vmem:[%s12283_s28 + $0x13b0] sm:$0xff] }
 0x110   : > { %1722 = vst [vmem:[%s12288_s29 + $0x7e0] sm:$0xff] %v1721_v60  ;;  %v1849_v60 = vld [vmem:[%s12283_s28 + $0x13c0] sm:$0xff] }
 0x111   : > { %1724 = vst [vmem:[%s12288_s29 + $0x7e8] sm:$0xff] %v1723_v61  ;;  %v1851_v61 = vld [vmem:[%s12283_s28 + $0x13d0] sm:$0xff] }
 0x112   : > { %1726 = vst [vmem:[%s12288_s29 + $0x7f0] sm:$0xff] %v1725_v62  ;;  %v1853_v62 = vld [vmem:[%s12283_s28 + $0x13e0] sm:$0xff] }
 0x113   : > { %1728 = vst [vmem:[%s12288_s29 + $0x7f8] sm:$0xff] %v1727_v63  ;;  %v1855_v63 = vld [vmem:[%s12283_s28 + $0x13f0] sm:$0xff] }
 0x114   : > { %1730 = vst [vmem:[%s12288_s29 + $0x800] sm:$0xff] %v1729_v0  ;;  %v1857_v0 = vld [vmem:[%s12283_s28 + $0x1400] sm:$0xff] }
 0x115   : > { %1732 = vst [vmem:[%s12288_s29 + $0x808] sm:$0xff] %v1731_v1  ;;  %v1859_v1 = vld [vmem:[%s12283_s28 + $0x1410] sm:$0xff] }
 0x116   : > { %1734 = vst [vmem:[%s12288_s29 + $0x810] sm:$0xff] %v1733_v2  ;;  %v1861_v2 = vld [vmem:[%s12283_s28 + $0x1420] sm:$0xff] }
 0x117   : > { %1736 = vst [vmem:[%s12288_s29 + $0x818] sm:$0xff] %v1735_v3  ;;  %v1863_v3 = vld [vmem:[%s12283_s28 + $0x1430] sm:$0xff] }
 0x118   : > { %1738 = vst [vmem:[%s12288_s29 + $0x820] sm:$0xff] %v1737_v4  ;;  %v1865_v4 = vld [vmem:[%s12283_s28 + $0x1440] sm:$0xff] }
 0x119   : > { %1740 = vst [vmem:[%s12288_s29 + $0x828] sm:$0xff] %v1739_v5  ;;  %v1867_v5 = vld [vmem:[%s12283_s28 + $0x1450] sm:$0xff] }
 0x11a   : > { %1742 = vst [vmem:[%s12288_s29 + $0x830] sm:$0xff] %v1741_v6  ;;  %v1869_v6 = vld [vmem:[%s12283_s28 + $0x1460] sm:$0xff] }
 0x11b   : > { %1744 = vst [vmem:[%s12288_s29 + $0x838] sm:$0xff] %v1743_v7  ;;  %v1871_v7 = vld [vmem:[%s12283_s28 + $0x1470] sm:$0xff] }
 0x11c   : > { %1746 = vst [vmem:[%s12288_s29 + $0x840] sm:$0xff] %v1745_v8  ;;  %v1873_v8 = vld [vmem:[%s12283_s28 + $0x1480] sm:$0xff] }
 0x11d   : > { %1748 = vst [vmem:[%s12288_s29 + $0x848] sm:$0xff] %v1747_v9  ;;  %v1875_v9 = vld [vmem:[%s12283_s28 + $0x1490] sm:$0xff] }
 0x11e   : > { %1750 = vst [vmem:[%s12288_s29 + $0x850] sm:$0xff] %v1749_v10  ;;  %v1877_v10 = vld [vmem:[%s12283_s28 + $0x14a0] sm:$0xff] }
 0x11f   : > { %1752 = vst [vmem:[%s12288_s29 + $0x858] sm:$0xff] %v1751_v11  ;;  %v1879_v11 = vld [vmem:[%s12283_s28 + $0x14b0] sm:$0xff] }
 0x120   : > { %1754 = vst [vmem:[%s12288_s29 + $0x860] sm:$0xff] %v1753_v12  ;;  %v1881_v12 = vld [vmem:[%s12283_s28 + $0x14c0] sm:$0xff] }
 0x121   : > { %1756 = vst [vmem:[%s12288_s29 + $0x868] sm:$0xff] %v1755_v13  ;;  %v1883_v13 = vld [vmem:[%s12283_s28 + $0x14d0] sm:$0xff] }
 0x122   : > { %1758 = vst [vmem:[%s12288_s29 + $0x870] sm:$0xff] %v1757_v14  ;;  %v1885_v14 = vld [vmem:[%s12283_s28 + $0x14e0] sm:$0xff] }
 0x123   : > { %1760 = vst [vmem:[%s12288_s29 + $0x878] sm:$0xff] %v1759_v15  ;;  %v1887_v15 = vld [vmem:[%s12283_s28 + $0x14f0] sm:$0xff] }
 0x124   : > { %1762 = vst [vmem:[%s12288_s29 + $0x880] sm:$0xff] %v1761_v16  ;;  %v1889_v16 = vld [vmem:[%s12283_s28 + $0x1500] sm:$0xff] }
 0x125   : > { %1764 = vst [vmem:[%s12288_s29 + $0x888] sm:$0xff] %v1763_v17  ;;  %v1891_v17 = vld [vmem:[%s12283_s28 + $0x1510] sm:$0xff] }
 0x126   : > { %1766 = vst [vmem:[%s12288_s29 + $0x890] sm:$0xff] %v1765_v18  ;;  %v1893_v18 = vld [vmem:[%s12283_s28 + $0x1520] sm:$0xff] }
 0x127   : > { %1768 = vst [vmem:[%s12288_s29 + $0x898] sm:$0xff] %v1767_v19  ;;  %v1895_v19 = vld [vmem:[%s12283_s28 + $0x1530] sm:$0xff] }
 0x128   : > { %1770 = vst [vmem:[%s12288_s29 + $0x8a0] sm:$0xff] %v1769_v20  ;;  %v1897_v20 = vld [vmem:[%s12283_s28 + $0x1540] sm:$0xff] }
 0x129   : > { %1772 = vst [vmem:[%s12288_s29 + $0x8a8] sm:$0xff] %v1771_v21  ;;  %v1899_v21 = vld [vmem:[%s12283_s28 + $0x1550] sm:$0xff] }
 0x12a   : > { %1774 = vst [vmem:[%s12288_s29 + $0x8b0] sm:$0xff] %v1773_v22  ;;  %v1901_v22 = vld [vmem:[%s12283_s28 + $0x1560] sm:$0xff] }
 0x12b   : > { %1776 = vst [vmem:[%s12288_s29 + $0x8b8] sm:$0xff] %v1775_v23  ;;  %v1903_v23 = vld [vmem:[%s12283_s28 + $0x1570] sm:$0xff] }
 0x12c   : > { %1778 = vst [vmem:[%s12288_s29 + $0x8c0] sm:$0xff] %v1777_v24  ;;  %v1905_v24 = vld [vmem:[%s12283_s28 + $0x1580] sm:$0xff] }
 0x12d   : > { %1780 = vst [vmem:[%s12288_s29 + $0x8c8] sm:$0xff] %v1779_v25  ;;  %v1907_v25 = vld [vmem:[%s12283_s28 + $0x1590] sm:$0xff] }
 0x12e   : > { %1782 = vst [vmem:[%s12288_s29 + $0x8d0] sm:$0xff] %v1781_v26  ;;  %v1909_v26 = vld [vmem:[%s12283_s28 + $0x15a0] sm:$0xff] }
 0x12f   : > { %1784 = vst [vmem:[%s12288_s29 + $0x8d8] sm:$0xff] %v1783_v27  ;;  %v1911_v27 = vld [vmem:[%s12283_s28 + $0x15b0] sm:$0xff] }
 0x130   : > { %1786 = vst [vmem:[%s12288_s29 + $0x8e0] sm:$0xff] %v1785_v28  ;;  %v1913_v28 = vld [vmem:[%s12283_s28 + $0x15c0] sm:$0xff] }
 0x131   : > { %1788 = vst [vmem:[%s12288_s29 + $0x8e8] sm:$0xff] %v1787_v29  ;;  %v1915_v29 = vld [vmem:[%s12283_s28 + $0x15d0] sm:$0xff] }
 0x132   : > { %1790 = vst [vmem:[%s12288_s29 + $0x8f0] sm:$0xff] %v1789_v30  ;;  %v1917_v30 = vld [vmem:[%s12283_s28 + $0x15e0] sm:$0xff] }
 0x133   : > { %1792 = vst [vmem:[%s12288_s29 + $0x8f8] sm:$0xff] %v1791_v31  ;;  %v1919_v31 = vld [vmem:[%s12283_s28 + $0x15f0] sm:$0xff] }
 0x134   : > { %1794 = vst [vmem:[%s12288_s29 + $0x900] sm:$0xff] %v1793_v32  ;;  %v1921_v32 = vld [vmem:[%s12283_s28 + $0x1600] sm:$0xff] }
 0x135   : > { %1796 = vst [vmem:[%s12288_s29 + $0x908] sm:$0xff] %v1795_v33  ;;  %v1923_v33 = vld [vmem:[%s12283_s28 + $0x1610] sm:$0xff] }
 0x136   : > { %1798 = vst [vmem:[%s12288_s29 + $0x910] sm:$0xff] %v1797_v34  ;;  %v1925_v34 = vld [vmem:[%s12283_s28 + $0x1620] sm:$0xff] }
 0x137   : > { %1800 = vst [vmem:[%s12288_s29 + $0x918] sm:$0xff] %v1799_v35  ;;  %v1927_v35 = vld [vmem:[%s12283_s28 + $0x1630] sm:$0xff] }
 0x138   : > { %1802 = vst [vmem:[%s12288_s29 + $0x920] sm:$0xff] %v1801_v36  ;;  %v1929_v36 = vld [vmem:[%s12283_s28 + $0x1640] sm:$0xff] }
 0x139   : > { %1804 = vst [vmem:[%s12288_s29 + $0x928] sm:$0xff] %v1803_v37  ;;  %v1931_v37 = vld [vmem:[%s12283_s28 + $0x1650] sm:$0xff] }
 0x13a   : > { %1806 = vst [vmem:[%s12288_s29 + $0x930] sm:$0xff] %v1805_v38  ;;  %v1933_v38 = vld [vmem:[%s12283_s28 + $0x1660] sm:$0xff] }
 0x13b   : > { %1808 = vst [vmem:[%s12288_s29 + $0x938] sm:$0xff] %v1807_v39  ;;  %v1935_v39 = vld [vmem:[%s12283_s28 + $0x1670] sm:$0xff] }
 0x13c   : > { %1810 = vst [vmem:[%s12288_s29 + $0x940] sm:$0xff] %v1809_v40  ;;  %v1937_v40 = vld [vmem:[%s12283_s28 + $0x1680] sm:$0xff] }
 0x13d   : > { %1812 = vst [vmem:[%s12288_s29 + $0x948] sm:$0xff] %v1811_v41  ;;  %v1939_v41 = vld [vmem:[%s12283_s28 + $0x1690] sm:$0xff] }
 0x13e   : > { %1814 = vst [vmem:[%s12288_s29 + $0x950] sm:$0xff] %v1813_v42  ;;  %v1941_v42 = vld [vmem:[%s12283_s28 + $0x16a0] sm:$0xff] }
 0x13f   : > { %1816 = vst [vmem:[%s12288_s29 + $0x958] sm:$0xff] %v1815_v43  ;;  %v1943_v43 = vld [vmem:[%s12283_s28 + $0x16b0] sm:$0xff] }
 0x140   : > { %1818 = vst [vmem:[%s12288_s29 + $0x960] sm:$0xff] %v1817_v44  ;;  %v1945_v44 = vld [vmem:[%s12283_s28 + $0x16c0] sm:$0xff] }
 0x141   : > { %1820 = vst [vmem:[%s12288_s29 + $0x968] sm:$0xff] %v1819_v45  ;;  %v1947_v45 = vld [vmem:[%s12283_s28 + $0x16d0] sm:$0xff] }
 0x142   : > { %1822 = vst [vmem:[%s12288_s29 + $0x970] sm:$0xff] %v1821_v46  ;;  %v1949_v46 = vld [vmem:[%s12283_s28 + $0x16e0] sm:$0xff] }
 0x143   : > { %1824 = vst [vmem:[%s12288_s29 + $0x978] sm:$0xff] %v1823_v47  ;;  %v1951_v47 = vld [vmem:[%s12283_s28 + $0x16f0] sm:$0xff] }
 0x144   : > { %1826 = vst [vmem:[%s12288_s29 + $0x980] sm:$0xff] %v1825_v48  ;;  %v1953_v48 = vld [vmem:[%s12283_s28 + $0x1700] sm:$0xff] }
 0x145   : > { %1828 = vst [vmem:[%s12288_s29 + $0x988] sm:$0xff] %v1827_v49  ;;  %v1955_v49 = vld [vmem:[%s12283_s28 + $0x1710] sm:$0xff] }
 0x146   : > { %1830 = vst [vmem:[%s12288_s29 + $0x990] sm:$0xff] %v1829_v50  ;;  %v1957_v50 = vld [vmem:[%s12283_s28 + $0x1720] sm:$0xff] }
 0x147   : > { %1832 = vst [vmem:[%s12288_s29 + $0x998] sm:$0xff] %v1831_v51  ;;  %v1959_v51 = vld [vmem:[%s12283_s28 + $0x1730] sm:$0xff] }
 0x148   : > { %1834 = vst [vmem:[%s12288_s29 + $0x9a0] sm:$0xff] %v1833_v52  ;;  %v1961_v52 = vld [vmem:[%s12283_s28 + $0x1740] sm:$0xff] }
 0x149   : > { %1836 = vst [vmem:[%s12288_s29 + $0x9a8] sm:$0xff] %v1835_v53  ;;  %v1963_v53 = vld [vmem:[%s12283_s28 + $0x1750] sm:$0xff] }
 0x14a   : > { %1838 = vst [vmem:[%s12288_s29 + $0x9b0] sm:$0xff] %v1837_v54  ;;  %v1965_v54 = vld [vmem:[%s12283_s28 + $0x1760] sm:$0xff] }
 0x14b   : > { %1840 = vst [vmem:[%s12288_s29 + $0x9b8] sm:$0xff] %v1839_v55  ;;  %v1967_v55 = vld [vmem:[%s12283_s28 + $0x1770] sm:$0xff] }
 0x14c   : > { %1842 = vst [vmem:[%s12288_s29 + $0x9c0] sm:$0xff] %v1841_v56  ;;  %v1969_v56 = vld [vmem:[%s12283_s28 + $0x1780] sm:$0xff] }
 0x14d   : > { %1844 = vst [vmem:[%s12288_s29 + $0x9c8] sm:$0xff] %v1843_v57  ;;  %v1971_v57 = vld [vmem:[%s12283_s28 + $0x1790] sm:$0xff] }
 0x14e   : > { %1846 = vst [vmem:[%s12288_s29 + $0x9d0] sm:$0xff] %v1845_v58  ;;  %v1973_v58 = vld [vmem:[%s12283_s28 + $0x17a0] sm:$0xff] }
 0x14f   : > { %1848 = vst [vmem:[%s12288_s29 + $0x9d8] sm:$0xff] %v1847_v59  ;;  %v1975_v59 = vld [vmem:[%s12283_s28 + $0x17b0] sm:$0xff] }
 0x150   : > { %1850 = vst [vmem:[%s12288_s29 + $0x9e0] sm:$0xff] %v1849_v60  ;;  %v1977_v60 = vld [vmem:[%s12283_s28 + $0x17c0] sm:$0xff] }
 0x151   : > { %1852 = vst [vmem:[%s12288_s29 + $0x9e8] sm:$0xff] %v1851_v61  ;;  %v1979_v61 = vld [vmem:[%s12283_s28 + $0x17d0] sm:$0xff] }
 0x152   : > { %1854 = vst [vmem:[%s12288_s29 + $0x9f0] sm:$0xff] %v1853_v62  ;;  %v1981_v62 = vld [vmem:[%s12283_s28 + $0x17e0] sm:$0xff] }
 0x153   : > { %1856 = vst [vmem:[%s12288_s29 + $0x9f8] sm:$0xff] %v1855_v63  ;;  %v1983_v63 = vld [vmem:[%s12283_s28 + $0x17f0] sm:$0xff] }
 0x154   : > { %1858 = vst [vmem:[%s12288_s29 + $0xa00] sm:$0xff] %v1857_v0  ;;  %v1985_v0 = vld [vmem:[%s12283_s28 + $0x1800] sm:$0xff] }
 0x155   : > { %1860 = vst [vmem:[%s12288_s29 + $0xa08] sm:$0xff] %v1859_v1  ;;  %v1987_v1 = vld [vmem:[%s12283_s28 + $0x1810] sm:$0xff] }
 0x156   : > { %1862 = vst [vmem:[%s12288_s29 + $0xa10] sm:$0xff] %v1861_v2  ;;  %v1989_v2 = vld [vmem:[%s12283_s28 + $0x1820] sm:$0xff] }
 0x157   : > { %1864 = vst [vmem:[%s12288_s29 + $0xa18] sm:$0xff] %v1863_v3  ;;  %v1991_v3 = vld [vmem:[%s12283_s28 + $0x1830] sm:$0xff] }
 0x158   : > { %1866 = vst [vmem:[%s12288_s29 + $0xa20] sm:$0xff] %v1865_v4  ;;  %v1993_v4 = vld [vmem:[%s12283_s28 + $0x1840] sm:$0xff] }
 0x159   : > { %1868 = vst [vmem:[%s12288_s29 + $0xa28] sm:$0xff] %v1867_v5  ;;  %v1995_v5 = vld [vmem:[%s12283_s28 + $0x1850] sm:$0xff] }
 0x15a   : > { %1870 = vst [vmem:[%s12288_s29 + $0xa30] sm:$0xff] %v1869_v6  ;;  %v1997_v6 = vld [vmem:[%s12283_s28 + $0x1860] sm:$0xff] }
 0x15b   : > { %1872 = vst [vmem:[%s12288_s29 + $0xa38] sm:$0xff] %v1871_v7  ;;  %v1999_v7 = vld [vmem:[%s12283_s28 + $0x1870] sm:$0xff] }
 0x15c   : > { %1874 = vst [vmem:[%s12288_s29 + $0xa40] sm:$0xff] %v1873_v8  ;;  %v2001_v8 = vld [vmem:[%s12283_s28 + $0x1880] sm:$0xff] }
 0x15d   : > { %1876 = vst [vmem:[%s12288_s29 + $0xa48] sm:$0xff] %v1875_v9  ;;  %v2003_v9 = vld [vmem:[%s12283_s28 + $0x1890] sm:$0xff] }
 0x15e   : > { %1878 = vst [vmem:[%s12288_s29 + $0xa50] sm:$0xff] %v1877_v10  ;;  %v2005_v10 = vld [vmem:[%s12283_s28 + $0x18a0] sm:$0xff] }
 0x15f   : > { %1880 = vst [vmem:[%s12288_s29 + $0xa58] sm:$0xff] %v1879_v11  ;;  %v2007_v11 = vld [vmem:[%s12283_s28 + $0x18b0] sm:$0xff] }
 0x160   : > { %1882 = vst [vmem:[%s12288_s29 + $0xa60] sm:$0xff] %v1881_v12  ;;  %v2009_v12 = vld [vmem:[%s12283_s28 + $0x18c0] sm:$0xff] }
 0x161   : > { %1884 = vst [vmem:[%s12288_s29 + $0xa68] sm:$0xff] %v1883_v13  ;;  %v2011_v13 = vld [vmem:[%s12283_s28 + $0x18d0] sm:$0xff] }
 0x162   : > { %1886 = vst [vmem:[%s12288_s29 + $0xa70] sm:$0xff] %v1885_v14  ;;  %v2013_v14 = vld [vmem:[%s12283_s28 + $0x18e0] sm:$0xff] }
 0x163   : > { %1888 = vst [vmem:[%s12288_s29 + $0xa78] sm:$0xff] %v1887_v15  ;;  %v2015_v15 = vld [vmem:[%s12283_s28 + $0x18f0] sm:$0xff] }
 0x164   : > { %1890 = vst [vmem:[%s12288_s29 + $0xa80] sm:$0xff] %v1889_v16  ;;  %v2017_v16 = vld [vmem:[%s12283_s28 + $0x1900] sm:$0xff] }
 0x165   : > { %1892 = vst [vmem:[%s12288_s29 + $0xa88] sm:$0xff] %v1891_v17  ;;  %v2019_v17 = vld [vmem:[%s12283_s28 + $0x1910] sm:$0xff] }
 0x166   : > { %1894 = vst [vmem:[%s12288_s29 + $0xa90] sm:$0xff] %v1893_v18  ;;  %v2021_v18 = vld [vmem:[%s12283_s28 + $0x1920] sm:$0xff] }
 0x167   : > { %1896 = vst [vmem:[%s12288_s29 + $0xa98] sm:$0xff] %v1895_v19  ;;  %v2023_v19 = vld [vmem:[%s12283_s28 + $0x1930] sm:$0xff] }
 0x168   : > { %1898 = vst [vmem:[%s12288_s29 + $0xaa0] sm:$0xff] %v1897_v20  ;;  %v2025_v20 = vld [vmem:[%s12283_s28 + $0x1940] sm:$0xff] }
 0x169   : > { %1900 = vst [vmem:[%s12288_s29 + $0xaa8] sm:$0xff] %v1899_v21  ;;  %v2027_v21 = vld [vmem:[%s12283_s28 + $0x1950] sm:$0xff] }
 0x16a   : > { %1902 = vst [vmem:[%s12288_s29 + $0xab0] sm:$0xff] %v1901_v22  ;;  %v2029_v22 = vld [vmem:[%s12283_s28 + $0x1960] sm:$0xff] }
 0x16b   : > { %1904 = vst [vmem:[%s12288_s29 + $0xab8] sm:$0xff] %v1903_v23  ;;  %v2031_v23 = vld [vmem:[%s12283_s28 + $0x1970] sm:$0xff] }
 0x16c   : > { %1906 = vst [vmem:[%s12288_s29 + $0xac0] sm:$0xff] %v1905_v24  ;;  %v2033_v24 = vld [vmem:[%s12283_s28 + $0x1980] sm:$0xff] }
 0x16d   : > { %1908 = vst [vmem:[%s12288_s29 + $0xac8] sm:$0xff] %v1907_v25  ;;  %v2035_v25 = vld [vmem:[%s12283_s28 + $0x1990] sm:$0xff] }
 0x16e   : > { %1910 = vst [vmem:[%s12288_s29 + $0xad0] sm:$0xff] %v1909_v26  ;;  %v2037_v26 = vld [vmem:[%s12283_s28 + $0x19a0] sm:$0xff] }
 0x16f   : > { %1912 = vst [vmem:[%s12288_s29 + $0xad8] sm:$0xff] %v1911_v27  ;;  %v2039_v27 = vld [vmem:[%s12283_s28 + $0x19b0] sm:$0xff] }
 0x170   : > { %1914 = vst [vmem:[%s12288_s29 + $0xae0] sm:$0xff] %v1913_v28  ;;  %v2041_v28 = vld [vmem:[%s12283_s28 + $0x19c0] sm:$0xff] }
 0x171   : > { %1916 = vst [vmem:[%s12288_s29 + $0xae8] sm:$0xff] %v1915_v29  ;;  %v2043_v29 = vld [vmem:[%s12283_s28 + $0x19d0] sm:$0xff] }
 0x172   : > { %1918 = vst [vmem:[%s12288_s29 + $0xaf0] sm:$0xff] %v1917_v30  ;;  %v2045_v30 = vld [vmem:[%s12283_s28 + $0x19e0] sm:$0xff] }
 0x173   : > { %1920 = vst [vmem:[%s12288_s29 + $0xaf8] sm:$0xff] %v1919_v31  ;;  %v2047_v31 = vld [vmem:[%s12283_s28 + $0x19f0] sm:$0xff] }
 0x174   : > { %1922 = vst [vmem:[%s12288_s29 + $0xb00] sm:$0xff] %v1921_v32  ;;  %v2049_v32 = vld [vmem:[%s12283_s28 + $0x1a00] sm:$0xff] }
 0x175   : > { %1924 = vst [vmem:[%s12288_s29 + $0xb08] sm:$0xff] %v1923_v33  ;;  %v2051_v33 = vld [vmem:[%s12283_s28 + $0x1a10] sm:$0xff] }
 0x176   : > { %1926 = vst [vmem:[%s12288_s29 + $0xb10] sm:$0xff] %v1925_v34  ;;  %v2053_v34 = vld [vmem:[%s12283_s28 + $0x1a20] sm:$0xff] }
 0x177   : > { %1928 = vst [vmem:[%s12288_s29 + $0xb18] sm:$0xff] %v1927_v35  ;;  %v2055_v35 = vld [vmem:[%s12283_s28 + $0x1a30] sm:$0xff] }
 0x178   : > { %1930 = vst [vmem:[%s12288_s29 + $0xb20] sm:$0xff] %v1929_v36  ;;  %v2057_v36 = vld [vmem:[%s12283_s28 + $0x1a40] sm:$0xff] }
 0x179   : > { %1932 = vst [vmem:[%s12288_s29 + $0xb28] sm:$0xff] %v1931_v37  ;;  %v2059_v37 = vld [vmem:[%s12283_s28 + $0x1a50] sm:$0xff] }
 0x17a   : > { %1934 = vst [vmem:[%s12288_s29 + $0xb30] sm:$0xff] %v1933_v38  ;;  %v2061_v38 = vld [vmem:[%s12283_s28 + $0x1a60] sm:$0xff] }
 0x17b   : > { %1936 = vst [vmem:[%s12288_s29 + $0xb38] sm:$0xff] %v1935_v39  ;;  %v2063_v39 = vld [vmem:[%s12283_s28 + $0x1a70] sm:$0xff] }
 0x17c   : > { %1938 = vst [vmem:[%s12288_s29 + $0xb40] sm:$0xff] %v1937_v40  ;;  %v2065_v40 = vld [vmem:[%s12283_s28 + $0x1a80] sm:$0xff] }
 0x17d   : > { %1940 = vst [vmem:[%s12288_s29 + $0xb48] sm:$0xff] %v1939_v41  ;;  %v2067_v41 = vld [vmem:[%s12283_s28 + $0x1a90] sm:$0xff] }
 0x17e   : > { %1942 = vst [vmem:[%s12288_s29 + $0xb50] sm:$0xff] %v1941_v42  ;;  %v2069_v42 = vld [vmem:[%s12283_s28 + $0x1aa0] sm:$0xff] }
 0x17f   : > { %1944 = vst [vmem:[%s12288_s29 + $0xb58] sm:$0xff] %v1943_v43  ;;  %v2071_v43 = vld [vmem:[%s12283_s28 + $0x1ab0] sm:$0xff] }
 0x180   : > { %1946 = vst [vmem:[%s12288_s29 + $0xb60] sm:$0xff] %v1945_v44  ;;  %v2073_v44 = vld [vmem:[%s12283_s28 + $0x1ac0] sm:$0xff] }
 0x181   : > { %1948 = vst [vmem:[%s12288_s29 + $0xb68] sm:$0xff] %v1947_v45  ;;  %v2075_v45 = vld [vmem:[%s12283_s28 + $0x1ad0] sm:$0xff] }
 0x182   : > { %1950 = vst [vmem:[%s12288_s29 + $0xb70] sm:$0xff] %v1949_v46  ;;  %v2077_v46 = vld [vmem:[%s12283_s28 + $0x1ae0] sm:$0xff] }
 0x183   : > { %1952 = vst [vmem:[%s12288_s29 + $0xb78] sm:$0xff] %v1951_v47  ;;  %v2079_v47 = vld [vmem:[%s12283_s28 + $0x1af0] sm:$0xff] }
 0x184   : > { %1954 = vst [vmem:[%s12288_s29 + $0xb80] sm:$0xff] %v1953_v48  ;;  %v2081_v48 = vld [vmem:[%s12283_s28 + $0x1b00] sm:$0xff] }
 0x185   : > { %1956 = vst [vmem:[%s12288_s29 + $0xb88] sm:$0xff] %v1955_v49  ;;  %v2083_v49 = vld [vmem:[%s12283_s28 + $0x1b10] sm:$0xff] }
 0x186   : > { %1958 = vst [vmem:[%s12288_s29 + $0xb90] sm:$0xff] %v1957_v50  ;;  %v2085_v50 = vld [vmem:[%s12283_s28 + $0x1b20] sm:$0xff] }
 0x187   : > { %1960 = vst [vmem:[%s12288_s29 + $0xb98] sm:$0xff] %v1959_v51  ;;  %v2087_v51 = vld [vmem:[%s12283_s28 + $0x1b30] sm:$0xff] }
 0x188   : > { %1962 = vst [vmem:[%s12288_s29 + $0xba0] sm:$0xff] %v1961_v52  ;;  %v2089_v52 = vld [vmem:[%s12283_s28 + $0x1b40] sm:$0xff] }
 0x189   : > { %1964 = vst [vmem:[%s12288_s29 + $0xba8] sm:$0xff] %v1963_v53  ;;  %v2091_v53 = vld [vmem:[%s12283_s28 + $0x1b50] sm:$0xff] }
 0x18a   : > { %1966 = vst [vmem:[%s12288_s29 + $0xbb0] sm:$0xff] %v1965_v54  ;;  %v2093_v54 = vld [vmem:[%s12283_s28 + $0x1b60] sm:$0xff] }
 0x18b   : > { %1968 = vst [vmem:[%s12288_s29 + $0xbb8] sm:$0xff] %v1967_v55  ;;  %v2095_v55 = vld [vmem:[%s12283_s28 + $0x1b70] sm:$0xff] }
 0x18c   : > { %1970 = vst [vmem:[%s12288_s29 + $0xbc0] sm:$0xff] %v1969_v56  ;;  %v2097_v56 = vld [vmem:[%s12283_s28 + $0x1b80] sm:$0xff] }
 0x18d   : > { %1972 = vst [vmem:[%s12288_s29 + $0xbc8] sm:$0xff] %v1971_v57  ;;  %v2099_v57 = vld [vmem:[%s12283_s28 + $0x1b90] sm:$0xff] }
 0x18e   : > { %1974 = vst [vmem:[%s12288_s29 + $0xbd0] sm:$0xff] %v1973_v58  ;;  %v2101_v58 = vld [vmem:[%s12283_s28 + $0x1ba0] sm:$0xff] }
 0x18f   : > { %1976 = vst [vmem:[%s12288_s29 + $0xbd8] sm:$0xff] %v1975_v59  ;;  %v2103_v59 = vld [vmem:[%s12283_s28 + $0x1bb0] sm:$0xff] }
 0x190   : > { %1978 = vst [vmem:[%s12288_s29 + $0xbe0] sm:$0xff] %v1977_v60  ;;  %v2105_v60 = vld [vmem:[%s12283_s28 + $0x1bc0] sm:$0xff] }
 0x191   : > { %1980 = vst [vmem:[%s12288_s29 + $0xbe8] sm:$0xff] %v1979_v61  ;;  %v2107_v61 = vld [vmem:[%s12283_s28 + $0x1bd0] sm:$0xff] }
 0x192   : > { %1982 = vst [vmem:[%s12288_s29 + $0xbf0] sm:$0xff] %v1981_v62  ;;  %v2109_v62 = vld [vmem:[%s12283_s28 + $0x1be0] sm:$0xff] }
 0x193   : > { %1984 = vst [vmem:[%s12288_s29 + $0xbf8] sm:$0xff] %v1983_v63  ;;  %v2111_v63 = vld [vmem:[%s12283_s28 + $0x1bf0] sm:$0xff] }
 0x194   : > { %1986 = vst [vmem:[%s12288_s29 + $0xc00] sm:$0xff] %v1985_v0  ;;  %v2113_v0 = vld [vmem:[%s12283_s28 + $0x1c00] sm:$0xff] }
 0x195   : > { %1988 = vst [vmem:[%s12288_s29 + $0xc08] sm:$0xff] %v1987_v1  ;;  %v2115_v1 = vld [vmem:[%s12283_s28 + $0x1c10] sm:$0xff] }
 0x196   : > { %1990 = vst [vmem:[%s12288_s29 + $0xc10] sm:$0xff] %v1989_v2  ;;  %v2117_v2 = vld [vmem:[%s12283_s28 + $0x1c20] sm:$0xff] }
 0x197   : > { %1992 = vst [vmem:[%s12288_s29 + $0xc18] sm:$0xff] %v1991_v3  ;;  %v2119_v3 = vld [vmem:[%s12283_s28 + $0x1c30] sm:$0xff] }
 0x198   : > { %1994 = vst [vmem:[%s12288_s29 + $0xc20] sm:$0xff] %v1993_v4  ;;  %v2121_v4 = vld [vmem:[%s12283_s28 + $0x1c40] sm:$0xff] }
 0x199   : > { %1996 = vst [vmem:[%s12288_s29 + $0xc28] sm:$0xff] %v1995_v5  ;;  %v2123_v5 = vld [vmem:[%s12283_s28 + $0x1c50] sm:$0xff] }
 0x19a   : > { %1998 = vst [vmem:[%s12288_s29 + $0xc30] sm:$0xff] %v1997_v6  ;;  %v2125_v6 = vld [vmem:[%s12283_s28 + $0x1c60] sm:$0xff] }
 0x19b   : > { %2000 = vst [vmem:[%s12288_s29 + $0xc38] sm:$0xff] %v1999_v7  ;;  %v2127_v7 = vld [vmem:[%s12283_s28 + $0x1c70] sm:$0xff] }
 0x19c   : > { %2002 = vst [vmem:[%s12288_s29 + $0xc40] sm:$0xff] %v2001_v8  ;;  %v2129_v8 = vld [vmem:[%s12283_s28 + $0x1c80] sm:$0xff] }
 0x19d   : > { %2004 = vst [vmem:[%s12288_s29 + $0xc48] sm:$0xff] %v2003_v9  ;;  %v2131_v9 = vld [vmem:[%s12283_s28 + $0x1c90] sm:$0xff] }
 0x19e   : > { %2006 = vst [vmem:[%s12288_s29 + $0xc50] sm:$0xff] %v2005_v10  ;;  %v2133_v10 = vld [vmem:[%s12283_s28 + $0x1ca0] sm:$0xff] }
 0x19f   : > { %2008 = vst [vmem:[%s12288_s29 + $0xc58] sm:$0xff] %v2007_v11  ;;  %v2135_v11 = vld [vmem:[%s12283_s28 + $0x1cb0] sm:$0xff] }
 0x1a0   : > { %2010 = vst [vmem:[%s12288_s29 + $0xc60] sm:$0xff] %v2009_v12  ;;  %v2137_v12 = vld [vmem:[%s12283_s28 + $0x1cc0] sm:$0xff] }
 0x1a1   : > { %2012 = vst [vmem:[%s12288_s29 + $0xc68] sm:$0xff] %v2011_v13  ;;  %v2139_v13 = vld [vmem:[%s12283_s28 + $0x1cd0] sm:$0xff] }
 0x1a2   : > { %2014 = vst [vmem:[%s12288_s29 + $0xc70] sm:$0xff] %v2013_v14  ;;  %v2141_v14 = vld [vmem:[%s12283_s28 + $0x1ce0] sm:$0xff] }
 0x1a3   : > { %2016 = vst [vmem:[%s12288_s29 + $0xc78] sm:$0xff] %v2015_v15  ;;  %v2143_v15 = vld [vmem:[%s12283_s28 + $0x1cf0] sm:$0xff] }
 0x1a4   : > { %2018 = vst [vmem:[%s12288_s29 + $0xc80] sm:$0xff] %v2017_v16  ;;  %v2145_v16 = vld [vmem:[%s12283_s28 + $0x1d00] sm:$0xff] }
 0x1a5   : > { %2020 = vst [vmem:[%s12288_s29 + $0xc88] sm:$0xff] %v2019_v17  ;;  %v2147_v17 = vld [vmem:[%s12283_s28 + $0x1d10] sm:$0xff] }
 0x1a6   : > { %2022 = vst [vmem:[%s12288_s29 + $0xc90] sm:$0xff] %v2021_v18  ;;  %v2149_v18 = vld [vmem:[%s12283_s28 + $0x1d20] sm:$0xff] }
 0x1a7   : > { %2024 = vst [vmem:[%s12288_s29 + $0xc98] sm:$0xff] %v2023_v19  ;;  %v2151_v19 = vld [vmem:[%s12283_s28 + $0x1d30] sm:$0xff] }
 0x1a8   : > { %2026 = vst [vmem:[%s12288_s29 + $0xca0] sm:$0xff] %v2025_v20  ;;  %v2153_v20 = vld [vmem:[%s12283_s28 + $0x1d40] sm:$0xff] }
 0x1a9   : > { %2028 = vst [vmem:[%s12288_s29 + $0xca8] sm:$0xff] %v2027_v21  ;;  %v2155_v21 = vld [vmem:[%s12283_s28 + $0x1d50] sm:$0xff] }
 0x1aa   : > { %2030 = vst [vmem:[%s12288_s29 + $0xcb0] sm:$0xff] %v2029_v22  ;;  %v2157_v22 = vld [vmem:[%s12283_s28 + $0x1d60] sm:$0xff] }
 0x1ab   : > { %2032 = vst [vmem:[%s12288_s29 + $0xcb8] sm:$0xff] %v2031_v23  ;;  %v2159_v23 = vld [vmem:[%s12283_s28 + $0x1d70] sm:$0xff] }
 0x1ac   : > { %2034 = vst [vmem:[%s12288_s29 + $0xcc0] sm:$0xff] %v2033_v24  ;;  %v2161_v24 = vld [vmem:[%s12283_s28 + $0x1d80] sm:$0xff] }
 0x1ad   : > { %2036 = vst [vmem:[%s12288_s29 + $0xcc8] sm:$0xff] %v2035_v25  ;;  %v2163_v25 = vld [vmem:[%s12283_s28 + $0x1d90] sm:$0xff] }
 0x1ae   : > { %2038 = vst [vmem:[%s12288_s29 + $0xcd0] sm:$0xff] %v2037_v26  ;;  %v2165_v26 = vld [vmem:[%s12283_s28 + $0x1da0] sm:$0xff] }
 0x1af   : > { %2040 = vst [vmem:[%s12288_s29 + $0xcd8] sm:$0xff] %v2039_v27  ;;  %v2167_v27 = vld [vmem:[%s12283_s28 + $0x1db0] sm:$0xff] }
 0x1b0   : > { %2042 = vst [vmem:[%s12288_s29 + $0xce0] sm:$0xff] %v2041_v28  ;;  %v2169_v28 = vld [vmem:[%s12283_s28 + $0x1dc0] sm:$0xff] }
 0x1b1   : > { %2044 = vst [vmem:[%s12288_s29 + $0xce8] sm:$0xff] %v2043_v29  ;;  %v2171_v29 = vld [vmem:[%s12283_s28 + $0x1dd0] sm:$0xff] }
 0x1b2   : > { %2046 = vst [vmem:[%s12288_s29 + $0xcf0] sm:$0xff] %v2045_v30  ;;  %v2173_v30 = vld [vmem:[%s12283_s28 + $0x1de0] sm:$0xff] }
 0x1b3   : > { %2048 = vst [vmem:[%s12288_s29 + $0xcf8] sm:$0xff] %v2047_v31  ;;  %v2175_v31 = vld [vmem:[%s12283_s28 + $0x1df0] sm:$0xff] }
 0x1b4   : > { %2050 = vst [vmem:[%s12288_s29 + $0xd00] sm:$0xff] %v2049_v32  ;;  %v2177_v32 = vld [vmem:[%s12283_s28 + $0x1e00] sm:$0xff] }
 0x1b5   : > { %2052 = vst [vmem:[%s12288_s29 + $0xd08] sm:$0xff] %v2051_v33  ;;  %v2179_v33 = vld [vmem:[%s12283_s28 + $0x1e10] sm:$0xff] }
 0x1b6   : > { %2054 = vst [vmem:[%s12288_s29 + $0xd10] sm:$0xff] %v2053_v34  ;;  %v2181_v34 = vld [vmem:[%s12283_s28 + $0x1e20] sm:$0xff] }
 0x1b7   : > { %2056 = vst [vmem:[%s12288_s29 + $0xd18] sm:$0xff] %v2055_v35  ;;  %v2183_v35 = vld [vmem:[%s12283_s28 + $0x1e30] sm:$0xff] }
 0x1b8   : > { %2058 = vst [vmem:[%s12288_s29 + $0xd20] sm:$0xff] %v2057_v36  ;;  %v2185_v36 = vld [vmem:[%s12283_s28 + $0x1e40] sm:$0xff] }
 0x1b9   : > { %2060 = vst [vmem:[%s12288_s29 + $0xd28] sm:$0xff] %v2059_v37  ;;  %v2187_v37 = vld [vmem:[%s12283_s28 + $0x1e50] sm:$0xff] }
 0x1ba   : > { %2062 = vst [vmem:[%s12288_s29 + $0xd30] sm:$0xff] %v2061_v38  ;;  %v2189_v38 = vld [vmem:[%s12283_s28 + $0x1e60] sm:$0xff] }
 0x1bb   : > { %2064 = vst [vmem:[%s12288_s29 + $0xd38] sm:$0xff] %v2063_v39  ;;  %v2191_v39 = vld [vmem:[%s12283_s28 + $0x1e70] sm:$0xff] }
 0x1bc   : > { %2066 = vst [vmem:[%s12288_s29 + $0xd40] sm:$0xff] %v2065_v40  ;;  %v2193_v40 = vld [vmem:[%s12283_s28 + $0x1e80] sm:$0xff] }
 0x1bd   : > { %2068 = vst [vmem:[%s12288_s29 + $0xd48] sm:$0xff] %v2067_v41  ;;  %v2195_v41 = vld [vmem:[%s12283_s28 + $0x1e90] sm:$0xff] }
 0x1be   : > { %2070 = vst [vmem:[%s12288_s29 + $0xd50] sm:$0xff] %v2069_v42  ;;  %v2197_v42 = vld [vmem:[%s12283_s28 + $0x1ea0] sm:$0xff] }
 0x1bf   : > { %2072 = vst [vmem:[%s12288_s29 + $0xd58] sm:$0xff] %v2071_v43  ;;  %v2199_v43 = vld [vmem:[%s12283_s28 + $0x1eb0] sm:$0xff] }
 0x1c0   : > { %2074 = vst [vmem:[%s12288_s29 + $0xd60] sm:$0xff] %v2073_v44  ;;  %v2201_v44 = vld [vmem:[%s12283_s28 + $0x1ec0] sm:$0xff] }
 0x1c1   : > { %2076 = vst [vmem:[%s12288_s29 + $0xd68] sm:$0xff] %v2075_v45  ;;  %v2203_v45 = vld [vmem:[%s12283_s28 + $0x1ed0] sm:$0xff] }
 0x1c2   : > { %2078 = vst [vmem:[%s12288_s29 + $0xd70] sm:$0xff] %v2077_v46  ;;  %v2205_v46 = vld [vmem:[%s12283_s28 + $0x1ee0] sm:$0xff] }
 0x1c3   : > { %2080 = vst [vmem:[%s12288_s29 + $0xd78] sm:$0xff] %v2079_v47  ;;  %v2207_v47 = vld [vmem:[%s12283_s28 + $0x1ef0] sm:$0xff] }
 0x1c4   : > { %2082 = vst [vmem:[%s12288_s29 + $0xd80] sm:$0xff] %v2081_v48  ;;  %v2209_v48 = vld [vmem:[%s12283_s28 + $0x1f00] sm:$0xff] }
 0x1c5   : > { %2084 = vst [vmem:[%s12288_s29 + $0xd88] sm:$0xff] %v2083_v49  ;;  %v2211_v49 = vld [vmem:[%s12283_s28 + $0x1f10] sm:$0xff] }
 0x1c6   : > { %2086 = vst [vmem:[%s12288_s29 + $0xd90] sm:$0xff] %v2085_v50  ;;  %v2213_v50 = vld [vmem:[%s12283_s28 + $0x1f20] sm:$0xff] }
 0x1c7   : > { %2088 = vst [vmem:[%s12288_s29 + $0xd98] sm:$0xff] %v2087_v51  ;;  %v2215_v51 = vld [vmem:[%s12283_s28 + $0x1f30] sm:$0xff] }
 0x1c8   : > { %2090 = vst [vmem:[%s12288_s29 + $0xda0] sm:$0xff] %v2089_v52  ;;  %v2217_v52 = vld [vmem:[%s12283_s28 + $0x1f40] sm:$0xff] }
 0x1c9   : > { %2092 = vst [vmem:[%s12288_s29 + $0xda8] sm:$0xff] %v2091_v53  ;;  %v2219_v53 = vld [vmem:[%s12283_s28 + $0x1f50] sm:$0xff] }
 0x1ca   : > { %2094 = vst [vmem:[%s12288_s29 + $0xdb0] sm:$0xff] %v2093_v54  ;;  %v2221_v54 = vld [vmem:[%s12283_s28 + $0x1f60] sm:$0xff] }
 0x1cb   : > { %2096 = vst [vmem:[%s12288_s29 + $0xdb8] sm:$0xff] %v2095_v55  ;;  %v2223_v55 = vld [vmem:[%s12283_s28 + $0x1f70] sm:$0xff] }
 0x1cc   : > { %2098 = vst [vmem:[%s12288_s29 + $0xdc0] sm:$0xff] %v2097_v56  ;;  %v2225_v56 = vld [vmem:[%s12283_s28 + $0x1f80] sm:$0xff] }
 0x1cd   : > { %2100 = vst [vmem:[%s12288_s29 + $0xdc8] sm:$0xff] %v2099_v57  ;;  %v2227_v57 = vld [vmem:[%s12283_s28 + $0x1f90] sm:$0xff] }
 0x1ce   : > { %2102 = vst [vmem:[%s12288_s29 + $0xdd0] sm:$0xff] %v2101_v58  ;;  %v2229_v58 = vld [vmem:[%s12283_s28 + $0x1fa0] sm:$0xff] }
 0x1cf   : > { %2104 = vst [vmem:[%s12288_s29 + $0xdd8] sm:$0xff] %v2103_v59  ;;  %v2231_v59 = vld [vmem:[%s12283_s28 + $0x1fb0] sm:$0xff] }
 0x1d0   : > { %2106 = vst [vmem:[%s12288_s29 + $0xde0] sm:$0xff] %v2105_v60  ;;  %v2233_v60 = vld [vmem:[%s12283_s28 + $0x1fc0] sm:$0xff] }
 0x1d1   : > { %2108 = vst [vmem:[%s12288_s29 + $0xde8] sm:$0xff] %v2107_v61  ;;  %v2235_v61 = vld [vmem:[%s12283_s28 + $0x1fd0] sm:$0xff] }
 0x1d2   : > { %2110 = vst [vmem:[%s12288_s29 + $0xdf0] sm:$0xff] %v2109_v62  ;;  %v2237_v62 = vld [vmem:[%s12283_s28 + $0x1fe0] sm:$0xff] }
 0x1d3   : > { %2112 = vst [vmem:[%s12288_s29 + $0xdf8] sm:$0xff] %v2111_v63  ;;  %v2239_v63 = vld [vmem:[%s12283_s28 + $0x1ff0] sm:$0xff] }
 0x1d4   : > { %2114 = vst [vmem:[%s12288_s29 + $0xe00] sm:$0xff] %v2113_v0 }
 0x1d5   : > { %2116 = vst [vmem:[%s12288_s29 + $0xe08] sm:$0xff] %v2115_v1 }
 0x1d6   : > { %2118 = vst [vmem:[%s12288_s29 + $0xe10] sm:$0xff] %v2117_v2 }
 0x1d7   : > { %2120 = vst [vmem:[%s12288_s29 + $0xe18] sm:$0xff] %v2119_v3 }
 0x1d8   : > { %2122 = vst [vmem:[%s12288_s29 + $0xe20] sm:$0xff] %v2121_v4 }
 0x1d9   : > { %2124 = vst [vmem:[%s12288_s29 + $0xe28] sm:$0xff] %v2123_v5 }
 0x1da   : > { %2126 = vst [vmem:[%s12288_s29 + $0xe30] sm:$0xff] %v2125_v6 }
 0x1db   : > { %2128 = vst [vmem:[%s12288_s29 + $0xe38] sm:$0xff] %v2127_v7 }
 0x1dc   : > { %2130 = vst [vmem:[%s12288_s29 + $0xe40] sm:$0xff] %v2129_v8 }
 0x1dd   : > { %2132 = vst [vmem:[%s12288_s29 + $0xe48] sm:$0xff] %v2131_v9 }
 0x1de   : > { %2134 = vst [vmem:[%s12288_s29 + $0xe50] sm:$0xff] %v2133_v10 }
 0x1df   : > { %2136 = vst [vmem:[%s12288_s29 + $0xe58] sm:$0xff] %v2135_v11 }
 0x1e0   : > { %2138 = vst [vmem:[%s12288_s29 + $0xe60] sm:$0xff] %v2137_v12 }
 0x1e1   : > { %2140 = vst [vmem:[%s12288_s29 + $0xe68] sm:$0xff] %v2139_v13 }
 0x1e2   : > { %2142 = vst [vmem:[%s12288_s29 + $0xe70] sm:$0xff] %v2141_v14 }
 0x1e3   : > { %2144 = vst [vmem:[%s12288_s29 + $0xe78] sm:$0xff] %v2143_v15 }
 0x1e4   : > { %2146 = vst [vmem:[%s12288_s29 + $0xe80] sm:$0xff] %v2145_v16 }
 0x1e5   : > { %2148 = vst [vmem:[%s12288_s29 + $0xe88] sm:$0xff] %v2147_v17 }
 0x1e6   : > { %2150 = vst [vmem:[%s12288_s29 + $0xe90] sm:$0xff] %v2149_v18 }
 0x1e7   : > { %2152 = vst [vmem:[%s12288_s29 + $0xe98] sm:$0xff] %v2151_v19 }
 0x1e8   : > { %2154 = vst [vmem:[%s12288_s29 + $0xea0] sm:$0xff] %v2153_v20 }
 0x1e9   : > { %2156 = vst [vmem:[%s12288_s29 + $0xea8] sm:$0xff] %v2155_v21 }
 0x1ea   : > { %2158 = vst [vmem:[%s12288_s29 + $0xeb0] sm:$0xff] %v2157_v22 }
 0x1eb   : > { %2160 = vst [vmem:[%s12288_s29 + $0xeb8] sm:$0xff] %v2159_v23 }
 0x1ec   : > { %2162 = vst [vmem:[%s12288_s29 + $0xec0] sm:$0xff] %v2161_v24 }
 0x1ed   : > { %2164 = vst [vmem:[%s12288_s29 + $0xec8] sm:$0xff] %v2163_v25 }
 0x1ee   : > { %2166 = vst [vmem:[%s12288_s29 + $0xed0] sm:$0xff] %v2165_v26 }
 0x1ef   : > { %2168 = vst [vmem:[%s12288_s29 + $0xed8] sm:$0xff] %v2167_v27 }
 0x1f0   : > { %2170 = vst [vmem:[%s12288_s29 + $0xee0] sm:$0xff] %v2169_v28 }
 0x1f1   : > { %2172 = vst [vmem:[%s12288_s29 + $0xee8] sm:$0xff] %v2171_v29 }
 0x1f2   : > { %2174 = vst [vmem:[%s12288_s29 + $0xef0] sm:$0xff] %v2173_v30 }
 0x1f3   : > { %2176 = vst [vmem:[%s12288_s29 + $0xef8] sm:$0xff] %v2175_v31 }
 0x1f4   : > { %2178 = vst [vmem:[%s12288_s29 + $0xf00] sm:$0xff] %v2177_v32 }
 0x1f5   : > { %2180 = vst [vmem:[%s12288_s29 + $0xf08] sm:$0xff] %v2179_v33 }
 0x1f6   : > { %2182 = vst [vmem:[%s12288_s29 + $0xf10] sm:$0xff] %v2181_v34 }
 0x1f7   : > { %2184 = vst [vmem:[%s12288_s29 + $0xf18] sm:$0xff] %v2183_v35 }
 0x1f8   : > { %2186 = vst [vmem:[%s12288_s29 + $0xf20] sm:$0xff] %v2185_v36 }
 0x1f9   : > { %2188 = vst [vmem:[%s12288_s29 + $0xf28] sm:$0xff] %v2187_v37 }
 0x1fa   : > { %2190 = vst [vmem:[%s12288_s29 + $0xf30] sm:$0xff] %v2189_v38 }
 0x1fb   : > { %2192 = vst [vmem:[%s12288_s29 + $0xf38] sm:$0xff] %v2191_v39 }
 0x1fc   : > { %2194 = vst [vmem:[%s12288_s29 + $0xf40] sm:$0xff] %v2193_v40 }
 0x1fd   : > { %2196 = vst [vmem:[%s12288_s29 + $0xf48] sm:$0xff] %v2195_v41 }
 0x1fe   : > { %2198 = vst [vmem:[%s12288_s29 + $0xf50] sm:$0xff] %v2197_v42 }
 0x1ff   : > { %2200 = vst [vmem:[%s12288_s29 + $0xf58] sm:$0xff] %v2199_v43 }
 0x200   : > { %2202 = vst [vmem:[%s12288_s29 + $0xf60] sm:$0xff] %v2201_v44 }
 0x201   : > { %2204 = vst [vmem:[%s12288_s29 + $0xf68] sm:$0xff] %v2203_v45 }
 0x202   : > { %2206 = vst [vmem:[%s12288_s29 + $0xf70] sm:$0xff] %v2205_v46 }
 0x203   : > { %2208 = vst [vmem:[%s12288_s29 + $0xf78] sm:$0xff] %v2207_v47 }
 0x204   : > { %2210 = vst [vmem:[%s12288_s29 + $0xf80] sm:$0xff] %v2209_v48 }
 0x205   : > { %2212 = vst [vmem:[%s12288_s29 + $0xf88] sm:$0xff] %v2211_v49 }
 0x206   : > { %2214 = vst [vmem:[%s12288_s29 + $0xf90] sm:$0xff] %v2213_v50 }
 0x207   : > { %2216 = vst [vmem:[%s12288_s29 + $0xf98] sm:$0xff] %v2215_v51 }
 0x208   : > { %2218 = vst [vmem:[%s12288_s29 + $0xfa0] sm:$0xff] %v2217_v52 }
 0x209   : > { %2220 = vst [vmem:[%s12288_s29 + $0xfa8] sm:$0xff] %v2219_v53 }
 0x20a   : > { %2222 = vst [vmem:[%s12288_s29 + $0xfb0] sm:$0xff] %v2221_v54 }
 0x20b   : > { %2224 = vst [vmem:[%s12288_s29 + $0xfb8] sm:$0xff] %v2223_v55 }
 0x20c   : > { %2226 = vst [vmem:[%s12288_s29 + $0xfc0] sm:$0xff] %v2225_v56 }
 0x20d   : > { %2228 = vst [vmem:[%s12288_s29 + $0xfc8] sm:$0xff] %v2227_v57 }
 0x20e   : > { %2230 = vst [vmem:[%s12288_s29 + $0xfd0] sm:$0xff] %v2229_v58 }
 0x20f   : > { %2232 = vst [vmem:[%s12288_s29 + $0xfd8] sm:$0xff] %v2231_v59 }
 0x210   : > { %2234 = vst [vmem:[%s12288_s29 + $0xfe0] sm:$0xff] %v2233_v60 }
 0x211   : > { %2236 = vst [vmem:[%s12288_s29 + $0xfe8] sm:$0xff] %v2235_v61 }
 0x212   : > { %2238 = vst [vmem:[%s12288_s29 + $0xff0] sm:$0xff] %v2237_v62 }
 0x213   : > { %2240 = vst [vmem:[%s12288_s29 + $0xff8] sm:$0xff] %v2239_v63 }
 0x214 PF: > { %p9243_p8 = scmp.ge.s32.totalorder %s12213_s16, 1  ;;  %p4336_p9 = scmp.lt.s32.totalorder %s12213_s16, 3 }
 0x216   : > { %p4337_p10 = pnand %p9243_p8, %p4336_p9 }
 0x218   : > { %4340 = sbr.rel (%p4337_p10) target bundleno = 1235 (0x4d3), region = 80 }
 0x21d   : > { %s4343_s30 = sand.u32 1, %s12197_s12   ;;  %s9246_s24 = sshll.u32 %s12205_s14, 1 }
 0x21e   : > { %s9244_s4 = sshll.u32 %s4343_s30, 12  ;;  %p13898_p11 = scmp.lt.s32.totalorder %s9246_s24, 3 }
 0x21f   : > { %s13316_s5 = scalar_lea.vmem [#allocation2], %s9244_s4  ;;  %s12133_s12 = sshll.u32 (%p12270_p6), %s12205_s14, 3 }
 0x220   : > { %v9561_v0 = vld [vmem:[%s13316_s5 + $0x70] sm:$0xf]  ;;  %v11636_v1 = vld [vmem:[%s13316_s5 + $0x74] sm:$0xf0]  ;;  %v9553_v11 = vld [vmem:[%s13316_s5 + $0x60] sm:$0xf]  ;;  %s9088_s29 = scalar_lea.vmem (%p12270_p6), %s15171_s3, %s12133_s12 }
 0x221   : > { %v9625_v2 = vld [vmem:[%s13316_s5 + $0xf0] sm:$0xf]  ;;  %v9562_v3 = vor.u32 %v11636_v1, %v9561_v0  ;;  %v11652_v4 = vld [vmem:[%s13316_s5 + $0xf4] sm:$0xf0]  ;;  %v11634_v13 = vld [vmem:[%s13316_s5 + $0x64] sm:$0xf0] }
 0x222   : > { %v9689_v5 = vld [vmem:[%s13316_s5 + $0x170] sm:$0xf]  ;;  %v11668_v6 = vld [vmem:[%s13316_s5 + $0x174] sm:$0xf0]  ;;  %v9626_v7 = vor.u32 %v11652_v4, %v9625_v2  ;;  %v9617_v14 = vld [vmem:[%s13316_s5 + $0xe0] sm:$0xf]  ;;  %v9554_v16 = vor.u32 %v11634_v13, %v9553_v11 }
 0x223   : > { %v9690_v8 = vor.u32 %v11668_v6, %v9689_v5  ;;  %v9753_v9 = vld [vmem:[%s13316_s5 + $0x1f0] sm:$0xf]  ;;  %v11684_v10 = vld [vmem:[%s13316_s5 + $0x1f4] sm:$0xf0]  ;;  %7852 = vmatpush.bf16.msra.mxu0 %v9562_v3  ;;  %v11650_v15 = vld [vmem:[%s13316_s5 + $0xe4] sm:$0xf0] }
 0x224   : > { %v9754_v12 = vor.u32 %v11684_v10, %v9753_v9  ;;  %7871 = vmatpush.bf16.msra.mxu1 %v9626_v7  ;;  %v9618_v17 = vor.u32 %v11650_v15, %v9617_v14  ;;  %v9681_v18 = vld [vmem:[%s13316_s5 + $0x160] sm:$0xf]  ;;  %v11666_v19 = vld [vmem:[%s13316_s5 + $0x164] sm:$0xf0]  ;;  %v9545_v23 = vld [vmem:[%s13316_s5 + $0x50] sm:$0xf] }
 0x225   : > { %7890 = vmatpush.bf16.msra.mxu2 %v9690_v8  ;;  %v9745_v20 = vld [vmem:[%s13316_s5 + $0x1e0] sm:$0xf]  ;;  %v9682_v21 = vor.u32 %v11666_v19, %v9681_v18  ;;  %v11682_v22 = vld [vmem:[%s13316_s5 + $0x1e4] sm:$0xf0]  ;;  %v11632_v24 = vld [vmem:[%s13316_s5 + $0x54] sm:$0xf0] }
 0x226   : > { %7909 = vmatpush.bf16.msra.mxu3 %v9754_v12  ;;  %v9746_v25 = vor.u32 %v11682_v22, %v9745_v20  ;;  %v9609_v26 = vld [vmem:[%s13316_s5 + $0xd0] sm:$0xf]  ;;  %v11648_v27 = vld [vmem:[%s13316_s5 + $0xd4] sm:$0xf0]  ;;  %v9546_v29 = vor.u32 %v11632_v24, %v9545_v23  ;;  %v9537_v35 = vld [vmem:[%s13316_s5 + $0x40] sm:$0xf] }
 0x227   : > { %v9673_v28 = vld [vmem:[%s13316_s5 + $0x150] sm:$0xf]  ;;  %7853 = vmatpush.bf16.msra.mxu0 %v9554_v16  ;;  %v11664_v30 = vld [vmem:[%s13316_s5 + $0x154] sm:$0xf0]  ;;  %v9610_v33 = vor.u32 %v11648_v27, %v9609_v26  ;;  %v11630_v36 = vld [vmem:[%s13316_s5 + $0x44] sm:$0xf0] }
 0x228   : > { %v9737_v31 = vld [vmem:[%s13316_s5 + $0x1d0] sm:$0xf]  ;;  %v11680_v32 = vld [vmem:[%s13316_s5 + $0x1d4] sm:$0xf0]  ;;  %7872 = vmatpush.bf16.msra.mxu1 %v9618_v17  ;;  %v9674_v34 = vor.u32 %v11664_v30, %v9673_v28  ;;  %v9601_v37 = vld [vmem:[%s13316_s5 + $0xc0] sm:$0xf]  ;;  %v9538_v44 = vor.u32 %v11630_v36, %v9537_v35 }
 0x229   : > { %7891 = vmatpush.bf16.msra.mxu2 %v9682_v21  ;;  %v9738_v38 = vor.u32 %v11680_v32, %v9737_v31  ;;  %v11646_v39 = vld [vmem:[%s13316_s5 + $0xc4] sm:$0xf0]  ;;  %v9665_v40 = vld [vmem:[%s13316_s5 + $0x140] sm:$0xf]  ;;  %v9529_v47 = vld [vmem:[%s13316_s5 + $0x30] sm:$0xf] }
 0x22a   : > { %7910 = vmatpush.bf16.msra.mxu3 %v9746_v25  ;;  %v11662_v41 = vld [vmem:[%s13316_s5 + $0x144] sm:$0xf0]  ;;  %v9729_v42 = vld [vmem:[%s13316_s5 + $0x1c0] sm:$0xf]  ;;  %v9602_v45 = vor.u32 %v11646_v39, %v9601_v37  ;;  %v11628_v48 = vld [vmem:[%s13316_s5 + $0x34] sm:$0xf0] }
 0x22b   : > { %v11678_v43 = vld [vmem:[%s13316_s5 + $0x1c4] sm:$0xf0]  ;;  %7854 = vmatpush.bf16.msra.mxu0 %v9546_v29  ;;  %v9666_v46 = vor.u32 %v11662_v41, %v9665_v40  ;;  %v9593_v49 = vld [vmem:[%s13316_s5 + $0xb0] sm:$0xf]  ;;  %v11644_v51 = vld [vmem:[%s13316_s5 + $0xb4] sm:$0xf0]  ;;  %v9530_v56 = vor.u32 %v11628_v48, %v9529_v47 }
 0x22c   : > { %7873 = vmatpush.bf16.msra.mxu1 %v9610_v33  ;;  %v9730_v50 = vor.u32 %v11678_v43, %v9729_v42  ;;  %v9657_v52 = vld [vmem:[%s13316_s5 + $0x130] sm:$0xf]  ;;  %v11660_v53 = vld [vmem:[%s13316_s5 + $0x134] sm:$0xf0]  ;;  %v9594_v57 = vor.u32 %v11644_v51, %v9593_v49  ;;  %v9521_v59 = vld [vmem:[%s13316_s5 + $0x20] sm:$0xf] }
 0x22d   : > { %7892 = vmatpush.bf16.msra.mxu2 %v9674_v34  ;;  %v9721_v54 = vld [vmem:[%s13316_s5 + $0x1b0] sm:$0xf]  ;;  %v11676_v55 = vld [vmem:[%s13316_s5 + $0x1b4] sm:$0xf0]  ;;  %v9658_v58 = vor.u32 %v11660_v53, %v9657_v52  ;;  %v11626_v60 = vld [vmem:[%s13316_s5 + $0x24] sm:$0xf0] }
 0x22e   : > { %7911 = vmatpush.bf16.msra.mxu3 %v9738_v38  ;;  %v9585_v61 = vld [vmem:[%s13316_s5 + $0xa0] sm:$0xf]  ;;  %v9722_v62 = vor.u32 %v11676_v55, %v9721_v54  ;;  %v11642_v63 = vld [vmem:[%s13316_s5 + $0xa4] sm:$0xf0]  ;;  %v9522_v4 = vor.u32 %v11626_v60, %v9521_v59  ;;  %v9513_v7 = vld [vmem:[%s13316_s5 + $0x10] sm:$0xf] }
 0x22f   : > { %7855 = vmatpush.bf16.msra.mxu0 %v9538_v44  ;;  %v9649_v0 = vld [vmem:[%s13316_s5 + $0x120] sm:$0xf]  ;;  %v11658_v1 = vld [vmem:[%s13316_s5 + $0x124] sm:$0xf0]  ;;  %v9586_v5 = vor.u32 %v11642_v63, %v9585_v61  ;;  %v11624_v8 = vld [vmem:[%s13316_s5 + $0x14] sm:$0xf0] }
 0x230   : > { %7874 = vmatpush.bf16.msra.mxu1 %v9602_v45  ;;  %v9713_v2 = vld [vmem:[%s13316_s5 + $0x1a0] sm:$0xf]  ;;  %v11674_v3 = vld [vmem:[%s13316_s5 + $0x1a4] sm:$0xf0]  ;;  %v9650_v6 = vor.u32 %v11658_v1, %v9649_v0  ;;  %v9577_v9 = vld [vmem:[%s13316_s5 + $0x90] sm:$0xf]  ;;  %v9514_v17 = vor.u32 %v11624_v8, %v9513_v7 }
 0x231   : > { %7893 = vmatpush.bf16.msra.mxu2 %v9666_v46  ;;  %v9714_v10 = vor.u32 %v11674_v3, %v9713_v2  ;;  %v11640_v11 = vld [vmem:[%s13316_s5 + $0x94] sm:$0xf0]  ;;  %v9641_v12 = vld [vmem:[%s13316_s5 + $0x110] sm:$0xf]  ;;  %v9505_v16 = vld [vmem:[%s13316_s5] sm:$0xf] }
 0x232   : > { %7912 = vmatpush.bf16.msra.mxu3 %v9730_v50  ;;  %v11656_v13 = vld [vmem:[%s13316_s5 + $0x114] sm:$0xf0]  ;;  %v9705_v14 = vld [vmem:[%s13316_s5 + $0x190] sm:$0xf]  ;;  %v11622_v18 = vld [vmem:[%s13316_s5 + $0x4] sm:$0xf0]  ;;  %v9578_v21 = vor.u32 %v11640_v11, %v9577_v9 }
 0x233   : > { %7856 = vmatpush.bf16.msra.mxu0 %v9530_v56  ;;  %v11672_v15 = vld [vmem:[%s13316_s5 + $0x194] sm:$0xf0]  ;;  %v9569_v19 = vld [vmem:[%s13316_s5 + $0x80] sm:$0xf]  ;;  %v11638_v20 = vld [vmem:[%s13316_s5 + $0x84] sm:$0xf0]  ;;  %v9642_v22 = vor.u32 %v11656_v13, %v9641_v12  ;;  %v9506_v34 = vor.u32 %v11622_v18, %v9505_v16 }
 0x234   : > { %7875 = vmatpush.bf16.msra.mxu1 %v9594_v57  ;;  %v9633_v23 = vld [vmem:[%s13316_s5 + $0x100] sm:$0xf]  ;;  %v11654_v24 = vld [vmem:[%s13316_s5 + $0x104] sm:$0xf0]  ;;  %v9706_v26 = vor.u32 %v11672_v15, %v9705_v14  ;;  %v11557_v30 = vld [vmem:[%s15168_s0 + $0x4] sm:$0xf]  ;;  %v9570_v38 = vor.u32 %v11638_v20, %v9569_v19 }
 0x235   : > { %7894 = vmatpush.bf16.msra.mxu2 %v9658_v58  ;;  %v9697_v25 = vld [vmem:[%s13316_s5 + $0x180] sm:$0xf]  ;;  %v11670_v27 = vld [vmem:[%s13316_s5 + $0x184] sm:$0xf0]  ;;  %v9251_v31 = vld [vmem:[%s15168_s0 + $0x80] sm:$0xf0]  ;;  %v9634_v39 = vor.u32 %v11654_v24, %v9633_v23 }
 0x236   : > { %7913 = vmatpush.bf16.msra.mxu3 %v9722_v62  ;;  %v9249_v28 = vld [vmem:[%s15168_s0] sm:$0xf]  ;;  %v9945_v32 = vld [vmem:[%s13316_s5 + $0x370] sm:$0xf]  ;;  %v11732_v33 = vld [vmem:[%s13316_s5 + $0x374] sm:$0xf0]  ;;  %v9698_v43 = vor.u32 %v11670_v27, %v9697_v25  ;;  %v13418_v53 = vor.u32 %v11557_v30, %v9251_v31 }
 0x237   : > { %7857 = vmatpush.bf16.msra.mxu0 %v9522_v4  ;;  %v11573_v29 = vld [vmem:[%s15168_s0 + $0x7c] sm:$0xf0]  ;;  %v9257_v35 = vld [vmem:[%s15168_s0 + $0x8] sm:$0xf]  ;;  %v9881_v36 = vld [vmem:[%s13316_s5 + $0x2f0] sm:$0xf]  ;;  %v9946_v44 = vor.u32 %v11732_v33, %v9945_v32 }
 0x238   : > { %7876 = vmatpush.bf16.msra.mxu1 %v9586_v5  ;;  %v11716_v37 = vld [vmem:[%s13316_s5 + $0x2f4] sm:$0xf0]  ;;  %v11574_v40 = vld [vmem:[%s15168_s0 + $0x84] sm:$0xf0]  ;;  %v11558_v41 = vld [vmem:[%s15168_s0 + $0xc] sm:$0xf]  ;;  %v13413_v48 = vor.u32 %v11573_v29, %v9249_v28 }
 0x239   : > { %7895 = vmatpush.bf16.msra.mxu2 %v9650_v6  ;;  %v9259_v42 = vld [vmem:[%s15168_s0 + $0x88] sm:$0xf0]  ;;  %v9817_v45 = vld [vmem:[%s13316_s5 + $0x270] sm:$0xf]  ;;  %v11700_v46 = vld [vmem:[%s13316_s5 + $0x274] sm:$0xf0]  ;;  %v9882_v49 = vor.u32 %v11716_v37, %v9881_v36  ;;  %v13420_v54 = vor.u32 %v11574_v40, %v9257_v35 }
 0x23a   : > { %7914 = vmatpush.bf16.msra.mxu3 %v9714_v10  ;;  %v10009_v47 = vld [vmem:[%s13316_s5 + $0x3f0] sm:$0xf]  ;;  %v11748_v50 = vld [vmem:[%s13316_s5 + $0x3f4] sm:$0xf0]  ;;  %v9937_v51 = vld [vmem:[%s13316_s5 + $0x360] sm:$0xf]  ;;  %v13424_v57 = vor.u32 %v11558_v41, %v9259_v42  ;;  %v9818_v58 = vor.u32 %v11700_v46, %v9817_v45 }
 0x23b   : > { %7858 = vmatpush.bf16.msra.mxu0 %v9514_v17  ;;  %v11730_v52 = vld [vmem:[%s13316_s5 + $0x364] sm:$0xf0]  ;;  %v9873_v55 = vld [vmem:[%s13316_s5 + $0x2e0] sm:$0xf]  ;;  %v10010_v59 = vor.u32 %v11748_v50, %v10009_v47  ;;  %v9929_v2 = vld [vmem:[%s13316_s5 + $0x350] sm:$0xf] }
 0x23c   : > { %7877 = vmatpush.bf16.msra.mxu1 %v9578_v21  ;;  %v11714_v56 = vld [vmem:[%s13316_s5 + $0x2e4] sm:$0xf0]  ;;  %v9938_v60 = vor.u32 %v11730_v52, %v9937_v51  ;;  %v9809_v61 = vld [vmem:[%s13316_s5 + $0x260] sm:$0xf]  ;;  %v11728_v3 = vld [vmem:[%s13316_s5 + $0x354] sm:$0xf0] }
 0x23d   : > { %7896 = vmatpush.bf16.msra.mxu2 %v9642_v22  ;;  %v11698_v62 = vld [vmem:[%s13316_s5 + $0x264] sm:$0xf0]  ;;  %v10001_v63 = vld [vmem:[%s13316_s5 + $0x3e0] sm:$0xf]  ;;  %v9874_v0 = vor.u32 %v11714_v56, %v9873_v55  ;;  %v9865_v4 = vld [vmem:[%s13316_s5 + $0x2d0] sm:$0xf]  ;;  %v9930_v8 = vor.u32 %v11728_v3, %v9929_v2 }
 0x23e   : > { %7915 = vmatpush.bf16.msra.mxu3 %v9706_v26  ;;  %v11746_v1 = vld [vmem:[%s13316_s5 + $0x3e4] sm:$0xf0]  ;;  %v11712_v5 = vld [vmem:[%s13316_s5 + $0x2d4] sm:$0xf0]  ;;  %v9810_v6 = vor.u32 %v11698_v62, %v9809_v61  ;;  %v9801_v9 = vld [vmem:[%s13316_s5 + $0x250] sm:$0xf] }
 0x23f   : > { %7859 = vmatpush.bf16.msra.mxu0 %v9506_v34  ;;  %v10002_v7 = vor.u32 %v11746_v1, %v10001_v63  ;;  %v11696_v10 = vld [vmem:[%s13316_s5 + $0x254] sm:$0xf0]  ;;  %v9993_v11 = vld [vmem:[%s13316_s5 + $0x3d0] sm:$0xf]  ;;  %v9866_v12 = vor.u32 %v11712_v5, %v9865_v4  ;;  %v9921_v14 = vld [vmem:[%s13316_s5 + $0x340] sm:$0xf] }
 0x240   : > { %7878 = vmatpush.bf16.msra.mxu1 %v9570_v38  ;;  %v11744_v13 = vld [vmem:[%s13316_s5 + $0x3d4] sm:$0xf0]  ;;  %v11726_v15 = vld [vmem:[%s13316_s5 + $0x344] sm:$0xf0]  ;;  %v9857_v16 = vld [vmem:[%s13316_s5 + $0x2c0] sm:$0xf]  ;;  %v9802_v18 = vor.u32 %v11696_v10, %v9801_v9 }
 0x241   : > { %7897 = vmatpush.bf16.msra.mxu2 %v9634_v39  ;;  %v11710_v17 = vld [vmem:[%s13316_s5 + $0x2c4] sm:$0xf0]  ;;  %v9793_v19 = vld [vmem:[%s13316_s5 + $0x240] sm:$0xf]  ;;  %v9994_v22 = vor.u32 %v11744_v13, %v9993_v11  ;;  %v9922_v23 = vor.u32 %v11726_v15, %v9921_v14  ;;  %v11589_v28 = vld [vmem:[%s15168_s0 + $0x104] sm:$0xf] }
 0x242   : > { %7916 = vmatpush.bf16.msra.mxu3 %v9698_v43  ;;  %7860 = vmatmul.bf16.vlgmr.msra.gmra.mxu0 %v13413_v48  ;;  %v11694_v20 = vld [vmem:[%s13316_s5 + $0x244] sm:$0xf0]  ;;  %v9985_v21 = vld [vmem:[%s13316_s5 + $0x3c0] sm:$0xf]  ;;  %v9858_v27 = vor.u32 %v11710_v17, %v9857_v16  ;;  %v9379_v29 = vld [vmem:[%s15168_s0 + $0x180] sm:$0xf0] }
 0x243   : > { %7879 = vmatmul.bf16.vlgmr.msra.gmra.mxu1 %v13418_v53  ;;  %7928 = vmatpush.bf16.msrb.mxu0 %v9818_v58  ;;  %v11742_v24 = vld [vmem:[%s13316_s5 + $0x3c4] sm:$0xf0]  ;;  %v9377_v25 = vld [vmem:[%s15168_s0 + $0x100] sm:$0xf]  ;;  %v9913_v30 = vld [vmem:[%s13316_s5 + $0x330] sm:$0xf]  ;;  %v9794_v35 = vor.u32 %v11694_v20, %v9793_v19  ;;  %v13486_v50 = vor.u32 %v11589_v28, %v9379_v29 }
 0x244   : > { %7947 = vmatpush.bf16.msrb.mxu1 %v9882_v49  ;;  %7898 = vmatmul.bf16.vlgmr.msra.gmra.mxu2 %v13420_v54  ;;  %v11605_v26 = vld [vmem:[%s15168_s0 + $0x17c] sm:$0xf0]  ;;  %v11724_v31 = vld [vmem:[%s13316_s5 + $0x334] sm:$0xf0]  ;;  %v9385_v32 = vld [vmem:[%s15168_s0 + $0x108] sm:$0xf]  ;;  %v9986_v39 = vor.u32 %v11742_v24, %v9985_v21 }
 0x245   : > { %7966 = vmatpush.bf16.msrb.mxu2 %v9946_v44  ;;  %7917 = vmatmul.bf16.vlgmr.msra.gmra.mxu3 %v13424_v57  ;;  %v9849_v33 = vld [vmem:[%s13316_s5 + $0x2b0] sm:$0xf]  ;;  %v11708_v34 = vld [vmem:[%s13316_s5 + $0x2b4] sm:$0xf0]  ;;  %v11606_v36 = vld [vmem:[%s15168_s0 + $0x184] sm:$0xf0]  ;;  %v9914_v40 = vor.u32 %v11724_v31, %v9913_v30  ;;  %v13481_v44 = vor.u32 %v11605_v26, %v9377_v25 }
 0x246   : > { %7985 = vmatpush.bf16.msrb.mxu3 %v10010_v59  ;;  %v11590_v37 = vld [vmem:[%s15168_s0 + $0x10c] sm:$0xf]  ;;  %v9785_v41 = vld [vmem:[%s13316_s5 + $0x230] sm:$0xf]  ;;  %v11692_v42 = vld [vmem:[%s13316_s5 + $0x234] sm:$0xf0]  ;;  %v9850_v45 = vor.u32 %v11708_v34, %v9849_v33  ;;  %v13488_v51 = vor.u32 %v11606_v36, %v9385_v32 }
 0x247   : > { %7929 = vmatpush.bf16.msrb.mxu0 %v9810_v6  ;;  %v9387_v38 = vld [vmem:[%s15168_s0 + $0x188] sm:$0xf0]  ;;  %v9977_v43 = vld [vmem:[%s13316_s5 + $0x3b0] sm:$0xf]  ;;  %v11740_v46 = vld [vmem:[%s13316_s5 + $0x3b4] sm:$0xf0]  ;;  %v9786_v58 = vor.u32 %v11692_v42, %v9785_v41 }
 0x248   : > { %7948 = vmatpush.bf16.msrb.mxu1 %v9874_v0  ;;  %v9905_v47 = vld [vmem:[%s13316_s5 + $0x320] sm:$0xf]  ;;  %v11722_v49 = vld [vmem:[%s13316_s5 + $0x324] sm:$0xf0]  ;;  %v13492_v56 = vor.u32 %v11590_v37, %v9387_v38  ;;  %v9978_v59 = vor.u32 %v11740_v46, %v9977_v43  ;;  %v9897_v2 = vld [vmem:[%s13316_s5 + $0x310] sm:$0xf] }
 0x249   : > { %7967 = vmatpush.bf16.msrb.mxu2 %v9938_v60  ;;  %v9841_v52 = vld [vmem:[%s13316_s5 + $0x2a0] sm:$0xf]  ;;  %v11706_v55 = vld [vmem:[%s13316_s5 + $0x2a4] sm:$0xf0]  ;;  %v9906_v60 = vor.u32 %v11722_v49, %v9905_v47  ;;  %v11720_v3 = vld [vmem:[%s13316_s5 + $0x314] sm:$0xf0] }
 0x24a   : > { %7986 = vmatpush.bf16.msrb.mxu3 %v10002_v7  ;;  %v9777_v61 = vld [vmem:[%s13316_s5 + $0x220] sm:$0xf]  ;;  %v11690_v62 = vld [vmem:[%s13316_s5 + $0x224] sm:$0xf0]  ;;  %v9842_v0 = vor.u32 %v11706_v55, %v9841_v52  ;;  %v9833_v4 = vld [vmem:[%s13316_s5 + $0x290] sm:$0xf]  ;;  %v9898_v9 = vor.u32 %v11720_v3, %v9897_v2 }
 0x24b   : > { %7930 = vmatpush.bf16.msrb.mxu0 %v9802_v18  ;;  %v9969_v63 = vld [vmem:[%s13316_s5 + $0x3a0] sm:$0xf]  ;;  %v11738_v1 = vld [vmem:[%s13316_s5 + $0x3a4] sm:$0xf0]  ;;  %v11704_v5 = vld [vmem:[%s13316_s5 + $0x294] sm:$0xf0]  ;;  %v9778_v6 = vor.u32 %v11690_v62, %v9777_v61 }
 0x24c   : > { %7949 = vmatpush.bf16.msrb.mxu1 %v9866_v12  ;;  %v9769_v7 = vld [vmem:[%s13316_s5 + $0x210] sm:$0xf]  ;;  %v11688_v10 = vld [vmem:[%s13316_s5 + $0x214] sm:$0xf0]  ;;  %v9834_v13 = vor.u32 %v11704_v5, %v9833_v4  ;;  %v9889_v14 = vld [vmem:[%s13316_s5 + $0x300] sm:$0xf] }
 0x24d   : > { %7968 = vmatpush.bf16.msrb.mxu2 %v9930_v8  ;;  %v9970_v8 = vor.u32 %v11738_v1, %v9969_v63  ;;  %v9961_v11 = vld [vmem:[%s13316_s5 + $0x390] sm:$0xf]  ;;  %v11736_v12 = vld [vmem:[%s13316_s5 + $0x394] sm:$0xf0]  ;;  %v11718_v15 = vld [vmem:[%s13316_s5 + $0x304] sm:$0xf0]  ;;  %v9770_v20 = vor.u32 %v11688_v10, %v9769_v7 }
 0x24e   : > { %7987 = vmatpush.bf16.msrb.mxu3 %v9994_v22  ;;  %v9825_v16 = vld [vmem:[%s13316_s5 + $0x280] sm:$0xf]  ;;  %v11702_v17 = vld [vmem:[%s13316_s5 + $0x284] sm:$0xf0]  ;;  %v10201_v18 = vld [vmem:[%s13316_s5 + $0x570] sm:$0xf]  ;;  %v9962_v24 = vor.u32 %v11736_v12, %v9961_v11  ;;  %v9890_v25 = vor.u32 %v11718_v15, %v9889_v14 }
 0x24f   : > { %7931 = vmatpush.bf16.msrb.mxu0 %v9794_v35  ;;  %v11796_v19 = vld [vmem:[%s13316_s5 + $0x574] sm:$0xf0]  ;;  %v9761_v21 = vld [vmem:[%s13316_s5 + $0x200] sm:$0xf]  ;;  %v10137_v22 = vld [vmem:[%s13316_s5 + $0x4f0] sm:$0xf]  ;;  %v9826_v29 = vor.u32 %v11702_v17, %v9825_v16 }
 0x250   : > { %7950 = vmatpush.bf16.msrb.mxu1 %v9858_v27  ;;  %v11686_v26 = vld [vmem:[%s13316_s5 + $0x204] sm:$0xf0]  ;;  %v9953_v27 = vld [vmem:[%s13316_s5 + $0x380] sm:$0xf]  ;;  %v9265_v30 = vld [vmem:[%s15168_s0 + $0x10] sm:$0xf]  ;;  %v10202_v34 = vor.u32 %v11796_v19, %v10201_v18 }
 0x251   : > { %7969 = vmatpush.bf16.msrb.mxu2 %v9922_v23  ;;  %v11780_v23 = vld [vmem:[%s13316_s5 + $0x4f4] sm:$0xf0]  ;;  %v11734_v28 = vld [vmem:[%s13316_s5 + $0x384] sm:$0xf0]  ;;  %v11575_v31 = vld [vmem:[%s15168_s0 + $0x8c] sm:$0xf0]  ;;  %v9762_v42 = vor.u32 %v11686_v26, %v9761_v21 }
 0x252   : > { %7988 = vmatpush.bf16.msrb.mxu3 %v9986_v39  ;;  %7865 = vmatmul.bf16.gmra.mxu0 %v13481_v44  ;;  %v11559_v32 = vld [vmem:[%s15168_s0 + $0x14] sm:$0xf]  ;;  %v10073_v35 = vld [vmem:[%s13316_s5 + $0x470] sm:$0xf]  ;;  %v11764_v36 = vld [vmem:[%s13316_s5 + $0x474] sm:$0xf0]  ;;  %v10138_v38 = vor.u32 %v11780_v23, %v10137_v22  ;;  %v9954_v47 = vor.u32 %v11734_v28, %v9953_v27 }
 0x253   : > { %7884 = vmatmul.bf16.gmra.mxu1 %v13486_v50  ;;  %7932 = vmatpush.bf16.msrb.mxu0 %v9786_v58  ;;  %v9267_v33 = vld [vmem:[%s15168_s0 + $0x90] sm:$0xf0]  ;;  %v10265_v37 = vld [vmem:[%s13316_s5 + $0x5f0] sm:$0xf]  ;;  %v11812_v39 = vld [vmem:[%s13316_s5 + $0x5f4] sm:$0xf0]  ;;  %v10074_v52 = vor.u32 %v11764_v36, %v10073_v35 }
 0x254   : > { %7951 = vmatpush.bf16.msrb.mxu1 %v9850_v45  ;;  %7903 = vmatmul.bf16.gmra.mxu2 %v13488_v51  ;;  %v11794_v41 = vld [vmem:[%s13316_s5 + $0x564] sm:$0xf0]  ;;  %v9273_v43 = vld [vmem:[%s15168_s0 + $0x18] sm:$0xf]  ;;  %v11560_v46 = vld [vmem:[%s15168_s0 + $0x1c] sm:$0xf]  ;;  %v13559_v1 = vor.u32 %v11559_v32, %v9267_v33 }
 0x255   : > { %7970 = vmatpush.bf16.msrb.mxu2 %v9914_v40  ;;  %7922 = vmatmul.bf16.gmra.mxu3 %v13492_v56  ;;  %v10193_v40 = vld [vmem:[%s13316_s5 + $0x560] sm:$0xf]  ;;  %v11576_v45 = vld [vmem:[%s15168_s0 + $0x94] sm:$0xf0]  ;;  %v9275_v49 = vld [vmem:[%s15168_s0 + $0x98] sm:$0xf0] }
 0x256   : > { %7989 = vmatpush.bf16.msrb.mxu3 %v9978_v59  ;;  %v10065_v55 = vld [vmem:[%s13316_s5 + $0x460] sm:$0xf]  ;;  %v11762_v58 = vld [vmem:[%s13316_s5 + $0x464] sm:$0xf0]  ;;  %v10266_v59 = vor.u32 %v11812_v39, %v10265_v37  ;;  %v10185_v3 = vld [vmem:[%s13316_s5 + $0x550] sm:$0xf]  ;;  %v13564_v5 = vor.u32 %v11576_v45, %v9273_v43 }
 0x257   : > { %7933 = vmatpush.bf16.msrb.mxu0 %v9778_v6  ;;  %v10129_v61 = vld [vmem:[%s13316_s5 + $0x4e0] sm:$0xf]  ;;  %v11778_v62 = vld [vmem:[%s13316_s5 + $0x4e4] sm:$0xf0]  ;;  %v11792_v4 = vld [vmem:[%s13316_s5 + $0x554] sm:$0xf0]  ;;  %v13566_v6 = vor.u32 %v11560_v46, %v9275_v49  ;;  %v10066_v7 = vor.u32 %v11762_v58, %v10065_v55 }
 0x258   : > { %7952 = vmatpush.bf16.msrb.mxu1 %v9842_v0  ;;  %v10257_v63 = vld [vmem:[%s13316_s5 + $0x5e0] sm:$0xf]  ;;  %v13557_v0 = vor.u32 %v11575_v31, %v9265_v30  ;;  %v11810_v2 = vld [vmem:[%s13316_s5 + $0x5e4] sm:$0xf0]  ;;  %v11760_v10 = vld [vmem:[%s13316_s5 + $0x454] sm:$0xf0]  ;;  %v10186_v12 = vor.u32 %v11792_v4, %v10185_v3 }
 0x259   : > { %7971 = vmatpush.bf16.msrb.mxu2 %v9906_v60  ;;  %v10194_v60 = vor.u32 %v11794_v41, %v10193_v40  ;;  %v10258_v11 = vor.u32 %v11810_v2, %v10257_v63  ;;  %v11776_v14 = vld [vmem:[%s13316_s5 + $0x4d4] sm:$0xf0]  ;;  %v10249_v15 = vld [vmem:[%s13316_s5 + $0x5d0] sm:$0xf]  ;;  %v10177_v17 = vld [vmem:[%s13316_s5 + $0x540] sm:$0xf] }
 0x25a   : > { %7990 = vmatpush.bf16.msrb.mxu3 %v9970_v8  ;;  %v10130_v8 = vor.u32 %v11778_v62, %v10129_v61  ;;  %v11808_v16 = vld [vmem:[%s13316_s5 + $0x5d4] sm:$0xf0]  ;;  %v11790_v18 = vld [vmem:[%s13316_s5 + $0x544] sm:$0xf0]  ;;  %v10049_v21 = vld [vmem:[%s13316_s5 + $0x440] sm:$0xf] }
 0x25b   : > { %7934 = vmatpush.bf16.msrb.mxu0 %v9770_v20  ;;  %v11758_v22 = vld [vmem:[%s13316_s5 + $0x444] sm:$0xf0]  ;;  %v10250_v23 = vor.u32 %v11808_v16, %v10249_v15  ;;  %v10241_v27 = vld [vmem:[%s13316_s5 + $0x5c0] sm:$0xf]  ;;  %v11788_v30 = vld [vmem:[%s13316_s5 + $0x534] sm:$0xf0] }
 0x25c   : > { %7953 = vmatpush.bf16.msrb.mxu1 %v9834_v13  ;;  %v10121_v13 = vld [vmem:[%s13316_s5 + $0x4d0] sm:$0xf]  ;;  %v11774_v26 = vld [vmem:[%s13316_s5 + $0x4c4] sm:$0xf0]  ;;  %v10050_v31 = vor.u32 %v11758_v22, %v10049_v21  ;;  %v9395_v39 = vld [vmem:[%s15168_s0 + $0x190] sm:$0xf0] }
 0x25d   : > { %7972 = vmatpush.bf16.msrb.mxu2 %v9898_v9  ;;  %v10057_v9 = vld [vmem:[%s13316_s5 + $0x450] sm:$0xf]  ;;  %v10122_v20 = vor.u32 %v11776_v14, %v10121_v13  ;;  %v11806_v28 = vld [vmem:[%s13316_s5 + $0x5c4] sm:$0xf0]  ;;  %v11804_v45 = vld [vmem:[%s13316_s5 + $0x5b4] sm:$0xf0] }
 0x25e   : > { %7991 = vmatpush.bf16.msrb.mxu3 %v9962_v24  ;;  %v10058_v19 = vor.u32 %v11760_v10, %v10057_v9  ;;  %v10178_v24 = vor.u32 %v11790_v18, %v10177_v17  ;;  %v10041_v33 = vld [vmem:[%s13316_s5 + $0x430] sm:$0xf]  ;;  %v10242_v35 = vor.u32 %v11806_v28, %v10241_v27  ;;  %v10161_v46 = vld [vmem:[%s13316_s5 + $0x520] sm:$0xf]  ;;  %v9401_v49 = vld [vmem:[%s15168_s0 + $0x118] sm:$0xf] }
 0x25f   : > { %7935 = vmatpush.bf16.msrb.mxu0 %v9762_v42  ;;  %v9393_v36 = vld [vmem:[%s15168_s0 + $0x110] sm:$0xf]  ;;  %v11772_v42 = vld [vmem:[%s13316_s5 + $0x4b4] sm:$0xf0]  ;;  %v11592_v55 = vld [vmem:[%s15168_s0 + $0x11c] sm:$0xf] }
 0x260   : > { %7954 = vmatpush.bf16.msrb.mxu1 %v9826_v29  ;;  %v10169_v29 = vld [vmem:[%s13316_s5 + $0x530] sm:$0xf]  ;;  %v9403_v58 = vld [vmem:[%s15168_s0 + $0x198] sm:$0xf0]  ;;  %v10033_v61 = vld [vmem:[%s13316_s5 + $0x420] sm:$0xf] }
 0x261   : > { %7973 = vmatpush.bf16.msrb.mxu2 %v9890_v25  ;;  %v10113_v25 = vld [vmem:[%s13316_s5 + $0x4c0] sm:$0xf]  ;;  %v11607_v37 = vld [vmem:[%s15168_s0 + $0x18c] sm:$0xf0]  ;;  %v10170_v40 = vor.u32 %v11788_v30, %v10169_v29  ;;  %v11754_v62 = vld [vmem:[%s13316_s5 + $0x424] sm:$0xf0]  ;;  %v13634_v14 = vor.u32 %v11592_v55, %v9403_v58 }
 0x262   : > { %7992 = vmatpush.bf16.msrb.mxu3 %v9954_v47  ;;  %7936 = vmatmul.bf16.vlgmr.msrb.gmra.mxu0 %v13557_v0  ;;  %v10114_v32 = vor.u32 %v11774_v26, %v10113_v25  ;;  %v10105_v41 = vld [vmem:[%s13316_s5 + $0x4b0] sm:$0xf]  ;;  %v11786_v47 = vld [vmem:[%s13316_s5 + $0x524] sm:$0xf0]  ;;  %v10097_v3 = vld [vmem:[%s13316_s5 + $0x4a0] sm:$0xf]  ;;  %v10034_v15 = vor.u32 %v11754_v62, %v10033_v61 }
 0x263   : > { %8004 = vmatpush.bf16.msra.mxu0 %v10074_v52  ;;  %7955 = vmatmul.bf16.vlgmr.msrb.gmra.mxu1 %v13559_v1  ;;  %v10233_v43 = vld [vmem:[%s13316_s5 + $0x5b0] sm:$0xf]  ;;  %v11608_v52 = vld [vmem:[%s15168_s0 + $0x194] sm:$0xf0]  ;;  %v10162_v2 = vor.u32 %v11786_v47, %v10161_v46  ;;  %v11770_v4 = vld [vmem:[%s13316_s5 + $0x4a4] sm:$0xf0] }
 0x264   : > { %8023 = vmatpush.bf16.msra.mxu1 %v10138_v38  ;;  %7974 = vmatmul.bf16.vlgmr.msrb.gmra.mxu2 %v13564_v5  ;;  %v11591_v38 = vld [vmem:[%s15168_s0 + $0x114] sm:$0xf]  ;;  %v10234_v63 = vor.u32 %v11804_v45, %v10233_v43  ;;  %v11802_v10 = vld [vmem:[%s13316_s5 + $0x5a4] sm:$0xf0]  ;;  %v13632_v13 = vor.u32 %v11608_v52, %v9401_v49  ;;  %v10098_v16 = vor.u32 %v11770_v4, %v10097_v3  ;;  %v10025_v17 = vld [vmem:[%s13316_s5 + $0x410] sm:$0xf] }
 0x265   : > { %8042 = vmatpush.bf16.msra.mxu2 %v10202_v34  ;;  %7993 = vmatmul.bf16.vlgmr.msrb.gmra.mxu3 %v13566_v6  ;;  %v11756_v34 = vld [vmem:[%s13316_s5 + $0x434] sm:$0xf0]  ;;  %v13627_v9 = vor.u32 %v11591_v38, %v9395_v39  ;;  %v10089_v21 = vld [vmem:[%s13316_s5 + $0x490] sm:$0xf]  ;;  %v10145_v25 = vld [vmem:[%s13316_s5 + $0x500] sm:$0xf] }
 0x266   : > { %8061 = vmatpush.bf16.msra.mxu3 %v10266_v59  ;;  %v10042_v59 = vor.u32 %v11756_v34, %v10041_v33  ;;  %v11752_v18 = vld [vmem:[%s13316_s5 + $0x414] sm:$0xf0]  ;;  %v11782_v26 = vld [vmem:[%s13316_s5 + $0x504] sm:$0xf0]  ;;  %v10457_v27 = vld [vmem:[%s13316_s5 + $0x770] sm:$0xf] }
 0x267   : > { %8005 = vmatpush.bf16.msra.mxu0 %v10066_v7  ;;  %v10225_v7 = vld [vmem:[%s13316_s5 + $0x5a0] sm:$0xf]  ;;  %v11768_v22 = vld [vmem:[%s13316_s5 + $0x494] sm:$0xf0]  ;;  %v10026_v29 = vor.u32 %v11752_v18, %v10025_v17  ;;  %v11798_v38 = vld [vmem:[%s13316_s5 + $0x584] sm:$0xf0] }
 0x268   : > { %8024 = vmatpush.bf16.msra.mxu1 %v10130_v8  ;;  %v13625_v8 = vor.u32 %v11607_v37, %v9393_v36  ;;  %v11860_v28 = vld [vmem:[%s13316_s5 + $0x774] sm:$0xf0]  ;;  %v10090_v30 = vor.u32 %v11768_v22, %v10089_v21  ;;  %v10081_v33 = vld [vmem:[%s13316_s5 + $0x480] sm:$0xf]  ;;  %v11766_v36 = vld [vmem:[%s13316_s5 + $0x484] sm:$0xf0] }
 0x269   : > { %8043 = vmatpush.bf16.msra.mxu2 %v10194_v60  ;;  %v10106_v60 = vor.u32 %v11772_v42, %v10105_v41  ;;  %v10209_v37 = vld [vmem:[%s13316_s5 + $0x580] sm:$0xf]  ;;  %v10458_v39 = vor.u32 %v11860_v28, %v10457_v27  ;;  %v11828_v41 = vld [vmem:[%s13316_s5 + $0x674] sm:$0xf0]  ;;  %v10393_v42 = vld [vmem:[%s13316_s5 + $0x6f0] sm:$0xf]  ;;  %v10082_v49 = vor.u32 %v11766_v36, %v10081_v33 }
 0x26a   : > { %8062 = vmatpush.bf16.msra.mxu3 %v10258_v11  ;;  %v10153_v11 = vld [vmem:[%s13316_s5 + $0x510] sm:$0xf]  ;;  %v11844_v43 = vld [vmem:[%s13316_s5 + $0x6f4] sm:$0xf0]  ;;  %v10449_v52 = vld [vmem:[%s13316_s5 + $0x760] sm:$0xf]  ;;  %v10210_v58 = vor.u32 %v11798_v38, %v10209_v37 }
 0x26b   : > { %8006 = vmatpush.bf16.msra.mxu0 %v10058_v19  ;;  %v10226_v19 = vor.u32 %v11802_v10, %v10225_v7  ;;  %v10521_v45 = vld [vmem:[%s13316_s5 + $0x7f0] sm:$0xf]  ;;  %v11876_v46 = vld [vmem:[%s13316_s5 + $0x7f4] sm:$0xf0]  ;;  %v11858_v55 = vld [vmem:[%s13316_s5 + $0x764] sm:$0xf0] }
 0x26c   : > { %8025 = vmatpush.bf16.msra.mxu1 %v10122_v20  ;;  %v11561_v61 = vld [vmem:[%s15168_s0 + $0x24] sm:$0xf]  ;;  %v10522_v3 = vor.u32 %v11876_v46, %v10521_v45  ;;  %v10321_v4 = vld [vmem:[%s13316_s5 + $0x660] sm:$0xf]  ;;  %v11826_v7 = vld [vmem:[%s13316_s5 + $0x664] sm:$0xf0] }
 0x26d   : > { %8044 = vmatpush.bf16.msra.mxu2 %v10186_v12  ;;  %v11784_v12 = vld [vmem:[%s13316_s5 + $0x514] sm:$0xf0]  ;;  %v9289_v10 = vld [vmem:[%s15168_s0 + $0x28] sm:$0xf]  ;;  %v10385_v17 = vld [vmem:[%s13316_s5 + $0x6e0] sm:$0xf] }
 0x26e   : > { %8063 = vmatpush.bf16.msra.mxu3 %v10250_v23  ;;  %v10154_v20 = vor.u32 %v11784_v12, %v10153_v11  ;;  %v10217_v23 = vld [vmem:[%s13316_s5 + $0x590] sm:$0xf]  ;;  %v11578_v11 = vld [vmem:[%s15168_s0 + $0xa4] sm:$0xf0]  ;;  %v11562_v12 = vld [vmem:[%s15168_s0 + $0x2c] sm:$0xf] }
 0x26f   : > { %8007 = vmatpush.bf16.msra.mxu0 %v10050_v31  ;;  %v10017_v31 = vld [vmem:[%s13316_s5 + $0x400] sm:$0xf]  ;;  %v11842_v18 = vld [vmem:[%s13316_s5 + $0x6e4] sm:$0xf0]  ;;  %v10441_v22 = vld [vmem:[%s13316_s5 + $0x750] sm:$0xf]  ;;  %v13702_v28 = vor.u32 %v11578_v11, %v9289_v10 }
 0x270   : > { %8026 = vmatpush.bf16.msra.mxu1 %v10114_v32  ;;  %v11750_v32 = vld [vmem:[%s13316_s5 + $0x404] sm:$0xf0]  ;;  %v11824_v27 = vld [vmem:[%s13316_s5 + $0x654] sm:$0xf0]  ;;  %v10505_v36 = vld [vmem:[%s13316_s5 + $0x7d0] sm:$0xf] }
 0x271   : > { %8045 = vmatpush.bf16.msra.mxu2 %v10178_v24  ;;  %v11800_v24 = vld [vmem:[%s13316_s5 + $0x594] sm:$0xf0]  ;;  %v10018_v47 = vor.u32 %v11750_v32, %v10017_v31  ;;  %v11874_v21 = vld [vmem:[%s13316_s5 + $0x7e4] sm:$0xf0]  ;;  %v10377_v32 = vld [vmem:[%s13316_s5 + $0x6d0] sm:$0xf] }
 0x272   : > { %8064 = vmatpush.bf16.msra.mxu3 %v10242_v35  ;;  %7941 = vmatmul.bf16.gmra.mxu0 %v13625_v8  ;;  %v10218_v34 = vor.u32 %v11800_v24, %v10217_v23  ;;  %v10146_v35 = vor.u32 %v11782_v26, %v10145_v25  ;;  %v11856_v25 = vld [vmem:[%s13316_s5 + $0x754] sm:$0xf0]  ;;  %v10313_v26 = vld [vmem:[%s13316_s5 + $0x650] sm:$0xf]  ;;  %v10433_v38 = vld [vmem:[%s13316_s5 + $0x740] sm:$0xf] }
 0x273   : > { %8008 = vmatpush.bf16.msra.mxu0 %v10042_v59  ;;  %7960 = vmatmul.bf16.gmra.mxu1 %v13627_v9  ;;  %v9281_v59 = vld [vmem:[%s15168_s0 + $0x20] sm:$0xf]  ;;  %v11840_v33 = vld [vmem:[%s13316_s5 + $0x6d4] sm:$0xf0]  ;;  %v11838_v46 = vld [vmem:[%s13316_s5 + $0x6c4] sm:$0xf0] }
 0x274   : > { %8027 = vmatpush.bf16.msra.mxu1 %v10106_v60  ;;  %7979 = vmatmul.bf16.gmra.mxu2 %v13632_v13  ;;  %v11577_v60 = vld [vmem:[%s15168_s0 + $0x9c] sm:$0xf0]  ;;  %v11872_v37 = vld [vmem:[%s13316_s5 + $0x7d4] sm:$0xf0]  ;;  %v11593_v10 = vld [vmem:[%s15168_s0 + $0x124] sm:$0xf] }
 0x275   : > { %8046 = vmatpush.bf16.msra.mxu2 %v10170_v40  ;;  %7998 = vmatmul.bf16.gmra.mxu3 %v13634_v14  ;;  %v10329_v40 = vld [vmem:[%s13316_s5 + $0x670] sm:$0xf]  ;;  %v13695_v23 = vor.u32 %v11577_v60, %v9281_v59  ;;  %v10369_v45 = vld [vmem:[%s13316_s5 + $0x6c0] sm:$0xf]  ;;  %v11852_v59 = vld [vmem:[%s13316_s5 + $0x734] sm:$0xf0] }
 0x276   : > { %8065 = vmatpush.bf16.msra.mxu3 %v10234_v63  ;;  %v10330_v62 = vor.u32 %v11828_v41, %v10329_v40  ;;  %v9283_v63 = vld [vmem:[%s15168_s0 + $0xa0] sm:$0xf0]  ;;  %v10305_v40 = vld [vmem:[%s13316_s5 + $0x640] sm:$0xf]  ;;  %v11822_v41 = vld [vmem:[%s13316_s5 + $0x644] sm:$0xf0] }
 0x277   : > { %8009 = vmatpush.bf16.msra.mxu0 %v10034_v15  ;;  %v10450_v15 = vor.u32 %v11858_v55, %v10449_v52  ;;  %v13697_v24 = vor.u32 %v11561_v61, %v9283_v63  ;;  %v10497_v52 = vld [vmem:[%s13316_s5 + $0x7c0] sm:$0xf]  ;;  %v11870_v55 = vld [vmem:[%s13316_s5 + $0x7c4] sm:$0xf0]  ;;  %v10297_v60 = vld [vmem:[%s13316_s5 + $0x630] sm:$0xf] }
 0x278   : > { %8028 = vmatpush.bf16.msra.mxu1 %v10098_v16  ;;  %v9291_v16 = vld [vmem:[%s15168_s0 + $0xa8] sm:$0xf0]  ;;  %v11820_v61 = vld [vmem:[%s13316_s5 + $0x634] sm:$0xf0]  ;;  %v10498_v63 = vor.u32 %v11870_v55, %v10497_v52  ;;  %v9411_v11 = vld [vmem:[%s15168_s0 + $0x1a0] sm:$0xf0] }
 0x279   : > { %8047 = vmatpush.bf16.msra.mxu2 %v10162_v2  ;;  %v10394_v2 = vor.u32 %v11844_v43, %v10393_v42  ;;  %v10378_v42 = vor.u32 %v11840_v33, %v10377_v32  ;;  %v10506_v43 = vor.u32 %v11872_v37, %v10505_v36  ;;  %v10353_v32 = vld [vmem:[%s13316_s5 + $0x6a0] sm:$0xf]  ;;  %v11834_v33 = vld [vmem:[%s13316_s5 + $0x6a4] sm:$0xf0]  ;;  %v10345_v52 = vld [vmem:[%s13316_s5 + $0x690] sm:$0xf] }
 0x27a   : > { %8066 = vmatpush.bf16.msra.mxu3 %v10226_v19  ;;  %v10322_v19 = vor.u32 %v11826_v7, %v10321_v4  ;;  %v9409_v4 = vld [vmem:[%s15168_s0 + $0x120] sm:$0xf]  ;;  %v11866_v37 = vld [vmem:[%s13316_s5 + $0x7a4] sm:$0xf0]  ;;  %v11832_v55 = vld [vmem:[%s13316_s5 + $0x694] sm:$0xf0] }
 0x27b   : > { %8010 = vmatpush.bf16.msra.mxu0 %v10026_v29  ;;  %v13704_v29 = vor.u32 %v11562_v12, %v9291_v16  ;;  %v11609_v7 = vld [vmem:[%s15168_s0 + $0x19c] sm:$0xf0]  ;;  %v10489_v16 = vld [vmem:[%s13316_s5 + $0x7b0] sm:$0xf]  ;;  %s15283_s24 = smov (!%p13898_p11, %s9246_s24), 3 }
 0x27c   : > { %8029 = vmatpush.bf16.msra.mxu1 %v10090_v30  ;;  %v10386_v30 = vor.u32 %v11842_v18, %v10385_v17  ;;  %v11868_v17 = vld [vmem:[%s13316_s5 + $0x7b4] sm:$0xf0]  ;;  %v10417_v18 = vld [vmem:[%s13316_s5 + $0x720] sm:$0xf]  ;;  %s13942_s28 = scalar_lea.vmem %s15170_s2, %s15283_s24 }
 0x27d   : > { %8048 = vmatpush.bf16.msra.mxu2 %v10154_v20  ;;  %v10513_v20 = vld [vmem:[%s13316_s5 + $0x7e0] sm:$0xf] }
 0x27e   : > { %8067 = vmatpush.bf16.msra.mxu3 %v10218_v34  ;;  %v10514_v31 = vor.u32 %v11874_v21, %v10513_v20  ;;  %v10442_v34 = vor.u32 %v11856_v25, %v10441_v22  ;;  %v10289_v20 = vld [vmem:[%s13316_s5 + $0x620] sm:$0xf]  ;;  %v11818_v21 = vld [vmem:[%s13316_s5 + $0x624] sm:$0xf0] }
 0x27f   : > { %8011 = vmatpush.bf16.msra.mxu0 %v10018_v47  ;;  %v9417_v22 = vld [vmem:[%s15168_s0 + $0x128] sm:$0xf]  ;;  %v10481_v36 = vld [vmem:[%s13316_s5 + $0x7a0] sm:$0xf] }
 0x280   : > { %8030 = vmatpush.bf16.msra.mxu1 %v10082_v49  ;;  %v10306_v49 = vor.u32 %v11822_v41, %v10305_v40  ;;  %v11610_v25 = vld [vmem:[%s15168_s0 + $0x1a4] sm:$0xf0]  ;;  %v13765_v40 = vor.u32 %v11593_v10, %v9411_v11  ;;  %v11848_v41 = vld [vmem:[%s13316_s5 + $0x714] sm:$0xf0]  ;;  %v10585_v10 = vld [vmem:[%s13316_s5 + $0x870] sm:$0xf] }
 0x281   : > { %8049 = vmatpush.bf16.msra.mxu2 %v10146_v35  ;;  %v10314_v35 = vor.u32 %v11824_v27, %v10313_v26  ;;  %v11594_v26 = vld [vmem:[%s15168_s0 + $0x12c] sm:$0xf]  ;;  %v11892_v11 = vld [vmem:[%s13316_s5 + $0x874] sm:$0xf0] }
 0x282   : > { %8068 = vmatpush.bf16.msra.mxu3 %v10210_v58  ;;  %8012 = vmatmul.bf16.vlgmr.msra.gmra.mxu0 %v13695_v23  ;;  %v10425_v58 = vld [vmem:[%s13316_s5 + $0x730] sm:$0xf]  ;;  %v9419_v27 = vld [vmem:[%s15168_s0 + $0x1a8] sm:$0xf0] }
 0x283   : > { %8080 = vmatpush.bf16.msrb.mxu0 %v10330_v62  ;;  %8031 = vmatmul.bf16.vlgmr.msra.gmra.mxu1 %v13697_v24  ;;  %v10370_v62 = vor.u32 %v11838_v46, %v10369_v45  ;;  %v10426_v12 = vor.u32 %v11852_v59, %v10425_v58  ;;  %v13770_v45 = vor.u32 %v11610_v25, %v9417_v22  ;;  %v10473_v58 = vld [vmem:[%s13316_s5 + $0x790] sm:$0xf]  ;;  %v11908_v25 = vld [vmem:[%s13316_s5 + $0x8f4] sm:$0xf0] }
 0x284   : > { %8099 = vmatpush.bf16.msrb.mxu1 %v10394_v2  ;;  %8050 = vmatmul.bf16.vlgmr.msra.gmra.mxu2 %v13702_v28  ;;  %v10361_v2 = vld [vmem:[%s13316_s5 + $0x6b0] sm:$0xf]  ;;  %v13772_v46 = vor.u32 %v11594_v26, %v9419_v27  ;;  %v10586_v27 = vor.u32 %v11892_v11, %v10585_v10 }
 0x285   : > { %8118 = vmatpush.bf16.msrb.mxu2 %v10458_v39  ;;  %v11854_v39 = vld [vmem:[%s13316_s5 + $0x744] sm:$0xf0]  ;;  %8069 = vmatmul.bf16.vlgmr.msra.gmra.mxu3 %v13704_v29  ;;  %v10649_v22 = vld [vmem:[%s13316_s5 + $0x8f0] sm:$0xf] }
 0x286   : > { %8137 = vmatpush.bf16.msrb.mxu3 %v10522_v3  ;;  %v10434_v47 = vor.u32 %v11854_v39, %v10433_v38  ;;  %v11836_v3 = vld [vmem:[%s13316_s5 + $0x6b4] sm:$0xf0]  ;;  %v10409_v38 = vld [vmem:[%s13316_s5 + $0x710] sm:$0xf]  ;;  %v13763_v39 = vor.u32 %v11609_v7, %v9409_v4 }
 0x287   : > { %8081 = vmatpush.bf16.msrb.mxu0 %v10322_v19  ;;  %v11850_v19 = vld [vmem:[%s13316_s5 + $0x724] sm:$0xf0]  ;;  %v10410_v59 = vor.u32 %v11848_v41, %v10409_v38  ;;  %v10713_v4 = vld [vmem:[%s13316_s5 + $0x970] sm:$0xf]  ;;  %v11924_v7 = vld [vmem:[%s13316_s5 + $0x974] sm:$0xf0] }
 0x288   : > { %8100 = vmatpush.bf16.msrb.mxu1 %v10386_v30  ;;  %v10362_v30 = vor.u32 %v11836_v3, %v10361_v2  ;;  %v10273_v2 = vld [vmem:[%s13316_s5 + $0x600] sm:$0xf]  ;;  %v11814_v3 = vld [vmem:[%s13316_s5 + $0x604] sm:$0xf0]  ;;  %v10714_v26 = vor.u32 %v11924_v7, %v10713_v4  ;;  %v9297_v38 = vld [vmem:[%s15168_s0 + $0x30] sm:$0xf] }
 0x289   : > { %8119 = vmatpush.bf16.msrb.mxu2 %v10450_v15  ;;  %v10298_v15 = vor.u32 %v11820_v61, %v10297_v60  ;;  %v11864_v61 = vld [vmem:[%s13316_s5 + $0x794] sm:$0xf0]  ;;  %v11579_v41 = vld [vmem:[%s15168_s0 + $0xac] sm:$0xf0] }
 0x28a   : > { %8138 = vmatpush.bf16.msrb.mxu3 %v10514_v31  ;;  %v10490_v31 = vor.u32 %v11868_v17, %v10489_v16  ;;  %v10337_v16 = vld [vmem:[%s13316_s5 + $0x680] sm:$0xf]  ;;  %v11830_v17 = vld [vmem:[%s13316_s5 + $0x684] sm:$0xf0]  ;;  %v10697_v4 = vld [vmem:[%s13316_s5 + $0x950] sm:$0xf] }
 0x28b   : > { %8082 = vmatpush.bf16.msrb.mxu0 %v10314_v35  ;;  %v10290_v35 = vor.u32 %v11818_v21, %v10289_v20  ;;  %v10274_v20 = vor.u32 %v11814_v3, %v10273_v2  ;;  %v11862_v21 = vld [vmem:[%s13316_s5 + $0x784] sm:$0xf0]  ;;  %v11564_v2 = vld [vmem:[%s15168_s0 + $0x3c] sm:$0xf]  ;;  %v11920_v7 = vld [vmem:[%s13316_s5 + $0x954] sm:$0xf0] }
 0x28c   : > { %8101 = vmatpush.bf16.msrb.mxu1 %v10378_v42  ;;  %v10281_v42 = vld [vmem:[%s13316_s5 + $0x610] sm:$0xf]  ;;  %v9307_v3 = vld [vmem:[%s15168_s0 + $0xb8] sm:$0xf0] }
 0x28d   : > { %8120 = vmatpush.bf16.msrb.mxu2 %v10442_v34  ;;  %v10418_v34 = vor.u32 %v11850_v19, %v10417_v18  ;;  %v10465_v18 = vld [vmem:[%s13316_s5 + $0x780] sm:$0xf] }
 0x28e   : > { %8139 = vmatpush.bf16.msrb.mxu3 %v10506_v43  ;;  %v11816_v43 = vld [vmem:[%s13316_s5 + $0x614] sm:$0xf0] }
 0x28f   : > { %8083 = vmatpush.bf16.msrb.mxu0 %v10306_v49  ;;  %v10482_v49 = vor.u32 %v11866_v37, %v10481_v36  ;;  %v10282_v60 = vor.u32 %v11816_v43, %v10281_v42  ;;  %v10338_v36 = vor.u32 %v11830_v17, %v10337_v16  ;;  %v10466_v37 = vor.u32 %v11862_v21, %v10465_v18  ;;  %v11563_v42 = vld [vmem:[%s15168_s0 + $0x34] sm:$0xf]  ;;  %v10633_v16 = vld [vmem:[%s13316_s5 + $0x8d0] sm:$0xf]  ;;  %v11936_v21 = vld [vmem:[%s13316_s5 + $0x9d4] sm:$0xf0] }
 0x290   : > { %8102 = vmatpush.bf16.msrb.mxu1 %v10370_v62  ;;  %v10401_v62 = vld [vmem:[%s13316_s5 + $0x700] sm:$0xf]  ;;  %v9299_v43 = vld [vmem:[%s15168_s0 + $0xb0] sm:$0xf0]  ;;  %v13835_v17 = vor.u32 %v11579_v41, %v9297_v38  ;;  %v11934_v41 = vld [vmem:[%s13316_s5 + $0x9c4] sm:$0xf0] }
 0x291   : > { %8121 = vmatpush.bf16.msrb.mxu2 %v10434_v47  ;;  %v10354_v47 = vor.u32 %v11834_v33, %v10353_v32  ;;  %v10705_v32 = vld [vmem:[%s13316_s5 + $0x960] sm:$0xf]  ;;  %v11922_v33 = vld [vmem:[%s13316_s5 + $0x964] sm:$0xf0]  ;;  %v13837_v18 = vor.u32 %v11563_v42, %v9299_v43 }
 0x292   : > { %8140 = vmatpush.bf16.msrb.mxu3 %v10498_v63  ;;  %v11846_v63 = vld [vmem:[%s13316_s5 + $0x704] sm:$0xf0]  ;;  %8017 = vmatmul.bf16.gmra.mxu0 %v13763_v39  ;;  %v10753_v38 = vld [vmem:[%s13316_s5 + $0x9c0] sm:$0xf] }
 0x293   : > { %8084 = vmatpush.bf16.msrb.mxu0 %v10298_v15  ;;  %8036 = vmatmul.bf16.gmra.mxu1 %v13765_v40  ;;  %v10474_v15 = vor.u32 %v11864_v61, %v10473_v58  ;;  %v10402_v19 = vor.u32 %v11846_v63, %v10401_v62  ;;  %v11938_v61 = vld [vmem:[%s13316_s5 + $0x9e4] sm:$0xf0]  ;;  %v9305_v62 = vld [vmem:[%s15168_s0 + $0x38] sm:$0xf] }
 0x294   : > { %8103 = vmatpush.bf16.msrb.mxu1 %v10362_v30  ;;  %8055 = vmatmul.bf16.gmra.mxu2 %v13770_v45  ;;  %v10777_v30 = vld [vmem:[%s13316_s5 + $0x9f0] sm:$0xf]  ;;  %v11580_v63 = vld [vmem:[%s15168_s0 + $0xb4] sm:$0xf0] }
 0x295   : > { %8122 = vmatpush.bf16.msrb.mxu2 %v10426_v12  ;;  %8074 = vmatmul.bf16.gmra.mxu3 %v13772_v46  ;;  %v10346_v12 = vor.u32 %v11832_v55, %v10345_v52  ;;  %v10641_v52 = vld [vmem:[%s13316_s5 + $0x8e0] sm:$0xf]  ;;  %v10706_v55 = vor.u32 %v11922_v33, %v10705_v32 }
 0x296   : > { %8141 = vmatpush.bf16.msrb.mxu3 %v10490_v31  ;;  %v11940_v31 = vld [vmem:[%s13316_s5 + $0x9f4] sm:$0xf0] }
 0x297   : > { %8085 = vmatpush.bf16.msrb.mxu0 %v10290_v35  ;;  %v11890_v35 = vld [vmem:[%s13316_s5 + $0x864] sm:$0xf0] }
 0x298   : > { %8104 = vmatpush.bf16.msrb.mxu1 %v10354_v47  ;;  %v10650_v47 = vor.u32 %v11908_v25, %v10649_v22  ;;  %v13842_v22 = vor.u32 %v11580_v63, %v9305_v62  ;;  %v13844_v25 = vor.u32 %v11564_v2, %v9307_v3  ;;  %v10745_v62 = vld [vmem:[%s13316_s5 + $0x9b0] sm:$0xf]  ;;  %v11932_v63 = vld [vmem:[%s13316_s5 + $0x9b4] sm:$0xf0] }
 0x299   : > { %8123 = vmatpush.bf16.msrb.mxu2 %v10418_v34  ;;  %v10577_v34 = vld [vmem:[%s13316_s5 + $0x860] sm:$0xf] }
 0x29a   : > { %8142 = vmatpush.bf16.msrb.mxu3 %v10482_v49  ;;  %v10778_v49 = vor.u32 %v11940_v31, %v10777_v30  ;;  %v10578_v58 = vor.u32 %v11890_v35, %v10577_v34  ;;  %v10689_v30 = vld [vmem:[%s13316_s5 + $0x940] sm:$0xf]  ;;  %v11918_v31 = vld [vmem:[%s13316_s5 + $0x944] sm:$0xf0] }
 0x29b   : > { %8086 = vmatpush.bf16.msrb.mxu0 %v10282_v60  ;;  %v10769_v60 = vld [vmem:[%s13316_s5 + $0x9e0] sm:$0xf]  ;;  %v11886_v35 = vld [vmem:[%s13316_s5 + $0x844] sm:$0xf0]  ;;  %v10690_v42 = vor.u32 %v11918_v31, %v10689_v30 }
 0x29c   : > { %8105 = vmatpush.bf16.msrb.mxu1 %v10346_v12  ;;  %v10770_v11 = vor.u32 %v11938_v61, %v10769_v60  ;;  %v10569_v12 = vld [vmem:[%s13316_s5 + $0x850] sm:$0xf]  ;;  %v10561_v34 = vld [vmem:[%s13316_s5 + $0x840] sm:$0xf]  ;;  %v11900_v61 = vld [vmem:[%s13316_s5 + $0x8b4] sm:$0xf0] }
 0x29d   : > { %8124 = vmatpush.bf16.msrb.mxu2 %v10410_v59  ;;  %v11906_v59 = vld [vmem:[%s13316_s5 + $0x8e4] sm:$0xf0]  ;;  %v10562_v43 = vor.u32 %v11886_v35, %v10561_v34  ;;  %v10617_v60 = vld [vmem:[%s13316_s5 + $0x8b0] sm:$0xf]  ;;  %v10737_v31 = vld [vmem:[%s13316_s5 + $0x9a0] sm:$0xf] }
 0x29e   : > { %8143 = vmatpush.bf16.msrb.mxu3 %v10474_v15  ;;  %v10642_v10 = vor.u32 %v11906_v59, %v10641_v52  ;;  %v11888_v15 = vld [vmem:[%s13316_s5 + $0x854] sm:$0xf0]  ;;  %v11898_v30 = vld [vmem:[%s13316_s5 + $0x8a4] sm:$0xf0]  ;;  %v11596_v34 = vld [vmem:[%s15168_s0 + $0x13c] sm:$0xf] }
 0x29f   : > { %8087 = vmatpush.bf16.msrb.mxu0 %v10274_v20  ;;  %v10761_v20 = vld [vmem:[%s13316_s5 + $0x9d0] sm:$0xf]  ;;  %v11884_v59 = vld [vmem:[%s13316_s5 + $0x834] sm:$0xf0]  ;;  %v9435_v35 = vld [vmem:[%s15168_s0 + $0x1b8] sm:$0xf0] }
 0x2a0   : > { %8106 = vmatpush.bf16.msrb.mxu1 %v10338_v36  ;;  %v10762_v33 = vor.u32 %v11936_v21, %v10761_v20  ;;  %v10625_v36 = vld [vmem:[%s13316_s5 + $0x8c0] sm:$0xf]  ;;  %v11882_v21 = vld [vmem:[%s13316_s5 + $0x824] sm:$0xf0] }
 0x2a1   : > { %8125 = vmatpush.bf16.msrb.mxu2 %v10402_v19  ;;  %v11904_v19 = vld [vmem:[%s13316_s5 + $0x8d4] sm:$0xf0]  ;;  %v10545_v20 = vld [vmem:[%s13316_s5 + $0x820] sm:$0xf] }
 0x2a2   : > { %8144 = vmatpush.bf16.msrb.mxu3 %v10466_v37  ;;  %v10634_v32 = vor.u32 %v11904_v19, %v10633_v16  ;;  %8088 = vmatmul.bf16.vlgmr.msrb.gmra.mxu0 %v13835_v17  ;;  %v11902_v37 = vld [vmem:[%s13316_s5 + $0x8c4] sm:$0xf0]  ;;  %v10618_v16 = vor.u32 %v11900_v61, %v10617_v60  ;;  %v10746_v19 = vor.u32 %v11932_v63, %v10745_v62  ;;  %v10729_v60 = vld [vmem:[%s13316_s5 + $0x990] sm:$0xf]  ;;  %v11928_v61 = vld [vmem:[%s13316_s5 + $0x994] sm:$0xf0] }
 0x2a3   : > { %8156 = vmatpush.bf16.msra.mxu0 %v10586_v27  ;;  %v10570_v27 = vor.u32 %v11888_v15, %v10569_v12  ;;  %8107 = vmatmul.bf16.vlgmr.msrb.gmra.mxu1 %v13837_v18  ;;  %v10626_v52 = vor.u32 %v11902_v37, %v10625_v36  ;;  %v11595_v12 = vld [vmem:[%s15168_s0 + $0x134] sm:$0xf]  ;;  %v10546_v37 = vor.u32 %v11882_v21, %v10545_v20  ;;  %v10721_v20 = vld [vmem:[%s13316_s5 + $0x980] sm:$0xf]  ;;  %v11926_v21 = vld [vmem:[%s13316_s5 + $0x984] sm:$0xf0] }
 0x2a4   : > { %8175 = vmatpush.bf16.msra.mxu1 %v10650_v47  ;;  %8126 = vmatmul.bf16.vlgmr.msrb.gmra.mxu2 %v13842_v22  ;;  %v10681_v47 = vld [vmem:[%s13316_s5 + $0x930] sm:$0xf]  ;;  %v9427_v15 = vld [vmem:[%s15168_s0 + $0x1b0] sm:$0xf0]  ;;  %v13919_v63 = vor.u32 %v11596_v34, %v9435_v35  ;;  %v11972_v35 = vld [vmem:[%s13316_s5 + $0xaf4] sm:$0xf0] }
 0x2a5   : > { %8194 = vmatpush.bf16.msra.mxu2 %v10714_v26  ;;  %v10698_v26 = vor.u32 %v11920_v7, %v10697_v4  ;;  %8145 = vmatmul.bf16.vlgmr.msrb.gmra.mxu3 %v13844_v25  ;;  %v10673_v4 = vld [vmem:[%s13316_s5 + $0x920] sm:$0xf]  ;;  %v11914_v7 = vld [vmem:[%s13316_s5 + $0x924] sm:$0xf0] }
 0x2a6   : > { %8213 = vmatpush.bf16.msra.mxu3 %v10778_v49  ;;  %v11916_v49 = vld [vmem:[%s13316_s5 + $0x934] sm:$0xf0]  ;;  %v10674_v36 = vor.u32 %v11914_v7, %v10673_v4  ;;  %15211 = vst [vmem:[#allocation7_spill] sm:$0xff] %v13919_v63  ;;  %v11910_v7 = vld [vmem:[%s13316_s5 + $0x904] sm:$0xf0] }
 0x2a7   : > { %8157 = vmatpush.bf16.msra.mxu0 %v10578_v58  ;;  %v10553_v58 = vld [vmem:[%s13316_s5 + $0x830] sm:$0xf]  ;;  %v10682_v2 = vor.u32 %v11916_v49, %v10681_v47  ;;  %v11880_v49 = vld [vmem:[%s13316_s5 + $0x814] sm:$0xf0] }
 0x2a8   : > { %8176 = vmatpush.bf16.msra.mxu1 %v10642_v10  ;;  %v10554_v3 = vor.u32 %v11884_v59, %v10553_v58  ;;  %v9425_v10 = vld [vmem:[%s15168_s0 + $0x130] sm:$0xf]  ;;  %v13912_v58 = vor.u32 %v11595_v12, %v9427_v15  ;;  %v11896_v59 = vld [vmem:[%s13316_s5 + $0x894] sm:$0xf0]  ;;  %v10730_v15 = vor.u32 %v11928_v61, %v10729_v60  ;;  %v10833_v61 = vld [vmem:[%s13316_s5 + $0xa60] sm:$0xf] }
 0x2a9   : > { %8195 = vmatpush.bf16.msra.mxu2 %v10706_v55  ;;  %v10754_v55 = vor.u32 %v11934_v41, %v10753_v38  ;;  %v10665_v38 = vld [vmem:[%s13316_s5 + $0x910] sm:$0xf]  ;;  %v11912_v41 = vld [vmem:[%s13316_s5 + $0x914] sm:$0xf0] }
 0x2aa   : > { %8214 = vmatpush.bf16.msra.mxu3 %v10770_v11  ;;  %v11611_v11 = vld [vmem:[%s15168_s0 + $0x1ac] sm:$0xf0]  ;;  %15209 = vst [vmem:[#allocation5_spill] sm:$0xff] %v13912_v58 }
 0x2ab   : > { %8158 = vmatpush.bf16.msra.mxu0 %v10570_v27  ;;  %v9433_v27 = vld [vmem:[%s15168_s0 + $0x138] sm:$0xf]  ;;  %v10537_v47 = vld [vmem:[%s13316_s5 + $0x810] sm:$0xf] }
 0x2ac   : > { %8177 = vmatpush.bf16.msra.mxu1 %v10634_v32  ;;  %v11930_v32 = vld [vmem:[%s13316_s5 + $0x9a4] sm:$0xf0]  ;;  %v10538_v4 = vor.u32 %v11880_v49, %v10537_v47  ;;  %v10961_v49 = vld [vmem:[%s13316_s5 + $0xb60] sm:$0xf] }
 0x2ad   : > { %8196 = vmatpush.bf16.msra.mxu2 %v10698_v26  ;;  %v10609_v26 = vld [vmem:[%s13316_s5 + $0x8a0] sm:$0xf] }
 0x2ae   : > { %8215 = vmatpush.bf16.msra.mxu3 %v10762_v33  ;;  %v11612_v33 = vld [vmem:[%s15168_s0 + $0x1b4] sm:$0xf0] }
 0x2af   : > { %8159 = vmatpush.bf16.msra.mxu0 %v10562_v43  ;;  %v10738_v43 = vor.u32 %v11930_v32, %v10737_v31  ;;  %v13917_v62 = vor.u32 %v11612_v33, %v9433_v27  ;;  %v11988_v27 = vld [vmem:[%s13316_s5 + $0xb74] sm:$0xf0]  ;;  %v10905_v32 = vld [vmem:[%s13316_s5 + $0xaf0] sm:$0xf] }
 0x2b0   : > { %8178 = vmatpush.bf16.msra.mxu1 %v10626_v52  ;;  %v10601_v52 = vld [vmem:[%s13316_s5 + $0x890] sm:$0xf]  ;;  %v11956_v31 = vld [vmem:[%s13316_s5 + $0xa74] sm:$0xf0] }
 0x2b1   : > { %8197 = vmatpush.bf16.msra.mxu2 %v10690_v42  ;;  %v10610_v42 = vor.u32 %v11898_v30, %v10609_v26  ;;  %15210 = vst [vmem:[#allocation6_spill] sm:$0xff] %v13917_v62  ;;  %v10602_v12 = vor.u32 %v11896_v59, %v10601_v52  ;;  %v10969_v26 = vld [vmem:[%s13316_s5 + $0xb70] sm:$0xf]  ;;  %v11986_v52 = vld [vmem:[%s13316_s5 + $0xb64] sm:$0xf0]  ;;  %v10906_v59 = vor.u32 %v11972_v35, %v10905_v32 }
 0x2b2   : > { %8216 = vmatpush.bf16.msra.mxu3 %v10754_v55  ;;  %v13910_v55 = vor.u32 %v11611_v11, %v9425_v10  ;;  %v10529_v10 = vld [vmem:[%s13316_s5 + $0x800] sm:$0xf]  ;;  %v11878_v11 = vld [vmem:[%s13316_s5 + $0x804] sm:$0xf0]  ;;  %v10841_v30 = vld [vmem:[%s13316_s5 + $0xa70] sm:$0xf] }
 0x2b3   : > { %8160 = vmatpush.bf16.msra.mxu0 %v10554_v3  ;;  %v10666_v3 = vor.u32 %v11912_v41, %v10665_v38  ;;  %8112 = vmatmul.bf16.gmra.mxu1 %v13912_v58  ;;  %v10530_v34 = vor.u32 %v11878_v11, %v10529_v10  ;;  %v10722_v41 = vor.u32 %v11926_v21, %v10721_v20  ;;  %v12002_v10 = vld [vmem:[%s13316_s5 + $0xbe4] sm:$0xf0]  ;;  %v9313_v11 = vld [vmem:[%s15168_s0 + $0x40] sm:$0xf]  ;;  %v11984_v35 = vld [vmem:[%s13316_s5 + $0xb54] sm:$0xf0] }
 0x2b4   : > { %8179 = vmatpush.bf16.msra.mxu1 %v10618_v16  ;;  %15208 = vst [vmem:[#allocation4_spill] sm:$0xff] %v13910_v55  ;;  %v10593_v16 = vld [vmem:[%s13316_s5 + $0x880] sm:$0xf]  ;;  %8093 = vmatmul.bf16.gmra.mxu0 %v13910_v55  ;;  %v10842_v47 = vor.u32 %v11956_v31, %v10841_v30  ;;  %v10962_v20 = vor.u32 %v11986_v52, %v10961_v49  ;;  %v11566_v30 = vld [vmem:[%s15168_s0 + $0x4c] sm:$0xf] }
 0x2b5   : > { %8198 = vmatpush.bf16.msra.mxu2 %v10682_v2  ;;  %v10657_v2 = vld [vmem:[%s13316_s5 + $0x900] sm:$0xf]  ;;  %8150 = vmatmul.bf16.gmra.mxu3 %v13919_v63  ;;  %v11017_v49 = vld [vmem:[%s13316_s5 + $0xbd0] sm:$0xf]  ;;  %v12000_v52 = vld [vmem:[%s13316_s5 + $0xbd4] sm:$0xf0] }
 0x2b6   : > { %8217 = vmatpush.bf16.msra.mxu3 %v10746_v19  ;;  %v11894_v19 = vld [vmem:[%s13316_s5 + $0x884] sm:$0xf0]  ;;  %8131 = vmatmul.bf16.gmra.mxu2 %v13917_v62  ;;  %v10658_v33 = vor.u32 %v11910_v7, %v10657_v2  ;;  %v11025_v7 = vld [vmem:[%s13316_s5 + $0xbe0] sm:$0xf]  ;;  %v10857_v63 = vld [vmem:[%s13316_s5 + $0xa90] sm:$0xf] }
 0x2b7   : > { %8161 = vmatpush.bf16.msra.mxu0 %v10546_v37  ;;  %v12004_v37 = vld [vmem:[%s13316_s5 + $0xbf4] sm:$0xf0]  ;;  %v10594_v38 = vor.u32 %v11894_v19, %v10593_v16  ;;  %v11954_v2 = vld [vmem:[%s13316_s5 + $0xa64] sm:$0xf0]  ;;  %v9315_v16 = vld [vmem:[%s15168_s0 + $0xc0] sm:$0xf0]  ;;  %v11026_v32 = vor.u32 %v12002_v10, %v11025_v7 }
 0x2b8   : > { %8180 = vmatpush.bf16.msra.mxu1 %v10610_v42  ;;  %v4966_v42 = vld [vmem:[%s13942_s28] sm:$0x3]  ;;  %v9321_v19 = vld [vmem:[%s15168_s0 + $0x48] sm:$0xf]  ;;  %v10834_v21 = vor.u32 %v11954_v2, %v10833_v61 }
 0x2b9   : > { %8199 = vmatpush.bf16.msra.mxu2 %v10674_v36  ;;  %v11033_v36 = vld [vmem:[%s13316_s5 + $0xbf0] sm:$0xf]  ;;  %v10945_v7 = vld [vmem:[%s13316_s5 + $0xb40] sm:$0xf]  ;;  %v11982_v10 = vld [vmem:[%s13316_s5 + $0xb44] sm:$0xf0] }
 0x2ba   : > { %8218 = vmatpush.bf16.msra.mxu3 %v10738_v43  ;;  %v10970_v43 = vor.u32 %v11988_v27, %v10969_v26  ;;  %v11034_v60 = vor.u32 %v12004_v37, %v11033_v36  ;;  %v13974_v26 = vperm.slane %v4966_v42, 0  ;;  %v11582_v27 = vld [vmem:[%s15168_s0 + $0xc4] sm:$0xf0]  ;;  %v10825_v36 = vld [vmem:[%s13316_s5 + $0xa50] sm:$0xf] }
 0x2bb   : > { %8162 = vmatpush.bf16.msra.mxu0 %v10538_v4  ;;  %v11970_v4 = vld [vmem:[%s13316_s5 + $0xae4] sm:$0xf0]  ;;  %v11952_v37 = vld [vmem:[%s13316_s5 + $0xa54] sm:$0xf0]  ;;  %v13998_v61 = vor.u32 %v11582_v27, %v9321_v19  ;;  %v10881_v19 = vld [vmem:[%s13316_s5 + $0xac0] sm:$0xf] }
 0x2bc   : > { %8181 = vmatpush.bf16.msra.mxu1 %v10602_v12  ;;  %v11581_v12 = vld [vmem:[%s15168_s0 + $0xbc] sm:$0xf0] }
 0x2bd   : > { %8200 = vmatpush.bf16.msra.mxu2 %v10666_v3  ;;  %v10897_v3 = vld [vmem:[%s13316_s5 + $0xae0] sm:$0xf]  ;;  %v13990_v42 = vor.u32 %v11581_v12, %v9313_v11  ;;  %15214 = vst [vmem:[#allocation10_spill] sm:$0xff] %v13998_v61 }
 0x2be   : > { %8219 = vmatpush.bf16.msra.mxu3 %v10730_v15  ;;  %v11565_v15 = vld [vmem:[%s15168_s0 + $0x44] sm:$0xf]  ;;  %v10898_v31 = vor.u32 %v11970_v4, %v10897_v3  ;;  %v10826_v4 = vor.u32 %v11952_v37, %v10825_v36  ;;  %v11009_v27 = vld [vmem:[%s13316_s5 + $0xbc0] sm:$0xf] }
 0x2bf   : > { %8163 = vmatpush.bf16.msra.mxu0 %v10530_v34  ;;  %v10953_v34 = vld [vmem:[%s13316_s5 + $0xb50] sm:$0xf]  ;;  %15212 = vst [vmem:[#allocation8_spill] sm:$0xff] %v13990_v42 }
 0x2c0   : > { %8182 = vmatpush.bf16.msra.mxu1 %v10594_v38  ;;  %v10889_v38 = vld [vmem:[%s13316_s5 + $0xad0] sm:$0xf]  ;;  %v10954_v3 = vor.u32 %v11984_v35, %v10953_v34  ;;  %v11980_v34 = vld [vmem:[%s13316_s5 + $0xb34] sm:$0xf0] }
 0x2c1   : > { %8201 = vmatpush.bf16.msra.mxu2 %v10658_v33  ;;  %v9323_v33 = vld [vmem:[%s15168_s0 + $0xc8] sm:$0xf0] }
 0x2c2   : > { %8220 = vmatpush.bf16.msra.mxu3 %v10722_v41  ;;  %v7861_v41 = vpop.f32.mrf.mxu0  ;;  %v14000_v2 = vor.u32 %v11566_v30, %v9323_v33  ;;  %v11998_v30 = vld [vmem:[%s13316_s5 + $0xbc4] sm:$0xf0]  ;;  %v10937_v33 = vld [vmem:[%s13316_s5 + $0xb30] sm:$0xf] }
 0x2c3   : > { %8232 = vmatpush.bf16.msrb.mxu0 %v10842_v47  ;;  %v11968_v47 = vld [vmem:[%s13316_s5 + $0xad4] sm:$0xf0]  ;;  %v11010_v37 = vor.u32 %v11998_v30, %v11009_v27  ;;  %v11613_v27 = vld [vmem:[%s15168_s0 + $0x1bc] sm:$0xf0]  ;;  %v11597_v30 = vld [vmem:[%s15168_s0 + $0x144] sm:$0xf] }
 0x2c4   : > { %8251 = vmatpush.bf16.msrb.mxu1 %v10906_v59  ;;  %v7862_v59 = vadd.f32 %v7861_v41, %v13974_v26  ;;  %15215 = vst [vmem:[#allocation11_spill] sm:$0xff] %v14000_v2  ;;  %v10890_v12 = vor.u32 %v11968_v47, %v10889_v38  ;;  %8164 = vmatmul.bf16.vlgmr.msra.gmra.mxu0 %v13990_v42  ;;  %v10809_v38 = vld [vmem:[%s13316_s5 + $0xa30] sm:$0xf]  ;;  %v11948_v41 = vld [vmem:[%s13316_s5 + $0xa34] sm:$0xf0] }
 0x2c5   : > { %8270 = vmatpush.bf16.msrb.mxu2 %v10970_v43  ;;  %v13992_v43 = vor.u32 %v11565_v15, %v9315_v16  ;;  %v11018_v15 = vor.u32 %v12000_v52, %v11017_v49  ;;  %v10817_v16 = vld [vmem:[%s13316_s5 + $0xa40] sm:$0xf]  ;;  %8221 = vmatmul.bf16.vlgmr.msra.gmra.mxu3 %v14000_v2  ;;  %v10873_v47 = vld [vmem:[%s13316_s5 + $0xab0] sm:$0xf]  ;;  %v11944_v42 = vld [vmem:[%s13316_s5 + $0xa14] sm:$0xf0] }
 0x2c6   : > { %8289 = vmatpush.bf16.msrb.mxu3 %v11034_v60  ;;  %v7880_v60 = vpop.f32.mrf.mxu1  ;;  %8202 = vmatmul.bf16.vlgmr.msra.gmra.mxu2 %v13998_v61 }
 0x2c7   : > { %15213 = vst [vmem:[#allocation9_spill] sm:$0xff] %v13992_v43  ;;  %8233 = vmatpush.bf16.msrb.mxu0 %v10834_v21  ;;  %v7881_v11 = vadd.f32 %v7880_v60, %v7862_v59  ;;  %8183 = vmatmul.bf16.vlgmr.msra.gmra.mxu1 %v13992_v43  ;;  %v11966_v21 = vld [vmem:[%s13316_s5 + $0xac4] sm:$0xf0]  ;;  %v7899_v35 = vpop.f32.mrf.mxu2  ;;  %v11964_v60 = vld [vmem:[%s13316_s5 + $0xab4] sm:$0xf0] }
 0x2c8   : > { %8252 = vmatpush.bf16.msrb.mxu1 %v10898_v31  ;;  %v10946_v31 = vor.u32 %v11982_v10, %v10945_v7  ;;  %v10882_v36 = vor.u32 %v11966_v21, %v10881_v19  ;;  %v7918_v52 = vpop.f32.mrf.mxu3  ;;  %v9441_v21 = vld [vmem:[%s15168_s0 + $0x140] sm:$0xf]  ;;  %v10793_v43 = vld [vmem:[%s13316_s5 + $0xa10] sm:$0xf] }
 0x2c9   : > { %8271 = vmatpush.bf16.msrb.mxu2 %v10962_v20  ;;  %v11950_v20 = vld [vmem:[%s13316_s5 + $0xa44] sm:$0xf0]  ;;  %v7900_v49 = vadd.f32 %v7899_v35, %v7881_v11  ;;  %v10929_v11 = vld [vmem:[%s13316_s5 + $0xb20] sm:$0xf] }
 0x2ca   : > { %8290 = vmatpush.bf16.msrb.mxu3 %v11026_v32  ;;  %v10818_v32 = vor.u32 %v11950_v20, %v10817_v16  ;;  %v7863_v59 = vpop.f32.mrf.mxu0  ;;  %v11978_v20 = vld [vmem:[%s13316_s5 + $0xb24] sm:$0xf0] }
 0x2cb   : > { %8234 = vmatpush.bf16.msrb.mxu0 %v10826_v4  ;;  %v11996_v4 = vld [vmem:[%s13316_s5 + $0xbb4] sm:$0xf0]  ;;  %v7864_v7 = vadd.f32 %v7863_v59, %v13974_v26  ;;  %v14023_v16 = vadd.f32 %v7918_v52, %v7900_v49  ;;  %v11946_v35 = vld [vmem:[%s13316_s5 + $0xa24] sm:$0xf0]  ;;  %v9451_v59 = vld [vmem:[%s15168_s0 + $0x1c8] sm:$0xf0] }
 0x2cc   : > { %8253 = vmatpush.bf16.msrb.mxu1 %v10890_v12  ;;  %v10938_v12 = vor.u32 %v11980_v34, %v10937_v33  ;;  %v10801_v34 = vld [vmem:[%s13316_s5 + $0xa20] sm:$0xf]  ;;  %v9449_v49 = vld [vmem:[%s15168_s0 + $0x148] sm:$0xf] }
 0x2cd   : > { %8272 = vmatpush.bf16.msrb.mxu2 %v10954_v3  ;;  %v11001_v3 = vld [vmem:[%s13316_s5 + $0xbb0] sm:$0xf]  ;;  %v11614_v52 = vld [vmem:[%s15168_s0 + $0x1c4] sm:$0xf0] }
 0x2ce   : > { %8291 = vmatpush.bf16.msrb.mxu3 %v11018_v15  ;;  %v7882_v10 = vpop.f32.mrf.mxu1  ;;  %v10810_v15 = vor.u32 %v11948_v41, %v10809_v38  ;;  %v11002_v33 = vor.u32 %v11996_v4, %v11001_v3  ;;  %v10993_v38 = vld [vmem:[%s13316_s5 + $0xba0] sm:$0xf]  ;;  %v11994_v41 = vld [vmem:[%s13316_s5 + $0xba4] sm:$0xf0]  ;;  %v10802_v3 = vor.u32 %v11946_v35, %v10801_v34  ;;  %v10921_v4 = vld [vmem:[%s13316_s5 + $0xb10] sm:$0xf] }
 0x2cf   : > { %8235 = vmatpush.bf16.msrb.mxu0 %v10818_v32  ;;  %v7883_v19 = vadd.f32 %v7882_v10, %v7864_v7  ;;  %v10874_v32 = vor.u32 %v11964_v60, %v10873_v47  ;;  %v11598_v47 = vld [vmem:[%s15168_s0 + $0x14c] sm:$0xf]  ;;  %v10930_v60 = vor.u32 %v11978_v20, %v10929_v11  ;;  %v11976_v7 = vld [vmem:[%s13316_s5 + $0xb14] sm:$0xf0]  ;;  %v7901_v10 = vpop.f32.mrf.mxu2  ;;  %v10994_v61 = vor.u32 %v11994_v41, %v10993_v38  ;;  %v10985_v34 = vld [vmem:[%s13316_s5 + $0xb90] sm:$0xf] }
 0x2d0   : > { %8254 = vmatpush.bf16.msrb.mxu1 %v10882_v36  ;;  %v10865_v36 = vld [vmem:[%s13316_s5 + $0xaa0] sm:$0xf]  ;;  %v7920_v58 = vpop.f32.mrf.mxu3  ;;  %v11960_v20 = vld [vmem:[%s13316_s5 + $0xa94] sm:$0xf0]  ;;  %v11942_v41 = vld [vmem:[%s13316_s5 + $0xa04] sm:$0xf0] }
 0x2d1   : > { %8273 = vmatpush.bf16.msrb.mxu2 %v10946_v31  ;;  %v9443_v31 = vld [vmem:[%s15168_s0 + $0x1c0] sm:$0xf0]  ;;  %v7902_v62 = vadd.f32 %v7901_v10, %v7883_v19  ;;  %v10913_v19 = vld [vmem:[%s13316_s5 + $0xb00] sm:$0xf]  ;;  %v11289_v10 = vld [vmem:[%s13316_s5 + $0xdf0] sm:$0xf] }
 0x2d2   : > { %8292 = vmatpush.bf16.msrb.mxu3 %v11010_v37  ;;  %v11962_v37 = vld [vmem:[%s13316_s5 + $0xaa4] sm:$0xf0]  ;;  %v14064_v11 = vor.u32 %v11597_v30, %v9443_v31  ;;  %v10794_v30 = vor.u32 %v11944_v42, %v10793_v43  ;;  %v10785_v38 = vld [vmem:[%s13316_s5 + $0xa00] sm:$0xf]  ;;  %v11225_v43 = vld [vmem:[%s13316_s5 + $0xd70] sm:$0xf] }
 0x2d3   : > { %8236 = vmatpush.bf16.msrb.mxu0 %v10810_v15  ;;  %v10866_v2 = vor.u32 %v11962_v37, %v10865_v36  ;;  %v14062_v15 = vor.u32 %v11613_v27, %v9441_v21  ;;  %v14070_v36 = vor.u32 %v11614_v52, %v9449_v49  ;;  %v14072_v37 = vor.u32 %v11598_v47, %v9451_v59  ;;  %v11974_v31 = vld [vmem:[%s13316_s5 + $0xb04] sm:$0xf0]  ;;  %v10977_v59 = vld [vmem:[%s13316_s5 + $0xb80] sm:$0xf] }
 0x2d4   : > { %8255 = vmatpush.bf16.msrb.mxu1 %v10874_v32  ;;  %15217 = vst [vmem:[#allocation13_spill] sm:$0xff] %v14064_v11  ;;  %v11992_v32 = vld [vmem:[%s13316_s5 + $0xb94] sm:$0xf0]  ;;  %v14075_v21 = vadd.f32 %v7920_v58, %v7902_v62  ;;  %v10922_v27 = vor.u32 %v11976_v7, %v10921_v4  ;;  %v10858_v52 = vor.u32 %v11960_v20, %v10857_v63  ;;  %v10849_v58 = vld [vmem:[%s13316_s5 + $0xa80] sm:$0xf] }
 0x2d5   : > { %8274 = vmatpush.bf16.msrb.mxu2 %v10938_v12  ;;  %v7866_v12 = vpop.f32.mrf.mxu0  ;;  %15216 = vst [vmem:[#allocation12_spill] sm:$0xff] %v14062_v15  ;;  %v10986_v47 = vor.u32 %v11992_v32, %v10985_v34  ;;  %v11958_v62 = vld [vmem:[%s13316_s5 + $0xa84] sm:$0xf0]  ;;  %8169 = vmatmul.bf16.gmra.mxu0 %v14062_v15  ;;  %v12020_v63 = vld [vmem:[%s13316_s5 + $0xc74] sm:$0xf0]  ;;  %v10786_v4 = vor.u32 %v11942_v41, %v10785_v38 }
 0x2d6   : > { %8293 = vmatpush.bf16.msrb.mxu3 %v11002_v33  ;;  %v7867_v33 = vadd.f32 %v7866_v12, %v13974_v26  ;;  %v7885_v35 = vpop.f32.mrf.mxu1  ;;  %15218 = vst [vmem:[#allocation14_spill] sm:$0xff] %v14070_v36  ;;  %v11990_v42 = vld [vmem:[%s13316_s5 + $0xb84] sm:$0xf0]  ;;  %8207 = vmatmul.bf16.gmra.mxu2 %v14070_v36  ;;  %v12036_v7 = vld [vmem:[%s13316_s5 + $0xcf4] sm:$0xf0]  ;;  %v10850_v34 = vor.u32 %v11958_v62, %v10849_v58 }
 0x2d7   : > { %15219 = vst [vmem:[#allocation15_spill] sm:$0xff] %v14072_v37  ;;  %8237 = vmatpush.bf16.msrb.mxu0 %v10802_v3  ;;  %8188 = vmatmul.bf16.gmra.mxu1 %v14064_v11  ;;  %v10914_v3 = vor.u32 %v11974_v31, %v10913_v19  ;;  %v12068_v12 = vld [vmem:[%s13316_s5 + $0xdf4] sm:$0xf0]  ;;  %v7904_v20 = vpop.f32.mrf.mxu2  ;;  %v10978_v32 = vor.u32 %v11990_v42, %v10977_v59  ;;  %v11217_v31 = vld [vmem:[%s13316_s5 + $0xd60] sm:$0xf] }
 0x2d8   : > { %v7886_v49 = vadd.f32 %v7885_v35, %v7867_v33  ;;  %8256 = vmatpush.bf16.msrb.mxu1 %v10866_v2  ;;  %8226 = vmatmul.bf16.gmra.mxu3 %v14072_v37  ;;  %v11161_v2 = vld [vmem:[%s13316_s5 + $0xcf0] sm:$0xf]  ;;  %v7923_v35 = vpop.f32.mrf.mxu3  ;;  %v12050_v38 = vld [vmem:[%s13316_s5 + $0xd64] sm:$0xf0]  ;;  %v11089_v11 = vld [vmem:[%s13316_s5 + $0xc60] sm:$0xf] }
 0x2d9   : > { %8275 = vmatpush.bf16.msrb.mxu2 %v10930_v60  ;;  %v12052_v60 = vld [vmem:[%s13316_s5 + $0xd74] sm:$0xf0]  ;;  %v11162_v36 = vor.u32 %v12036_v7, %v11161_v2  ;;  %v11153_v15 = vld [vmem:[%s13316_s5 + $0xce0] sm:$0xf]  ;;  %v12066_v59 = vld [vmem:[%s13316_s5 + $0xde4] sm:$0xf0] }
 0x2da   : > { %8294 = vmatpush.bf16.msrb.mxu3 %v10994_v61  ;;  %v11097_v61 = vld [vmem:[%s13316_s5 + $0xc70] sm:$0xf]  ;;  %v7905_v33 = vadd.f32 %v7904_v20, %v7886_v49  ;;  %v12034_v49 = vld [vmem:[%s13316_s5 + $0xce4] sm:$0xf0]  ;;  %v11281_v62 = vld [vmem:[%s13316_s5 + $0xde0] sm:$0xf] }
 0x2db   : > { %8238 = vmatpush.bf16.msrb.mxu0 %v10794_v30  ;;  %v11226_v30 = vor.u32 %v12052_v60, %v11225_v43  ;;  %v11098_v19 = vor.u32 %v12020_v63, %v11097_v61  ;;  %v11583_v43 = vld [vmem:[%s15168_s0 + $0xcc] sm:$0xf0]  ;;  %v11567_v60 = vld [vmem:[%s15168_s0 + $0x54] sm:$0xf]  ;;  %v11218_v61 = vor.u32 %v12050_v38, %v11217_v31  ;;  %v9337_v2 = vld [vmem:[%s15168_s0 + $0x58] sm:$0xf]  ;;  %v11154_v7 = vor.u32 %v12034_v49, %v11153_v15 }
 0x2dc   : > { %8257 = vmatpush.bf16.msrb.mxu1 %v10858_v52  ;;  %v11290_v52 = vor.u32 %v12068_v12, %v11289_v10  ;;  %v14102_v58 = vadd.f32 %v7923_v35, %v7905_v33  ;;  %v11282_v10 = vor.u32 %v12066_v59, %v11281_v62  ;;  %v11209_v12 = vld [vmem:[%s13316_s5 + $0xd50] sm:$0xf]  ;;  %v12048_v20 = vld [vmem:[%s13316_s5 + $0xd54] sm:$0xf0] }
 0x2dd   : > { %8276 = vmatpush.bf16.msrb.mxu2 %v10922_v27  ;;  %v7868_v27 = vpop.f32.mrf.mxu0  ;;  %v12016_v33 = vld [vmem:[%s13316_s5 + $0xc54] sm:$0xf0]  ;;  %v11145_v35 = vld [vmem:[%s13316_s5 + $0xcd0] sm:$0xf] }
 0x2de   : > { %8295 = vmatpush.bf16.msrb.mxu3 %v10986_v47  ;;  %v7869_v41 = vadd.f32 %v7868_v27, %v13974_v26  ;;  %v7887_v37 = vpop.f32.mrf.mxu1  ;;  %v12018_v47 = vld [vmem:[%s13316_s5 + $0xc64] sm:$0xf0]  ;;  %v9329_v26 = vld [vmem:[%s15168_s0 + $0x50] sm:$0xf]  ;;  %v12032_v15 = vld [vmem:[%s13316_s5 + $0xcd4] sm:$0xf0] }
 0x2df   : > { %8239 = vmatpush.bf16.msrb.mxu0 %v10786_v4  ;;  %v11090_v63 = vor.u32 %v12018_v47, %v11089_v11  ;;  %v11568_v4 = vld [vmem:[%s15168_s0 + $0x5c] sm:$0xf]  ;;  %v11273_v31 = vld [vmem:[%s13316_s5 + $0xdd0] sm:$0xf]  ;;  %v12064_v38 = vld [vmem:[%s13316_s5 + $0xdd4] sm:$0xf0] }
 0x2e0   : > { %v7888_v42 = vadd.f32 %v7887_v37, %v7869_v41  ;;  %8258 = vmatpush.bf16.msrb.mxu1 %v10850_v34  ;;  %v9331_v37 = vld [vmem:[%s15168_s0 + $0xd0] sm:$0xf0]  ;;  %v9339_v11 = vld [vmem:[%s15168_s0 + $0xd8] sm:$0xf0]  ;;  %v7906_v34 = vpop.f32.mrf.mxu2 }
 0x2e1   : > { %8277 = vmatpush.bf16.msrb.mxu2 %v10914_v3  ;;  %v11584_v3 = vld [vmem:[%s15168_s0 + $0xd4] sm:$0xf0]  ;;  %v14145_v49 = vor.u32 %v11568_v4, %v9339_v11 }
 0x2e2   : > { %8296 = vmatpush.bf16.msrb.mxu3 %v10978_v32  ;;  %v11081_v32 = vld [vmem:[%s13316_s5 + $0xc50] sm:$0xf]  ;;  %v7907_v27 = vadd.f32 %v7906_v34, %v7888_v42  ;;  %v14143_v47 = vor.u32 %v11584_v3, %v9337_v2  ;;  %v11210_v42 = vor.u32 %v12048_v20, %v11209_v12  ;;  %v12014_v2 = vld [vmem:[%s13316_s5 + $0xc44] sm:$0xf0]  ;;  %v11137_v3 = vld [vmem:[%s13316_s5 + $0xcc0] sm:$0xf] }
 0x2e3   : > { %8308 = vmatpush.bf16.msra.mxu0 %v11098_v19  ;;  %v14136_v19 = vor.u32 %v11583_v43, %v9329_v26  ;;  %15223 = vst [vmem:[#allocation19_spill] sm:$0xff] %v14145_v49  ;;  %v11082_v26 = vor.u32 %v12016_v33, %v11081_v32  ;;  %v11201_v43 = vld [vmem:[%s13316_s5 + $0xd40] sm:$0xf]  ;;  %v11193_v20 = vld [vmem:[%s13316_s5 + $0xd30] sm:$0xf] }
 0x2e4   : > { %8327 = vmatpush.bf16.msra.mxu1 %v11162_v36  ;;  %v14138_v36 = vor.u32 %v11567_v60, %v9331_v37  ;;  %15222 = vst [vmem:[#allocation18_spill] sm:$0xff] %v14143_v47  ;;  %v12046_v60 = vld [vmem:[%s13316_s5 + $0xd44] sm:$0xf0]  ;;  %v11146_v37 = vor.u32 %v12032_v15, %v11145_v35  ;;  %v12044_v34 = vld [vmem:[%s13316_s5 + $0xd34] sm:$0xf0] }
 0x2e5   : > { %8346 = vmatpush.bf16.msra.mxu2 %v11226_v30  ;;  %v7925_v30 = vpop.f32.mrf.mxu3  ;;  %15220 = vst [vmem:[#allocation16_spill] sm:$0xff] %v14136_v19  ;;  %v7937_v41 = vpop.f32.mrf.mxu0  ;;  %8240 = vmatmul.bf16.vlgmr.msrb.gmra.mxu0 %v14136_v19  ;;  %v11202_v11 = vor.u32 %v12046_v60, %v11201_v43  ;;  %v11065_v35 = vld [vmem:[%s13316_s5 + $0xc30] sm:$0xf]  ;;  %v11194_v60 = vor.u32 %v12044_v34, %v11193_v20  ;;  %v11121_v20 = vld [vmem:[%s13316_s5 + $0xca0] sm:$0xf] }
 0x2e6   : > { %8365 = vmatpush.bf16.msra.mxu3 %v11290_v52  ;;  %15221 = vst [vmem:[#allocation17_spill] sm:$0xff] %v14138_v36  ;;  %v7956_v52 = vpop.f32.mrf.mxu1  ;;  %v14147_v62 = vadd.f32 %v7925_v30, %v7907_v27  ;;  %v7938_v59 = vadd.f32 %v7937_v41, %v14023_v16  ;;  %v11265_v16 = vld [vmem:[%s13316_s5 + $0xdc0] sm:$0xf]  ;;  %8278 = vmatmul.bf16.vlgmr.msrb.gmra.mxu2 %v14143_v47  ;;  %v12012_v27 = vld [vmem:[%s13316_s5 + $0xc34] sm:$0xf0] }
 0x2e7   : > { %8309 = vmatpush.bf16.msra.mxu0 %v11090_v63  ;;  %v11073_v63 = vld [vmem:[%s13316_s5 + $0xc40] sm:$0xf]  ;;  %8259 = vmatmul.bf16.vlgmr.msrb.gmra.mxu1 %v14138_v36  ;;  %v11129_v30 = vld [vmem:[%s13316_s5 + $0xcb0] sm:$0xf] }
 0x2e8   : > { %8328 = vmatpush.bf16.msra.mxu1 %v11154_v7  ;;  %v7957_v4 = vadd.f32 %v7956_v52, %v7938_v59  ;;  %v12030_v7 = vld [vmem:[%s13316_s5 + $0xcc4] sm:$0xf0]  ;;  %8297 = vmatmul.bf16.vlgmr.msrb.gmra.mxu3 %v14145_v49  ;;  %v11074_v12 = vor.u32 %v12014_v2, %v11073_v63  ;;  %v7975_v15 = vpop.f32.mrf.mxu2  ;;  %v11257_v41 = vld [vmem:[%s13316_s5 + $0xdb0] sm:$0xf]  ;;  %v12060_v52 = vld [vmem:[%s13316_s5 + $0xdb4] sm:$0xf0] }
 0x2e9   : > { %8347 = vmatpush.bf16.msra.mxu2 %v11218_v61  ;;  %v11274_v61 = vor.u32 %v12064_v38, %v11273_v31  ;;  %v11138_v32 = vor.u32 %v12030_v7, %v11137_v3  ;;  %v12028_v38 = vld [vmem:[%s13316_s5 + $0xcb4] sm:$0xf0]  ;;  %v12042_v63 = vld [vmem:[%s13316_s5 + $0xd24] sm:$0xf0]  ;;  %v11615_v3 = vld [vmem:[%s15168_s0 + $0x1cc] sm:$0xf0] }
 0x2ea   : > { %8366 = vmatpush.bf16.msra.mxu3 %v11282_v10  ;;  %v12062_v10 = vld [vmem:[%s13316_s5 + $0xdc4] sm:$0xf0]  ;;  %v7976_v59 = vadd.f32 %v7975_v15, %v7957_v4  ;;  %v11599_v4 = vld [vmem:[%s15168_s0 + $0x154] sm:$0xf]  ;;  %v11600_v15 = vld [vmem:[%s15168_s0 + $0x15c] sm:$0xf] }
 0x2eb   : > { %8310 = vmatpush.bf16.msra.mxu0 %v11082_v26  ;;  %v11266_v33 = vor.u32 %v12062_v10, %v11265_v16  ;;  %v9459_v7 = vld [vmem:[%s15168_s0 + $0x1d0] sm:$0xf0]  ;;  %v11130_v16 = vor.u32 %v12028_v38, %v11129_v30  ;;  %v11258_v10 = vor.u32 %v12060_v52, %v11257_v41  ;;  %v11616_v30 = vld [vmem:[%s15168_s0 + $0x1d4] sm:$0xf0]  ;;  %v11177_v52 = vld [vmem:[%s13316_s5 + $0xd10] sm:$0xf] }
 0x2ec   : > { %8329 = vmatpush.bf16.msra.mxu1 %v11146_v37  ;;  %v11066_v37 = vor.u32 %v12012_v27, %v11065_v35  ;;  %v12058_v35 = vld [vmem:[%s13316_s5 + $0xda4] sm:$0xf0]  ;;  %v9465_v27 = vld [vmem:[%s15168_s0 + $0x158] sm:$0xf]  ;;  %v11113_v47 = vld [vmem:[%s13316_s5 + $0xc90] sm:$0xf] }
 0x2ed   : > { %8348 = vmatpush.bf16.msra.mxu2 %v11210_v42  ;;  %v7994_v31 = vpop.f32.mrf.mxu3  ;;  %v7939_v42 = vpop.f32.mrf.mxu0  ;;  %v12008_v49 = vld [vmem:[%s13316_s5 + $0xc14] sm:$0xf0] }
 0x2ee   : > { %8367 = vmatpush.bf16.msra.mxu3 %v11274_v61  ;;  %v7958_v26 = vpop.f32.mrf.mxu1  ;;  %v7940_v43 = vadd.f32 %v7939_v42, %v14075_v21  ;;  %v11185_v61 = vld [vmem:[%s13316_s5 + $0xd20] sm:$0xf]  ;;  %v14173_v2 = vadd.f32 %v7994_v31, %v7976_v59  ;;  %v9457_v21 = vld [vmem:[%s15168_s0 + $0x150] sm:$0xf]  ;;  %v9467_v31 = vld [vmem:[%s15168_s0 + $0x1d8] sm:$0xf0] }
 0x2ef   : > { %8311 = vmatpush.bf16.msra.mxu0 %v11074_v12  ;;  %v12010_v12 = vld [vmem:[%s13316_s5 + $0xc24] sm:$0xf0]  ;;  %v11186_v38 = vor.u32 %v12042_v63, %v11185_v61  ;;  %v12040_v59 = vld [vmem:[%s13316_s5 + $0xd14] sm:$0xf0]  ;;  %v14210_v55 = vor.u32 %v11615_v3, %v9457_v21  ;;  %v11241_v61 = vld [vmem:[%s13316_s5 + $0xd90] sm:$0xf] }
 0x2f0   : > { %8330 = vmatpush.bf16.msra.mxu1 %v11138_v32  ;;  %v7959_v34 = vadd.f32 %v7958_v26, %v7940_v43  ;;  %v12026_v32 = vld [vmem:[%s13316_s5 + $0xca4] sm:$0xf0]  ;;  %v11049_v43 = vld [vmem:[%s13316_s5 + $0xc10] sm:$0xf]  ;;  %v7977_v36 = vpop.f32.mrf.mxu2  ;;  %v12056_v63 = vld [vmem:[%s13316_s5 + $0xd94] sm:$0xf0]  ;;  %v11178_v3 = vor.u32 %v12040_v59, %v11177_v52 }
 0x2f1   : > { %8349 = vmatpush.bf16.msra.mxu2 %v11202_v11  ;;  %v11057_v11 = vld [vmem:[%s13316_s5 + $0xc20] sm:$0xf]  ;;  %v11122_v42 = vor.u32 %v12026_v32, %v11121_v20  ;;  %15224 = vst [vmem:[#allocation20_spill] sm:$0xff] %v14210_v55  ;;  %v14219_v20 = vor.u32 %v11600_v15, %v9467_v31  ;;  %v11417_v52 = vld [vmem:[%s13316_s5 + $0xef0] sm:$0xf] }
 0x2f2   : > { %8368 = vmatpush.bf16.msra.mxu3 %v11266_v33  ;;  %v11249_v33 = vld [vmem:[%s13316_s5 + $0xda0] sm:$0xf]  ;;  %v11058_v41 = vor.u32 %v12010_v12, %v11057_v11  ;;  %v14217_v12 = vor.u32 %v11616_v30, %v9465_v27  ;;  %v11242_v27 = vor.u32 %v12056_v63, %v11241_v61  ;;  %v12022_v30 = vld [vmem:[%s13316_s5 + $0xc84] sm:$0xf0] }
 0x2f3   : > { %8312 = vmatpush.bf16.msra.mxu0 %v11066_v37  ;;  %v11250_v26 = vor.u32 %v12058_v35, %v11249_v33  ;;  %v12024_v37 = vld [vmem:[%s13316_s5 + $0xc94] sm:$0xf0]  ;;  %15227 = vst [vmem:[#allocation23_spill] sm:$0xff] %v14219_v20  ;;  %v11169_v32 = vld [vmem:[%s13316_s5 + $0xd00] sm:$0xf] }
 0x2f4   : > { %8331 = vmatpush.bf16.msra.mxu1 %v11130_v16  ;;  %v7978_v16 = vadd.f32 %v7977_v36, %v7959_v34  ;;  %15226 = vst [vmem:[#allocation22_spill] sm:$0xff] %v14217_v12  ;;  %v11041_v36 = vld [vmem:[%s13316_s5 + $0xc00] sm:$0xf]  ;;  %v12006_v34 = vld [vmem:[%s13316_s5 + $0xc04] sm:$0xf0]  ;;  %v11114_v35 = vor.u32 %v12024_v37, %v11113_v47 }
 0x2f5   : > { %8350 = vmatpush.bf16.msra.mxu2 %v11194_v60  ;;  %v7996_v19 = vpop.f32.mrf.mxu3  ;;  %v14212_v60 = vor.u32 %v11599_v4, %v9459_v7  ;;  %v11050_v4 = vor.u32 %v12008_v49, %v11049_v43  ;;  %v12038_v7 = vld [vmem:[%s13316_s5 + $0xd04] sm:$0xf0]  ;;  %v11233_v15 = vld [vmem:[%s13316_s5 + $0xd80] sm:$0xf]  ;;  %8245 = vmatmul.bf16.gmra.mxu0 %v14210_v55  ;;  %v11481_v49 = vld [vmem:[%s13316_s5 + $0xf70] sm:$0xf] }
 0x2f6   : > { %8369 = vmatpush.bf16.msra.mxu3 %v11258_v10  ;;  %v7942_v10 = vpop.f32.mrf.mxu0  ;;  %v7961_v11 = vpop.f32.mrf.mxu1  ;;  %v14226_v33 = vadd.f32 %v7996_v19, %v7978_v16  ;;  %v12054_v19 = vld [vmem:[%s13316_s5 + $0xd84] sm:$0xf0]  ;;  %8283 = vmatmul.bf16.gmra.mxu2 %v14217_v12  ;;  %v11353_v47 = vld [vmem:[%s13316_s5 + $0xe70] sm:$0xf]  ;;  %v11170_v59 = vor.u32 %v12038_v7, %v11169_v32  ;;  %v12132_v37 = vld [vmem:[%s13316_s5 + $0xff4] sm:$0xf0] }
 0x2f7   : > { %15225 = vst [vmem:[#allocation21_spill] sm:$0xff] %v14212_v60  ;;  %v7943_v21 = vadd.f32 %v7942_v10, %v14102_v58  ;;  %8313 = vmatpush.bf16.msra.mxu0 %v11058_v41  ;;  %v11105_v58 = vld [vmem:[%s13316_s5 + $0xc80] sm:$0xf]  ;;  %8264 = vmatmul.bf16.gmra.mxu1 %v14212_v60  ;;  %v12084_v41 = vld [vmem:[%s13316_s5 + $0xe74] sm:$0xf0]  ;;  %v11234_v63 = vor.u32 %v12054_v19, %v11233_v15 }
 0x2f8   : > { %8332 = vmatpush.bf16.msra.mxu1 %v11122_v42  ;;  %8302 = vmatmul.bf16.gmra.mxu3 %v14219_v20  ;;  %v11042_v42 = vor.u32 %v12006_v34, %v11041_v36  ;;  %v11545_v43 = vld [vmem:[%s13316_s5 + $0xff0] sm:$0xf]  ;;  %v11106_v61 = vor.u32 %v12022_v30, %v11105_v58  ;;  %v7980_v16 = vpop.f32.mrf.mxu2  ;;  %v12114_v32 = vld [vmem:[%s13316_s5 + $0xf64] sm:$0xf0]  ;;  %v11537_v15 = vld [vmem:[%s13316_s5 + $0xfe0] sm:$0xf] }
 0x2f9   : > { %8351 = vmatpush.bf16.msra.mxu2 %v11186_v38  ;;  %v7962_v31 = vadd.f32 %v7961_v11, %v7943_v21  ;;  %v12116_v38 = vld [vmem:[%s13316_s5 + $0xf74] sm:$0xf0]  ;;  %v11354_v21 = vor.u32 %v12084_v41, %v11353_v47  ;;  %v11546_v20 = vor.u32 %v12132_v37, %v11545_v43  ;;  %v12082_v12 = vld [vmem:[%s13316_s5 + $0xe64] sm:$0xf0]  ;;  %v11585_v47 = vld [vmem:[%s15168_s0 + $0xdc] sm:$0xf0] }
 0x2fa   : > { %8370 = vmatpush.bf16.msra.mxu3 %v11250_v26  ;;  %v12100_v26 = vld [vmem:[%s13316_s5 + $0xef4] sm:$0xf0]  ;;  %v11482_v11 = vor.u32 %v12116_v38, %v11481_v49  ;;  %v12098_v30 = vld [vmem:[%s13316_s5 + $0xee4] sm:$0xf0]  ;;  %v9347_v41 = vld [vmem:[%s15168_s0 + $0xe0] sm:$0xf0] }
 0x2fb   : > { %8314 = vmatpush.bf16.msra.mxu0 %v11050_v4  ;;  %v7981_v4 = vadd.f32 %v7980_v16, %v7962_v31  ;;  %v11418_v34 = vor.u32 %v12100_v26, %v11417_v52  ;;  %v12130_v19 = vld [vmem:[%s13316_s5 + $0xfe4] sm:$0xf0]  ;;  %v9345_v31 = vld [vmem:[%s15168_s0 + $0x60] sm:$0xf]  ;;  %v11570_v43 = vld [vmem:[%s15168_s0 + $0x6c] sm:$0xf] }
 0x2fc   : > { %8333 = vmatpush.bf16.msra.mxu1 %v11114_v35  ;;  %v11345_v35 = vld [vmem:[%s13316_s5 + $0xe60] sm:$0xf]  ;;  %v11586_v26 = vld [vmem:[%s15168_s0 + $0xe4] sm:$0xf0]  ;;  %v12112_v16 = vld [vmem:[%s13316_s5 + $0xf54] sm:$0xf0] }
 0x2fd   : > { %8352 = vmatpush.bf16.msra.mxu2 %v11178_v3  ;;  %v7999_v10 = vpop.f32.mrf.mxu3  ;;  %v11473_v3 = vld [vmem:[%s13316_s5 + $0xf60] sm:$0xf] }
 0x2fe   : > { %8371 = vmatpush.bf16.msra.mxu3 %v11242_v27  ;;  %v7944_v7 = vpop.f32.mrf.mxu0  ;;  %v7963_v36 = vpop.f32.mrf.mxu1  ;;  %v11409_v27 = vld [vmem:[%s13316_s5 + $0xee0] sm:$0xf]  ;;  %v14253_v49 = vadd.f32 %v7999_v10, %v7981_v4  ;;  %v11474_v52 = vor.u32 %v12114_v32, %v11473_v3  ;;  %v11337_v10 = vld [vmem:[%s13316_s5 + $0xe50] sm:$0xf]  ;;  %v14284_v4 = vor.u32 %v11585_v47, %v9345_v31 }
 0x2ff   : > { %v7945_v58 = vadd.f32 %v7944_v7, %v14147_v62  ;;  %8315 = vmatpush.bf16.msra.mxu0 %v11042_v42  ;;  %v11569_v62 = vld [vmem:[%s15168_s0 + $0x64] sm:$0xf]  ;;  %v9353_v42 = vld [vmem:[%s15168_s0 + $0x68] sm:$0xf]  ;;  %v11410_v37 = vor.u32 %v12098_v30, %v11409_v27 }
 0x300   : > { %8334 = vmatpush.bf16.msra.mxu1 %v11106_v61  ;;  %v11538_v61 = vor.u32 %v12130_v19, %v11537_v15  ;;  %v7982_v3 = vpop.f32.mrf.mxu2  ;;  %15228 = vst [vmem:[#allocation24_spill] sm:$0xff] %v14284_v4  ;;  %v14286_v7 = vor.u32 %v11569_v62, %v9347_v41  ;;  %v14291_v30 = vor.u32 %v11586_v26, %v9353_v42  ;;  %v11457_v62 = vld [vmem:[%s13316_s5 + $0xf40] sm:$0xf]  ;;  %v12110_v41 = vld [vmem:[%s13316_s5 + $0xf44] sm:$0xf0] }
 0x301   : > { %8353 = vmatpush.bf16.msra.mxu2 %v11170_v59  ;;  %v7964_v38 = vadd.f32 %v7963_v36, %v7945_v58  ;;  %v11346_v59 = vor.u32 %v12082_v12, %v11345_v35  ;;  %v9355_v12 = vld [vmem:[%s15168_s0 + $0xe8] sm:$0xf0]  ;;  %v11529_v36 = vld [vmem:[%s13316_s5 + $0xfd0] sm:$0xf]  ;;  %v11329_v42 = vld [vmem:[%s13316_s5 + $0xe40] sm:$0xf] }
 0x302   : > { %8372 = vmatpush.bf16.msra.mxu3 %v11234_v63  ;;  %v11465_v63 = vld [vmem:[%s13316_s5 + $0xf50] sm:$0xf]  ;;  %15229 = vst [vmem:[#allocation25_spill] sm:$0xff] %v14286_v7  ;;  %v14293_v15 = vor.u32 %v11570_v43, %v9355_v12  ;;  %v12078_v26 = vld [vmem:[%s13316_s5 + $0xe44] sm:$0xf0] }
 0x303   : > { %8384 = vmatpush.bf16.msrb.mxu0 %v11354_v21  ;;  %v11401_v21 = vld [vmem:[%s13316_s5 + $0xed0] sm:$0xf]  ;;  %v7983_v35 = vadd.f32 %v7982_v3, %v7964_v38  ;;  %15230 = vst [vmem:[#allocation26_spill] sm:$0xff] %v14291_v30  ;;  %v11466_v31 = vor.u32 %v12112_v16, %v11465_v63  ;;  %v11393_v43 = vld [vmem:[%s13316_s5 + $0xec0] sm:$0xf]  ;;  %v11458_v63 = vor.u32 %v12110_v41, %v11457_v62 }
 0x304   : > { %8403 = vmatpush.bf16.msrb.mxu1 %v11418_v34  ;;  %v12128_v34 = vld [vmem:[%s13316_s5 + $0xfd4] sm:$0xf0]  ;;  %15231 = vst [vmem:[#allocation27_spill] sm:$0xff] %v14293_v15  ;;  %v12126_v12 = vld [vmem:[%s13316_s5 + $0xfc4] sm:$0xf0]  ;;  %v11330_v16 = vor.u32 %v12078_v26, %v11329_v42 }
 0x305   : > { %8422 = vmatpush.bf16.msrb.mxu2 %v11482_v11  ;;  %v12080_v11 = vld [vmem:[%s13316_s5 + $0xe54] sm:$0xf0]  ;;  %v8001_v32 = vpop.f32.mrf.mxu3  ;;  %8316 = vmatmul.bf16.vlgmr.msra.gmra.mxu0 %v14284_v4  ;;  %v11441_v42 = vld [vmem:[%s13316_s5 + $0xf20] sm:$0xf]  ;;  %v12106_v26 = vld [vmem:[%s13316_s5 + $0xf24] sm:$0xf0] }
 0x306   : > { %8441 = vmatpush.bf16.msrb.mxu3 %v11546_v20  ;;  %v12096_v20 = vld [vmem:[%s13316_s5 + $0xed4] sm:$0xf0]  ;;  %v8013_v27 = vpop.f32.mrf.mxu0  ;;  %v8032_v58 = vpop.f32.mrf.mxu1  ;;  %v11338_v47 = vor.u32 %v12080_v11, %v11337_v10  ;;  %v14298_v38 = vadd.f32 %v8001_v32, %v7983_v35  ;;  %8354 = vmatmul.bf16.vlgmr.msra.gmra.mxu2 %v14291_v30  ;;  %v11449_v10 = vld [vmem:[%s13316_s5 + $0xf30] sm:$0xf] }
 0x307   : > { %8385 = vmatpush.bf16.msrb.mxu0 %v11346_v59  ;;  %v8014_v19 = vadd.f32 %v8013_v27, %v14173_v2  ;;  %v11530_v59 = vor.u32 %v12128_v34, %v11529_v36  ;;  %8335 = vmatmul.bf16.vlgmr.msra.gmra.mxu1 %v14286_v7  ;;  %v12094_v2 = vld [vmem:[%s13316_s5 + $0xec4] sm:$0xf0]  ;;  %v12108_v11 = vld [vmem:[%s13316_s5 + $0xf34] sm:$0xf0]  ;;  %v11321_v32 = vld [vmem:[%s13316_s5 + $0xe30] sm:$0xf] }
 0x308   : > { %8404 = vmatpush.bf16.msrb.mxu1 %v11410_v37  ;;  %8373 = vmatmul.bf16.vlgmr.msra.gmra.mxu3 %v14293_v15  ;;  %v11385_v36 = vld [vmem:[%s13316_s5 + $0xeb0] sm:$0xf]  ;;  %v8051_v34 = vpop.f32.mrf.mxu2  ;;  %v12092_v27 = vld [vmem:[%s13316_s5 + $0xeb4] sm:$0xf0] }
 0x309   : > { %8423 = vmatpush.bf16.msrb.mxu2 %v11474_v52  ;;  %v11402_v52 = vor.u32 %v12096_v20, %v11401_v21  ;;  %v8033_v37 = vadd.f32 %v8032_v58, %v8014_v19  ;;  %v11394_v21 = vor.u32 %v12094_v2, %v11393_v43  ;;  %v12076_v20 = vld [vmem:[%s13316_s5 + $0xe34] sm:$0xf0]  ;;  %v11513_v58 = vld [vmem:[%s13316_s5 + $0xfb0] sm:$0xf]  ;;  %v11601_v2 = vld [vmem:[%s15168_s0 + $0x164] sm:$0xf] }
 0x30a   : > { %8442 = vmatpush.bf16.msrb.mxu3 %v11538_v61  ;;  %v11521_v61 = vld [vmem:[%s13316_s5 + $0xfc0] sm:$0xf]  ;;  %v12124_v19 = vld [vmem:[%s13316_s5 + $0xfb4] sm:$0xf0]  ;;  %v11305_v15 = vld [vmem:[%s13316_s5 + $0xe10] sm:$0xf] }
 0x30b   : > { %8386 = vmatpush.bf16.msrb.mxu0 %v11338_v47  ;;  %v11522_v3 = vor.u32 %v12126_v12, %v11521_v61  ;;  %v9475_v61 = vld [vmem:[%s15168_s0 + $0x1e0] sm:$0xf0]  ;;  %v11386_v12 = vor.u32 %v12092_v27, %v11385_v36  ;;  %v11618_v36 = vld [vmem:[%s15168_s0 + $0x1e4] sm:$0xf0]  ;;  %v9483_v27 = vld [vmem:[%s15168_s0 + $0x1e8] sm:$0xf0] }
 0x30c   : > { %8405 = vmatpush.bf16.msrb.mxu1 %v11402_v52  ;;  %v11450_v52 = vor.u32 %v12108_v11, %v11449_v10  ;;  %v12074_v10 = vld [vmem:[%s13316_s5 + $0xe24] sm:$0xf0]  ;;  %v11377_v11 = vld [vmem:[%s13316_s5 + $0xea0] sm:$0xf]  ;;  %v12072_v30 = vld [vmem:[%s13316_s5 + $0xe14] sm:$0xf0] }
 0x30d   : > { %8424 = vmatpush.bf16.msrb.mxu2 %v11466_v31  ;;  %v8070_v35 = vpop.f32.mrf.mxu3  ;;  %v8052_v31 = vadd.f32 %v8051_v34, %v8033_v37  ;;  %v11617_v37 = vld [vmem:[%s15168_s0 + $0x1dc] sm:$0xf0]  ;;  %v9481_v34 = vld [vmem:[%s15168_s0 + $0x168] sm:$0xf]  ;;  %v11369_v7 = vld [vmem:[%s13316_s5 + $0xe90] sm:$0xf] }
 0x30e   : > { %8443 = vmatpush.bf16.msrb.mxu3 %v11530_v59  ;;  %v8015_v47 = vpop.f32.mrf.mxu0  ;;  %v8034_v62 = vpop.f32.mrf.mxu1  ;;  %v11322_v59 = vor.u32 %v12076_v20, %v11321_v32  ;;  %v11505_v32 = vld [vmem:[%s13316_s5 + $0xfa0] sm:$0xf]  ;;  %v12122_v20 = vld [vmem:[%s13316_s5 + $0xfa4] sm:$0xf0] }
 0x30f   : > { %v8016_v41 = vadd.f32 %v8015_v47, %v14226_v33  ;;  %8387 = vmatpush.bf16.msrb.mxu0 %v11330_v16  ;;  %v14321_v43 = vadd.f32 %v8070_v35, %v8052_v31  ;;  %v9473_v33 = vld [vmem:[%s15168_s0 + $0x160] sm:$0xf]  ;;  %v11602_v35 = vld [vmem:[%s15168_s0 + $0x16c] sm:$0xf]  ;;  %v11433_v31 = vld [vmem:[%s13316_s5 + $0xf10] sm:$0xf] }
 0x310   : > { %8406 = vmatpush.bf16.msrb.mxu1 %v11394_v21  ;;  %v11313_v16 = vld [vmem:[%s13316_s5 + $0xe20] sm:$0xf]  ;;  %v12104_v47 = vld [vmem:[%s13316_s5 + $0xf14] sm:$0xf0]  ;;  %v8053_v4 = vpop.f32.mrf.mxu2  ;;  %v14358_v55 = vor.u32 %v11617_v37, %v9473_v33 }
 0x311   : > { %8425 = vmatpush.bf16.msrb.mxu2 %v11458_v63  ;;  %v11514_v63 = vor.u32 %v12124_v19, %v11513_v58  ;;  %v8035_v21 = vadd.f32 %v8034_v62, %v8016_v41  ;;  %v11442_v58 = vor.u32 %v12106_v26, %v11441_v42  ;;  %v11314_v19 = vor.u32 %v12074_v10, %v11313_v16  ;;  %v11497_v42 = vld [vmem:[%s13316_s5 + $0xf90] sm:$0xf]  ;;  %v12120_v26 = vld [vmem:[%s13316_s5 + $0xf94] sm:$0xf0] }
 0x312   : > { %8444 = vmatpush.bf16.msrb.mxu3 %v11522_v3  ;;  %v12090_v3 = vld [vmem:[%s13316_s5 + $0xea4] sm:$0xf0]  ;;  %v11506_v41 = vor.u32 %v12122_v20, %v11505_v32  ;;  %15232 = vst [vmem:[#allocation28_spill] sm:$0xff] %v14358_v55  ;;  %v14365_v10 = vor.u32 %v11618_v36, %v9481_v34  ;;  %v11434_v37 = vor.u32 %v12104_v47, %v11433_v31 }
 0x313   : > { %8388 = vmatpush.bf16.msrb.mxu0 %v11322_v59  ;;  %v11378_v62 = vor.u32 %v12090_v3, %v11377_v11  ;;  %v12088_v59 = vld [vmem:[%s13316_s5 + $0xe94] sm:$0xf0]  ;;  %v14367_v11 = vor.u32 %v11602_v35, %v9483_v27  ;;  %v11425_v3 = vld [vmem:[%s13316_s5 + $0xf00] sm:$0xf]  ;;  %v11498_v34 = vor.u32 %v12120_v26, %v11497_v42  ;;  %v12086_v36 = vld [vmem:[%s13316_s5 + $0xe84] sm:$0xf0] }
 0x314   : > { %8407 = vmatpush.bf16.msrb.mxu1 %v11386_v12  ;;  %v8054_v12 = vadd.f32 %v8053_v4, %v8035_v21  ;;  %15234 = vst [vmem:[#allocation30_spill] sm:$0xff] %v14365_v10  ;;  %v11297_v4 = vld [vmem:[%s13316_s5 + $0xe00] sm:$0xf]  ;;  %v12070_v21 = vld [vmem:[%s13316_s5 + $0xe04] sm:$0xf0]  ;;  %v11370_v20 = vor.u32 %v12088_v59, %v11369_v7 }
 0x315   : > { %8426 = vmatpush.bf16.msrb.mxu2 %v11450_v52  ;;  %v8072_v60 = vpop.f32.mrf.mxu3  ;;  %v14360_v52 = vor.u32 %v11601_v2, %v9475_v61  ;;  %15235 = vst [vmem:[#allocation31_spill] sm:$0xff] %v14367_v11  ;;  %v11306_v2 = vor.u32 %v12072_v30, %v11305_v15  ;;  %v12102_v61 = vld [vmem:[%s13316_s5 + $0xf04] sm:$0xf0]  ;;  %v11489_v35 = vld [vmem:[%s13316_s5 + $0xf80] sm:$0xf]  ;;  %8321 = vmatmul.bf16.gmra.mxu0 %v14358_v55 }
 0x316   : > { %8445 = vmatpush.bf16.msrb.mxu3 %v11514_v63  ;;  %v8018_v63 = vpop.f32.mrf.mxu0  ;;  %v8037_v16 = vpop.f32.mrf.mxu1  ;;  %v14374_v32 = vadd.f32 %v8072_v60, %v8054_v12  ;;  %v12118_v60 = vld [vmem:[%s13316_s5 + $0xf84] sm:$0xf0]  ;;  %v11667_v30 = vld [vmem:[%s13316_s5 + $0x174] sm:$0xf]  ;;  %v9691_v15 = vld [vmem:[%s13316_s5 + $0x178] sm:$0xf0]  ;;  %8359 = vmatmul.bf16.gmra.mxu2 %v14365_v10  ;;  %v11426_v31 = vor.u32 %v12102_v61, %v11425_v3  ;;  %v11298_v47 = vor.u32 %v12070_v21, %v11297_v4 }
 0x317   : > { %15233 = vst [vmem:[#allocation29_spill] sm:$0xff] %v14360_v52  ;;  %v8019_v33 = vadd.f32 %v8018_v63, %v14253_v49  ;;  %8389 = vmatpush.bf16.msrb.mxu0 %v11314_v19  ;;  %v11361_v49 = vld [vmem:[%s13316_s5 + $0xe80] sm:$0xf]  ;;  %8340 = vmatmul.bf16.gmra.mxu1 %v14360_v52  ;;  %v11635_v7 = vld [vmem:[%s13316_s5 + $0x74] sm:$0xf]  ;;  %v11490_v26 = vor.u32 %v12118_v60, %v11489_v35 }
 0x318   : > { %8408 = vmatpush.bf16.msrb.mxu1 %v11378_v62  ;;  %8378 = vmatmul.bf16.gmra.mxu3 %v14367_v11  ;;  %v11651_v19 = vld [vmem:[%s13316_s5 + $0xf4] sm:$0xf]  ;;  %v9627_v62 = vld [vmem:[%s13316_s5 + $0xf8] sm:$0xf0]  ;;  %v11362_v42 = vor.u32 %v12086_v36, %v11361_v49  ;;  %v8056_v12 = vpop.f32.mrf.mxu2  ;;  %v9683_v3 = vld [vmem:[%s13316_s5 + $0x168] sm:$0xf0] }
 0x319   : > { %8427 = vmatpush.bf16.msrb.mxu2 %v11442_v58  ;;  %v8038_v27 = vadd.f32 %v8037_v16, %v8019_v33  ;;  %v9563_v58 = vld [vmem:[%s13316_s5 + $0x78] sm:$0xf0]  ;;  %v9694_v16 = vor.u32 %v11667_v30, %v9691_v15  ;;  %v9630_v21 = vor.u32 %v11651_v19, %v9627_v62  ;;  %v9555_v10 = vld [vmem:[%s13316_s5 + $0x68] sm:$0xf0]  ;;  %v11681_v35 = vld [vmem:[%s13316_s5 + $0x1e4] sm:$0xf] }
 0x31a   : > { %8446 = vmatpush.bf16.msrb.mxu3 %v11506_v41  ;;  %v11683_v41 = vld [vmem:[%s13316_s5 + $0x1f4] sm:$0xf]  ;;  %v9755_v59 = vld [vmem:[%s13316_s5 + $0x1f8] sm:$0xf0]  ;;  %v9566_v33 = vor.u32 %v11635_v7, %v9563_v58  ;;  %v9619_v36 = vld [vmem:[%s13316_s5 + $0xe8] sm:$0xf0] }
 0x31b   : > { %8390 = vmatpush.bf16.msrb.mxu0 %v11306_v2  ;;  %v8057_v2 = vadd.f32 %v8056_v12, %v8038_v27  ;;  %v9758_v11 = vor.u32 %v11683_v41, %v9755_v59  ;;  %v9747_v60 = vld [vmem:[%s13316_s5 + $0x1e8] sm:$0xf0]  ;;  %v9361_v27 = vld [vmem:[%s15168_s0 + $0x70] sm:$0xf]  ;;  %v9363_v58 = vld [vmem:[%s15168_s0 + $0xf0] sm:$0xf0] }
 0x31c   : > { %8409 = vmatpush.bf16.msrb.mxu1 %v11370_v20  ;;  %v11633_v20 = vld [vmem:[%s13316_s5 + $0x64] sm:$0xf]  ;;  %v11587_v7 = vld [vmem:[%s15168_s0 + $0xec] sm:$0xf0]  ;;  %v11588_v62 = vld [vmem:[%s15168_s0 + $0xf4] sm:$0xf0] }
 0x31d   : > { %8428 = vmatpush.bf16.msrb.mxu2 %v11434_v37  ;;  %v8075_v63 = vpop.f32.mrf.mxu3  ;;  %v11665_v37 = vld [vmem:[%s13316_s5 + $0x164] sm:$0xf]  ;;  %v11572_v41 = vld [vmem:[%s15168_s0 + $0x7c] sm:$0xf] }
 0x31e   : > { %8447 = vmatpush.bf16.msrb.mxu3 %v11498_v34  ;;  %v8020_v61 = vpop.f32.mrf.mxu0  ;;  %v8039_v4 = vpop.f32.mrf.mxu1  ;;  %v11649_v34 = vld [vmem:[%s13316_s5 + $0xe4] sm:$0xf]  ;;  %v14401_v30 = vadd.f32 %v8075_v63, %v8057_v2  ;;  %v9686_v19 = vor.u32 %v11665_v37, %v9683_v3  ;;  %v9675_v12 = vld [vmem:[%s13316_s5 + $0x158] sm:$0xf0]  ;;  %v11631_v63 = vld [vmem:[%s13316_s5 + $0x54] sm:$0xf]  ;;  %v14432_v2 = vor.u32 %v11587_v7, %v9361_v27 }
 0x31f   : > { %v8021_v49 = vadd.f32 %v8020_v61, %v14298_v38  ;;  %8391 = vmatpush.bf16.msrb.mxu0 %v11298_v47  ;;  %v11571_v38 = vld [vmem:[%s15168_s0 + $0x74] sm:$0xf]  ;;  %v9369_v47 = vld [vmem:[%s15168_s0 + $0x78] sm:$0xf]  ;;  %v9622_v59 = vor.u32 %v11649_v34, %v9619_v36 }
 0x320   : > { %8410 = vmatpush.bf16.msrb.mxu1 %v11362_v42  ;;  %v9750_v42 = vor.u32 %v11681_v35, %v9747_v60  ;;  %v8058_v37 = vpop.f32.mrf.mxu2  ;;  %15236 = vst [vmem:[#allocation32_spill] sm:$0xff] %v14432_v2  ;;  %v14434_v61 = vor.u32 %v11571_v38, %v9363_v58  ;;  %v14439_v36 = vor.u32 %v11588_v62, %v9369_v47  ;;  %v11661_v38 = vld [vmem:[%s13316_s5 + $0x144] sm:$0xf]  ;;  %v9667_v58 = vld [vmem:[%s13316_s5 + $0x148] sm:$0xf0] }
 0x321   : > { %8429 = vmatpush.bf16.msrb.mxu2 %v11426_v31  ;;  %v8040_v15 = vadd.f32 %v8039_v4, %v8021_v49  ;;  %v9558_v31 = vor.u32 %v11633_v20, %v9555_v10  ;;  %v9371_v10 = vld [vmem:[%s15168_s0 + $0xf8] sm:$0xf0]  ;;  %v11679_v4 = vld [vmem:[%s13316_s5 + $0x1d4] sm:$0xf]  ;;  %v11629_v47 = vld [vmem:[%s13316_s5 + $0x44] sm:$0xf] }
 0x322   : > { %8448 = vmatpush.bf16.msrb.mxu3 %v11490_v26  ;;  %v11663_v26 = vld [vmem:[%s13316_s5 + $0x154] sm:$0xf]  ;;  %15237 = vst [vmem:[#allocation33_spill] sm:$0xff] %v14434_v61  ;;  %v14441_v35 = vor.u32 %v11572_v41, %v9371_v10  ;;  %v9539_v62 = vld [vmem:[%s13316_s5 + $0x48] sm:$0xf0] }
 0x323   : > { %8460 = vmatpush.bf16.msra.mxu0 %v9566_v33  ;;  %v11647_v33 = vld [vmem:[%s13316_s5 + $0xd4] sm:$0xf]  ;;  %v8059_v20 = vadd.f32 %v8058_v37, %v8040_v15  ;;  %15238 = vst [vmem:[#allocation34_spill] sm:$0xff] %v14439_v36  ;;  %v9678_v27 = vor.u32 %v11663_v26, %v9675_v12  ;;  %v11645_v41 = vld [vmem:[%s13316_s5 + $0xc4] sm:$0xf]  ;;  %v9670_v26 = vor.u32 %v11661_v38, %v9667_v58 }
 0x324   : > { %8479 = vmatpush.bf16.msra.mxu1 %v9630_v21  ;;  %v9739_v21 = vld [vmem:[%s13316_s5 + $0x1d8] sm:$0xf0]  ;;  %15239 = vst [vmem:[#allocation35_spill] sm:$0xff] %v14441_v35  ;;  %v9731_v10 = vld [vmem:[%s13316_s5 + $0x1c8] sm:$0xf0]  ;;  %v9542_v12 = vor.u32 %v11629_v47, %v9539_v62 }
 0x325   : > { %8498 = vmatpush.bf16.msra.mxu2 %v9694_v16  ;;  %v9547_v16 = vld [vmem:[%s13316_s5 + $0x58] sm:$0xf0]  ;;  %v8077_v3 = vpop.f32.mrf.mxu3  ;;  %8392 = vmatmul.bf16.vlgmr.msrb.gmra.mxu0 %v14432_v2  ;;  %v11657_v47 = vld [vmem:[%s13316_s5 + $0x124] sm:$0xf]  ;;  %v9651_v62 = vld [vmem:[%s13316_s5 + $0x128] sm:$0xf0] }
 0x326   : > { %8517 = vmatpush.bf16.msra.mxu3 %v9758_v11  ;;  %v9611_v11 = vld [vmem:[%s13316_s5 + $0xd8] sm:$0xf0]  ;;  %v8089_v34 = vpop.f32.mrf.mxu0  ;;  %v8108_v49 = vpop.f32.mrf.mxu1  ;;  %v9550_v7 = vor.u32 %v11631_v63, %v9547_v16  ;;  %v14446_v15 = vadd.f32 %v8077_v3, %v8059_v20  ;;  %8430 = vmatmul.bf16.vlgmr.msrb.gmra.mxu2 %v14439_v36  ;;  %v11659_v63 = vld [vmem:[%s13316_s5 + $0x134] sm:$0xf] }
 0x327   : > { %8461 = vmatpush.bf16.msra.mxu0 %v9558_v31  ;;  %v8090_v60 = vadd.f32 %v8089_v34, %v14321_v43  ;;  %v9742_v31 = vor.u32 %v11679_v4, %v9739_v21  ;;  %8411 = vmatmul.bf16.vlgmr.msrb.gmra.mxu1 %v14434_v61  ;;  %v9603_v43 = vld [vmem:[%s13316_s5 + $0xc8] sm:$0xf0]  ;;  %v9659_v16 = vld [vmem:[%s13316_s5 + $0x138] sm:$0xf0]  ;;  %v11627_v3 = vld [vmem:[%s13316_s5 + $0x34] sm:$0xf] }
 0x328   : > { %8480 = vmatpush.bf16.msra.mxu1 %v9622_v59  ;;  %8449 = vmatmul.bf16.vlgmr.msrb.gmra.mxu3 %v14441_v35  ;;  %v11643_v4 = vld [vmem:[%s13316_s5 + $0xb4] sm:$0xf]  ;;  %v8127_v21 = vpop.f32.mrf.mxu2  ;;  %v9595_v34 = vld [vmem:[%s13316_s5 + $0xb8] sm:$0xf0] }
 0x329   : > { %8499 = vmatpush.bf16.msra.mxu2 %v9686_v19  ;;  %v9614_v19 = vor.u32 %v11647_v33, %v9611_v11  ;;  %v8109_v59 = vadd.f32 %v8108_v49, %v8090_v60  ;;  %v9606_v33 = vor.u32 %v11645_v41, %v9603_v43  ;;  %v9531_v11 = vld [vmem:[%s13316_s5 + $0x38] sm:$0xf0]  ;;  %v11675_v49 = vld [vmem:[%s13316_s5 + $0x1b4] sm:$0xf] }
 0x32a   : > { %8518 = vmatpush.bf16.msra.mxu3 %v9750_v42  ;;  %v11677_v42 = vld [vmem:[%s13316_s5 + $0x1c4] sm:$0xf]  ;;  %v9723_v60 = vld [vmem:[%s13316_s5 + $0x1b8] sm:$0xf0]  ;;  %v11603_v43 = vld [vmem:[%s15168_s0 + $0x174] sm:$0xf] }
 0x32b   : > { %8462 = vmatpush.bf16.msra.mxu0 %v9550_v7  ;;  %v9734_v37 = vor.u32 %v11677_v42, %v9731_v10  ;;  %v9491_v42 = vld [vmem:[%s15168_s0 + $0x1f0] sm:$0xf0]  ;;  %v9598_v10 = vor.u32 %v11643_v4, %v9595_v34  ;;  %v11620_v4 = vld [vmem:[%s15168_s0 + $0x1f4] sm:$0xf0]  ;;  %v9499_v34 = vld [vmem:[%s15168_s0 + $0x1f8] sm:$0xf0] }
 0x32c   : > { %8481 = vmatpush.bf16.msra.mxu1 %v9614_v19  ;;  %v9662_v19 = vor.u32 %v11659_v63, %v9659_v16  ;;  %v9523_v63 = vld [vmem:[%s13316_s5 + $0x28] sm:$0xf0]  ;;  %v11641_v16 = vld [vmem:[%s13316_s5 + $0xa4] sm:$0xf]  ;;  %v11623_v35 = vld [vmem:[%s13316_s5 + $0x14] sm:$0xf] }
 0x32d   : > { %8500 = vmatpush.bf16.msra.mxu2 %v9678_v27  ;;  %v8146_v20 = vpop.f32.mrf.mxu3  ;;  %v8128_v27 = vadd.f32 %v8127_v21, %v8109_v59  ;;  %v11619_v59 = vld [vmem:[%s15168_s0 + $0x1ec] sm:$0xf0]  ;;  %v9497_v21 = vld [vmem:[%s15168_s0 + $0x178] sm:$0xf]  ;;  %v9515_v36 = vld [vmem:[%s13316_s5 + $0x18] sm:$0xf0] }
 0x32e   : > { %8519 = vmatpush.bf16.msra.mxu3 %v9742_v31  ;;  %v8091_v7 = vpop.f32.mrf.mxu0  ;;  %v8110_v38 = vpop.f32.mrf.mxu1  ;;  %v9534_v31 = vor.u32 %v11627_v3, %v9531_v11  ;;  %v11673_v3 = vld [vmem:[%s13316_s5 + $0x1a4] sm:$0xf]  ;;  %v9715_v11 = vld [vmem:[%s13316_s5 + $0x1a8] sm:$0xf0]  ;;  %v11639_v61 = vld [vmem:[%s13316_s5 + $0x94] sm:$0xf] }
 0x32f   : > { %v8092_v58 = vadd.f32 %v8091_v7, %v14374_v32  ;;  %8463 = vmatpush.bf16.msra.mxu0 %v9542_v12  ;;  %v14469_v41 = vadd.f32 %v8146_v20, %v8128_v27  ;;  %v9489_v32 = vld [vmem:[%s15168_s0 + $0x170] sm:$0xf]  ;;  %v11625_v12 = vld [vmem:[%s13316_s5 + $0x24] sm:$0xf]  ;;  %v11604_v20 = vld [vmem:[%s15168_s0 + $0x17c] sm:$0xf] }
 0x330   : > { %8482 = vmatpush.bf16.msra.mxu1 %v9606_v33  ;;  %v11655_v27 = vld [vmem:[%s13316_s5 + $0x114] sm:$0xf]  ;;  %v9643_v7 = vld [vmem:[%s13316_s5 + $0x118] sm:$0xf0]  ;;  %v8129_v2 = vpop.f32.mrf.mxu2  ;;  %v14506_v55 = vor.u32 %v11619_v59, %v9489_v32 }
 0x331   : > { %8501 = vmatpush.bf16.msra.mxu2 %v9670_v26  ;;  %v9726_v26 = vor.u32 %v11675_v49, %v9723_v60  ;;  %v8111_v33 = vadd.f32 %v8110_v38, %v8092_v58  ;;  %v9654_v49 = vor.u32 %v11657_v47, %v9651_v62  ;;  %v9526_v60 = vor.u32 %v11625_v12, %v9523_v63  ;;  %v11671_v47 = vld [vmem:[%s13316_s5 + $0x194] sm:$0xf]  ;;  %v9707_v62 = vld [vmem:[%s13316_s5 + $0x198] sm:$0xf0] }
 0x332   : > { %8520 = vmatpush.bf16.msra.mxu3 %v9734_v37  ;;  %v9587_v37 = vld [vmem:[%s13316_s5 + $0xa8] sm:$0xf0]  ;;  %v9718_v58 = vor.u32 %v11673_v3, %v9715_v11  ;;  %v14513_v63 = vor.u32 %v11620_v4, %v9497_v21  ;;  %v9646_v59 = vor.u32 %v11655_v27, %v9643_v7  ;;  %v9710_v21 = vor.u32 %v11671_v47, %v9707_v62 }
 0x333   : > { %8464 = vmatpush.bf16.msra.mxu0 %v9534_v31  ;;  %v9590_v38 = vor.u32 %v11641_v16, %v9587_v37  ;;  %v9579_v31 = vld [vmem:[%s13316_s5 + $0x98] sm:$0xf0]  ;;  %v14515_v16 = vor.u32 %v11604_v20, %v9499_v34  ;;  %v11653_v37 = vld [vmem:[%s13316_s5 + $0x104] sm:$0xf]  ;;  %v9571_v4 = vld [vmem:[%s13316_s5 + $0x88] sm:$0xf0] }
 0x334   : > { %8483 = vmatpush.bf16.msra.mxu1 %v9598_v10  ;;  %v8130_v10 = vadd.f32 %v8129_v2, %v8111_v33  ;;  %15240 = vst [vmem:[#allocation36_spill] sm:$0xff] %v14513_v63  ;;  %v11621_v2 = vld [vmem:[%s13316_s5 + $0x4] sm:$0xf]  ;;  %v9507_v33 = vld [vmem:[%s13316_s5 + $0x8] sm:$0xf0]  ;;  %v9582_v11 = vor.u32 %v11639_v61, %v9579_v31 }
 0x335   : > { %8502 = vmatpush.bf16.msra.mxu2 %v9662_v19  ;;  %v8148_v52 = vpop.f32.mrf.mxu3  ;;  %v14508_v19 = vor.u32 %v11603_v43, %v9491_v42  ;;  %15241 = vst [vmem:[#allocation37_spill] sm:$0xff] %v14515_v16  ;;  %v9518_v43 = vor.u32 %v11623_v35, %v9515_v36  ;;  %v9635_v42 = vld [vmem:[%s13316_s5 + $0x108] sm:$0xf0]  ;;  %v11669_v20 = vld [vmem:[%s13316_s5 + $0x184] sm:$0xf]  ;;  %8397 = vmatmul.bf16.gmra.mxu0 %v14506_v55 }
 0x336   : > { %8521 = vmatpush.bf16.msra.mxu3 %v9726_v26  ;;  %v8094_v26 = vpop.f32.mrf.mxu0  ;;  %v8113_v12 = vpop.f32.mrf.mxu1  ;;  %v14522_v3 = vadd.f32 %v8148_v52, %v8130_v10  ;;  %v9699_v52 = vld [vmem:[%s13316_s5 + $0x188] sm:$0xf0]  ;;  %v11731_v36 = vld [vmem:[%s13316_s5 + $0x374] sm:$0xf]  ;;  %v9947_v35 = vld [vmem:[%s13316_s5 + $0x378] sm:$0xf0]  ;;  %8435 = vmatmul.bf16.gmra.mxu2 %v14513_v63  ;;  %v9638_v27 = vor.u32 %v11653_v37, %v9635_v42  ;;  %v9510_v7 = vor.u32 %v11621_v2, %v9507_v33 }
 0x337   : > { %v8095_v32 = vadd.f32 %v8094_v26, %v14401_v30  ;;  %8465 = vmatpush.bf16.msra.mxu0 %v9526_v60  ;;  %v11637_v30 = vld [vmem:[%s13316_s5 + $0x84] sm:$0xf]  ;;  %8416 = vmatmul.bf16.gmra.mxu1 %v14508_v19  ;;  %v11699_v61 = vld [vmem:[%s13316_s5 + $0x274] sm:$0xf]  ;;  %v10011_v31 = vld [vmem:[%s13316_s5 + $0x3f8] sm:$0xf0]  ;;  %v9702_v62 = vor.u32 %v11669_v20, %v9699_v52 }
 0x338   : > { %8484 = vmatpush.bf16.msra.mxu1 %v9590_v38  ;;  %8454 = vmatmul.bf16.gmra.mxu3 %v14515_v16  ;;  %v11715_v60 = vld [vmem:[%s13316_s5 + $0x2f4] sm:$0xf]  ;;  %v9883_v38 = vld [vmem:[%s13316_s5 + $0x2f8] sm:$0xf0]  ;;  %v9574_v47 = vor.u32 %v11637_v30, %v9571_v4  ;;  %v9939_v37 = vld [vmem:[%s13316_s5 + $0x368] sm:$0xf0] }
 0x339   : > { %8503 = vmatpush.bf16.msra.mxu2 %v9654_v49  ;;  %v8114_v34 = vadd.f32 %v8113_v12, %v8095_v32  ;;  %v9819_v49 = vld [vmem:[%s13316_s5 + $0x278] sm:$0xf0]  ;;  %v8132_v10 = vpop.f32.mrf.mxu2  ;;  %v9950_v12 = vor.u32 %v11731_v36, %v9947_v35  ;;  %v9886_v33 = vor.u32 %v11715_v60, %v9883_v38  ;;  %v9811_v63 = vld [vmem:[%s13316_s5 + $0x268] sm:$0xf0]  ;;  %v11745_v20 = vld [vmem:[%s13316_s5 + $0x3e4] sm:$0xf] }
 0x33a   : > { %8522 = vmatpush.bf16.msra.mxu3 %v9718_v58  ;;  %v11747_v58 = vld [vmem:[%s13316_s5 + $0x3f4] sm:$0xf]  ;;  %v9822_v32 = vor.u32 %v11699_v61, %v9819_v49  ;;  %v9875_v4 = vld [vmem:[%s13316_s5 + $0x2e8] sm:$0xf0]  ;;  %v9803_v38 = vld [vmem:[%s13316_s5 + $0x258] sm:$0xf0] }
 0x33b   : > { %8466 = vmatpush.bf16.msra.mxu0 %v9518_v43  ;;  %v8133_v43 = vadd.f32 %v8132_v10, %v8114_v34  ;;  %v10014_v16 = vor.u32 %v11747_v58, %v10011_v31  ;;  %v10003_v52 = vld [vmem:[%s13316_s5 + $0x3e8] sm:$0xf0]  ;;  %v11727_v60 = vld [vmem:[%s13316_s5 + $0x354] sm:$0xf] }
 0x33c   : > { %8485 = vmatpush.bf16.msra.mxu1 %v9582_v11  ;;  %v11697_v11 = vld [vmem:[%s13316_s5 + $0x264] sm:$0xf]  ;;  %v10006_v49 = vor.u32 %v11745_v20, %v10003_v52  ;;  %v11711_v58 = vld [vmem:[%s13316_s5 + $0x2d4] sm:$0xf] }
 0x33d   : > { %8504 = vmatpush.bf16.msra.mxu2 %v9646_v59  ;;  %v8151_v26 = vpop.f32.mrf.mxu3  ;;  %v11729_v59 = vld [vmem:[%s13316_s5 + $0x364] sm:$0xf]  ;;  %v11743_v10 = vld [vmem:[%s13316_s5 + $0x3d4] sm:$0xf] }
 0x33e   : > { %8523 = vmatpush.bf16.msra.mxu3 %v9710_v21  ;;  %v8096_v42 = vpop.f32.mrf.mxu0  ;;  %v8115_v2 = vpop.f32.mrf.mxu1  ;;  %v11713_v21 = vld [vmem:[%s13316_s5 + $0x2e4] sm:$0xf]  ;;  %v14549_v36 = vadd.f32 %v8151_v26, %v8133_v43  ;;  %v9942_v35 = vor.u32 %v11729_v59, %v9939_v37 }
 0x33f   : > { %v8097_v30 = vadd.f32 %v8096_v42, %v14446_v15  ;;  %8467 = vmatpush.bf16.msra.mxu0 %v9510_v7  ;;  %v9814_v15 = vor.u32 %v11697_v11, %v9811_v63  ;;  %v9878_v61 = vor.u32 %v11713_v21, %v9875_v4  ;;  %v11695_v7 = vld [vmem:[%s13316_s5 + $0x254] sm:$0xf]  ;;  %v9995_v63 = vld [vmem:[%s13316_s5 + $0x3d8] sm:$0xf0]  ;;  %v11725_v43 = vld [vmem:[%s13316_s5 + $0x344] sm:$0xf] }
 0x340   : > { %8486 = vmatpush.bf16.msra.mxu1 %v9574_v47  ;;  %v9806_v37 = vor.u32 %v11695_v7, %v9803_v38  ;;  %v9923_v42 = vld [vmem:[%s13316_s5 + $0x348] sm:$0xf0]  ;;  %v9998_v11 = vor.u32 %v11743_v10, %v9995_v63  ;;  %v11693_v21 = vld [vmem:[%s13316_s5 + $0x244] sm:$0xf]  ;;  %v9851_v38 = vld [vmem:[%s13316_s5 + $0x2b8] sm:$0xf0] }
 0x341   : > { %8505 = vmatpush.bf16.msra.mxu2 %v9638_v27  ;;  %v8116_v34 = vadd.f32 %v8115_v2, %v8097_v30  ;;  %v9931_v27 = vld [vmem:[%s13316_s5 + $0x358] sm:$0xf0]  ;;  %v8134_v31 = vpop.f32.mrf.mxu2  ;;  %v9795_v30 = vld [vmem:[%s13316_s5 + $0x248] sm:$0xf0]  ;;  %v11709_v4 = vld [vmem:[%s13316_s5 + $0x2c4] sm:$0xf] }
 0x342   : > { %8524 = vmatpush.bf16.msra.mxu3 %v9702_v62  ;;  %v9867_v62 = vld [vmem:[%s13316_s5 + $0x2d8] sm:$0xf0]  ;;  %v9934_v59 = vor.u32 %v11727_v60, %v9931_v27  ;;  %v11741_v52 = vld [vmem:[%s13316_s5 + $0x3c4] sm:$0xf]  ;;  %v11691_v60 = vld [vmem:[%s13316_s5 + $0x234] sm:$0xf] }
 0x343   : > { %8536 = vmatpush.bf16.msrb.mxu0 %v9822_v32  ;;  %v9787_v27 = vld [vmem:[%s13316_s5 + $0x238] sm:$0xf0] }
 0x344   : > { %8555 = vmatpush.bf16.msrb.mxu1 %v9886_v33  ;;  %v9870_v33 = vor.u32 %v11711_v58, %v9867_v62  ;;  %v11739_v58 = vld [vmem:[%s13316_s5 + $0x3b4] sm:$0xf] }
 0x345   : > { %8574 = vmatpush.bf16.msrb.mxu2 %v9950_v12  ;;  %v8153_v47 = vpop.f32.mrf.mxu3  ;;  %8468 = vmatmul.bf16.vlgmr.msra.gmra.mxu0 %v13413_v48  ;;  %v11723_v48 = vld [vmem:[%s13316_s5 + $0x334] sm:$0xf] }
 0x346   : > { %8593 = vmatpush.bf16.msrb.mxu3 %v10014_v16  ;;  %v8135_v16 = vadd.f32 %v8134_v31, %v8116_v34  ;;  %v8165_v26 = vpop.f32.mrf.mxu0  ;;  %v8184_v12 = vpop.f32.mrf.mxu1  ;;  %v9987_v34 = vld [vmem:[%s13316_s5 + $0x3c8] sm:$0xf0]  ;;  %8506 = vmatmul.bf16.vlgmr.msra.gmra.mxu2 %v13420_v54  ;;  %v11707_v54 = vld [vmem:[%s13316_s5 + $0x2b4] sm:$0xf]  ;;  %v9979_v31 = vld [vmem:[%s13316_s5 + $0x3b8] sm:$0xf0] }
 0x347   : > { %8537 = vmatpush.bf16.msrb.mxu0 %v9814_v15  ;;  %v8166_v32 = vadd.f32 %v8165_v26, %v14469_v41  ;;  %8487 = vmatmul.bf16.vlgmr.msra.gmra.mxu1 %v13418_v53  ;;  %v9859_v41 = vld [vmem:[%s13316_s5 + $0x2c8] sm:$0xf0]  ;;  %v9798_v15 = vor.u32 %v11693_v21, %v9795_v30  ;;  %v9790_v26 = vor.u32 %v11691_v60, %v9787_v27  ;;  %v11737_v30 = vld [vmem:[%s13316_s5 + $0x3a4] sm:$0xf]  ;;  %v9835_v27 = vld [vmem:[%s13316_s5 + $0x298] sm:$0xf0] }
 0x348   : > { %8556 = vmatpush.bf16.msrb.mxu1 %v9878_v61  ;;  %v14562_v2 = vadd.f32 %v8153_v47, %v8135_v16  ;;  %8525 = vmatmul.bf16.vlgmr.msra.gmra.mxu3 %v13424_v57  ;;  %v9915_v61 = vld [vmem:[%s13316_s5 + $0x338] sm:$0xf0]  ;;  %v9862_v53 = vor.u32 %v11709_v4, %v9859_v41  ;;  %v9843_v21 = vld [vmem:[%s13316_s5 + $0x2a8] sm:$0xf0] }
 0x349   : > { %8575 = vmatpush.bf16.msrb.mxu2 %v9942_v35  ;;  %v8185_v20 = vadd.f32 %v8184_v12, %v8166_v32  ;;  %v9926_v35 = vor.u32 %v11725_v43, %v9923_v42  ;;  %v8203_v7 = vpop.f32.mrf.mxu2  ;;  %v9918_v16 = vor.u32 %v11723_v48, %v9915_v61  ;;  %v11721_v12 = vld [vmem:[%s13316_s5 + $0x324] sm:$0xf]  ;;  %v9907_v32 = vld [vmem:[%s13316_s5 + $0x328] sm:$0xf0]  ;;  %v9982_v43 = vor.u32 %v11739_v58, %v9979_v31  ;;  %v11687_v48 = vld [vmem:[%s13316_s5 + $0x214] sm:$0xf] }
 0x34a   : > { %8594 = vmatpush.bf16.msrb.mxu3 %v10006_v49  ;;  %v9990_v49 = vor.u32 %v11741_v52, %v9987_v34  ;;  %v11689_v42 = vld [vmem:[%s13316_s5 + $0x224] sm:$0xf]  ;;  %v9971_v4 = vld [vmem:[%s13316_s5 + $0x3a8] sm:$0xf0]  ;;  %v11719_v52 = vld [vmem:[%s13316_s5 + $0x314] sm:$0xf] }
 0x34b   : > { %8538 = vmatpush.bf16.msrb.mxu0 %v9806_v37  ;;  %v8204_v47 = vadd.f32 %v8203_v7, %v8185_v20  ;;  %v9854_v37 = vor.u32 %v11707_v54, %v9851_v38  ;;  %v9910_v20 = vor.u32 %v11721_v12, %v9907_v32  ;;  %v9899_v34 = vld [vmem:[%s13316_s5 + $0x318] sm:$0xf0]  ;;  %v11735_v54 = vld [vmem:[%s13316_s5 + $0x394] sm:$0xf]  ;;  %v11717_v31 = vld [vmem:[%s13316_s5 + $0x304] sm:$0xf] }
 0x34c   : > { %8557 = vmatpush.bf16.msrb.mxu1 %v9870_v33  ;;  %v9779_v33 = vld [vmem:[%s13316_s5 + $0x228] sm:$0xf0]  ;;  %v9771_v61 = vld [vmem:[%s13316_s5 + $0x218] sm:$0xf0] }
 0x34d   : > { %8576 = vmatpush.bf16.msrb.mxu2 %v9934_v59  ;;  %v8222_v57 = vpop.f32.mrf.mxu3  ;;  %v9782_v41 = vor.u32 %v11689_v42, %v9779_v33  ;;  %v9963_v7 = vld [vmem:[%s13316_s5 + $0x398] sm:$0xf0]  ;;  %v11733_v42 = vld [vmem:[%s13316_s5 + $0x384] sm:$0xf] }
 0x34e   : > { %8595 = vmatpush.bf16.msrb.mxu3 %v9998_v11  ;;  %v8167_v62 = vpop.f32.mrf.mxu0  ;;  %v8186_v10 = vpop.f32.mrf.mxu1  ;;  %v14585_v59 = vadd.f32 %v8222_v57, %v8204_v47 }
 0x34f   : > { %v8168_v63 = vadd.f32 %v8167_v62, %v14522_v3  ;;  %8539 = vmatpush.bf16.msrb.mxu0 %v9798_v15  ;;  %v11705_v3 = vld [vmem:[%s13316_s5 + $0x2a4] sm:$0xf]  ;;  %v9974_v15 = vor.u32 %v11737_v30, %v9971_v4  ;;  %v9902_v62 = vor.u32 %v11719_v52, %v9899_v34  ;;  %v11763_v30 = vld [vmem:[%s13316_s5 + $0x474] sm:$0xf]  ;;  %v10075_v4 = vld [vmem:[%s13316_s5 + $0x478] sm:$0xf0] }
 0x350   : > { %8558 = vmatpush.bf16.msrb.mxu1 %v9862_v53  ;;  %v11703_v53 = vld [vmem:[%s13316_s5 + $0x294] sm:$0xf] }
 0x351   : > { %8577 = vmatpush.bf16.msrb.mxu2 %v9926_v35  ;;  %v8187_v11 = vadd.f32 %v8186_v10, %v8168_v63  ;;  %v9846_v35 = vor.u32 %v11705_v3, %v9843_v21  ;;  %v9774_v10 = vor.u32 %v11687_v48, %v9771_v61  ;;  %v9891_v63 = vld [vmem:[%s13316_s5 + $0x308] sm:$0xf0]  ;;  %v9838_v32 = vor.u32 %v11703_v53, %v9835_v27  ;;  %v10203_v21 = vld [vmem:[%s13316_s5 + $0x578] sm:$0xf0]  ;;  %v11811_v34 = vld [vmem:[%s13316_s5 + $0x5f4] sm:$0xf] }
 0x352   : > { %8596 = vmatpush.bf16.msrb.mxu3 %v9990_v49  ;;  %v8205_v49 = vpop.f32.mrf.mxu2  ;;  %v9955_v3 = vld [vmem:[%s13316_s5 + $0x388] sm:$0xf0]  ;;  %v10078_v61 = vor.u32 %v11763_v30, %v10075_v4  ;;  %v11793_v53 = vld [vmem:[%s13316_s5 + $0x564] sm:$0xf]  ;;  %v10123_v4 = vld [vmem:[%s13316_s5 + $0x4d8] sm:$0xf0] }
 0x353   : > { %8540 = vmatpush.bf16.msrb.mxu0 %v9790_v26  ;;  %v8206_v57 = vadd.f32 %v8205_v49, %v8187_v11  ;;  %v9763_v26 = vld [vmem:[%s13316_s5 + $0x208] sm:$0xf0]  ;;  %v11795_v11 = vld [vmem:[%s13316_s5 + $0x574] sm:$0xf] }
 0x354   : > { %8559 = vmatpush.bf16.msrb.mxu1 %v9854_v37  ;;  %v9966_v37 = vor.u32 %v11735_v54, %v9963_v7  ;;  %v10206_v48 = vor.u32 %v11795_v11, %v10203_v21  ;;  %v10195_v49 = vld [vmem:[%s13316_s5 + $0x568] sm:$0xf0]  ;;  %v11775_v11 = vld [vmem:[%s13316_s5 + $0x4d4] sm:$0xf] }
 0x355   : > { %8578 = vmatpush.bf16.msrb.mxu2 %v9918_v16  ;;  %v8224_v60 = vpop.f32.mrf.mxu3  ;;  %v11685_v16 = vld [vmem:[%s13316_s5 + $0x204] sm:$0xf]  ;;  %8473 = vmatmul.bf16.gmra.mxu0 %v13481_v44  ;;  %v10139_v44 = vld [vmem:[%s13316_s5 + $0x4f8] sm:$0xf0] }
 0x356   : > { %8597 = vmatpush.bf16.msrb.mxu3 %v9982_v43  ;;  %v8170_v38 = vpop.f32.mrf.mxu0  ;;  %v8189_v58 = vpop.f32.mrf.mxu1  ;;  %v14606_v12 = vadd.f32 %v8224_v60, %v8206_v57  ;;  %v9827_v43 = vld [vmem:[%s13316_s5 + $0x288] sm:$0xf0]  ;;  %8511 = vmatmul.bf16.gmra.mxu2 %v13488_v51  ;;  %v9766_v52 = vor.u32 %v11685_v16, %v9763_v26  ;;  %v9958_v51 = vor.u32 %v11733_v42, %v9955_v3  ;;  %v10187_v42 = vld [vmem:[%s13316_s5 + $0x558] sm:$0xf0] }
 0x357   : > { %v8171_v47 = vadd.f32 %v8170_v38, %v14549_v36  ;;  %8541 = vmatpush.bf16.msrb.mxu0 %v9782_v41  ;;  %v11701_v36 = vld [vmem:[%s13316_s5 + $0x284] sm:$0xf]  ;;  %8492 = vmatmul.bf16.gmra.mxu1 %v13486_v50  ;;  %v9894_v41 = vor.u32 %v11717_v31, %v9891_v63  ;;  %v10259_v63 = vld [vmem:[%s13316_s5 + $0x5e8] sm:$0xf0]  ;;  %v10059_v3 = vld [vmem:[%s13316_s5 + $0x458] sm:$0xf0] }
 0x358   : > { %8560 = vmatpush.bf16.msrb.mxu1 %v9846_v35  ;;  %8530 = vmatmul.bf16.gmra.mxu3 %v13492_v56  ;;  %v10267_v35 = vld [vmem:[%s13316_s5 + $0x5f8] sm:$0xf0]  ;;  %v9830_v50 = vor.u32 %v11701_v36, %v9827_v43  ;;  %v11761_v38 = vld [vmem:[%s13316_s5 + $0x464] sm:$0xf]  ;;  %v11791_v43 = vld [vmem:[%s13316_s5 + $0x554] sm:$0xf] }
 0x359   : > { %8579 = vmatpush.bf16.msrb.mxu2 %v9910_v20  ;;  %v8190_v33 = vadd.f32 %v8189_v58, %v8171_v47  ;;  %v11779_v20 = vld [vmem:[%s13316_s5 + $0x4f4] sm:$0xf]  ;;  %v10270_v57 = vor.u32 %v11811_v34, %v10267_v35  ;;  %v10067_v58 = vld [vmem:[%s13316_s5 + $0x468] sm:$0xf0]  ;;  %v11777_v31 = vld [vmem:[%s13316_s5 + $0x4e4] sm:$0xf] }
 0x35a   : > { %8598 = vmatpush.bf16.msrb.mxu3 %v9974_v15  ;;  %v8208_v56 = vpop.f32.mrf.mxu2  ;;  %v10142_v7 = vor.u32 %v11779_v20, %v10139_v44  ;;  %v11807_v20 = vld [vmem:[%s13316_s5 + $0x5d4] sm:$0xf] }
 0x35b   : > { %8542 = vmatpush.bf16.msrb.mxu0 %v9774_v10  ;;  %v8209_v60 = vadd.f32 %v8208_v56, %v8190_v33  ;;  %v11809_v10 = vld [vmem:[%s13316_s5 + $0x5e4] sm:$0xf]  ;;  %v11759_v33 = vld [vmem:[%s13316_s5 + $0x454] sm:$0xf] }
 0x35c   : > { %8561 = vmatpush.bf16.msrb.mxu1 %v9838_v32  ;;  %v10198_v32 = vor.u32 %v11793_v53, %v10195_v49  ;;  %v10262_v36 = vor.u32 %v11809_v10, %v10259_v63  ;;  %v11789_v56 = vld [vmem:[%s13316_s5 + $0x544] sm:$0xf]  ;;  %v10043_v10 = vld [vmem:[%s13316_s5 + $0x438] sm:$0xf0] }
 0x35d   : > { %8580 = vmatpush.bf16.msrb.mxu2 %v9902_v62  ;;  %v8227_v15 = vpop.f32.mrf.mxu3  ;;  %v10131_v62 = vld [vmem:[%s13316_s5 + $0x4e8] sm:$0xf0]  ;;  %v11757_v49 = vld [vmem:[%s13316_s5 + $0x444] sm:$0xf] }
 0x35e   : > { %8599 = vmatpush.bf16.msrb.mxu3 %v9966_v37  ;;  %v8172_v27 = vpop.f32.mrf.mxu0  ;;  %v8191_v54 = vpop.f32.mrf.mxu1  ;;  %v14633_v16 = vadd.f32 %v8227_v15, %v8209_v60  ;;  %v10134_v37 = vor.u32 %v11777_v31, %v10131_v62  ;;  %v10179_v15 = vld [vmem:[%s13316_s5 + $0x548] sm:$0xf0]  ;;  %v10171_v31 = vld [vmem:[%s13316_s5 + $0x538] sm:$0xf0]  ;;  %v11755_v62 = vld [vmem:[%s13316_s5 + $0x434] sm:$0xf] }
 0x35f   : > { %v8173_v47 = vadd.f32 %v8172_v27, %v14562_v2  ;;  %8543 = vmatpush.bf16.msrb.mxu0 %v9766_v52  ;;  %v10070_v2 = vor.u32 %v11761_v38, %v10067_v58  ;;  %v10051_v60 = vld [vmem:[%s13316_s5 + $0x448] sm:$0xf0]  ;;  %v11773_v27 = vld [vmem:[%s13316_s5 + $0x4c4] sm:$0xf]  ;;  %v10182_v38 = vor.u32 %v11789_v56, %v10179_v15  ;;  %v11783_v15 = vld [vmem:[%s13316_s5 + $0x514] sm:$0xf] }
 0x360   : > { %8562 = vmatpush.bf16.msrb.mxu1 %v9830_v50  ;;  %v10190_v50 = vor.u32 %v11791_v43, %v10187_v42  ;;  %v10054_v58 = vor.u32 %v11757_v49, %v10051_v60  ;;  %v11751_v60 = vld [vmem:[%s13316_s5 + $0x414] sm:$0xf] }
 0x361   : > { %8581 = vmatpush.bf16.msrb.mxu2 %v9894_v41  ;;  %v8192_v26 = vadd.f32 %v8191_v54, %v8173_v47  ;;  %v10251_v41 = vld [vmem:[%s13316_s5 + $0x5d8] sm:$0xf0] }
 0x362   : > { %8600 = vmatpush.bf16.msrb.mxu3 %v9958_v51  ;;  %v8210_v21 = vpop.f32.mrf.mxu2  ;;  %v10062_v51 = vor.u32 %v11759_v33, %v10059_v3  ;;  %v10254_v53 = vor.u32 %v11807_v20, %v10251_v41  ;;  %v10046_v3 = vor.u32 %v11755_v62, %v10043_v10  ;;  %v11753_v41 = vld [vmem:[%s13316_s5 + $0x424] sm:$0xf] }
 0x363   : > { %8612 = vmatpush.bf16.msra.mxu0 %v10078_v61  ;;  %v8211_v52 = vadd.f32 %v8210_v21, %v8192_v26  ;;  %v10126_v61 = vor.u32 %v11775_v11, %v10123_v4  ;;  %v10107_v26 = vld [vmem:[%s13316_s5 + $0x4b8] sm:$0xf0]  ;;  %v11785_v11 = vld [vmem:[%s13316_s5 + $0x524] sm:$0xf]  ;;  %v10163_v21 = vld [vmem:[%s13316_s5 + $0x528] sm:$0xf0] }
 0x364   : > { %8631 = vmatpush.bf16.msra.mxu1 %v10142_v7  ;;  %v11805_v7 = vld [vmem:[%s13316_s5 + $0x5c4] sm:$0xf] }
 0x365   : > { %8650 = vmatpush.bf16.msra.mxu2 %v10206_v48  ;;  %v8229_v30 = vpop.f32.mrf.mxu3  ;;  %8544 = vmatmul.bf16.vlgmr.msrb.gmra.mxu0 %v13557_v0  ;;  %v11787_v0 = vld [vmem:[%s13316_s5 + $0x534] sm:$0xf] }
 0x366   : > { %8669 = vmatpush.bf16.msra.mxu3 %v10270_v57  ;;  %v8241_v44 = vpop.f32.mrf.mxu0  ;;  %v8260_v34 = vpop.f32.mrf.mxu1  ;;  %v14646_v48 = vadd.f32 %v8229_v30, %v8211_v52  ;;  %v10243_v57 = vld [vmem:[%s13316_s5 + $0x5c8] sm:$0xf0]  ;;  %8582 = vmatmul.bf16.vlgmr.msrb.gmra.mxu2 %v13564_v5  ;;  %v11771_v5 = vld [vmem:[%s13316_s5 + $0x4b4] sm:$0xf]  ;;  %v10174_v33 = vor.u32 %v11787_v0, %v10171_v31 }
 0x367   : > { %8613 = vmatpush.bf16.msra.mxu0 %v10070_v2  ;;  %v8242_v35 = vadd.f32 %v8241_v44, %v14585_v59  ;;  %8563 = vmatmul.bf16.vlgmr.msrb.gmra.mxu1 %v13559_v1  ;;  %v10115_v59 = vld [vmem:[%s13316_s5 + $0x4c8] sm:$0xf0]  ;;  %v10246_v47 = vor.u32 %v11805_v7, %v10243_v57  ;;  %v10235_v2 = vld [vmem:[%s13316_s5 + $0x5b8] sm:$0xf0]  ;;  %v10110_v4 = vor.u32 %v11771_v5, %v10107_v26 }
 0x368   : > { %8632 = vmatpush.bf16.msra.mxu1 %v10134_v37  ;;  %8601 = vmatmul.bf16.vlgmr.msrb.gmra.mxu3 %v13566_v6  ;;  %v10118_v1 = vor.u32 %v11773_v27, %v10115_v59  ;;  %v10035_v52 = vld [vmem:[%s13316_s5 + $0x428] sm:$0xf0]  ;;  %v10027_v27 = vld [vmem:[%s13316_s5 + $0x418] sm:$0xf0] }
 0x369   : > { %8651 = vmatpush.bf16.msra.mxu2 %v10198_v32  ;;  %v8261_v54 = vadd.f32 %v8260_v34, %v8242_v35  ;;  %v11803_v32 = vld [vmem:[%s13316_s5 + $0x5b4] sm:$0xf]  ;;  %v10099_v34 = vld [vmem:[%s13316_s5 + $0x4a8] sm:$0xf0]  ;;  %v11801_v35 = vld [vmem:[%s13316_s5 + $0x5a4] sm:$0xf]  ;;  %v10038_v56 = vor.u32 %v11753_v41, %v10035_v52  ;;  %v10030_v5 = vor.u32 %v11751_v60, %v10027_v27 }
 0x36a   : > { %8670 = vmatpush.bf16.msra.mxu3 %v10262_v36  ;;  %v8279_v63 = vpop.f32.mrf.mxu2  ;;  %v10238_v20 = vor.u32 %v11803_v32, %v10235_v2  ;;  %v10091_v57 = vld [vmem:[%s13316_s5 + $0x498] sm:$0xf0]  ;;  %v10019_v26 = vld [vmem:[%s13316_s5 + $0x408] sm:$0xf0]  ;;  %v11825_v27 = vld [vmem:[%s13316_s5 + $0x664] sm:$0xf] }
 0x36b   : > { %8614 = vmatpush.bf16.msra.mxu0 %v10062_v51  ;;  %v8280_v37 = vadd.f32 %v8279_v63, %v8261_v54  ;;  %v10166_v51 = vor.u32 %v11785_v11, %v10163_v21  ;;  %v11767_v54 = vld [vmem:[%s13316_s5 + $0x494] sm:$0xf]  ;;  %v10147_v63 = vld [vmem:[%s13316_s5 + $0x508] sm:$0xf0]  ;;  %v10459_v11 = vld [vmem:[%s13316_s5 + $0x778] sm:$0xf0] }
 0x36c   : > { %8633 = vmatpush.bf16.msra.mxu1 %v10126_v61  ;;  %v10155_v61 = vld [vmem:[%s13316_s5 + $0x518] sm:$0xf0]  ;;  %v10094_v2 = vor.u32 %v11767_v54, %v10091_v57  ;;  %v11827_v21 = vld [vmem:[%s13316_s5 + $0x674] sm:$0xf]  ;;  %v10323_v54 = vld [vmem:[%s13316_s5 + $0x668] sm:$0xf0] }
 0x36d   : > { %8652 = vmatpush.bf16.msra.mxu2 %v10190_v50  ;;  %v8298_v6 = vpop.f32.mrf.mxu3  ;;  %v10227_v50 = vld [vmem:[%s13316_s5 + $0x5a8] sm:$0xf0]  ;;  %v10158_v10 = vor.u32 %v11783_v15, %v10155_v61 }
 0x36e   : > { %8671 = vmatpush.bf16.msra.mxu3 %v10254_v53  ;;  %v8243_v36 = vpop.f32.mrf.mxu0  ;;  %v8262_v43 = vpop.f32.mrf.mxu1  ;;  %v14669_v30 = vadd.f32 %v8298_v6, %v8280_v37  ;;  %v10230_v49 = vor.u32 %v11801_v35, %v10227_v50  ;;  %v11749_v6 = vld [vmem:[%s13316_s5 + $0x404] sm:$0xf]  ;;  %v10387_v57 = vld [vmem:[%s13316_s5 + $0x6e8] sm:$0xf0] }
 0x36f   : > { %v8244_v42 = vadd.f32 %v8243_v36, %v14606_v12  ;;  %8615 = vmatpush.bf16.msra.mxu0 %v10054_v58  ;;  %v11769_v12 = vld [vmem:[%s13316_s5 + $0x4a4] sm:$0xf]  ;;  %v10219_v58 = vld [vmem:[%s13316_s5 + $0x598] sm:$0xf0]  ;;  %v10083_v36 = vld [vmem:[%s13316_s5 + $0x488] sm:$0xf0]  ;;  %v10022_v52 = vor.u32 %v11749_v6, %v10019_v26 }
 0x370   : > { %8634 = vmatpush.bf16.msra.mxu1 %v10118_v1  ;;  %v10102_v53 = vor.u32 %v11769_v12, %v10099_v34  ;;  %v11875_v12 = vld [vmem:[%s13316_s5 + $0x7f4] sm:$0xf]  ;;  %v10315_v6 = vld [vmem:[%s13316_s5 + $0x658] sm:$0xf0] }
 0x371   : > { %8653 = vmatpush.bf16.msra.mxu2 %v10182_v38  ;;  %v8263_v44 = vadd.f32 %v8262_v43, %v8244_v42  ;;  %v11799_v38 = vld [vmem:[%s13316_s5 + $0x594] sm:$0xf]  ;;  %v11797_v43 = vld [vmem:[%s13316_s5 + $0x584] sm:$0xf] }
 0x372   : > { %8672 = vmatpush.bf16.msra.mxu3 %v10246_v47  ;;  %v8281_v59 = vpop.f32.mrf.mxu2  ;;  %v11781_v47 = vld [vmem:[%s13316_s5 + $0x504] sm:$0xf]  ;;  %v10222_v37 = vor.u32 %v11799_v38, %v10219_v58  ;;  %v10515_v58 = vld [vmem:[%s13316_s5 + $0x7e8] sm:$0xf0]  ;;  %v11839_v26 = vld [vmem:[%s13316_s5 + $0x6d4] sm:$0xf] }
 0x373   : > { %8616 = vmatpush.bf16.msra.mxu0 %v10046_v3  ;;  %v8282_v0 = vadd.f32 %v8281_v59, %v8263_v44  ;;  %v11859_v3 = vld [vmem:[%s13316_s5 + $0x774] sm:$0xf]  ;;  %v10150_v41 = vor.u32 %v11781_v47, %v10147_v63  ;;  %v10523_v44 = vld [vmem:[%s13316_s5 + $0x7f8] sm:$0xf0]  ;;  %v11841_v59 = vld [vmem:[%s13316_s5 + $0x6e4] sm:$0xf] }
 0x374   : > { %8635 = vmatpush.bf16.msra.mxu1 %v10110_v4  ;;  %v10331_v4 = vld [vmem:[%s13316_s5 + $0x678] sm:$0xf0]  ;;  %v10462_v35 = vor.u32 %v11859_v3, %v10459_v11  ;;  %v10526_v60 = vor.u32 %v11875_v12, %v10523_v44  ;;  %v11873_v38 = vld [vmem:[%s13316_s5 + $0x7e4] sm:$0xf]  ;;  %v10390_v47 = vor.u32 %v11841_v59, %v10387_v57  ;;  %v11823_v63 = vld [vmem:[%s13316_s5 + $0x654] sm:$0xf] }
 0x375   : > { %8654 = vmatpush.bf16.msra.mxu2 %v10174_v33  ;;  %v8300_v7 = vpop.f32.mrf.mxu3  ;;  %8549 = vmatmul.bf16.gmra.mxu0 %v13625_v8  ;;  %v10211_v33 = vld [vmem:[%s13316_s5 + $0x588] sm:$0xf0]  ;;  %v10395_v8 = vld [vmem:[%s13316_s5 + $0x6f8] sm:$0xf0]  ;;  %v10334_v50 = vor.u32 %v11827_v21, %v10331_v4  ;;  %v10318_v4 = vor.u32 %v11823_v63, %v10315_v6  ;;  %v11821_v44 = vld [vmem:[%s13316_s5 + $0x644] sm:$0xf] }
 0x376   : > { %8673 = vmatpush.bf16.msra.mxu3 %v10238_v20  ;;  %v8246_v31 = vpop.f32.mrf.mxu0  ;;  %v8265_v1 = vpop.f32.mrf.mxu1  ;;  %v14690_v32 = vadd.f32 %v8300_v7, %v8282_v0  ;;  %8587 = vmatmul.bf16.gmra.mxu2 %v13632_v13  ;;  %v11843_v20 = vld [vmem:[%s13316_s5 + $0x6f4] sm:$0xf]  ;;  %v10214_v13 = vor.u32 %v11797_v43, %v10211_v33  ;;  %v10507_v43 = vld [vmem:[%s13316_s5 + $0x7d8] sm:$0xf0]  ;;  %v10291_v63 = vld [vmem:[%s13316_s5 + $0x628] sm:$0xf0] }
 0x377   : > { %v8247_v62 = vadd.f32 %v8246_v31, %v14633_v16  ;;  %8617 = vmatpush.bf16.msra.mxu0 %v10038_v56  ;;  %v11765_v16 = vld [vmem:[%s13316_s5 + $0x484] sm:$0xf]  ;;  %8568 = vmatmul.bf16.gmra.mxu1 %v13627_v9  ;;  %v10451_v56 = vld [vmem:[%s13316_s5 + $0x768] sm:$0xf0] }
 0x378   : > { %8636 = vmatpush.bf16.msra.mxu1 %v10102_v53  ;;  %8606 = vmatmul.bf16.gmra.mxu3 %v13634_v14  ;;  %v10086_v9 = vor.u32 %v11765_v16, %v10083_v36  ;;  %v10379_v16 = vld [vmem:[%s13316_s5 + $0x6d8] sm:$0xf0]  ;;  %v11871_v36 = vld [vmem:[%s13316_s5 + $0x7d4] sm:$0xf] }
 0x379   : > { %8655 = vmatpush.bf16.msra.mxu2 %v10166_v51  ;;  %v8266_v42 = vadd.f32 %v8265_v1, %v8247_v62  ;;  %v11857_v51 = vld [vmem:[%s13316_s5 + $0x764] sm:$0xf]  ;;  %v10518_v62 = vor.u32 %v11873_v38, %v10515_v58  ;;  %v10510_v12 = vor.u32 %v11871_v36, %v10507_v43  ;;  %v11847_v43 = vld [vmem:[%s13316_s5 + $0x714] sm:$0xf] }
 0x37a   : > { %8674 = vmatpush.bf16.msra.mxu3 %v10230_v49  ;;  %v8284_v14 = vpop.f32.mrf.mxu2  ;;  %v10398_v49 = vor.u32 %v11843_v20, %v10395_v8  ;;  %v10454_v1 = vor.u32 %v11857_v51, %v10451_v56  ;;  %v11853_v20 = vld [vmem:[%s13316_s5 + $0x744] sm:$0xf]  ;;  %v10382_v8 = vor.u32 %v11839_v26, %v10379_v16  ;;  %v10427_v56 = vld [vmem:[%s13316_s5 + $0x738] sm:$0xf0]  ;;  %v10355_v26 = vld [vmem:[%s13316_s5 + $0x6a8] sm:$0xf0] }
 0x37b   : > { %8618 = vmatpush.bf16.msra.mxu0 %v10030_v5  ;;  %v8285_v15 = vadd.f32 %v8284_v14, %v8266_v42  ;;  %v10443_v5 = vld [vmem:[%s13316_s5 + $0x758] sm:$0xf0] }
 0x37c   : > { %8637 = vmatpush.bf16.msra.mxu1 %v10094_v2 }
 0x37d   : > { %8656 = vmatpush.bf16.msra.mxu2 %v10158_v10  ;;  %v8303_v34 = vpop.f32.mrf.mxu3  ;;  %v11855_v10 = vld [vmem:[%s13316_s5 + $0x754] sm:$0xf] }
 0x37e   : > { %8675 = vmatpush.bf16.msra.mxu3 %v10222_v37  ;;  %v8248_v61 = vpop.f32.mrf.mxu0  ;;  %v8267_v53 = vpop.f32.mrf.mxu1  ;;  %v14717_v0 = vadd.f32 %v8303_v34, %v8285_v15  ;;  %v10446_v21 = vor.u32 %v11855_v10, %v10443_v5  ;;  %v11869_v34 = vld [vmem:[%s13316_s5 + $0x7c4] sm:$0xf] }
 0x37f   : > { %v8249_v7 = vadd.f32 %v8248_v61, %v14646_v48  ;;  %8619 = vmatpush.bf16.msra.mxu0 %v10022_v52  ;;  %v10326_v48 = vor.u32 %v11825_v27, %v10323_v54  ;;  %v11819_v61 = vld [vmem:[%s13316_s5 + $0x634] sm:$0xf]  ;;  %v10491_v54 = vld [vmem:[%s13316_s5 + $0x7b8] sm:$0xf0]  ;;  %v11817_v5 = vld [vmem:[%s13316_s5 + $0x624] sm:$0xf] }
 0x380   : > { %8638 = vmatpush.bf16.msra.mxu1 %v10086_v9  ;;  %v10307_v9 = vld [vmem:[%s13316_s5 + $0x648] sm:$0xf0]  ;;  %v11867_v27 = vld [vmem:[%s13316_s5 + $0x7b4] sm:$0xf]  ;;  %v10294_v36 = vor.u32 %v11817_v5, %v10291_v63 }
 0x381   : > { %8657 = vmatpush.bf16.msra.mxu2 %v10150_v41  ;;  %v8268_v31 = vadd.f32 %v8267_v53, %v8249_v7  ;;  %v10435_v41 = vld [vmem:[%s13316_s5 + $0x748] sm:$0xf0]  ;;  %v10310_v51 = vor.u32 %v11821_v44, %v10307_v9  ;;  %v10299_v53 = vld [vmem:[%s13316_s5 + $0x638] sm:$0xf0]  ;;  %v10494_v10 = vor.u32 %v11867_v27, %v10491_v54  ;;  %v11891_v54 = vld [vmem:[%s13316_s5 + $0x874] sm:$0xf] }
 0x382   : > { %8676 = vmatpush.bf16.msra.mxu3 %v10214_v13  ;;  %v8286_v2 = vpop.f32.mrf.mxu2  ;;  %v11837_v13 = vld [vmem:[%s13316_s5 + $0x6c4] sm:$0xf]  ;;  %v10475_v44 = vld [vmem:[%s13316_s5 + $0x798] sm:$0xf0]  ;;  %v10707_v5 = vld [vmem:[%s13316_s5 + $0x968] sm:$0xf0] }
 0x383   : > { %8688 = vmatpush.bf16.msrb.mxu0 %v10334_v50  ;;  %v8287_v42 = vadd.f32 %v8286_v2, %v8268_v31  ;;  %v10438_v50 = vor.u32 %v11853_v20, %v10435_v41  ;;  %v10302_v31 = vor.u32 %v11819_v61, %v10299_v53  ;;  %v11865_v2 = vld [vmem:[%s13316_s5 + $0x7a4] sm:$0xf]  ;;  %v10339_v53 = vld [vmem:[%s13316_s5 + $0x688] sm:$0xf0]  ;;  %v10715_v27 = vld [vmem:[%s13316_s5 + $0x978] sm:$0xf0] }
 0x384   : > { %8707 = vmatpush.bf16.msrb.mxu1 %v10398_v49 }
 0x385   : > { %8726 = vmatpush.bf16.msrb.mxu2 %v10462_v35  ;;  %v8305_v37 = vpop.f32.mrf.mxu3  ;;  %8620 = vmatmul.bf16.vlgmr.msra.gmra.mxu0 %v13695_v23  ;;  %v10499_v35 = vld [vmem:[%s13316_s5 + $0x7c8] sm:$0xf0]  ;;  %v11851_v23 = vld [vmem:[%s13316_s5 + $0x734] sm:$0xf] }
 0x386   : > { %8745 = vmatpush.bf16.msrb.mxu3 %v10526_v60  ;;  %v8317_v33 = vpop.f32.mrf.mxu0  ;;  %v8336_v3 = vpop.f32.mrf.mxu1  ;;  %v14730_v52 = vadd.f32 %v8305_v37, %v8287_v42  ;;  %8658 = vmatmul.bf16.vlgmr.msra.gmra.mxu2 %v13702_v28  ;;  %v10502_v15 = vor.u32 %v11869_v34, %v10499_v35  ;;  %v11835_v28 = vld [vmem:[%s13316_s5 + $0x6b4] sm:$0xf]  ;;  %v10363_v60 = vld [vmem:[%s13316_s5 + $0x6b8] sm:$0xf0]  ;;  %v10430_v58 = vor.u32 %v11851_v23, %v10427_v56  ;;  %v10483_v37 = vld [vmem:[%s13316_s5 + $0x7a8] sm:$0xf0] }
 0x387   : > { %8689 = vmatpush.bf16.msrb.mxu0 %v10326_v48  ;;  %v8318_v11 = vadd.f32 %v8317_v33, %v14669_v30  ;;  %8639 = vmatmul.bf16.vlgmr.msra.gmra.mxu1 %v13697_v24  ;;  %v10371_v30 = vld [vmem:[%s13316_s5 + $0x6c8] sm:$0xf0]  ;;  %v10411_v42 = vld [vmem:[%s13316_s5 + $0x718] sm:$0xf0]  ;;  %v11813_v23 = vld [vmem:[%s13316_s5 + $0x604] sm:$0xf] }
 0x388   : > { %8708 = vmatpush.bf16.msrb.mxu1 %v10390_v47  ;;  %8677 = vmatmul.bf16.vlgmr.msra.gmra.mxu3 %v13704_v29  ;;  %v10374_v24 = vor.u32 %v11837_v13, %v10371_v30  ;;  %v10419_v48 = vld [vmem:[%s13316_s5 + $0x728] sm:$0xf0]  ;;  %v11845_v30 = vld [vmem:[%s13316_s5 + $0x704] sm:$0xf]  ;;  %v10414_v35 = vor.u32 %v11847_v43, %v10411_v42 }
 0x389   : > { %8727 = vmatpush.bf16.msrb.mxu2 %v10454_v1  ;;  %v8337_v14 = vadd.f32 %v8336_v3, %v8318_v11  ;;  %v11849_v1 = vld [vmem:[%s13316_s5 + $0x724] sm:$0xf]  ;;  %v10486_v3 = vor.u32 %v11865_v2, %v10483_v37  ;;  %v11815_v11 = vld [vmem:[%s13316_s5 + $0x614] sm:$0xf]  ;;  %v10275_v56 = vld [vmem:[%s13316_s5 + $0x608] sm:$0xf0] }
 0x38a   : > { %8746 = vmatpush.bf16.msrb.mxu3 %v10518_v62  ;;  %v8355_v49 = vpop.f32.mrf.mxu2  ;;  %v10366_v62 = vor.u32 %v11835_v28, %v10363_v60  ;;  %v10422_v16 = vor.u32 %v11849_v1, %v10419_v48  ;;  %v11861_v28 = vld [vmem:[%s13316_s5 + $0x784] sm:$0xf]  ;;  %v11923_v60 = vld [vmem:[%s13316_s5 + $0x974] sm:$0xf]  ;;  %v10643_v42 = vld [vmem:[%s13316_s5 + $0x8e8] sm:$0xf0] }
 0x38b   : > { %8690 = vmatpush.bf16.msrb.mxu0 %v10318_v4  ;;  %v8356_v59 = vadd.f32 %v8355_v49, %v8337_v14  ;;  %v11831_v4 = vld [vmem:[%s13316_s5 + $0x694] sm:$0xf]  ;;  %v10718_v48 = vor.u32 %v11923_v60, %v10715_v27  ;;  %v11889_v37 = vld [vmem:[%s13316_s5 + $0x864] sm:$0xf] }
 0x38c   : > { %8709 = vmatpush.bf16.msrb.mxu1 %v10382_v8  ;;  %v10347_v8 = vld [vmem:[%s13316_s5 + $0x698] sm:$0xf0]  ;;  %v11885_v27 = vld [vmem:[%s13316_s5 + $0x844] sm:$0xf] }
 0x38d   : > { %8728 = vmatpush.bf16.msrb.mxu2 %v10446_v21  ;;  %v8374_v29 = vpop.f32.mrf.mxu3  ;;  %v10283_v21 = vld [vmem:[%s13316_s5 + $0x618] sm:$0xf0] }
 0x38e   : > { %8747 = vmatpush.bf16.msrb.mxu3 %v10510_v12  ;;  %v8319_v7 = vpop.f32.mrf.mxu0  ;;  %v8338_v57 = vpop.f32.mrf.mxu1  ;;  %v14753_v47 = vadd.f32 %v8374_v29, %v8356_v59  ;;  %v11863_v12 = vld [vmem:[%s13316_s5 + $0x794] sm:$0xf]  ;;  %v10467_v29 = vld [vmem:[%s13316_s5 + $0x788] sm:$0xf0]  ;;  %v10587_v59 = vld [vmem:[%s13316_s5 + $0x878] sm:$0xf0] }
 0x38f   : > { %v8320_v38 = vadd.f32 %v8319_v7, %v14690_v32  ;;  %8691 = vmatpush.bf16.msrb.mxu0 %v10310_v51  ;;  %v11833_v32 = vld [vmem:[%s13316_s5 + $0x6a4] sm:$0xf]  ;;  %v10403_v51 = vld [vmem:[%s13316_s5 + $0x708] sm:$0xf0]  ;;  %v10478_v61 = vor.u32 %v11863_v12, %v10475_v44  ;;  %v11907_v7 = vld [vmem:[%s13316_s5 + $0x8f4] sm:$0xf] }
 0x390   : > { %8710 = vmatpush.bf16.msrb.mxu1 %v10374_v24  ;;  %v10358_v33 = vor.u32 %v11833_v32, %v10355_v26  ;;  %v10699_v12 = vld [vmem:[%s13316_s5 + $0x958] sm:$0xf0]  ;;  %v11887_v44 = vld [vmem:[%s13316_s5 + $0x854] sm:$0xf] }
 0x391   : > { %8729 = vmatpush.bf16.msrb.mxu2 %v10438_v50  ;;  %v8339_v6 = vadd.f32 %v8338_v57, %v8320_v38  ;;  %v10286_v50 = vor.u32 %v11815_v11, %v10283_v21  ;;  %v10406_v57 = vor.u32 %v11845_v30, %v10403_v51  ;;  %v10278_v38 = vor.u32 %v11813_v23, %v10275_v56 }
 0x392   : > { %8748 = vmatpush.bf16.msrb.mxu3 %v10502_v15  ;;  %v8357_v20 = vpop.f32.mrf.mxu2  ;;  %v10350_v15 = vor.u32 %v11831_v4, %v10347_v8  ;;  %v11919_v8 = vld [vmem:[%s13316_s5 + $0x954] sm:$0xf] }
 0x393   : > { %8692 = vmatpush.bf16.msrb.mxu0 %v10302_v31  ;;  %v8358_v9 = vadd.f32 %v8357_v20, %v8339_v6  ;;  %v10779_v31 = vld [vmem:[%s13316_s5 + $0x9f8] sm:$0xf0] }
 0x394   : > { %8711 = vmatpush.bf16.msrb.mxu1 %v10366_v62  ;;  %v10590_v62 = vor.u32 %v11891_v54, %v10587_v59  ;;  %v10563_v54 = vld [vmem:[%s13316_s5 + $0x848] sm:$0xf0]  ;;  %v11901_v59 = vld [vmem:[%s13316_s5 + $0x8c4] sm:$0xf] }
 0x395   : > { %8730 = vmatpush.bf16.msrb.mxu2 %v10430_v58  ;;  %v8376_v41 = vpop.f32.mrf.mxu3  ;;  %8625 = vmatmul.bf16.gmra.mxu0 %v13763_v39  ;;  %v10651_v39 = vld [vmem:[%s13316_s5 + $0x8f8] sm:$0xf0]  ;;  %v11939_v58 = vld [vmem:[%s13316_s5 + $0x9f4] sm:$0xf] }
 0x396   : > { %8749 = vmatpush.bf16.msrb.mxu3 %v10494_v10  ;;  %v8322_v13 = vpop.f32.mrf.mxu0  ;;  %v8341_v14 = vpop.f32.mrf.mxu1  ;;  %v14774_v24 = vadd.f32 %v8376_v41, %v8358_v9  ;;  %8663 = vmatmul.bf16.gmra.mxu2 %v13770_v45  ;;  %v10470_v45 = vor.u32 %v11861_v28, %v10467_v29  ;;  %v11921_v10 = vld [vmem:[%s13316_s5 + $0x964] sm:$0xf]  ;;  %v10654_v26 = vor.u32 %v11907_v7, %v10651_v39  ;;  %v10571_v9 = vld [vmem:[%s13316_s5 + $0x858] sm:$0xf0]  ;;  %v10691_v28 = vld [vmem:[%s13316_s5 + $0x948] sm:$0xf0] }
 0x397   : > { %v8323_v34 = vadd.f32 %v8322_v13, %v14717_v0  ;;  %8693 = vmatpush.bf16.msrb.mxu0 %v10294_v36  ;;  %v11829_v0 = vld [vmem:[%s13316_s5 + $0x684] sm:$0xf]  ;;  %8644 = vmatmul.bf16.gmra.mxu1 %v13765_v40  ;;  %v10782_v2 = vor.u32 %v11939_v58, %v10779_v31  ;;  %v10710_v4 = vor.u32 %v11921_v10, %v10707_v5  ;;  %v11903_v13 = vld [vmem:[%s13316_s5 + $0x8d4] sm:$0xf]  ;;  %v10683_v31 = vld [vmem:[%s13316_s5 + $0x938] sm:$0xf0] }
 0x398   : > { %8712 = vmatpush.bf16.msrb.mxu1 %v10358_v33  ;;  %8682 = vmatmul.bf16.gmra.mxu3 %v13772_v46  ;;  %v10342_v40 = vor.u32 %v11829_v0, %v10339_v53  ;;  %v11905_v36 = vld [vmem:[%s13316_s5 + $0x8e4] sm:$0xf]  ;;  %v10574_v0 = vor.u32 %v11887_v44, %v10571_v9  ;;  %v10566_v58 = vor.u32 %v11885_v27, %v10563_v54  ;;  %v10747_v10 = vld [vmem:[%s13316_s5 + $0x9b8] sm:$0xf0]  ;;  %v10659_v27 = vld [vmem:[%s13316_s5 + $0x908] sm:$0xf0] }
 0x399   : > { %8731 = vmatpush.bf16.msrb.mxu2 %v10422_v16  ;;  %v8342_v49 = vadd.f32 %v8341_v14, %v8323_v34  ;;  %v10579_v16 = vld [vmem:[%s13316_s5 + $0x868] sm:$0xf0]  ;;  %v11937_v33 = vld [vmem:[%s13316_s5 + $0x9e4] sm:$0xf]  ;;  %v10646_v20 = vor.u32 %v11905_v36, %v10643_v42  ;;  %v10635_v34 = vld [vmem:[%s13316_s5 + $0x8d8] sm:$0xf0] }
 0x39a   : > { %8750 = vmatpush.bf16.msrb.mxu3 %v10486_v3  ;;  %v8360_v46 = vpop.f32.mrf.mxu2  ;;  %v10771_v3 = vld [vmem:[%s13316_s5 + $0x9e8] sm:$0xf0]  ;;  %v11917_v53 = vld [vmem:[%s13316_s5 + $0x944] sm:$0xf]  ;;  %v10638_v29 = vor.u32 %v11903_v13, %v10635_v34  ;;  %v10667_v44 = vld [vmem:[%s13316_s5 + $0x918] sm:$0xf0] }
 0x39b   : > { %8694 = vmatpush.bf16.msrb.mxu0 %v10286_v50  ;;  %v8361_v63 = vadd.f32 %v8360_v46, %v8342_v49  ;;  %v10774_v41 = vor.u32 %v11937_v33, %v10771_v3  ;;  %v10763_v50 = vld [vmem:[%s13316_s5 + $0x9d8] sm:$0xf0]  ;;  %v10694_v39 = vor.u32 %v11917_v53, %v10691_v28  ;;  %v11881_v33 = vld [vmem:[%s13316_s5 + $0x824] sm:$0xf]  ;;  %v10547_v3 = vld [vmem:[%s13316_s5 + $0x828] sm:$0xf0] }
 0x39c   : > { %8713 = vmatpush.bf16.msrb.mxu1 %v10350_v15  ;;  %v10555_v46 = vld [vmem:[%s13316_s5 + $0x838] sm:$0xf0]  ;;  %v11895_v34 = vld [vmem:[%s13316_s5 + $0x894] sm:$0xf]  ;;  %v11909_v53 = vld [vmem:[%s13316_s5 + $0x904] sm:$0xf] }
 0x39d   : > { %8732 = vmatpush.bf16.msrb.mxu2 %v10414_v35  ;;  %v8379_v1 = vpop.f32.mrf.mxu3  ;;  %v11935_v35 = vld [vmem:[%s13316_s5 + $0x9d4] sm:$0xf]  ;;  %v11877_v54 = vld [vmem:[%s13316_s5 + $0x804] sm:$0xf] }
 0x39e   : > { %8751 = vmatpush.bf16.msrb.mxu3 %v10478_v61  ;;  %v8324_v32 = vpop.f32.mrf.mxu0  ;;  %v8343_v6 = vpop.f32.mrf.mxu1  ;;  %v14801_v11 = vadd.f32 %v8379_v1, %v8361_v63  ;;  %v10702_v61 = vor.u32 %v11919_v8, %v10699_v12  ;;  %v10766_v60 = vor.u32 %v11935_v35, %v10763_v50  ;;  %v10550_v8 = vor.u32 %v11881_v33, %v10547_v3  ;;  %v11911_v12 = vld [vmem:[%s13316_s5 + $0x914] sm:$0xf]  ;;  %v10963_v33 = vld [vmem:[%s13316_s5 + $0xb68] sm:$0xf0] }
 0x39f   : > { %v8325_v43 = vadd.f32 %v8324_v32, %v14730_v52  ;;  %8695 = vmatpush.bf16.msrb.mxu0 %v10278_v38  ;;  %v10582_v52 = vor.u32 %v11889_v37, %v10579_v16  ;;  %v10755_v38 = vld [vmem:[%s13316_s5 + $0x9c8] sm:$0xf0]  ;;  %v11913_v37 = vld [vmem:[%s13316_s5 + $0x924] sm:$0xf] }
 0x3a0   : > { %8714 = vmatpush.bf16.msrb.mxu1 %v10342_v40  ;;  %v10675_v16 = vld [vmem:[%s13316_s5 + $0x928] sm:$0xf0] }
 0x3a1   : > { %8733 = vmatpush.bf16.msrb.mxu2 %v10406_v57  ;;  %v8344_v21 = vadd.f32 %v8343_v6, %v8325_v43  ;;  %v11933_v57 = vld [vmem:[%s13316_s5 + $0x9c4] sm:$0xf] }
 0x3a2   : > { %8752 = vmatpush.bf16.msrb.mxu3 %v10470_v45  ;;  %v8362_v14 = vpop.f32.mrf.mxu2  ;;  %v10758_v40 = vor.u32 %v11933_v57, %v10755_v38  ;;  %v11883_v45 = vld [vmem:[%s13316_s5 + $0x834] sm:$0xf]  ;;  %v10595_v38 = vld [vmem:[%s13316_s5 + $0x888] sm:$0xf0] }
 0x3a3   : > { %8764 = vmatpush.bf16.msra.mxu0 %v10590_v62  ;;  %v8363_v51 = vadd.f32 %v8362_v14, %v8344_v21  ;;  %v11931_v62 = vld [vmem:[%s13316_s5 + $0x9b4] sm:$0xf] }
 0x3a4   : > { %8783 = vmatpush.bf16.msra.mxu1 %v10654_v26  ;;  %v10750_v42 = vor.u32 %v11931_v62, %v10747_v10  ;;  %v11879_v14 = vld [vmem:[%s13316_s5 + $0x814] sm:$0xf]  ;;  %v10662_v62 = vor.u32 %v11909_v53, %v10659_v27 }
 0x3a5   : > { %8802 = vmatpush.bf16.msra.mxu2 %v10718_v48  ;;  %v8381_v30 = vpop.f32.mrf.mxu3  ;;  %8696 = vmatmul.bf16.vlgmr.msrb.gmra.mxu0 %v13835_v17  ;;  %v11915_v17 = vld [vmem:[%s13316_s5 + $0x934] sm:$0xf]  ;;  %v10619_v48 = vld [vmem:[%s13316_s5 + $0x8b8] sm:$0xf0] }
 0x3a6   : > { %8821 = vmatpush.bf16.msra.mxu3 %v10782_v2  ;;  %v8393_v23 = vpop.f32.mrf.mxu0  ;;  %v8412_v56 = vpop.f32.mrf.mxu1  ;;  %v14814_v49 = vadd.f32 %v8381_v30, %v8363_v51  ;;  %8734 = vmatmul.bf16.vlgmr.msrb.gmra.mxu2 %v13842_v22  ;;  %v11899_v22 = vld [vmem:[%s13316_s5 + $0x8b4] sm:$0xf]  ;;  %v10686_v26 = vor.u32 %v11915_v17, %v10683_v31  ;;  %v10558_v2 = vor.u32 %v11883_v45, %v10555_v46  ;;  %v10539_v30 = vld [vmem:[%s13316_s5 + $0x818] sm:$0xf0]  ;;  %v15242_v17 = vld [vmem:[#allocation4_spill] sm:$0xff] }
 0x3a7   : > { %8765 = vmatpush.bf16.msra.mxu0 %v10582_v52  ;;  %v8394_v15 = vadd.f32 %v8393_v23, %v14753_v47  ;;  %8715 = vmatmul.bf16.vlgmr.msrb.gmra.mxu1 %v13837_v18  ;;  %v10627_v47 = vld [vmem:[%s13316_s5 + $0x8c8] sm:$0xf0]  ;;  %v10622_v43 = vor.u32 %v11899_v22, %v10619_v48  ;;  %v11929_v52 = vld [vmem:[%s13316_s5 + $0x9a4] sm:$0xf]  ;;  %v10603_v51 = vld [vmem:[%s13316_s5 + $0x898] sm:$0xf0] }
 0x3a8   : > { %8784 = vmatpush.bf16.msra.mxu1 %v10646_v20  ;;  %8753 = vmatmul.bf16.vlgmr.msrb.gmra.mxu3 %v13844_v25  ;;  %v10630_v18 = vor.u32 %v11901_v59, %v10627_v47  ;;  %v10739_v20 = vld [vmem:[%s13316_s5 + $0x9a8] sm:$0xf0]  ;;  %v11927_v23 = vld [vmem:[%s13316_s5 + $0x994] sm:$0xf]  ;;  %v10606_v47 = vor.u32 %v11895_v34, %v10603_v51  ;;  %v10971_v45 = vld [vmem:[%s13316_s5 + $0xb78] sm:$0xf0] }
 0x3a9   : > { %8803 = vmatpush.bf16.msra.mxu2 %v10710_v4  ;;  %v8413_v7 = vadd.f32 %v8412_v56, %v8394_v15  ;;  %v10611_v4 = vld [vmem:[%s13316_s5 + $0x8a8] sm:$0xf0]  ;;  %v10742_v13 = vor.u32 %v11929_v52, %v10739_v20  ;;  %v10731_v56 = vld [vmem:[%s13316_s5 + $0x998] sm:$0xf0]  ;;  %v15244_v46 = vld [vmem:[#allocation6_spill] sm:$0xff] }
 0x3aa   : > { %8822 = vmatpush.bf16.msra.mxu3 %v10774_v41  ;;  %v8431_v1 = vpop.f32.mrf.mxu2  ;;  %v10678_v41 = vor.u32 %v11913_v37, %v10675_v16  ;;  %v10531_v59 = vld [vmem:[%s13316_s5 + $0x808] sm:$0xf0]  ;;  %v10734_v57 = vor.u32 %v11927_v23, %v10731_v56  ;;  %v15245_v22 = vld [vmem:[#allocation7_spill] sm:$0xff]  ;;  %v11971_v48 = vld [vmem:[%s13316_s5 + $0xaf4] sm:$0xf] }
 0x3ab   : > { %8766 = vmatpush.bf16.msra.mxu0 %v10574_v0  ;;  %v8432_v5 = vadd.f32 %v8431_v1, %v8413_v7  ;;  %v15243_v31 = vld [vmem:[#allocation5_spill] sm:$0xff]  ;;  %v11955_v1 = vld [vmem:[%s13316_s5 + $0xa74] sm:$0xf]  ;;  %v10534_v10 = vor.u32 %v11877_v54, %v10531_v59  ;;  %v11953_v20 = vld [vmem:[%s13316_s5 + $0xa64] sm:$0xf] }
 0x3ac   : > { %8785 = vmatpush.bf16.msra.mxu1 %v10638_v29  ;;  %v10670_v29 = vor.u32 %v11911_v12, %v10667_v44  ;;  %v10899_v44 = vld [vmem:[%s13316_s5 + $0xae8] sm:$0xf0]  ;;  %v12174_v51 = vld [vmem:[%s13942_s28] sm:$0x3]  ;;  %v11983_v56 = vld [vmem:[%s13316_s5 + $0xb54] sm:$0xf] }
 0x3ad   : > { %8804 = vmatpush.bf16.msra.mxu2 %v10702_v61  ;;  %v8450_v25 = vpop.f32.mrf.mxu3  ;;  %v14888_v23 = vperm.slane %v12174_v51, 1  ;;  %v11967_v53 = vld [vmem:[%s13316_s5 + $0xad4] sm:$0xf]  ;;  %v11019_v54 = vld [vmem:[%s13316_s5 + $0xbd8] sm:$0xf0] }
 0x3ae   : > { %8823 = vmatpush.bf16.msra.mxu3 %v10766_v60  ;;  %v8395_v63 = vpop.f32.mrf.mxu0  ;;  %v8414_v32 = vpop.f32.mrf.mxu1  ;;  %v14837_v36 = vadd.f32 %v8450_v25, %v8432_v5  ;;  %v10542_v60 = vor.u32 %v11879_v14, %v10539_v30  ;;  %v10843_v25 = vld [vmem:[%s13316_s5 + $0xa78] sm:$0xf0]  ;;  %v11999_v27 = vld [vmem:[%s13316_s5 + $0xbd4] sm:$0xf]  ;;  %v11945_v51 = vld [vmem:[%s13316_s5 + $0xa24] sm:$0xf] }
 0x3af   : > { %v8396_v6 = vadd.f32 %v8395_v63, %v14774_v24  ;;  %8767 = vmatpush.bf16.msra.mxu0 %v10566_v58  ;;  %v11897_v24 = vld [vmem:[%s13316_s5 + $0x8a4] sm:$0xf]  ;;  %v10907_v5 = vld [vmem:[%s13316_s5 + $0xaf8] sm:$0xf0]  ;;  %v12003_v63 = vld [vmem:[%s13316_s5 + $0xbf4] sm:$0xf] }
 0x3b0   : > { %8786 = vmatpush.bf16.msra.mxu1 %v10630_v18  ;;  %v10614_v9 = vor.u32 %v11897_v24, %v10611_v4  ;;  %v10723_v18 = vld [vmem:[%s13316_s5 + $0x988] sm:$0xf0]  ;;  %v10910_v4 = vor.u32 %v11971_v48, %v10907_v5 }
 0x3b1   : > { %8805 = vmatpush.bf16.msra.mxu2 %v10694_v39  ;;  %v8415_v21 = vadd.f32 %v8414_v32, %v8396_v6  ;;  %v11925_v39 = vld [vmem:[%s13316_s5 + $0x984] sm:$0xf]  ;;  %v11035_v32 = vld [vmem:[%s13316_s5 + $0xbf8] sm:$0xf0]  ;;  %v15247_v48 = vld [vmem:[#allocation9_spill] sm:$0xff] }
 0x3b2   : > { %8824 = vmatpush.bf16.msra.mxu3 %v10758_v40  ;;  %v8433_v35 = vpop.f32.mrf.mxu2  ;;  %v11987_v40 = vld [vmem:[%s13316_s5 + $0xb74] sm:$0xf]  ;;  %v11038_v52 = vor.u32 %v12003_v63, %v11035_v32  ;;  %v11011_v5 = vld [vmem:[%s13316_s5 + $0xbc8] sm:$0xf0]  ;;  %v15249_v32 = vld [vmem:[#allocation11_spill] sm:$0xff] }
 0x3b3   : > { %8768 = vmatpush.bf16.msra.mxu0 %v10558_v2  ;;  %v8434_v15 = vadd.f32 %v8433_v35, %v8415_v21  ;;  %v10974_v16 = vor.u32 %v11987_v40, %v10971_v45  ;;  %v11022_v40 = vor.u32 %v11999_v27, %v11019_v54  ;;  %v11949_v45 = vld [vmem:[%s13316_s5 + $0xa44] sm:$0xf]  ;;  %v15248_v63 = vld [vmem:[#allocation10_spill] sm:$0xff]  ;;  %v10923_v54 = vld [vmem:[%s13316_s5 + $0xb18] sm:$0xf0] }
 0x3b4   : > { %8787 = vmatpush.bf16.msra.mxu1 %v10622_v43  ;;  %v10846_v43 = vor.u32 %v11955_v1, %v10843_v25  ;;  %v15246_v25 = vld [vmem:[#allocation8_spill] sm:$0xff]  ;;  %v11975_v27 = vld [vmem:[%s13316_s5 + $0xb14] sm:$0xf] }
 0x3b5   : > { %8806 = vmatpush.bf16.msra.mxu2 %v10686_v26  ;;  %v8452_v50 = vpop.f32.mrf.mxu3  ;;  %8701 = vmatmul.bf16.gmra.mxu0 %v15242_v17  ;;  %v10726_v26 = vor.u32 %v11925_v39, %v10723_v18  ;;  %v10947_v17 = vld [vmem:[%s13316_s5 + $0xb48] sm:$0xf0] }
 0x3b6   : > { %8825 = vmatpush.bf16.msra.mxu3 %v10750_v42  ;;  %v8398_v61 = vpop.f32.mrf.mxu0  ;;  %v8417_v0 = vpop.f32.mrf.mxu1  ;;  %v14858_v7 = vadd.f32 %v8452_v50, %v8434_v15  ;;  %8739 = vmatmul.bf16.gmra.mxu2 %v15244_v46  ;;  %v11985_v42 = vld [vmem:[%s13316_s5 + $0xb64] sm:$0xf]  ;;  %v10955_v15 = vld [vmem:[%s13316_s5 + $0xb58] sm:$0xf0]  ;;  %v10819_v46 = vld [vmem:[%s13316_s5 + $0xa48] sm:$0xf0] }
 0x3b7   : > { %v8399_v28 = vadd.f32 %v8398_v61, %v14801_v11  ;;  %8769 = vmatpush.bf16.msra.mxu0 %v10550_v8  ;;  %v11893_v11 = vld [vmem:[%s13316_s5 + $0x884] sm:$0xf]  ;;  %8720 = vmatmul.bf16.gmra.mxu1 %v15243_v31  ;;  %v10966_v34 = vor.u32 %v11985_v42, %v10963_v33  ;;  %v11951_v61 = vld [vmem:[%s13316_s5 + $0xa54] sm:$0xf]  ;;  %v10811_v33 = vld [vmem:[%s13316_s5 + $0xa38] sm:$0xf0] }
 0x3b8   : > { %8788 = vmatpush.bf16.msra.mxu1 %v10614_v9  ;;  %8758 = vmatmul.bf16.gmra.mxu3 %v15245_v22  ;;  %v10598_v6 = vor.u32 %v11893_v11, %v10595_v38  ;;  %v11969_v8 = vld [vmem:[%s13316_s5 + $0xae4] sm:$0xf]  ;;  %v10958_v38 = vor.u32 %v11983_v56, %v10955_v15  ;;  %v11947_v42 = vld [vmem:[%s13316_s5 + $0xa34] sm:$0xf]  ;;  %v10803_v56 = vld [vmem:[%s13316_s5 + $0xa28] sm:$0xf0] }
 0x3b9   : > { %8807 = vmatpush.bf16.msra.mxu2 %v10678_v41  ;;  %v8418_v58 = vadd.f32 %v8417_v0, %v8399_v28  ;;  %v10835_v41 = vld [vmem:[%s13316_s5 + $0xa68] sm:$0xf0]  ;;  %v12001_v9 = vld [vmem:[%s13316_s5 + $0xbe4] sm:$0xf]  ;;  %v10902_v35 = vor.u32 %v11969_v8, %v10899_v44  ;;  %v10827_v0 = vld [vmem:[%s13316_s5 + $0xa58] sm:$0xf0] }
 0x3ba   : > { %8826 = vmatpush.bf16.msra.mxu3 %v10742_v13  ;;  %v8436_v2 = vpop.f32.mrf.mxu2  ;;  %v11027_v13 = vld [vmem:[%s13316_s5 + $0xbe8] sm:$0xf0]  ;;  %v10830_v39 = vor.u32 %v11951_v61, %v10827_v0  ;;  %v11965_v22 = vld [vmem:[%s13316_s5 + $0xac4] sm:$0xf] }
 0x3bb   : > { %8770 = vmatpush.bf16.msra.mxu0 %v10542_v60  ;;  %v8437_v3 = vadd.f32 %v8436_v2, %v8418_v58  ;;  %v11030_v50 = vor.u32 %v12001_v9, %v11027_v13  ;;  %v10891_v60 = vld [vmem:[%s13316_s5 + $0xad8] sm:$0xf0]  ;;  %v11981_v58 = vld [vmem:[%s13316_s5 + $0xb44] sm:$0xf]  ;;  %v11979_v2 = vld [vmem:[%s13316_s5 + $0xb34] sm:$0xf]  ;;  %v10814_v13 = vor.u32 %v11947_v42, %v10811_v33 }
 0x3bc   : > { %8789 = vmatpush.bf16.msra.mxu1 %v10606_v47  ;;  %v10894_v18 = vor.u32 %v11967_v53, %v10891_v60  ;;  %v11961_v15 = vld [vmem:[%s13316_s5 + $0xaa4] sm:$0xf]  ;;  %v10867_v0 = vld [vmem:[%s13316_s5 + $0xaa8] sm:$0xf0]  ;;  %v10806_v60 = vor.u32 %v11945_v51, %v10803_v56 }
 0x3bd   : > { %8808 = vmatpush.bf16.msra.mxu2 %v10670_v29  ;;  %v8455_v37 = vpop.f32.mrf.mxu3  ;;  %v11993_v53 = vld [vmem:[%s13316_s5 + $0xba4] sm:$0xf]  ;;  %v15251_v33 = vld [vmem:[#allocation13_spill] sm:$0xff] }
 0x3be   : > { %8827 = vmatpush.bf16.msra.mxu3 %v10734_v57  ;;  %v8400_v24 = vpop.f32.mrf.mxu0  ;;  %v8419_v21 = vpop.f32.mrf.mxu1  ;;  %v14885_v14 = vadd.f32 %v8455_v37, %v8437_v3  ;;  %v10939_v37 = vld [vmem:[%s13316_s5 + $0xb38] sm:$0xf0]  ;;  %v11963_v3 = vld [vmem:[%s13316_s5 + $0xab4] sm:$0xf]  ;;  %v15250_v42 = vld [vmem:[#allocation12_spill] sm:$0xff] }
 0x3bf   : > { %v8401_v12 = vadd.f32 %v8400_v24, %v14814_v49  ;;  %8771 = vmatpush.bf16.msra.mxu0 %v10534_v10  ;;  %v10838_v49 = vor.u32 %v11953_v20, %v10835_v41  ;;  %v11997_v10 = vld [vmem:[%s13316_s5 + $0xbc4] sm:$0xf]  ;;  %v11003_v20 = vld [vmem:[%s13316_s5 + $0xbb8] sm:$0xf0]  ;;  %v10942_v9 = vor.u32 %v11979_v2, %v10939_v37  ;;  %v10851_v37 = vld [vmem:[%s13316_s5 + $0xa88] sm:$0xf0] }
 0x3c0   : > { %8790 = vmatpush.bf16.msra.mxu1 %v10598_v6  ;;  %v10950_v6 = vor.u32 %v11981_v58, %v10947_v17  ;;  %v10859_v17 = vld [vmem:[%s13316_s5 + $0xa98] sm:$0xf0]  ;;  %v11957_v2 = vld [vmem:[%s13316_s5 + $0xa84] sm:$0xf] }
 0x3c1   : > { %8809 = vmatpush.bf16.msra.mxu2 %v10662_v62  ;;  %v8420_v30 = vadd.f32 %v8419_v21, %v8401_v12  ;;  %v10883_v62 = vld [vmem:[%s13316_s5 + $0xac8] sm:$0xf0] }
 0x3c2   : > { %8828 = vmatpush.bf16.msra.mxu3 %v10726_v26  ;;  %v8438_v28 = vpop.f32.mrf.mxu2  ;;  %v10822_v26 = vor.u32 %v11949_v45, %v10819_v46 }
 0x3c3   : > { %8840 = vmatpush.bf16.msrb.mxu0 %v10846_v43  ;;  %v8439_v59 = vadd.f32 %v8438_v28, %v8420_v30  ;;  %v11014_v43 = vor.u32 %v11997_v10, %v11011_v5  ;;  %v11977_v30 = vld [vmem:[%s13316_s5 + $0xb24] sm:$0xf]  ;;  %v10995_v28 = vld [vmem:[%s13316_s5 + $0xba8] sm:$0xf0] }
 0x3c4   : > { %8859 = vmatpush.bf16.msrb.mxu1 %v10910_v4  ;;  %v10875_v4 = vld [vmem:[%s13316_s5 + $0xab8] sm:$0xf0]  ;;  %v10915_v10 = vld [vmem:[%s13316_s5 + $0xb08] sm:$0xf0]  ;;  %v11941_v5 = vld [vmem:[%s13316_s5 + $0xa04] sm:$0xf] }
 0x3c5   : > { %8878 = vmatpush.bf16.msrb.mxu2 %v10974_v16  ;;  %v8457_v29 = vpop.f32.mrf.mxu3  ;;  %8772 = vmatmul.bf16.vlgmr.msra.gmra.mxu0 %v15246_v25  ;;  %v10886_v16 = vor.u32 %v11965_v22, %v10883_v62 }
 0x3c6   : > { %8897 = vmatpush.bf16.msrb.mxu3 %v11038_v52  ;;  %v8469_v47 = vpop.f32.mrf.mxu0  ;;  %v8488_v57 = vpop.f32.mrf.mxu1  ;;  %v14901_v31 = vadd.f32 %v8457_v29, %v8439_v59  ;;  %8810 = vmatmul.bf16.vlgmr.msra.gmra.mxu2 %v15248_v63  ;;  %v11995_v52 = vld [vmem:[%s13316_s5 + $0xbb4] sm:$0xf]  ;;  %v10870_v59 = vor.u32 %v11961_v15, %v10867_v0  ;;  %v10787_v63 = vld [vmem:[%s13316_s5 + $0xa08] sm:$0xf0] }
 0x3c7   : > { %8841 = vmatpush.bf16.msrb.mxu0 %v10838_v49  ;;  %v8470_v11 = vadd.f32 %v8469_v47, %v14888_v23  ;;  %8791 = vmatmul.bf16.vlgmr.msra.gmra.mxu1 %v15247_v48  ;;  %v10998_v47 = vor.u32 %v11993_v53, %v10995_v28  ;;  %v10926_v48 = vor.u32 %v11975_v27, %v10923_v54  ;;  %v11219_v0 = vld [vmem:[%s13316_s5 + $0xd68] sm:$0xf0]  ;;  %v12017_v54 = vld [vmem:[%s13316_s5 + $0xc64] sm:$0xf] }
 0x3c8   : > { %8860 = vmatpush.bf16.msrb.mxu1 %v10902_v35  ;;  %8829 = vmatmul.bf16.vlgmr.msra.gmra.mxu3 %v15249_v32  ;;  %v10878_v35 = vor.u32 %v11963_v3, %v10875_v4  ;;  %v10979_v3 = vld [vmem:[%s13316_s5 + $0xb88] sm:$0xf0]  ;;  %v15252_v4 = vld [vmem:[#allocation14_spill] sm:$0xff] }
 0x3c9   : > { %8879 = vmatpush.bf16.msrb.mxu2 %v10966_v34  ;;  %v8489_v1 = vadd.f32 %v8488_v57, %v8470_v11  ;;  %v10931_v34 = vld [vmem:[%s13316_s5 + $0xb28] sm:$0xf0]  ;;  %v11943_v57 = vld [vmem:[%s13316_s5 + $0xa14] sm:$0xf]  ;;  %v10795_v11 = vld [vmem:[%s13316_s5 + $0xa18] sm:$0xf0] }
 0x3ca   : > { %8898 = vmatpush.bf16.msrb.mxu3 %v11030_v50  ;;  %v8507_v24 = vpop.f32.mrf.mxu2  ;;  %v11006_v50 = vor.u32 %v11995_v52, %v11003_v20  ;;  %v10934_v29 = vor.u32 %v11977_v30, %v10931_v34  ;;  %v10798_v62 = vor.u32 %v11943_v57, %v10795_v11  ;;  %v15253_v52 = vld [vmem:[#allocation15_spill] sm:$0xff]  ;;  %v12019_v20 = vld [vmem:[%s13316_s5 + $0xc74] sm:$0xf]  ;;  %v10854_v34 = vor.u32 %v11957_v2, %v10851_v37  ;;  %v11155_v11 = vld [vmem:[%s13316_s5 + $0xce8] sm:$0xf0] }
 0x3cb   : > { %8842 = vmatpush.bf16.msrb.mxu0 %v10830_v39  ;;  %v8508_v41 = vadd.f32 %v8507_v24, %v8489_v1  ;;  %v11973_v1 = vld [vmem:[%s13316_s5 + $0xb04] sm:$0xf]  ;;  %v12051_v24 = vld [vmem:[%s13316_s5 + $0xd74] sm:$0xf]  ;;  %v11291_v30 = vld [vmem:[%s13316_s5 + $0xdf8] sm:$0xf0] }
 0x3cc   : > { %8861 = vmatpush.bf16.msrb.mxu1 %v10894_v18  ;;  %v11991_v18 = vld [vmem:[%s13316_s5 + $0xb94] sm:$0xf] }
 0x3cd   : > { %8880 = vmatpush.bf16.msrb.mxu2 %v10958_v38  ;;  %v8526_v21 = vpop.f32.mrf.mxu3  ;;  %v11959_v38 = vld [vmem:[%s13316_s5 + $0xa94] sm:$0xf] }
 0x3ce   : > { %8899 = vmatpush.bf16.msrb.mxu3 %v11022_v40  ;;  %v8471_v8 = vpop.f32.mrf.mxu0  ;;  %v8490_v12 = vpop.f32.mrf.mxu1  ;;  %v14924_v49 = vadd.f32 %v8526_v21, %v8508_v41  ;;  %v10987_v40 = vld [vmem:[%s13316_s5 + $0xb98] sm:$0xf0] }
 0x3cf   : > { %v8472_v44 = vadd.f32 %v8471_v8, %v14888_v23  ;;  %8843 = vmatpush.bf16.msrb.mxu0 %v10822_v26  ;;  %v10990_v26 = vor.u32 %v11991_v18, %v10987_v40  ;;  %v11227_v21 = vld [vmem:[%s13316_s5 + $0xd78] sm:$0xf0]  ;;  %v12035_v8 = vld [vmem:[%s13316_s5 + $0xcf4] sm:$0xf] }
 0x3d0   : > { %8862 = vmatpush.bf16.msrb.mxu1 %v10886_v16  ;;  %v11989_v16 = vld [vmem:[%s13316_s5 + $0xb84] sm:$0xf]  ;;  %v11099_v41 = vld [vmem:[%s13316_s5 + $0xc78] sm:$0xf0]  ;;  %v11230_v56 = vor.u32 %v12051_v24, %v11227_v21 }
 0x3d1   : > { %8881 = vmatpush.bf16.msrb.mxu2 %v10950_v6  ;;  %v8491_v61 = vadd.f32 %v8490_v12, %v8472_v44  ;;  %v10862_v6 = vor.u32 %v11959_v38, %v10859_v17  ;;  %v10918_v12 = vor.u32 %v11973_v1, %v10915_v10  ;;  %v10790_v44 = vor.u32 %v11941_v5, %v10787_v63  ;;  %v12065_v38 = vld [vmem:[%s13316_s5 + $0xde4] sm:$0xf]  ;;  %v12015_v1 = vld [vmem:[%s13316_s5 + $0xc54] sm:$0xf]  ;;  %v11147_v5 = vld [vmem:[%s13316_s5 + $0xcd8] sm:$0xf0] }
 0x3d2   : > { %8900 = vmatpush.bf16.msrb.mxu3 %v11014_v43  ;;  %v8509_v39 = vpop.f32.mrf.mxu2  ;;  %v11102_v15 = vor.u32 %v12019_v20, %v11099_v41  ;;  %v12063_v63 = vld [vmem:[%s13316_s5 + $0xdd4] sm:$0xf]  ;;  %v11075_v20 = vld [vmem:[%s13316_s5 + $0xc48] sm:$0xf0]  ;;  %v12029_v41 = vld [vmem:[%s13316_s5 + $0xcc4] sm:$0xf] }
 0x3d3   : > { %8844 = vmatpush.bf16.msrb.mxu0 %v10814_v13  ;;  %v8510_v45 = vadd.f32 %v8509_v39, %v8491_v61  ;;  %v12067_v13 = vld [vmem:[%s13316_s5 + $0xdf4] sm:$0xf]  ;;  %v12049_v61 = vld [vmem:[%s13316_s5 + $0xd64] sm:$0xf]  ;;  %v11283_v39 = vld [vmem:[%s13316_s5 + $0xde8] sm:$0xf0] }
 0x3d4   : > { %8863 = vmatpush.bf16.msrb.mxu1 %v10878_v35  ;;  %v10982_v35 = vor.u32 %v11989_v16, %v10979_v3  ;;  %v11294_v27 = vor.u32 %v12067_v13, %v11291_v30  ;;  %v11222_v18 = vor.u32 %v12049_v61, %v11219_v0  ;;  %v11203_v3 = vld [vmem:[%s13316_s5 + $0xd48] sm:$0xf0]  ;;  %v15256_v30 = vld [vmem:[#allocation18_spill] sm:$0xff] }
 0x3d5   : > { %8882 = vmatpush.bf16.msrb.mxu2 %v10942_v9  ;;  %v8528_v58 = vpop.f32.mrf.mxu3  ;;  %8777 = vmatmul.bf16.gmra.mxu0 %v15250_v42  ;;  %v11163_v9 = vld [vmem:[%s13316_s5 + $0xcf8] sm:$0xf0]  ;;  %v11267_v13 = vld [vmem:[%s13316_s5 + $0xdc8] sm:$0xf0]  ;;  %v12011_v0 = vld [vmem:[%s13316_s5 + $0xc34] sm:$0xf] }
 0x3d6   : > { %8901 = vmatpush.bf16.msrb.mxu3 %v11006_v50  ;;  %v8474_v46 = vpop.f32.mrf.mxu0  ;;  %v8493_v22 = vpop.f32.mrf.mxu1  ;;  %v14945_v32 = vadd.f32 %v8528_v58, %v8510_v45  ;;  %8815 = vmatmul.bf16.gmra.mxu2 %v15252_v4  ;;  %v11286_v45 = vor.u32 %v12065_v38, %v11283_v39 }
 0x3d7   : > { %v8475_v25 = vadd.f32 %v8474_v46, %v14888_v23  ;;  %8845 = vmatpush.bf16.msrb.mxu0 %v10806_v60  ;;  %8796 = vmatmul.bf16.gmra.mxu1 %v15251_v33  ;;  %v11166_v60 = vor.u32 %v12035_v8, %v11163_v9  ;;  %v12047_v46 = vld [vmem:[%s13316_s5 + $0xd54] sm:$0xf]  ;;  %v12045_v33 = vld [vmem:[%s13316_s5 + $0xd44] sm:$0xf] }
 0x3d8   : > { %8864 = vmatpush.bf16.msrb.mxu1 %v10870_v59  ;;  %8834 = vmatmul.bf16.gmra.mxu3 %v15253_v52  ;;  %v11091_v59 = vld [vmem:[%s13316_s5 + $0xc68] sm:$0xf0]  ;;  %v12013_v52 = vld [vmem:[%s13316_s5 + $0xc44] sm:$0xf] }
 0x3d9   : > { %8883 = vmatpush.bf16.msrb.mxu2 %v10934_v29  ;;  %v8494_v43 = vadd.f32 %v8493_v22, %v8475_v25  ;;  %v11211_v22 = vld [vmem:[%s13316_s5 + $0xd58] sm:$0xf0]  ;;  %v12061_v9 = vld [vmem:[%s13316_s5 + $0xdc4] sm:$0xf] }
 0x3da   : > { %8902 = vmatpush.bf16.msrb.mxu3 %v10998_v47  ;;  %v8512_v50 = vpop.f32.mrf.mxu2  ;;  %v12033_v47 = vld [vmem:[%s13316_s5 + $0xce4] sm:$0xf]  ;;  %v11083_v25 = vld [vmem:[%s13316_s5 + $0xc58] sm:$0xf0]  ;;  %v11270_v61 = vor.u32 %v12061_v9, %v11267_v13  ;;  %v11171_v13 = vld [vmem:[%s13316_s5 + $0xd08] sm:$0xf0] }
 0x3db   : > { %8846 = vmatpush.bf16.msrb.mxu0 %v10798_v62  ;;  %v8513_v53 = vadd.f32 %v8512_v50, %v8494_v43  ;;  %v11158_v40 = vor.u32 %v12033_v47, %v11155_v11  ;;  %v11214_v43 = vor.u32 %v12047_v46, %v11211_v22  ;;  %v11086_v42 = vor.u32 %v12015_v1, %v11083_v25  ;;  %v12009_v22 = vld [vmem:[%s13316_s5 + $0xc24] sm:$0xf]  ;;  %v11059_v1 = vld [vmem:[%s13316_s5 + $0xc28] sm:$0xf0] }
 0x3dc   : > { %8865 = vmatpush.bf16.msrb.mxu1 %v10862_v6  ;;  %v11275_v6 = vld [vmem:[%s13316_s5 + $0xdd8] sm:$0xf0]  ;;  %v11078_v50 = vor.u32 %v12013_v52, %v11075_v20 }
 0x3dd   : > { %8884 = vmatpush.bf16.msrb.mxu2 %v10926_v48  ;;  %v8531_v51 = vpop.f32.mrf.mxu3  ;;  %v12031_v48 = vld [vmem:[%s13316_s5 + $0xcd4] sm:$0xf]  ;;  %v11278_v4 = vor.u32 %v12063_v63, %v11275_v6  ;;  %v11062_v63 = vor.u32 %v12009_v22, %v11059_v1  ;;  %v11243_v52 = vld [vmem:[%s13316_s5 + $0xd98] sm:$0xf0] }
 0x3de   : > { %8903 = vmatpush.bf16.msrb.mxu3 %v10990_v26  ;;  %v8476_v28 = vpop.f32.mrf.mxu0  ;;  %v8495_v29 = vpop.f32.mrf.mxu1  ;;  %v14972_v58 = vadd.f32 %v8531_v51, %v8513_v53  ;;  %v11150_v21 = vor.u32 %v12031_v48, %v11147_v5  ;;  %v12043_v51 = vld [vmem:[%s13316_s5 + $0xd34] sm:$0xf]  ;;  %v11067_v53 = vld [vmem:[%s13316_s5 + $0xc38] sm:$0xf0]  ;;  %v11123_v48 = vld [vmem:[%s13316_s5 + $0xca8] sm:$0xf0] }
 0x3df   : > { %v8477_v57 = vadd.f32 %v8476_v28, %v14888_v23  ;;  %8847 = vmatpush.bf16.msrb.mxu0 %v10790_v44  ;;  %v11094_v23 = vor.u32 %v12017_v54, %v11091_v59  ;;  %v15255_v44 = vld [vmem:[#allocation17_spill] sm:$0xff]  ;;  %v12027_v28 = vld [vmem:[%s13316_s5 + $0xcb4] sm:$0xf]  ;;  %v11259_v59 = vld [vmem:[%s13316_s5 + $0xdb8] sm:$0xf0] }
 0x3e0   : > { %8866 = vmatpush.bf16.msrb.mxu1 %v10854_v34  ;;  %v15257_v34 = vld [vmem:[#allocation19_spill] sm:$0xff]  ;;  %v12059_v54 = vld [vmem:[%s13316_s5 + $0xdb4] sm:$0xf] }
 0x3e1   : > { %8885 = vmatpush.bf16.msrb.mxu2 %v10918_v12  ;;  %v8496_v17 = vadd.f32 %v8495_v29, %v8477_v57  ;;  %v15254_v12 = vld [vmem:[#allocation16_spill] sm:$0xff]  ;;  %v11262_v46 = vor.u32 %v12059_v54, %v11259_v59  ;;  %v12039_v6 = vld [vmem:[%s13316_s5 + $0xd14] sm:$0xf]  ;;  %v15261_v54 = vld [vmem:[#allocation23_spill] sm:$0xff] }
 0x3e2   : > { %8904 = vmatpush.bf16.msrb.mxu3 %v10982_v35  ;;  %v8514_v62 = vpop.f32.mrf.mxu2  ;;  %v11206_v35 = vor.u32 %v12045_v33, %v11203_v3  ;;  %v12083_v59 = vld [vmem:[%s13316_s5 + $0xe74] sm:$0xf] }
 0x3e3   : > { %8916 = vmatpush.bf16.msra.mxu0 %v11102_v15  ;;  %v8515_v26 = vadd.f32 %v8514_v62, %v8496_v17  ;;  %v11070_v17 = vor.u32 %v12011_v0, %v11067_v53  ;;  %v12057_v62 = vld [vmem:[%s13316_s5 + $0xda4] sm:$0xf]  ;;  %v15259_v53 = vld [vmem:[#allocation21_spill] sm:$0xff] }
 0x3e4   : > { %8935 = vmatpush.bf16.msra.mxu1 %v11166_v60  ;;  %v15258_v0 = vld [vmem:[#allocation20_spill] sm:$0xff] }
 0x3e5   : > { %8954 = vmatpush.bf16.msra.mxu2 %v11230_v56  ;;  %v8533_v10 = vpop.f32.mrf.mxu3  ;;  %8848 = vmatmul.bf16.vlgmr.msrb.gmra.mxu0 %v15254_v12  ;;  %v11195_v56 = vld [vmem:[%s13316_s5 + $0xd38] sm:$0xf0]  ;;  %v12037_v12 = vld [vmem:[%s13316_s5 + $0xd04] sm:$0xf] }
 0x3e6   : > { %8973 = vmatpush.bf16.msra.mxu3 %v11294_v27  ;;  %v8545_v2 = vpop.f32.mrf.mxu0  ;;  %v8564_v37 = vpop.f32.mrf.mxu1  ;;  %v14985_v24 = vadd.f32 %v8533_v10, %v8515_v26  ;;  %8886 = vmatmul.bf16.vlgmr.msrb.gmra.mxu2 %v15256_v30  ;;  %v11131_v27 = vld [vmem:[%s13316_s5 + $0xcb8] sm:$0xf0]  ;;  %v11198_v39 = vor.u32 %v12043_v51, %v11195_v56  ;;  %v11251_v10 = vld [vmem:[%s13316_s5 + $0xda8] sm:$0xf0]  ;;  %v12005_v30 = vld [vmem:[%s13316_s5 + $0xc04] sm:$0xf] }
 0x3e7   : > { %8917 = vmatpush.bf16.msra.mxu0 %v11094_v23  ;;  %v8546_v16 = vadd.f32 %v8545_v2, %v14924_v49  ;;  %8867 = vmatmul.bf16.vlgmr.msrb.gmra.mxu1 %v15255_v44  ;;  %v11139_v49 = vld [vmem:[%s13316_s5 + $0xcc8] sm:$0xf0]  ;;  %v11179_v26 = vld [vmem:[%s13316_s5 + $0xd18] sm:$0xf0] }
 0x3e8   : > { %8936 = vmatpush.bf16.msra.mxu1 %v11158_v40  ;;  %8905 = vmatmul.bf16.vlgmr.msrb.gmra.mxu3 %v15257_v34  ;;  %v11142_v15 = vor.u32 %v12029_v41, %v11139_v49  ;;  %v11187_v23 = vld [vmem:[%s13316_s5 + $0xd28] sm:$0xf0]  ;;  %v11182_v49 = vor.u32 %v12039_v6, %v11179_v26  ;;  %v12081_v26 = vld [vmem:[%s13316_s5 + $0xe64] sm:$0xf] }
 0x3e9   : > { %8955 = vmatpush.bf16.msra.mxu2 %v11222_v18  ;;  %v8565_v8 = vadd.f32 %v8564_v37, %v8546_v16  ;;  %v12041_v18 = vld [vmem:[%s13316_s5 + $0xd24] sm:$0xf]  ;;  %v11254_v37 = vor.u32 %v12057_v62, %v11251_v10  ;;  %v12007_v16 = vld [vmem:[%s13316_s5 + $0xc14] sm:$0xf]  ;;  %v11043_v34 = vld [vmem:[%s13316_s5 + $0xc08] sm:$0xf0] }
 0x3ea   : > { %8974 = vmatpush.bf16.msra.mxu3 %v11286_v45  ;;  %v8583_v29 = vpop.f32.mrf.mxu2  ;;  %v11134_v45 = vor.u32 %v12027_v28, %v11131_v27  ;;  %v11190_v5 = vor.u32 %v12041_v18, %v11187_v23  ;;  %v11107_v56 = vld [vmem:[%s13316_s5 + $0xc88] sm:$0xf0]  ;;  %v15260_v27 = vld [vmem:[#allocation22_spill] sm:$0xff]  ;;  %v11547_v18 = vld [vmem:[%s13316_s5 + $0xff8] sm:$0xf0] }
 0x3eb   : > { %8918 = vmatpush.bf16.msra.mxu0 %v11086_v42  ;;  %v8584_v47 = vadd.f32 %v8583_v29, %v8565_v8  ;;  %v12023_v42 = vld [vmem:[%s13316_s5 + $0xc94] sm:$0xf]  ;;  %v11235_v28 = vld [vmem:[%s13316_s5 + $0xd88] sm:$0xf0] }
 0x3ec   : > { %8937 = vmatpush.bf16.msra.mxu1 %v11150_v21  ;;  %v11115_v21 = vld [vmem:[%s13316_s5 + $0xc98] sm:$0xf0]  ;;  %v12115_v29 = vld [vmem:[%s13316_s5 + $0xf74] sm:$0xf] }
 0x3ed   : > { %8956 = vmatpush.bf16.msra.mxu2 %v11214_v43  ;;  %v8602_v60 = vpop.f32.mrf.mxu3  ;;  %v11051_v43 = vld [vmem:[%s13316_s5 + $0xc18] sm:$0xf0] }
 0x3ee   : > { %8975 = vmatpush.bf16.msra.mxu3 %v11278_v4  ;;  %v8547_v57 = vpop.f32.mrf.mxu0  ;;  %v8566_v11 = vpop.f32.mrf.mxu1  ;;  %v15008_v40 = vadd.f32 %v8602_v60, %v8584_v47  ;;  %v12055_v4 = vld [vmem:[%s13316_s5 + $0xd94] sm:$0xf]  ;;  %v11054_v9 = vor.u32 %v12007_v16, %v11051_v43  ;;  %v11483_v60 = vld [vmem:[%s13316_s5 + $0xf78] sm:$0xf0]  ;;  %v11411_v43 = vld [vmem:[%s13316_s5 + $0xee8] sm:$0xf0] }
 0x3ef   : > { %v8548_v38 = vadd.f32 %v8547_v57, %v14945_v32  ;;  %8919 = vmatpush.bf16.msra.mxu0 %v11078_v50  ;;  %v12025_v32 = vld [vmem:[%s13316_s5 + $0xca4] sm:$0xf]  ;;  %v11118_v50 = vor.u32 %v12023_v42, %v11115_v21  ;;  %v11246_v51 = vor.u32 %v12055_v4, %v11243_v52  ;;  %v11355_v47 = vld [vmem:[%s13316_s5 + $0xe78] sm:$0xf0]  ;;  %v12099_v57 = vld [vmem:[%s13316_s5 + $0xef4] sm:$0xf]  ;;  %v11486_v1 = vor.u32 %v12115_v29, %v11483_v60 }
 0x3f0   : > { %8938 = vmatpush.bf16.msra.mxu1 %v11142_v15  ;;  %v11126_v2 = vor.u32 %v12025_v32, %v11123_v48  ;;  %v12053_v15 = vld [vmem:[%s13316_s5 + $0xd84] sm:$0xf]  ;;  %v11358_v32 = vor.u32 %v12083_v59, %v11355_v47  ;;  %v11475_v48 = vld [vmem:[%s13316_s5 + $0xf68] sm:$0xf0] }
 0x3f1   : > { %8957 = vmatpush.bf16.msra.mxu2 %v11206_v35  ;;  %v8567_v25 = vadd.f32 %v8566_v11, %v8548_v38  ;;  %v11174_v11 = vor.u32 %v12037_v12, %v11171_v13  ;;  %v11046_v38 = vor.u32 %v12005_v30, %v11043_v34  ;;  %v12129_v42 = vld [vmem:[%s13316_s5 + $0xfe4] sm:$0xf]  ;;  %v12079_v12 = vld [vmem:[%s13316_s5 + $0xe54] sm:$0xf]  ;;  %v11403_v30 = vld [vmem:[%s13316_s5 + $0xed8] sm:$0xf0] }
 0x3f2   : > { %8976 = vmatpush.bf16.msra.mxu3 %v11270_v61  ;;  %v8585_v33 = vpop.f32.mrf.mxu2  ;;  %v12127_v34 = vld [vmem:[%s13316_s5 + $0xfd4] sm:$0xf]  ;;  %v11331_v59 = vld [vmem:[%s13316_s5 + $0xe48] sm:$0xf0]  ;;  %v12093_v47 = vld [vmem:[%s13316_s5 + $0xec4] sm:$0xf] }
 0x3f3   : > { %8920 = vmatpush.bf16.msra.mxu0 %v11070_v17  ;;  %v8586_v20 = vadd.f32 %v8585_v33, %v8567_v25  ;;  %v12131_v17 = vld [vmem:[%s13316_s5 + $0xff4] sm:$0xf]  ;;  %v12113_v25 = vld [vmem:[%s13316_s5 + $0xf64] sm:$0xf]  ;;  %v11539_v33 = vld [vmem:[%s13316_s5 + $0xfe8] sm:$0xf0] }
 0x3f4   : > { %8939 = vmatpush.bf16.msra.mxu1 %v11134_v45  ;;  %v11238_v45 = vor.u32 %v12053_v15, %v11235_v28  ;;  %v11550_v6 = vor.u32 %v12131_v17, %v11547_v18  ;;  %v11478_v4 = vor.u32 %v12113_v25, %v11475_v48  ;;  %v11459_v28 = vld [vmem:[%s13316_s5 + $0xf48] sm:$0xf0]  ;;  %v15264_v18 = vld [vmem:[#allocation26_spill] sm:$0xff] }
 0x3f5   : > { %8958 = vmatpush.bf16.msra.mxu2 %v11198_v39  ;;  %v8604_v3 = vpop.f32.mrf.mxu3  ;;  %8853 = vmatmul.bf16.gmra.mxu0 %v15258_v0  ;;  %v11419_v39 = vld [vmem:[%s13316_s5 + $0xef8] sm:$0xf0]  ;;  %v11523_v17 = vld [vmem:[%s13316_s5 + $0xfc8] sm:$0xf0]  ;;  %v12075_v48 = vld [vmem:[%s13316_s5 + $0xe34] sm:$0xf] }
 0x3f6   : > { %8977 = vmatpush.bf16.msra.mxu3 %v11262_v46  ;;  %v8550_v41 = vpop.f32.mrf.mxu0  ;;  %v8569_v8 = vpop.f32.mrf.mxu1  ;;  %v15029_v35 = vadd.f32 %v8604_v3, %v8586_v20  ;;  %8891 = vmatmul.bf16.gmra.mxu2 %v15260_v27  ;;  %v11542_v20 = vor.u32 %v12129_v42, %v11539_v33 }
 0x3f7   : > { %v8551_v44 = vadd.f32 %v8550_v41, %v14972_v58  ;;  %8921 = vmatpush.bf16.msra.mxu0 %v11062_v63  ;;  %v12021_v58 = vld [vmem:[%s13316_s5 + $0xc84] sm:$0xf]  ;;  %8872 = vmatmul.bf16.gmra.mxu1 %v15259_v53  ;;  %v11422_v63 = vor.u32 %v12099_v57, %v11419_v39  ;;  %v12111_v41 = vld [vmem:[%s13316_s5 + $0xf54] sm:$0xf] }
 0x3f8   : > { %8940 = vmatpush.bf16.msra.mxu1 %v11126_v2  ;;  %8910 = vmatmul.bf16.gmra.mxu3 %v15261_v54  ;;  %v11110_v23 = vor.u32 %v12021_v58, %v11107_v56  ;;  %v11347_v2 = vld [vmem:[%s13316_s5 + $0xe68] sm:$0xf0]  ;;  %v12109_v53 = vld [vmem:[%s13316_s5 + $0xf44] sm:$0xf] }
 0x3f9   : > { %8959 = vmatpush.bf16.msra.mxu2 %v11190_v5  ;;  %v8570_v61 = vadd.f32 %v8569_v8, %v8551_v44  ;;  %v11467_v8 = vld [vmem:[%s13316_s5 + $0xf58] sm:$0xf0]  ;;  %v12077_v54 = vld [vmem:[%s13316_s5 + $0xe44] sm:$0xf] }
 0x3fa   : > { %8978 = vmatpush.bf16.msra.mxu3 %v11254_v37  ;;  %v8588_v46 = vpop.f32.mrf.mxu2  ;;  %v12097_v37 = vld [vmem:[%s13316_s5 + $0xee4] sm:$0xf]  ;;  %v11339_v44 = vld [vmem:[%s13316_s5 + $0xe58] sm:$0xf0] }
 0x3fb   : > { %8922 = vmatpush.bf16.msra.mxu0 %v11054_v9  ;;  %v8589_v62 = vadd.f32 %v8588_v46, %v8570_v61  ;;  %v11414_v52 = vor.u32 %v12097_v37, %v11411_v43  ;;  %v11470_v61 = vor.u32 %v12111_v41, %v11467_v8  ;;  %v11342_v0 = vor.u32 %v12079_v12, %v11339_v44  ;;  %v12125_v39 = vld [vmem:[%s13316_s5 + $0xfc4] sm:$0xf]  ;;  %v11315_v12 = vld [vmem:[%s13316_s5 + $0xe28] sm:$0xf0] }
 0x3fc   : > { %8941 = vmatpush.bf16.msra.mxu1 %v11118_v50  ;;  %v11531_v50 = vld [vmem:[%s13316_s5 + $0xfd8] sm:$0xf0]  ;;  %v11334_v46 = vor.u32 %v12077_v54, %v11331_v59  ;;  %v11526_v25 = vor.u32 %v12125_v39, %v11523_v17  ;;  %v12073_v8 = vld [vmem:[%s13316_s5 + $0xe24] sm:$0xf]  ;;  %v11427_v17 = vld [vmem:[%s13316_s5 + $0xf08] sm:$0xf0] }
 0x3fd   : > { %8960 = vmatpush.bf16.msra.mxu2 %v11182_v49  ;;  %v8607_v22 = vpop.f32.mrf.mxu3  ;;  %v12095_v49 = vld [vmem:[%s13316_s5 + $0xed4] sm:$0xf]  ;;  %v11534_v27 = vor.u32 %v12127_v34, %v11531_v50  ;;  %v11318_v34 = vor.u32 %v12073_v8, %v11315_v12  ;;  %v11499_v54 = vld [vmem:[%s13316_s5 + $0xf98] sm:$0xf0]  ;;  %v12101_v39 = vld [vmem:[%s13316_s5 + $0xf04] sm:$0xf] }
 0x3fe   : > { %8979 = vmatpush.bf16.msra.mxu3 %v11246_v51  ;;  %v8552_v10 = vpop.f32.mrf.mxu0  ;;  %v8571_v5 = vpop.f32.mrf.mxu1  ;;  %v15056_v3 = vadd.f32 %v8607_v22, %v8589_v62  ;;  %v11406_v60 = vor.u32 %v12095_v49, %v11403_v30  ;;  %v12107_v22 = vld [vmem:[%s13316_s5 + $0xf34] sm:$0xf]  ;;  %v11323_v62 = vld [vmem:[%s13316_s5 + $0xe38] sm:$0xf0]  ;;  %v11379_v49 = vld [vmem:[%s13316_s5 + $0xea8] sm:$0xf0] }
 0x3ff   : > { %v8553_v16 = vadd.f32 %v8552_v10, %v14985_v24  ;;  %8923 = vmatpush.bf16.msra.mxu0 %v11046_v38  ;;  %v11350_v24 = vor.u32 %v12081_v26, %v11347_v2  ;;  %v15263_v38 = vld [vmem:[#allocation25_spill] sm:$0xff]  ;;  %v12091_v10 = vld [vmem:[%s13316_s5 + $0xeb4] sm:$0xf]  ;;  %v11515_v2 = vld [vmem:[%s13316_s5 + $0xfb8] sm:$0xf0] }
 0x400   : > { %8942 = vmatpush.bf16.msra.mxu1 %v11110_v23  ;;  %v15265_v23 = vld [vmem:[#allocation27_spill] sm:$0xff]  ;;  %v12123_v26 = vld [vmem:[%s13316_s5 + $0xfb4] sm:$0xf] }
 0x401   : > { %8961 = vmatpush.bf16.msra.mxu2 %v11174_v11  ;;  %v8572_v21 = vadd.f32 %v8571_v5, %v8553_v16  ;;  %v15262_v11 = vld [vmem:[#allocation24_spill] sm:$0xff]  ;;  %v11518_v41 = vor.u32 %v12123_v26, %v11515_v2  ;;  %v12103_v50 = vld [vmem:[%s13316_s5 + $0xf14] sm:$0xf] }
 0x402   : > { %8980 = vmatpush.bf16.msra.mxu3 %v11238_v45  ;;  %v8590_v9 = vpop.f32.mrf.mxu2  ;;  %v11462_v45 = vor.u32 %v12109_v53, %v11459_v28 }
 0x403   : > { %8992 = vmatpush.bf16.msrb.mxu0 %v11358_v32  ;;  %v8591_v51 = vadd.f32 %v8590_v9, %v8572_v21  ;;  %v11326_v21 = vor.u32 %v12075_v48, %v11323_v62  ;;  %v12121_v9 = vld [vmem:[%s13316_s5 + $0xfa4] sm:$0xf]  ;;  %v11363_v48 = vld [vmem:[%s13316_s5 + $0xe88] sm:$0xf0] }
 0x404   : > { %9011 = vmatpush.bf16.msrb.mxu1 %v11422_v63  ;;  %v12117_v62 = vld [vmem:[%s13316_s5 + $0xf84] sm:$0xf] }
 0x405   : > { %9030 = vmatpush.bf16.msrb.mxu2 %v11486_v1  ;;  %v8609_v13 = vpop.f32.mrf.mxu3  ;;  %8924 = vmatmul.bf16.vlgmr.msra.gmra.mxu0 %v15262_v11  ;;  %v11451_v1 = vld [vmem:[%s13316_s5 + $0xf38] sm:$0xf0] }
 0x406   : > { %9049 = vmatpush.bf16.msrb.mxu3 %v11550_v6  ;;  %v8621_v58 = vpop.f32.mrf.mxu0  ;;  %v8640_v56 = vpop.f32.mrf.mxu1  ;;  %v15069_v29 = vadd.f32 %v8609_v13, %v8591_v51  ;;  %8962 = vmatmul.bf16.vlgmr.msra.gmra.mxu2 %v15264_v18  ;;  %v11387_v6 = vld [vmem:[%s13316_s5 + $0xeb8] sm:$0xf0]  ;;  %v11454_v33 = vor.u32 %v12107_v22, %v11451_v1  ;;  %v11507_v13 = vld [vmem:[%s13316_s5 + $0xfa8] sm:$0xf0]  ;;  %v12085_v1 = vld [vmem:[%s13316_s5 + $0xe84] sm:$0xf] }
 0x407   : > { %8993 = vmatpush.bf16.msrb.mxu0 %v11350_v24  ;;  %v8622_v15 = vadd.f32 %v8621_v58, %v15008_v40  ;;  %8943 = vmatmul.bf16.vlgmr.msra.gmra.mxu1 %v15263_v38  ;;  %v11395_v40 = vld [vmem:[%s13316_s5 + $0xec8] sm:$0xf0]  ;;  %v11435_v51 = vld [vmem:[%s13316_s5 + $0xf18] sm:$0xf0]  ;;  %v11366_v2 = vor.u32 %v12085_v1, %v11363_v48 }
 0x408   : > { %9012 = vmatpush.bf16.msrb.mxu1 %v11414_v52  ;;  %8981 = vmatmul.bf16.vlgmr.msra.gmra.mxu3 %v15265_v23  ;;  %v11398_v32 = vor.u32 %v12093_v47, %v11395_v40  ;;  %v11443_v24 = vld [vmem:[%s13316_s5 + $0xf28] sm:$0xf0]  ;;  %v11438_v38 = vor.u32 %v12103_v50, %v11435_v51  ;;  %v15273_v50 = vld [vmem:[#allocation35_spill] sm:$0xff] }
 0x409   : > { %9031 = vmatpush.bf16.msrb.mxu2 %v11478_v4  ;;  %v8641_v57 = vadd.f32 %v8640_v56, %v8622_v15  ;;  %v12105_v4 = vld [vmem:[%s13316_s5 + $0xf24] sm:$0xf]  ;;  %v11510_v56 = vor.u32 %v12121_v9, %v11507_v13  ;;  %v12071_v15 = vld [vmem:[%s13316_s5 + $0xe14] sm:$0xf]  ;;  %v11299_v22 = vld [vmem:[%s13316_s5 + $0xe08] sm:$0xf0] }
 0x40a   : > { %9050 = vmatpush.bf16.msrb.mxu3 %v11542_v20  ;;  %v8659_v5 = vpop.f32.mrf.mxu2  ;;  %v11390_v20 = vor.u32 %v12091_v10, %v11387_v6  ;;  %v11446_v30 = vor.u32 %v12105_v4, %v11443_v24  ;;  %v11491_v10 = vld [vmem:[%s13316_s5 + $0xf88] sm:$0xf0]  ;;  %v11430_v6 = vor.u32 %v12101_v39, %v11427_v17 }
 0x40b   : > { %8994 = vmatpush.bf16.msrb.mxu0 %v11342_v0  ;;  %v8660_v37 = vadd.f32 %v8659_v5, %v8641_v57  ;;  %v12087_v0 = vld [vmem:[%s13316_s5 + $0xe94] sm:$0xf] }
 0x40c   : > { %9013 = vmatpush.bf16.msrb.mxu1 %v11406_v60  ;;  %v11371_v60 = vld [vmem:[%s13316_s5 + $0xe98] sm:$0xf0]  ;;  %v15268_v5 = vld [vmem:[#allocation30_spill] sm:$0xff] }
 0x40d   : > { %9032 = vmatpush.bf16.msrb.mxu2 %v11470_v61  ;;  %v8678_v63 = vpop.f32.mrf.mxu3  ;;  %v11307_v61 = vld [vmem:[%s13316_s5 + $0xe18] sm:$0xf0]  ;;  %v11374_v23 = vor.u32 %v12087_v0, %v11371_v60 }
 0x40e   : > { %9051 = vmatpush.bf16.msrb.mxu3 %v11534_v27  ;;  %v8623_v16 = vpop.f32.mrf.mxu0  ;;  %v8642_v43 = vpop.f32.mrf.mxu1  ;;  %v15092_v52 = vadd.f32 %v8678_v63, %v8660_v37  ;;  %v12119_v27 = vld [vmem:[%s13316_s5 + $0xf94] sm:$0xf]  ;;  %v11310_v40 = vor.u32 %v12071_v15, %v11307_v61  ;;  %v15269_v63 = vld [vmem:[#allocation31_spill] sm:$0xff]  ;;  %v11494_v37 = vor.u32 %v12117_v62, %v11491_v10 }
 0x40f   : > { %v8624_v42 = vadd.f32 %v8623_v16, %v15029_v35  ;;  %8995 = vmatpush.bf16.msrb.mxu0 %v11334_v46  ;;  %v12089_v35 = vld [vmem:[%s13316_s5 + $0xea4] sm:$0xf] }
 0x410   : > { %9014 = vmatpush.bf16.msrb.mxu1 %v11398_v32  ;;  %v11382_v58 = vor.u32 %v12089_v35, %v11379_v49  ;;  %v12069_v46 = vld [vmem:[%s13316_s5 + $0xe04] sm:$0xf]  ;;  %s9245_s5 = sshll.u32 %s4343_s30, 5 }
 0x411   : > { %9033 = vmatpush.bf16.msrb.mxu2 %v11462_v45  ;;  %v8643_v44 = vadd.f32 %v8642_v43, %v8624_v42  ;;  %v11502_v45 = vor.u32 %v12119_v27, %v11499_v54  ;;  %v11302_v26 = vor.u32 %v12069_v46, %v11299_v22  ;;  %s15134_s28 = scalar_lea.vmem [#allocation3], %s9245_s5 }
 0x412   : > { %9052 = vmatpush.bf16.msrb.mxu3 %v11526_v25  ;;  %v8661_v53 = vpop.f32.mrf.mxu2  ;;  %v15266_v25 = vld [vmem:[#allocation28_spill] sm:$0xff] }
 0x413   : > { %8996 = vmatpush.bf16.msrb.mxu0 %v11326_v21  ;;  %v8662_v59 = vadd.f32 %v8661_v53, %v8643_v44 }
 0x414   : > { %9015 = vmatpush.bf16.msrb.mxu1 %v11390_v20 }
 0x415   : > { %9034 = vmatpush.bf16.msrb.mxu2 %v11454_v33  ;;  %v8680_v28 = vpop.f32.mrf.mxu3  ;;  %8929 = vmatmul.bf16.gmra.mxu0 %v15266_v25 }
 0x416   : > { %9053 = vmatpush.bf16.msrb.mxu3 %v11518_v41  ;;  %v8626_v47 = vpop.f32.mrf.mxu0  ;;  %v8645_v57 = vpop.f32.mrf.mxu1  ;;  %v8681_v18 = vadd.f32 %v8680_v28, %v8662_v59  ;;  %8967 = vmatmul.bf16.gmra.mxu2 %v15268_v5 }
 0x417   : > { %v8627_v11 = vadd.f32 %v8626_v47, %v15056_v3  ;;  %8997 = vmatpush.bf16.msrb.mxu0 %v11318_v34  ;;  %v15267_v3 = vld [vmem:[#allocation29_spill] sm:$0xff] }
 0x418   : > { %9016 = vmatpush.bf16.msrb.mxu1 %v11382_v58  ;;  %8986 = vmatmul.bf16.gmra.mxu3 %v15269_v63  ;;  %v15271_v34 = vld [vmem:[#allocation33_spill] sm:$0xff] }
 0x419   : > { %9035 = vmatpush.bf16.msrb.mxu2 %v11446_v30  ;;  %v8646_v32 = vadd.f32 %v8645_v57, %v8627_v11  ;;  %8948 = vmatmul.bf16.gmra.mxu1 %v15267_v3  ;;  %v15270_v30 = vld [vmem:[#allocation32_spill] sm:$0xff] }
 0x41a   : > { %9054 = vmatpush.bf16.msrb.mxu3 %v11510_v56  ;;  %v8664_v16 = vpop.f32.mrf.mxu2 }
 0x41b   : > { %8998 = vmatpush.bf16.msrb.mxu0 %v11310_v40  ;;  %v8665_v42 = vadd.f32 %v8664_v16, %v8646_v32  ;;  %v15275_v40 = vld [vmem:[#allocation37_spill] sm:$0xff] }
 0x41c   : > { %9017 = vmatpush.bf16.msrb.mxu1 %v11374_v23 }
 0x41d   : > { %9036 = vmatpush.bf16.msrb.mxu2 %v11438_v38  ;;  %v8683_v43 = vpop.f32.mrf.mxu3  ;;  %v15274_v38 = vld [vmem:[#allocation36_spill] sm:$0xff] }
 0x41e   : > { %9055 = vmatpush.bf16.msrb.mxu3 %v11502_v45  ;;  %v8628_v33 = vpop.f32.mrf.mxu0  ;;  %v8647_v21 = vpop.f32.mrf.mxu1  ;;  %v8684_v24 = vadd.f32 %v8683_v43, %v8665_v42 }
 0x41f   : > { %v8629_v4 = vadd.f32 %v8628_v33, %v15069_v29  ;;  %8999 = vmatpush.bf16.msrb.mxu0 %v11302_v26  ;;  %v15272_v29 = vld [vmem:[#allocation34_spill] sm:$0xff] }
 0x420   : > { %9018 = vmatpush.bf16.msrb.mxu1 %v11366_v2 }
 0x421   : > { %9037 = vmatpush.bf16.msrb.mxu2 %v11430_v6  ;;  %v8648_v20 = vadd.f32 %v8647_v21, %v8629_v4 }
 0x422   : > { %9056 = vmatpush.bf16.msrb.mxu3 %v11494_v37  ;;  %v8666_v41 = vpop.f32.mrf.mxu2 }
 0x423   : > { %v8667_v12 = vadd.f32 %v8666_v41, %v8648_v20 }
 0x425   : > { %v8685_v8 = vpop.f32.mrf.mxu3  ;;  %9000 = vmatmul.bf16.vlgmr.msrb.gmra.mxu0 %v15270_v30 }
 0x426   : > { %v8697_v35 = vpop.f32.mrf.mxu0  ;;  %v8716_v44 = vpop.f32.mrf.mxu1  ;;  %v8686_v9 = vadd.f32 %v8685_v8, %v8667_v12  ;;  %9038 = vmatmul.bf16.vlgmr.msrb.gmra.mxu2 %v15272_v29 }
 0x427   : > { %v8698_v49 = vadd.f32 %v8697_v35, %v15092_v52 }
 0x428   : > { %9057 = vmatmul.bf16.vlgmr.msrb.gmra.mxu3 %v15273_v50 }
 0x429   : > { %v8717_v13 = vadd.f32 %v8716_v44, %v8698_v49  ;;  %9019 = vmatmul.bf16.vlgmr.msrb.gmra.mxu1 %v15271_v34 }
 0x42a   : > { %v8735_v51 = vpop.f32.mrf.mxu2 }
 0x42b   : > { %v8736_v56 = vadd.f32 %v8735_v51, %v8717_v13 }
 0x42d   : > { %v8754_v58 = vpop.f32.mrf.mxu3 }
 0x42e   : > { %v8699_v15 = vpop.f32.mrf.mxu0  ;;  %v8718_v61 = vpop.f32.mrf.mxu1  ;;  %v8755_v53 = vadd.f32 %v8754_v58, %v8736_v56 }
 0x42f   : > { %v8700_v0 = vadd.f32 %v8699_v15, %v8681_v18 }
 0x431   : > { %v8719_v28 = vadd.f32 %v8718_v61, %v8700_v0 }
 0x432   : > { %v8737_v60 = vpop.f32.mrf.mxu2 }
 0x433   : > { %v8738_v27 = vadd.f32 %v8737_v60, %v8719_v28 }
 0x435   : > { %v8756_v52 = vpop.f32.mrf.mxu3  ;;  %9005 = vmatmul.bf16.gmra.mxu0 %v14506_v55 }
 0x436   : > { %v8702_v54 = vpop.f32.mrf.mxu0  ;;  %v8721_v59 = vpop.f32.mrf.mxu1  ;;  %v8757_v57 = vadd.f32 %v8756_v52, %v8738_v27  ;;  %9043 = vmatmul.bf16.gmra.mxu2 %v15274_v38 }
 0x437   : > { %v8703_v47 = vadd.f32 %v8702_v54, %v8684_v24 }
 0x438   : > { %9062 = vmatmul.bf16.gmra.mxu3 %v15275_v40 }
 0x439   : > { %v8722_v11 = vadd.f32 %v8721_v59, %v8703_v47  ;;  %9024 = vmatmul.bf16.gmra.mxu1 %v14508_v19 }
 0x43a   : > { %v8740_v39 = vpop.f32.mrf.mxu2 }
 0x43b   : > { %v8741_v18 = vadd.f32 %v8740_v39, %v8722_v11 }
 0x43d   : > { %v8759_v17 = vpop.f32.mrf.mxu3 }
 0x43e   : > { %v8704_v23 = vpop.f32.mrf.mxu0  ;;  %v8723_v45 = vpop.f32.mrf.mxu1  ;;  %v8760_v22 = vadd.f32 %v8759_v17, %v8741_v18 }
 0x43f   : > { %v8705_v46 = vadd.f32 %v8704_v23, %v8686_v9 }
 0x441   : > { %v8724_v1 = vadd.f32 %v8723_v45, %v8705_v46 }
 0x442   : > { %v8742_v32 = vpop.f32.mrf.mxu2 }
 0x443   : > { %v8743_v3 = vadd.f32 %v8742_v32, %v8724_v1 }
 0x445   : > { %v8761_v25 = vpop.f32.mrf.mxu3 }
 0x446   : > { %v8773_v48 = vpop.f32.mrf.mxu0  ;;  %v8792_v62 = vpop.f32.mrf.mxu1  ;;  %v8762_v10 = vadd.f32 %v8761_v25, %v8743_v3 }
 0x447   : > { %v8774_v55 = vadd.f32 %v8773_v48, %v8755_v53 }
 0x449   : > { %v8793_v19 = vadd.f32 %v8792_v62, %v8774_v55 }
 0x44a   : > { %v8811_v5 = vpop.f32.mrf.mxu2 }
 0x44b   : > { %v8812_v6 = vadd.f32 %v8811_v5, %v8793_v19 }
 0x44d   : > { %v8830_v63 = vpop.f32.mrf.mxu3 }
 0x44e   : > { %v8775_v26 = vpop.f32.mrf.mxu0  ;;  %v8794_v2 = vpop.f32.mrf.mxu1  ;;  %v8831_v16 = vadd.f32 %v8830_v63, %v8812_v6 }
 0x44f   : > { %v8776_v37 = vadd.f32 %v8775_v26, %v8757_v57 }
 0x451   : > { %v8795_v43 = vadd.f32 %v8794_v2, %v8776_v37 }
 0x452   : > { %v8813_v42 = vpop.f32.mrf.mxu2 }
 0x453   : > { %v8814_v21 = vadd.f32 %v8813_v42, %v8795_v43 }
 0x455   : > { %v8832_v33 = vpop.f32.mrf.mxu3 }
 0x456   : > { %v8778_v4 = vpop.f32.mrf.mxu0  ;;  %v8797_v24 = vpop.f32.mrf.mxu1  ;;  %v8833_v41 = vadd.f32 %v8832_v33, %v8814_v21 }
 0x457   : > { %v8779_v20 = vadd.f32 %v8778_v4, %v8760_v22 }
 0x459   : > { %v8798_v8 = vadd.f32 %v8797_v24, %v8779_v20 }
 0x45a   : > { %v8816_v12 = vpop.f32.mrf.mxu2 }
 0x45b   : > { %v8817_v44 = vadd.f32 %v8816_v12, %v8798_v8 }
 0x45d   : > { %v8835_v35 = vpop.f32.mrf.mxu3 }
 0x45e   : > { %v8780_v49 = vpop.f32.mrf.mxu0  ;;  %v8799_v9 = vpop.f32.mrf.mxu1  ;;  %v8836_v30 = vadd.f32 %v8835_v35, %v8817_v44 }
 0x45f   : > { %v8781_v13 = vadd.f32 %v8780_v49, %v8762_v10 }
 0x461   : > { %v8800_v34 = vadd.f32 %v8799_v9, %v8781_v13 }
 0x462   : > { %v8818_v29 = vpop.f32.mrf.mxu2 }
 0x463   : > { %v8819_v51 = vadd.f32 %v8818_v29, %v8800_v34 }
 0x465   : > { %v8837_v50 = vpop.f32.mrf.mxu3 }
 0x466   : > { %v8849_v58 = vpop.f32.mrf.mxu0  ;;  %v8868_v56 = vpop.f32.mrf.mxu1  ;;  %v8838_v15 = vadd.f32 %v8837_v50, %v8819_v51 }
 0x467   : > { %v8850_v22 = vadd.f32 %v8849_v58, %v8831_v16 }
 0x469   : > { %v8869_v1 = vadd.f32 %v8868_v56, %v8850_v22 }
 0x46a   : > { %v8887_v61 = vpop.f32.mrf.mxu2 }
 0x46b   : > { %v8888_v3 = vadd.f32 %v8887_v61, %v8869_v1 }
 0x46d   : > { %v8906_v0 = vpop.f32.mrf.mxu3 }
 0x46e   : > { %v8851_v53 = vpop.f32.mrf.mxu0  ;;  %v8870_v28 = vpop.f32.mrf.mxu1  ;;  %v8907_v10 = vadd.f32 %v8906_v0, %v8888_v3 }
 0x46f   : > { %v8852_v55 = vadd.f32 %v8851_v53, %v8833_v41 }
 0x471   : > { %v8871_v19 = vadd.f32 %v8870_v28, %v8852_v55 }
 0x472   : > { %v8889_v60 = vpop.f32.mrf.mxu2 }
 0x473   : > { %v8890_v26 = vadd.f32 %v8889_v60, %v8871_v19 }
 0x475   : > { %v8908_v52 = vpop.f32.mrf.mxu3 }
 0x476   : > { %v8854_v27 = vpop.f32.mrf.mxu0  ;;  %v8873_v54 = vpop.f32.mrf.mxu1  ;;  %v8909_v33 = vadd.f32 %v8908_v52, %v8890_v26 }
 0x477   : > { %v8855_v43 = vadd.f32 %v8854_v27, %v8836_v30 }
 0x479   : > { %v8874_v16 = vadd.f32 %v8873_v54, %v8855_v43 }
 0x47a   : > { %v8892_v59 = vpop.f32.mrf.mxu2 }
 0x47b   : > { %v8893_v8 = vadd.f32 %v8892_v59, %v8874_v16 }
 0x47d   : > { %v8911_v47 = vpop.f32.mrf.mxu3 }
 0x47e   : > { %v8856_v57 = vpop.f32.mrf.mxu0  ;;  %v8875_v11 = vpop.f32.mrf.mxu1  ;;  %v8912_v13 = vadd.f32 %v8911_v47, %v8893_v8 }
 0x47f   : > { %v8857_v44 = vadd.f32 %v8856_v57, %v8838_v15 }
 0x481   : > { %v8876_v29 = vadd.f32 %v8875_v11, %v8857_v44 }
 0x482   : > { %v8894_v38 = vpop.f32.mrf.mxu2 }
 0x483   : > { %v8895_v56 = vadd.f32 %v8894_v38, %v8876_v29 }
 0x485   : > { %v8913_v40 = vpop.f32.mrf.mxu3 }
 0x486   : > { %v8925_v39 = vpop.f32.mrf.mxu0  ;;  %v8944_v17 = vpop.f32.mrf.mxu1  ;;  %v8914_v15 = vadd.f32 %v8913_v40, %v8895_v56 }
 0x487   : > { %v8926_v5 = vadd.f32 %v8925_v39, %v8907_v10 }
 0x489   : > { %v8945_v42 = vadd.f32 %v8944_v17, %v8926_v5 }
 0x48a   : > { %v8963_v18 = vpop.f32.mrf.mxu2 }
 0x48b   : > { %v8964_v21 = vadd.f32 %v8963_v18, %v8945_v42 }
 0x48d   : > { %v8982_v23 = vpop.f32.mrf.mxu3 }
 0x48e   : > { %v8927_v45 = vpop.f32.mrf.mxu0  ;;  %v8946_v46 = vpop.f32.mrf.mxu1  ;;  %v8983_v12 = vadd.f32 %v8982_v23, %v8964_v21 }
 0x48f   : > { %v8928_v4 = vadd.f32 %v8927_v45, %v8909_v33 }
 0x491   : > { %v8947_v49 = vadd.f32 %v8946_v46, %v8928_v4 }
 0x492   : > { %v8965_v32 = vpop.f32.mrf.mxu2 }
 0x493   : > { %v8966_v34 = vadd.f32 %v8965_v32, %v8947_v49 }
 0x495   : > { %v8984_v25 = vpop.f32.mrf.mxu3 }
 0x496   : > { %v8930_v48 = vpop.f32.mrf.mxu0  ;;  %v8949_v62 = vpop.f32.mrf.mxu1  ;;  %v8985_v61 = vadd.f32 %v8984_v25, %v8966_v34 }
 0x497   : > { %v8931_v50 = vadd.f32 %v8930_v48, %v8912_v13 }
 0x499   : > { %v8950_v60 = vadd.f32 %v8949_v62, %v8931_v50 }
 0x49a   : > { %v8968_v63 = vpop.f32.mrf.mxu2 }
 0x49b   : > { %v8969_v54 = vadd.f32 %v8968_v63, %v8950_v60 }
 0x49d   : > { %v8987_v6 = vpop.f32.mrf.mxu3 }
 0x49e   : > { %v8932_v2 = vpop.f32.mrf.mxu0  ;;  %v8951_v37 = vpop.f32.mrf.mxu1  ;;  %v8988_v39 = vadd.f32 %v8987_v6, %v8969_v54 }
 0x49f   : > { %v8933_v47 = vadd.f32 %v8932_v2, %v8914_v15 }
 0x4a1   : > { %v8952_v23 = vadd.f32 %v8951_v37, %v8933_v47 }
 0x4a2   : > { %v8970_v24 = vpop.f32.mrf.mxu2 }
 0x4a3   : > { %v8971_v22 = vadd.f32 %v8970_v24, %v8952_v23 }
 0x4a5   : > { %v8989_v20 = vpop.f32.mrf.mxu3 }
 0x4a6   : > { %v9001_v41 = vpop.f32.mrf.mxu0  ;;  %v9020_v35 = vpop.f32.mrf.mxu1  ;;  %v8990_v3 = vadd.f32 %v8989_v20, %v8971_v22 }
 0x4a7   : > { %v9002_v9 = vadd.f32 %v9001_v41, %v8983_v12 }
 0x4a9   : > { %v9021_v30 = vadd.f32 %v9020_v35, %v9002_v9 }
 0x4aa   : > { %v9039_v51 = vpop.f32.mrf.mxu2 }
 0x4ab   : > { %v9040_v0 = vadd.f32 %v9039_v51, %v9021_v30 }
 0x4ad   : > { %v9058_v58 = vpop.f32.mrf.mxu3 }
 0x4ae   : > { %v9003_v53 = vpop.f32.mrf.mxu0  ;;  %v9022_v28 = vpop.f32.mrf.mxu1  ;;  %v9059_v52 = vadd.f32 %v9058_v58, %v9040_v0 }
 0x4af   : > { %v9004_v27 = vadd.f32 %v9003_v53, %v8985_v61 }
 0x4b0   : > { %v9068_v59 = vpack.c.bf16 %v9059_v52, %v14837_v36 }
 0x4b1   : > { %v9023_v57 = vadd.f32 %v9022_v28, %v9004_v27 }
 0x4b2   : > { %9072 = vst [vmem:[%s15134_s28] sm:$0xff] %v9068_v59  ;;  %v9041_v11 = vpop.f32.mrf.mxu2 }
 0x4b3   : > { %v9042_v17 = vadd.f32 %v9041_v11, %v9023_v57 }
 0x4b5   : > { %v9060_v38 = vpop.f32.mrf.mxu3 }
 0x4b6   : > { %v9006_v18 = vpop.f32.mrf.mxu0  ;;  %v9061_v45 = vadd.f32 %v9060_v38, %v9042_v17  ;;  %v9025_v40 = vpop.f32.mrf.mxu1 }
 0x4b7   : > { %v9007_v46 = vadd.f32 %v9006_v18, %v8988_v39 }
 0x4b8   : > { %v9069_v36 = vpack.c.bf16 %v9061_v45, %v14858_v7 }
 0x4b9   : > { %v9026_v1 = vadd.f32 %v9025_v40, %v9007_v46 }
 0x4ba   : > { %9073 = vst [vmem:[%s15134_s28 + $0x8] sm:$0xff] %v9069_v36  ;;  %v9044_v32 = vpop.f32.mrf.mxu2 }
 0x4bb   : > { %v9045_v48 = vadd.f32 %v9044_v32, %v9026_v1 }
 0x4bd   : > { %v9063_v25 = vpop.f32.mrf.mxu3 }
 0x4be   : > { %v9008_v62 = vpop.f32.mrf.mxu0  ;;  %v9064_v55 = vadd.f32 %v9063_v25, %v9045_v48  ;;  %v9027_v5 = vpop.f32.mrf.mxu1 }
 0x4bf   : > { %v9009_v10 = vadd.f32 %v9008_v62, %v8990_v3 }
 0x4c0   : > { %v9070_v19 = vpack.c.bf16 %v9064_v55, %v14885_v14  ;;  %v9123_v14 = vld [vmem:[%s15134_s28] sm:$0xff] (%p12270_p6) }
 0x4c1   : > { %v9028_v63 = vadd.f32 %v9027_v5, %v9009_v10  ;;  %v9125_v43 = vld [vmem:[%s15134_s28 + $0x8] sm:$0xff] (%p12270_p6)  ;;  %9124 = vst [vmem:[%s9088_s29] sm:$0xff] (%p12270_p6), %v9123_v14 }
 0x4c2   : > { %9074 = vst [vmem:[%s15134_s28 + $0x10] sm:$0xff] %v9070_v19  ;;  %v9046_v6 = vpop.f32.mrf.mxu2 }
 0x4c3   : > { %v9047_v26 = vadd.f32 %v9046_v6, %v9028_v63  ;;  %9126 = vst [vmem:[%s9088_s29 + $0x10] sm:$0xff] (%p12270_p6), %v9125_v43 }
 0x4c5   : > { %v9065_v2 = vpop.f32.mrf.mxu3 }
 0x4c6   : > { %v9066_v37 = vadd.f32 %v9065_v2, %v9047_v26  ;;  %9082 = sbr.rel (!%p12270_p6) target bundleno = 1235 (0x4d3), region = 88 }
 0x4c8   : > { %v9071_v7 = vpack.c.bf16 %v9066_v37, %v14901_v31 }
 0x4c9   : > { %v9127_v42 = vld [vmem:[%s15134_s28 + $0x10] sm:$0xff] (%p12270_p6) }
 0x4ca   : > { %9075 = vst [vmem:[%s15134_s28 + $0x18] sm:$0xff] %v9071_v7 }
 0x4cb   : > { %9128 = vst [vmem:[%s9088_s29 + $0x20] sm:$0xff] %v9127_v42 }
 0x4d1   : > { %v9129_v33 = vld [vmem:[%s15134_s28 + $0x18] sm:$0xff] }
 0x4d2   : > { %9130 = vst [vmem:[%s9088_s29 + $0x30] sm:$0xff] %v9129_v33 }
 0x4d3 PF: > { %s13_s16 = sadd.s32 1, %s12213_s16   ;;  %s15276_s12 = smov %s12201_s13 }
 0x4d4   : > { %p10_p12 = scmp.ge.s32.totalorder %s13_s16, 4   ;;  %s15277_s13 = smov %s12275_s22 }
 0x4d5   : > { %s15278_s14 = smov %s12209_s15  ;;  %s15279_s15 = smov %s15281_s17 }
 0x4d6   :  { %12 = sbr.rel (!%p10_p12) target bundleno = 3 (0x3), region = 169 }

</bundles_post_ra>
